<compile_context>
chip_gen: v7x
topology: tpu7x:2x2x1
jax: 0.10.0
libtpu: 0.0.40
codegen_flags: <defaults>
</compile_context>

<pallas_src>
import jax
import jax.numpy as jnp
from jax.experimental import pallas as pl
from jax.experimental.pallas import tpu as pltpu

EPS = 1e-5  # nn.BatchNorm2d default


# ---------------------------------------------------------------------------
# Kernel helpers (traced inside the kernel body)
# ---------------------------------------------------------------------------
def _conv3x3(xp_ref, w_ref, M, H, W):
    """3x3 'same' conv on a zero-padded VMEM tile.

    xp_ref: (N, H+2, W+2, Cin) zero-haloed input scratch.
    w_ref : (3, 3, Cin, Cout) HWIO weights.
    Returns the conv output as (M, Cout) f32 with M = N*H*W.

    Each tap contracts over the REAL channel count only (no zero-padded
    K=128), so the MXU does no work on padding channels.
    """
    Cin = xp_ref.shape[-1]
    Cout = w_ref.shape[-1]
    acc = jnp.zeros((M, Cout), jnp.float32)
    for dy in range(3):
        for dx in range(3):
            tap = xp_ref[:, dy:dy + H, dx:dx + W, :].reshape(M, Cin)
            acc = acc + jnp.dot(tap, w_ref[dy, dx],
                                preferred_element_type=jnp.float32)
    return acc


def _bn_relu(y, gamma, beta, count):
    """Training-mode BatchNorm (biased batch variance) + ReLU on (M, C)."""
    inv_count = 1.0 / count
    mean = jnp.sum(y, axis=0, keepdims=True) * inv_count
    c = y - mean
    var = jnp.sum(c * c, axis=0, keepdims=True) * inv_count   # two-pass: stable
    scale = gamma * jax.lax.rsqrt(var + EPS)
    return jnp.maximum(c * scale + beta, 0.0)


# ---------------------------------------------------------------------------
# Fused kernel: conv1 -> BN1 -> ReLU -> conv2 -> BN2 -> ReLU
# ---------------------------------------------------------------------------
def _cv_block_kernel(x_ref, w1_ref, g1_ref, b1_ref, w2_ref, g2_ref, b2_ref,
                     out_ref, xp1_ref, xp2_ref):
    N, H, W, _ = x_ref.shape
    Cout = out_ref.shape[-1]
    M = N * H * W
    count = float(M)            # BN statistics are over (N, H, W)

    # ---- Stage 1: conv1 (1-pixel zero halo built in VMEM, zeroed once). ----
    xp1_ref[...] = jnp.zeros(xp1_ref.shape, xp1_ref.dtype)
    xp1_ref[:, 1:H + 1, 1:W + 1, :] = x_ref[...]
    y1 = _conv3x3(xp1_ref, w1_ref, M, H, W)                      # (M, Cout)

    # ---- BN1 (batch stats computed on-chip) + ReLU, kept in VMEM. ----
    a1 = _bn_relu(y1, g1_ref[...], b1_ref[...], count)           # (M, Cout)

    # ---- Stage 2: conv2 on the activated intermediate (no HBM round-trip). -
    xp2_ref[...] = jnp.zeros(xp2_ref.shape, xp2_ref.dtype)
    xp2_ref[:, 1:H + 1, 1:W + 1, :] = a1.reshape(N, H, W, Cout)
    y2 = _conv3x3(xp2_ref, w2_ref, M, H, W)                      # (M, Cout)

    # ---- BN2 + ReLU, write only the real channels. ----
    a2 = _bn_relu(y2, g2_ref[...], b2_ref[...], count)
    out_ref[...] = a2.reshape(N, H, W, Cout)


# ---------------------------------------------------------------------------
# Host-side wrapper
# ---------------------------------------------------------------------------
@jax.jit
def cv_block(x_nchw, w1, g1, b1, w2, g2, b2):
    """CvBlock forward.  x_nchw: (N, Cin, H, W) -> (N, Cout, H, W).

    Conv weights are HWIO (3, 3, Cin, Cout) == PyTorch (Cout, Cin, 3, 3)
    transposed to (2, 3, 1, 0).  gamma/beta are per-channel (any shape that
    flattens to (Cout,)).
    """
    N, Cin, H, W = x_nchw.shape
    Cout = w1.shape[-1]

    # Layout plumbing on REAL channels only (8 KiB copy; no 32x lane-padded
    # HBM inflation of the input).
    x_nhwc = jnp.transpose(x_nchw, (0, 2, 3, 1))
    g1r = g1.reshape(1, Cout)
    b1r = b1.reshape(1, Cout)
    g2r = g2.reshape(1, Cout)
    b2r = b2.reshape(1, Cout)

    out_nhwc = pl.pallas_call(
        _cv_block_kernel,
        grid=(1,),                                    # whole problem, one step
        in_specs=[
            pl.BlockSpec((N, H, W, Cin), lambda i: (0, 0, 0, 0)),
            pl.BlockSpec((3, 3, Cin, Cout), lambda i: (0, 0, 0, 0)),
            pl.BlockSpec((1, Cout), lambda i: (0, 0)),
            pl.BlockSpec((1, Cout), lambda i: (0, 0)),
            pl.BlockSpec((3, 3, Cout, Cout), lambda i: (0, 0, 0, 0)),
            pl.BlockSpec((1, Cout), lambda i: (0, 0)),
            pl.BlockSpec((1, Cout), lambda i: (0, 0)),
        ],
        out_specs=pl.BlockSpec((N, H, W, Cout), lambda i: (0, 0, 0, 0)),
        out_shape=jax.ShapeDtypeStruct((N, H, W, Cout), jnp.float32),
        scratch_shapes=[
            pltpu.VMEM((N, H + 2, W + 2, Cin), jnp.float32),    # halo, stage 1
            pltpu.VMEM((N, H + 2, W + 2, Cout), jnp.float32),   # halo, stage 2
        ],
        compiler_params=pltpu.CompilerParams(
            dimension_semantics=("arbitrary",),
            vmem_limit_bytes=32 * 1024 * 1024),
    )(x_nhwc, w1, g1r, b1r, w2, g2r, b2r)

    # Final layout plumbing on 16 KiB of real-channel data: NHWC -> NCHW
    # (left to XLA; no lane-padded HBM write, no extra pallas_call).
    return jnp.transpose(out_nhwc, (0, 3, 1, 2))


# ---------------------------------------------------------------------------
# Pure-JAX reference (PyTorch training-mode forward) for validation.
# ---------------------------------------------------------------------------
def _ref_stage(x_nhwc, w_hwio, gamma, beta):
    y = jax.lax.conv_general_dilated(
        x_nhwc, w_hwio, window_strides=(1, 1), padding=((1, 1), (1, 1)),
        dimension_numbers=("NHWC", "HWIO", "NHWC"))
    mean = jnp.mean(y, axis=(0, 1, 2), keepdims=True)
    var = jnp.mean((y - mean) ** 2, axis=(0, 1, 2), keepdims=True)  # biased
    y = (y - mean) * jax.lax.rsqrt(var + EPS) * gamma.reshape(1, 1, 1, -1) \
        + beta.reshape(1, 1, 1, -1)
    return jnp.maximum(y, 0.0)


def cv_block_ref(x_nchw, w1, g1, b1, w2, g2, b2):
    x = jnp.transpose(x_nchw, (0, 2, 3, 1))
    y = _ref_stage(x, w1, g1, b1)
    y = _ref_stage(y, w2, g2, b2)
    return jnp.transpose(y, (0, 3, 1, 2))


if __name__ == "__main__":
    key = jax.random.PRNGKey(0)
    k_x, k_w1, k_g1, k_b1, k_w2, k_g2, k_b2 = jax.random.split(key, 7)

    N, Cin, Cout, H, W = 2, 4, 8, 16, 16

    x = jax.random.normal(k_x, (N, Cin, H, W), jnp.float32)
    # Conv weights in HWIO (== PyTorch (Cout,Cin,3,3).transpose(2,3,1,0)).
    w1 = jax.random.normal(k_w1, (3, 3, Cin, Cout), jnp.float32) * 0.1
    w2 = jax.random.normal(k_w2, (3, 3, Cout, Cout), jnp.float32) * 0.1
    # BN affine params (PyTorch default init is gamma=1, beta=0; randomized
    # here so the check is non-trivial).
    g1 = 1.0 + 0.1 * jax.random.normal(k_g1, (1, Cout), jnp.float32)
    b1 = 0.1 * jax.random.normal(k_b1, (1, Cout), jnp.float32)
    g2 = 1.0 + 0.1 * jax.random.normal(k_g2, (1, Cout), jnp.float32)
    b2 = 0.1 * jax.random.normal(k_b2, (1, Cout), jnp.float32)

    out = cv_block(x, w1, g1, b1, w2, g2, b2)
    out = jax.block_until_ready(out)

    ref = cv_block_ref(x, w1, g1, b1, w2, g2, b2)
    assert out.shape == (N, Cout, H, W), out.shape
    err = float(jnp.max(jnp.abs(out - ref)))
    assert jnp.allclose(out, ref, atol=1e-4, rtol=1e-4), err

    print("KERNEL_OK")
</pallas_src>

<mosaic_0001>
module attributes {stable_mosaic.version = 11 : i64} {
  func.func @_cv_block_kernel(%arg0: i32, %arg1: memref<2x16x16x4xf32, #tpu.memory_space<vmem>>, %arg2: memref<3x3x4x8xf32, #tpu.memory_space<vmem>>, %arg3: memref<1x8xf32, #tpu.memory_space<vmem>>, %arg4: memref<1x8xf32, #tpu.memory_space<vmem>>, %arg5: memref<3x3x8x8xf32, #tpu.memory_space<vmem>>, %arg6: memref<1x8xf32, #tpu.memory_space<vmem>>, %arg7: memref<1x8xf32, #tpu.memory_space<vmem>>, %arg8: memref<2x16x16x8xf32, #tpu.memory_space<vmem>>, %arg9: memref<2x18x18x4xf32, #tpu.memory_space<vmem>>, %arg10: memref<2x18x18x8xf32, #tpu.memory_space<vmem>>) attributes {dimension_semantics = [#tpu.dimension_semantics<arbitrary>], iteration_bounds = array<i64: 1>, scalar_prefetch = 0 : i64, scratch_operands = 2 : i64, tpu.core_type = #tpu.core_type<tc>, window_params = [{pipeline_mode = #tpu.pipeline_mode<synchronous>, transform_indices = @transform_0, window_bounds = array<i64: 2, 16, 16, 4>}, {pipeline_mode = #tpu.pipeline_mode<synchronous>, transform_indices = @transform_1, window_bounds = array<i64: 3, 3, 4, 8>}, {pipeline_mode = #tpu.pipeline_mode<synchronous>, transform_indices = @transform_2, window_bounds = array<i64: 1, 8>}, {pipeline_mode = #tpu.pipeline_mode<synchronous>, transform_indices = @transform_3, window_bounds = array<i64: 1, 8>}, {pipeline_mode = #tpu.pipeline_mode<synchronous>, transform_indices = @transform_4, window_bounds = array<i64: 3, 3, 8, 8>}, {pipeline_mode = #tpu.pipeline_mode<synchronous>, transform_indices = @transform_5, window_bounds = array<i64: 1, 8>}, {pipeline_mode = #tpu.pipeline_mode<synchronous>, transform_indices = @transform_6, window_bounds = array<i64: 1, 8>}, {pipeline_mode = #tpu.pipeline_mode<synchronous>, transform_indices = @transform_7, window_bounds = array<i64: 2, 16, 16, 8>}]} {
    %cst = arith.constant 0.000000e+00 : f32
    %0 = vector.broadcast %cst : f32 to vector<2x18x18x4xf32>
    %c0 = arith.constant 0 : index
    %c0_0 = arith.constant 0 : index
    %c0_1 = arith.constant 0 : index
    %c0_2 = arith.constant 0 : index
    %1 = vector.load %arg9[%c0, %c0_0, %c0_1, %c0_2] : memref<2x18x18x4xf32, #tpu.memory_space<vmem>>, vector<2x18x18x4xf32>
    tpu.vector_store %arg9[%c0, %c0_0, %c0_1, %c0_2], %0 {strides = array<i32>} : memref<2x18x18x4xf32, #tpu.memory_space<vmem>>, vector<2x18x18x4xf32>,
    %c0_3 = arith.constant 0 : index
    %c0_4 = arith.constant 0 : index
    %c0_5 = arith.constant 0 : index
    %c0_6 = arith.constant 0 : index
    %2 = vector.load %arg1[%c0_3, %c0_4, %c0_5, %c0_6] : memref<2x16x16x4xf32, #tpu.memory_space<vmem>>, vector<2x16x16x4xf32>
    %c0_7 = arith.constant 0 : index
    %c1 = arith.constant 1 : index
    %c1_8 = arith.constant 1 : index
    %c0_9 = arith.constant 0 : index
    %3 = vector.load %arg9[%c0_7, %c1, %c1_8, %c0_9] : memref<2x18x18x4xf32, #tpu.memory_space<vmem>>, vector<2x16x16x4xf32>
    tpu.vector_store %arg9[%c0_7, %c1, %c1_8, %c0_9], %2 {strides = array<i32>} : memref<2x18x18x4xf32, #tpu.memory_space<vmem>>, vector<2x16x16x4xf32>,
    %cst_10 = arith.constant 0.000000e+00 : f32
    %4 = vector.broadcast %cst_10 : f32 to vector<512x8xf32>
    %c0_11 = arith.constant 0 : index
    %c0_12 = arith.constant 0 : index
    %c0_13 = arith.constant 0 : index
    %c0_14 = arith.constant 0 : index
    %5 = vector.load %arg9[%c0_11, %c0_12, %c0_13, %c0_14] : memref<2x18x18x4xf32, #tpu.memory_space<vmem>>, vector<2x16x16x4xf32>
    %6 = vector.shape_cast %5 : vector<2x16x16x4xf32> to vector<512x4xf32>
    %c0_15 = arith.constant 0 : index
    %c0_16 = arith.constant 0 : index
    %c0_17 = arith.constant 0 : index
    %c0_18 = arith.constant 0 : index
    %7 = vector.load %arg2[%c0_15, %c0_16, %c0_17, %c0_18] : memref<3x3x4x8xf32, #tpu.memory_space<vmem>>, vector<1x1x4x8xf32>
    %8 = vector.shape_cast %7 : vector<1x1x4x8xf32> to vector<4x8xf32>
    %cst_19 = arith.constant dense<0.000000e+00> : vector<512x8xf32>
    %9 = tpu.matmul %6, %8, %cst_19 {dimension_numbers = #tpu.dot_dimension_numbers<[1], [0], [0], [1], [0, 0, 1, 1], [], []>} : vector<512x4xf32>, vector<4x8xf32>, vector<512x8xf32> -> vector<512x8xf32>
    %10 = arith.addf %4, %9 : vector<512x8xf32>
    %c0_20 = arith.constant 0 : index
    %c0_21 = arith.constant 0 : index
    %c1_22 = arith.constant 1 : index
    %c0_23 = arith.constant 0 : index
    %11 = vector.load %arg9[%c0_20, %c0_21, %c1_22, %c0_23] : memref<2x18x18x4xf32, #tpu.memory_space<vmem>>, vector<2x16x16x4xf32>
    %12 = vector.shape_cast %11 : vector<2x16x16x4xf32> to vector<512x4xf32>
    %c0_24 = arith.constant 0 : index
    %c1_25 = arith.constant 1 : index
    %c0_26 = arith.constant 0 : index
    %c0_27 = arith.constant 0 : index
    %13 = vector.load %arg2[%c0_24, %c1_25, %c0_26, %c0_27] : memref<3x3x4x8xf32, #tpu.memory_space<vmem>>, vector<1x1x4x8xf32>
    %14 = vector.shape_cast %13 : vector<1x1x4x8xf32> to vector<4x8xf32>
    %cst_28 = arith.constant dense<0.000000e+00> : vector<512x8xf32>
    %15 = tpu.matmul %12, %14, %cst_28 {dimension_numbers = #tpu.dot_dimension_numbers<[1], [0], [0], [1], [0, 0, 1, 1], [], []>} : vector<512x4xf32>, vector<4x8xf32>, vector<512x8xf32> -> vector<512x8xf32>
    %16 = arith.addf %10, %15 : vector<512x8xf32>
    %c0_29 = arith.constant 0 : index
    %c0_30 = arith.constant 0 : index
    %c2 = arith.constant 2 : index
    %c0_31 = arith.constant 0 : index
    %17 = vector.load %arg9[%c0_29, %c0_30, %c2, %c0_31] : memref<2x18x18x4xf32, #tpu.memory_space<vmem>>, vector<2x16x16x4xf32>
    %18 = vector.shape_cast %17 : vector<2x16x16x4xf32> to vector<512x4xf32>
    %c0_32 = arith.constant 0 : index
    %c2_33 = arith.constant 2 : index
    %c0_34 = arith.constant 0 : index
    %c0_35 = arith.constant 0 : index
    %19 = vector.load %arg2[%c0_32, %c2_33, %c0_34, %c0_35] : memref<3x3x4x8xf32, #tpu.memory_space<vmem>>, vector<1x1x4x8xf32>
    %20 = vector.shape_cast %19 : vector<1x1x4x8xf32> to vector<4x8xf32>
    %cst_36 = arith.constant dense<0.000000e+00> : vector<512x8xf32>
    %21 = tpu.matmul %18, %20, %cst_36 {dimension_numbers = #tpu.dot_dimension_numbers<[1], [0], [0], [1], [0, 0, 1, 1], [], []>} : vector<512x4xf32>, vector<4x8xf32>, vector<512x8xf32> -> vector<512x8xf32>
    %22 = arith.addf %16, %21 : vector<512x8xf32>
    %c0_37 = arith.constant 0 : index
    %c1_38 = arith.constant 1 : index
    %c0_39 = arith.constant 0 : index
    %c0_40 = arith.constant 0 : index
    %23 = vector.load %arg9[%c0_37, %c1_38, %c0_39, %c0_40] : memref<2x18x18x4xf32, #tpu.memory_space<vmem>>, vector<2x16x16x4xf32>
    %24 = vector.shape_cast %23 : vector<2x16x16x4xf32> to vector<512x4xf32>
    %c1_41 = arith.constant 1 : index
    %c0_42 = arith.constant 0 : index
    %c0_43 = arith.constant 0 : index
    %c0_44 = arith.constant 0 : index
    %25 = vector.load %arg2[%c1_41, %c0_42, %c0_43, %c0_44] : memref<3x3x4x8xf32, #tpu.memory_space<vmem>>, vector<1x1x4x8xf32>
    %26 = vector.shape_cast %25 : vector<1x1x4x8xf32> to vector<4x8xf32>
    %cst_45 = arith.constant dense<0.000000e+00> : vector<512x8xf32>
    %27 = tpu.matmul %24, %26, %cst_45 {dimension_numbers = #tpu.dot_dimension_numbers<[1], [0], [0], [1], [0, 0, 1, 1], [], []>} : vector<512x4xf32>, vector<4x8xf32>, vector<512x8xf32> -> vector<512x8xf32>
    %28 = arith.addf %22, %27 : vector<512x8xf32>
    %c0_46 = arith.constant 0 : index
    %c1_47 = arith.constant 1 : index
    %c1_48 = arith.constant 1 : index
    %c0_49 = arith.constant 0 : index
    %29 = vector.load %arg9[%c0_46, %c1_47, %c1_48, %c0_49] : memref<2x18x18x4xf32, #tpu.memory_space<vmem>>, vector<2x16x16x4xf32>
    %30 = vector.shape_cast %29 : vector<2x16x16x4xf32> to vector<512x4xf32>
    %c1_50 = arith.constant 1 : index
    %c1_51 = arith.constant 1 : index
    %c0_52 = arith.constant 0 : index
    %c0_53 = arith.constant 0 : index
    %31 = vector.load %arg2[%c1_50, %c1_51, %c0_52, %c0_53] : memref<3x3x4x8xf32, #tpu.memory_space<vmem>>, vector<1x1x4x8xf32>
    %32 = vector.shape_cast %31 : vector<1x1x4x8xf32> to vector<4x8xf32>
    %cst_54 = arith.constant dense<0.000000e+00> : vector<512x8xf32>
    %33 = tpu.matmul %30, %32, %cst_54 {dimension_numbers = #tpu.dot_dimension_numbers<[1], [0], [0], [1], [0, 0, 1, 1], [], []>} : vector<512x4xf32>, vector<4x8xf32>, vector<512x8xf32> -> vector<512x8xf32>
    %34 = arith.addf %28, %33 : vector<512x8xf32>
    %c0_55 = arith.constant 0 : index
    %c1_56 = arith.constant 1 : index
    %c2_57 = arith.constant 2 : index
    %c0_58 = arith.constant 0 : index
    %35 = vector.load %arg9[%c0_55, %c1_56, %c2_57, %c0_58] : memref<2x18x18x4xf32, #tpu.memory_space<vmem>>, vector<2x16x16x4xf32>
    %36 = vector.shape_cast %35 : vector<2x16x16x4xf32> to vector<512x4xf32>
    %c1_59 = arith.constant 1 : index
    %c2_60 = arith.constant 2 : index
    %c0_61 = arith.constant 0 : index
    %c0_62 = arith.constant 0 : index
    %37 = vector.load %arg2[%c1_59, %c2_60, %c0_61, %c0_62] : memref<3x3x4x8xf32, #tpu.memory_space<vmem>>, vector<1x1x4x8xf32>
    %38 = vector.shape_cast %37 : vector<1x1x4x8xf32> to vector<4x8xf32>
    %cst_63 = arith.constant dense<0.000000e+00> : vector<512x8xf32>
    %39 = tpu.matmul %36, %38, %cst_63 {dimension_numbers = #tpu.dot_dimension_numbers<[1], [0], [0], [1], [0, 0, 1, 1], [], []>} : vector<512x4xf32>, vector<4x8xf32>, vector<512x8xf32> -> vector<512x8xf32>
    %40 = arith.addf %34, %39 : vector<512x8xf32>
    %c0_64 = arith.constant 0 : index
    %c2_65 = arith.constant 2 : index
    %c0_66 = arith.constant 0 : index
    %c0_67 = arith.constant 0 : index
    %41 = vector.load %arg9[%c0_64, %c2_65, %c0_66, %c0_67] : memref<2x18x18x4xf32, #tpu.memory_space<vmem>>, vector<2x16x16x4xf32>
    %42 = vector.shape_cast %41 : vector<2x16x16x4xf32> to vector<512x4xf32>
    %c2_68 = arith.constant 2 : index
    %c0_69 = arith.constant 0 : index
    %c0_70 = arith.constant 0 : index
    %c0_71 = arith.constant 0 : index
    %43 = vector.load %arg2[%c2_68, %c0_69, %c0_70, %c0_71] : memref<3x3x4x8xf32, #tpu.memory_space<vmem>>, vector<1x1x4x8xf32>
    %44 = vector.shape_cast %43 : vector<1x1x4x8xf32> to vector<4x8xf32>
    %cst_72 = arith.constant dense<0.000000e+00> : vector<512x8xf32>
    %45 = tpu.matmul %42, %44, %cst_72 {dimension_numbers = #tpu.dot_dimension_numbers<[1], [0], [0], [1], [0, 0, 1, 1], [], []>} : vector<512x4xf32>, vector<4x8xf32>, vector<512x8xf32> -> vector<512x8xf32>
    %46 = arith.addf %40, %45 : vector<512x8xf32>
    %c0_73 = arith.constant 0 : index
    %c2_74 = arith.constant 2 : index
    %c1_75 = arith.constant 1 : index
    %c0_76 = arith.constant 0 : index
    %47 = vector.load %arg9[%c0_73, %c2_74, %c1_75, %c0_76] : memref<2x18x18x4xf32, #tpu.memory_space<vmem>>, vector<2x16x16x4xf32>
    %48 = vector.shape_cast %47 : vector<2x16x16x4xf32> to vector<512x4xf32>
    %c2_77 = arith.constant 2 : index
    %c1_78 = arith.constant 1 : index
    %c0_79 = arith.constant 0 : index
    %c0_80 = arith.constant 0 : index
    %49 = vector.load %arg2[%c2_77, %c1_78, %c0_79, %c0_80] : memref<3x3x4x8xf32, #tpu.memory_space<vmem>>, vector<1x1x4x8xf32>
    %50 = vector.shape_cast %49 : vector<1x1x4x8xf32> to vector<4x8xf32>
    %cst_81 = arith.constant dense<0.000000e+00> : vector<512x8xf32>
    %51 = tpu.matmul %48, %50, %cst_81 {dimension_numbers = #tpu.dot_dimension_numbers<[1], [0], [0], [1], [0, 0, 1, 1], [], []>} : vector<512x4xf32>, vector<4x8xf32>, vector<512x8xf32> -> vector<512x8xf32>
    %52 = arith.addf %46, %51 : vector<512x8xf32>
    %c0_82 = arith.constant 0 : index
    %c2_83 = arith.constant 2 : index
    %c2_84 = arith.constant 2 : index
    %c0_85 = arith.constant 0 : index
    %53 = vector.load %arg9[%c0_82, %c2_83, %c2_84, %c0_85] : memref<2x18x18x4xf32, #tpu.memory_space<vmem>>, vector<2x16x16x4xf32>
    %54 = vector.shape_cast %53 : vector<2x16x16x4xf32> to vector<512x4xf32>
    %c2_86 = arith.constant 2 : index
    %c2_87 = arith.constant 2 : index
    %c0_88 = arith.constant 0 : index
    %c0_89 = arith.constant 0 : index
    %55 = vector.load %arg2[%c2_86, %c2_87, %c0_88, %c0_89] : memref<3x3x4x8xf32, #tpu.memory_space<vmem>>, vector<1x1x4x8xf32>
    %56 = vector.shape_cast %55 : vector<1x1x4x8xf32> to vector<4x8xf32>
    %cst_90 = arith.constant dense<0.000000e+00> : vector<512x8xf32>
    %57 = tpu.matmul %54, %56, %cst_90 {dimension_numbers = #tpu.dot_dimension_numbers<[1], [0], [0], [1], [0, 0, 1, 1], [], []>} : vector<512x4xf32>, vector<4x8xf32>, vector<512x8xf32> -> vector<512x8xf32>
    %58 = arith.addf %52, %57 : vector<512x8xf32>
    %c0_91 = arith.constant 0 : index
    %c0_92 = arith.constant 0 : index
    %59 = vector.load %arg3[%c0_91, %c0_92] : memref<1x8xf32, #tpu.memory_space<vmem>>, vector<1x8xf32>
    %c0_93 = arith.constant 0 : index
    %c0_94 = arith.constant 0 : index
    %60 = vector.load %arg4[%c0_93, %c0_94] : memref<1x8xf32, #tpu.memory_space<vmem>>, vector<1x8xf32>
    %cst_95 = arith.constant dense<0.000000e+00> : vector<8xf32>
    %61 = vector.multi_reduction <add>, %58, %cst_95 [0] : vector<512x8xf32> to vector<8xf32>
    %62 = vector.shape_cast %61 : vector<8xf32> to vector<1x8xf32>
    %cst_96 = arith.constant 0.001953125 : f32
    %63 = vector.broadcast %cst_96 : f32 to vector<1x8xf32>
    %64 = arith.mulf %62, %63 : vector<1x8xf32>
    %65 = vector.broadcast %64 : vector<1x8xf32> to vector<512x8xf32>
    %66 = arith.subf %58, %65 : vector<512x8xf32>
    %67 = arith.mulf %66, %66 : vector<512x8xf32>
    %cst_97 = arith.constant dense<0.000000e+00> : vector<8xf32>
    %68 = vector.multi_reduction <add>, %67, %cst_97 [0] : vector<512x8xf32> to vector<8xf32>
    %69 = vector.shape_cast %68 : vector<8xf32> to vector<1x8xf32>
    %cst_98 = arith.constant 0.001953125 : f32
    %70 = vector.broadcast %cst_98 : f32 to vector<1x8xf32>
    %71 = arith.mulf %69, %70 : vector<1x8xf32>
    %cst_99 = arith.constant 9.99999974E-6 : f32
    %72 = vector.broadcast %cst_99 : f32 to vector<1x8xf32>
    %73 = arith.addf %71, %72 : vector<1x8xf32>
    %74 = math.rsqrt %73 : vector<1x8xf32>
    %75 = arith.mulf %59, %74 : vector<1x8xf32>
    %76 = vector.broadcast %75 : vector<1x8xf32> to vector<512x8xf32>
    %77 = arith.mulf %66, %76 : vector<512x8xf32>
    %78 = vector.broadcast %60 : vector<1x8xf32> to vector<512x8xf32>
    %79 = arith.addf %77, %78 : vector<512x8xf32>
    %cst_100 = arith.constant 0.000000e+00 : f32
    %80 = vector.broadcast %cst_100 : f32 to vector<512x8xf32>
    %81 = arith.maximumf %79, %80 : vector<512x8xf32>
    %cst_101 = arith.constant 0.000000e+00 : f32
    %82 = vector.broadcast %cst_101 : f32 to vector<2x18x18x8xf32>
    %c0_102 = arith.constant 0 : index
    %c0_103 = arith.constant 0 : index
    %c0_104 = arith.constant 0 : index
    %c0_105 = arith.constant 0 : index
    %83 = vector.load %arg10[%c0_102, %c0_103, %c0_104, %c0_105] : memref<2x18x18x8xf32, #tpu.memory_space<vmem>>, vector<2x18x18x8xf32>
    tpu.vector_store %arg10[%c0_102, %c0_103, %c0_104, %c0_105], %82 {strides = array<i32>} : memref<2x18x18x8xf32, #tpu.memory_space<vmem>>, vector<2x18x18x8xf32>,
    %84 = vector.shape_cast %81 : vector<512x8xf32> to vector<2x16x16x8xf32>
    %c0_106 = arith.constant 0 : index
    %c1_107 = arith.constant 1 : index
    %c1_108 = arith.constant 1 : index
    %c0_109 = arith.constant 0 : index
    %85 = vector.load %arg10[%c0_106, %c1_107, %c1_108, %c0_109] : memref<2x18x18x8xf32, #tpu.memory_space<vmem>>, vector<2x16x16x8xf32>
    tpu.vector_store %arg10[%c0_106, %c1_107, %c1_108, %c0_109], %84 {strides = array<i32>} : memref<2x18x18x8xf32, #tpu.memory_space<vmem>>, vector<2x16x16x8xf32>,
    %cst_110 = arith.constant 0.000000e+00 : f32
    %86 = vector.broadcast %cst_110 : f32 to vector<512x8xf32>
    %c0_111 = arith.constant 0 : index
    %c0_112 = arith.constant 0 : index
    %c0_113 = arith.constant 0 : index
    %c0_114 = arith.constant 0 : index
    %87 = vector.load %arg10[%c0_111, %c0_112, %c0_113, %c0_114] : memref<2x18x18x8xf32, #tpu.memory_space<vmem>>, vector<2x16x16x8xf32>
    %88 = vector.shape_cast %87 : vector<2x16x16x8xf32> to vector<512x8xf32>
    %c0_115 = arith.constant 0 : index
    %c0_116 = arith.constant 0 : index
    %c0_117 = arith.constant 0 : index
    %c0_118 = arith.constant 0 : index
    %89 = vector.load %arg5[%c0_115, %c0_116, %c0_117, %c0_118] : memref<3x3x8x8xf32, #tpu.memory_space<vmem>>, vector<1x1x8x8xf32>
    %90 = vector.shape_cast %89 : vector<1x1x8x8xf32> to vector<8x8xf32>
    %cst_119 = arith.constant dense<0.000000e+00> : vector<512x8xf32>
    %91 = tpu.matmul %88, %90, %cst_119 {dimension_numbers = #tpu.dot_dimension_numbers<[1], [0], [0], [1], [0, 0, 1, 1], [], []>} : vector<512x8xf32>, vector<8x8xf32>, vector<512x8xf32> -> vector<512x8xf32>
    %92 = arith.addf %86, %91 : vector<512x8xf32>
    %c0_120 = arith.constant 0 : index
    %c0_121 = arith.constant 0 : index
    %c1_122 = arith.constant 1 : index
    %c0_123 = arith.constant 0 : index
    %93 = vector.load %arg10[%c0_120, %c0_121, %c1_122, %c0_123] : memref<2x18x18x8xf32, #tpu.memory_space<vmem>>, vector<2x16x16x8xf32>
    %94 = vector.shape_cast %93 : vector<2x16x16x8xf32> to vector<512x8xf32>
    %c0_124 = arith.constant 0 : index
    %c1_125 = arith.constant 1 : index
    %c0_126 = arith.constant 0 : index
    %c0_127 = arith.constant 0 : index
    %95 = vector.load %arg5[%c0_124, %c1_125, %c0_126, %c0_127] : memref<3x3x8x8xf32, #tpu.memory_space<vmem>>, vector<1x1x8x8xf32>
    %96 = vector.shape_cast %95 : vector<1x1x8x8xf32> to vector<8x8xf32>
    %cst_128 = arith.constant dense<0.000000e+00> : vector<512x8xf32>
    %97 = tpu.matmul %94, %96, %cst_128 {dimension_numbers = #tpu.dot_dimension_numbers<[1], [0], [0], [1], [0, 0, 1, 1], [], []>} : vector<512x8xf32>, vector<8x8xf32>, vector<512x8xf32> -> vector<512x8xf32>
    %98 = arith.addf %92, %97 : vector<512x8xf32>
    %c0_129 = arith.constant 0 : index
    %c0_130 = arith.constant 0 : index
    %c2_131 = arith.constant 2 : index
    %c0_132 = arith.constant 0 : index
    %99 = vector.load %arg10[%c0_129, %c0_130, %c2_131, %c0_132] : memref<2x18x18x8xf32, #tpu.memory_space<vmem>>, vector<2x16x16x8xf32>
    %100 = vector.shape_cast %99 : vector<2x16x16x8xf32> to vector<512x8xf32>
    %c0_133 = arith.constant 0 : index
    %c2_134 = arith.constant 2 : index
    %c0_135 = arith.constant 0 : index
    %c0_136 = arith.constant 0 : index
    %101 = vector.load %arg5[%c0_133, %c2_134, %c0_135, %c0_136] : memref<3x3x8x8xf32, #tpu.memory_space<vmem>>, vector<1x1x8x8xf32>
    %102 = vector.shape_cast %101 : vector<1x1x8x8xf32> to vector<8x8xf32>
    %cst_137 = arith.constant dense<0.000000e+00> : vector<512x8xf32>
    %103 = tpu.matmul %100, %102, %cst_137 {dimension_numbers = #tpu.dot_dimension_numbers<[1], [0], [0], [1], [0, 0, 1, 1], [], []>} : vector<512x8xf32>, vector<8x8xf32>, vector<512x8xf32> -> vector<512x8xf32>
    %104 = arith.addf %98, %103 : vector<512x8xf32>
    %c0_138 = arith.constant 0 : index
    %c1_139 = arith.constant 1 : index
    %c0_140 = arith.constant 0 : index
    %c0_141 = arith.constant 0 : index
    %105 = vector.load %arg10[%c0_138, %c1_139, %c0_140, %c0_141] : memref<2x18x18x8xf32, #tpu.memory_space<vmem>>, vector<2x16x16x8xf32>
    %106 = vector.shape_cast %105 : vector<2x16x16x8xf32> to vector<512x8xf32>
    %c1_142 = arith.constant 1 : index
    %c0_143 = arith.constant 0 : index
    %c0_144 = arith.constant 0 : index
    %c0_145 = arith.constant 0 : index
    %107 = vector.load %arg5[%c1_142, %c0_143, %c0_144, %c0_145] : memref<3x3x8x8xf32, #tpu.memory_space<vmem>>, vector<1x1x8x8xf32>
    %108 = vector.shape_cast %107 : vector<1x1x8x8xf32> to vector<8x8xf32>
    %cst_146 = arith.constant dense<0.000000e+00> : vector<512x8xf32>
    %109 = tpu.matmul %106, %108, %cst_146 {dimension_numbers = #tpu.dot_dimension_numbers<[1], [0], [0], [1], [0, 0, 1, 1], [], []>} : vector<512x8xf32>, vector<8x8xf32>, vector<512x8xf32> -> vector<512x8xf32>
    %110 = arith.addf %104, %109 : vector<512x8xf32>
    %c0_147 = arith.constant 0 : index
    %c1_148 = arith.constant 1 : index
    %c1_149 = arith.constant 1 : index
    %c0_150 = arith.constant 0 : index
    %111 = vector.load %arg10[%c0_147, %c1_148, %c1_149, %c0_150] : memref<2x18x18x8xf32, #tpu.memory_space<vmem>>, vector<2x16x16x8xf32>
    %112 = vector.shape_cast %111 : vector<2x16x16x8xf32> to vector<512x8xf32>
    %c1_151 = arith.constant 1 : index
    %c1_152 = arith.constant 1 : index
    %c0_153 = arith.constant 0 : index
    %c0_154 = arith.constant 0 : index
    %113 = vector.load %arg5[%c1_151, %c1_152, %c0_153, %c0_154] : memref<3x3x8x8xf32, #tpu.memory_space<vmem>>, vector<1x1x8x8xf32>
    %114 = vector.shape_cast %113 : vector<1x1x8x8xf32> to vector<8x8xf32>
    %cst_155 = arith.constant dense<0.000000e+00> : vector<512x8xf32>
    %115 = tpu.matmul %112, %114, %cst_155 {dimension_numbers = #tpu.dot_dimension_numbers<[1], [0], [0], [1], [0, 0, 1, 1], [], []>} : vector<512x8xf32>, vector<8x8xf32>, vector<512x8xf32> -> vector<512x8xf32>
    %116 = arith.addf %110, %115 : vector<512x8xf32>
    %c0_156 = arith.constant 0 : index
    %c1_157 = arith.constant 1 : index
    %c2_158 = arith.constant 2 : index
    %c0_159 = arith.constant 0 : index
    %117 = vector.load %arg10[%c0_156, %c1_157, %c2_158, %c0_159] : memref<2x18x18x8xf32, #tpu.memory_space<vmem>>, vector<2x16x16x8xf32>
    %118 = vector.shape_cast %117 : vector<2x16x16x8xf32> to vector<512x8xf32>
    %c1_160 = arith.constant 1 : index
    %c2_161 = arith.constant 2 : index
    %c0_162 = arith.constant 0 : index
    %c0_163 = arith.constant 0 : index
    %119 = vector.load %arg5[%c1_160, %c2_161, %c0_162, %c0_163] : memref<3x3x8x8xf32, #tpu.memory_space<vmem>>, vector<1x1x8x8xf32>
    %120 = vector.shape_cast %119 : vector<1x1x8x8xf32> to vector<8x8xf32>
    %cst_164 = arith.constant dense<0.000000e+00> : vector<512x8xf32>
    %121 = tpu.matmul %118, %120, %cst_164 {dimension_numbers = #tpu.dot_dimension_numbers<[1], [0], [0], [1], [0, 0, 1, 1], [], []>} : vector<512x8xf32>, vector<8x8xf32>, vector<512x8xf32> -> vector<512x8xf32>
    %122 = arith.addf %116, %121 : vector<512x8xf32>
    %c0_165 = arith.constant 0 : index
    %c2_166 = arith.constant 2 : index
    %c0_167 = arith.constant 0 : index
    %c0_168 = arith.constant 0 : index
    %123 = vector.load %arg10[%c0_165, %c2_166, %c0_167, %c0_168] : memref<2x18x18x8xf32, #tpu.memory_space<vmem>>, vector<2x16x16x8xf32>
    %124 = vector.shape_cast %123 : vector<2x16x16x8xf32> to vector<512x8xf32>
    %c2_169 = arith.constant 2 : index
    %c0_170 = arith.constant 0 : index
    %c0_171 = arith.constant 0 : index
    %c0_172 = arith.constant 0 : index
    %125 = vector.load %arg5[%c2_169, %c0_170, %c0_171, %c0_172] : memref<3x3x8x8xf32, #tpu.memory_space<vmem>>, vector<1x1x8x8xf32>
    %126 = vector.shape_cast %125 : vector<1x1x8x8xf32> to vector<8x8xf32>
    %cst_173 = arith.constant dense<0.000000e+00> : vector<512x8xf32>
    %127 = tpu.matmul %124, %126, %cst_173 {dimension_numbers = #tpu.dot_dimension_numbers<[1], [0], [0], [1], [0, 0, 1, 1], [], []>} : vector<512x8xf32>, vector<8x8xf32>, vector<512x8xf32> -> vector<512x8xf32>
    %128 = arith.addf %122, %127 : vector<512x8xf32>
    %c0_174 = arith.constant 0 : index
    %c2_175 = arith.constant 2 : index
    %c1_176 = arith.constant 1 : index
    %c0_177 = arith.constant 0 : index
    %129 = vector.load %arg10[%c0_174, %c2_175, %c1_176, %c0_177] : memref<2x18x18x8xf32, #tpu.memory_space<vmem>>, vector<2x16x16x8xf32>
    %130 = vector.shape_cast %129 : vector<2x16x16x8xf32> to vector<512x8xf32>
    %c2_178 = arith.constant 2 : index
    %c1_179 = arith.constant 1 : index
    %c0_180 = arith.constant 0 : index
    %c0_181 = arith.constant 0 : index
    %131 = vector.load %arg5[%c2_178, %c1_179, %c0_180, %c0_181] : memref<3x3x8x8xf32, #tpu.memory_space<vmem>>, vector<1x1x8x8xf32>
    %132 = vector.shape_cast %131 : vector<1x1x8x8xf32> to vector<8x8xf32>
    %cst_182 = arith.constant dense<0.000000e+00> : vector<512x8xf32>
    %133 = tpu.matmul %130, %132, %cst_182 {dimension_numbers = #tpu.dot_dimension_numbers<[1], [0], [0], [1], [0, 0, 1, 1], [], []>} : vector<512x8xf32>, vector<8x8xf32>, vector<512x8xf32> -> vector<512x8xf32>
    %134 = arith.addf %128, %133 : vector<512x8xf32>
    %c0_183 = arith.constant 0 : index
    %c2_184 = arith.constant 2 : index
    %c2_185 = arith.constant 2 : index
    %c0_186 = arith.constant 0 : index
    %135 = vector.load %arg10[%c0_183, %c2_184, %c2_185, %c0_186] : memref<2x18x18x8xf32, #tpu.memory_space<vmem>>, vector<2x16x16x8xf32>
    %136 = vector.shape_cast %135 : vector<2x16x16x8xf32> to vector<512x8xf32>
    %c2_187 = arith.constant 2 : index
    %c2_188 = arith.constant 2 : index
    %c0_189 = arith.constant 0 : index
    %c0_190 = arith.constant 0 : index
    %137 = vector.load %arg5[%c2_187, %c2_188, %c0_189, %c0_190] : memref<3x3x8x8xf32, #tpu.memory_space<vmem>>, vector<1x1x8x8xf32>
    %138 = vector.shape_cast %137 : vector<1x1x8x8xf32> to vector<8x8xf32>
    %cst_191 = arith.constant dense<0.000000e+00> : vector<512x8xf32>
    %139 = tpu.matmul %136, %138, %cst_191 {dimension_numbers = #tpu.dot_dimension_numbers<[1], [0], [0], [1], [0, 0, 1, 1], [], []>} : vector<512x8xf32>, vector<8x8xf32>, vector<512x8xf32> -> vector<512x8xf32>
    %140 = arith.addf %134, %139 : vector<512x8xf32>
    %c0_192 = arith.constant 0 : index
    %c0_193 = arith.constant 0 : index
    %141 = vector.load %arg6[%c0_192, %c0_193] : memref<1x8xf32, #tpu.memory_space<vmem>>, vector<1x8xf32>
    %c0_194 = arith.constant 0 : index
    %c0_195 = arith.constant 0 : index
    %142 = vector.load %arg7[%c0_194, %c0_195] : memref<1x8xf32, #tpu.memory_space<vmem>>, vector<1x8xf32>
    %cst_196 = arith.constant dense<0.000000e+00> : vector<8xf32>
    %143 = vector.multi_reduction <add>, %140, %cst_196 [0] : vector<512x8xf32> to vector<8xf32>
    %144 = vector.shape_cast %143 : vector<8xf32> to vector<1x8xf32>
    %cst_197 = arith.constant 0.001953125 : f32
    %145 = vector.broadcast %cst_197 : f32 to vector<1x8xf32>
    %146 = arith.mulf %144, %145 : vector<1x8xf32>
    %147 = vector.broadcast %146 : vector<1x8xf32> to vector<512x8xf32>
    %148 = arith.subf %140, %147 : vector<512x8xf32>
    %149 = arith.mulf %148, %148 : vector<512x8xf32>
    %cst_198 = arith.constant dense<0.000000e+00> : vector<8xf32>
    %150 = vector.multi_reduction <add>, %149, %cst_198 [0] : vector<512x8xf32> to vector<8xf32>
    %151 = vector.shape_cast %150 : vector<8xf32> to vector<1x8xf32>
    %cst_199 = arith.constant 0.001953125 : f32
    %152 = vector.broadcast %cst_199 : f32 to vector<1x8xf32>
    %153 = arith.mulf %151, %152 : vector<1x8xf32>
    %cst_200 = arith.constant 9.99999974E-6 : f32
    %154 = vector.broadcast %cst_200 : f32 to vector<1x8xf32>
    %155 = arith.addf %153, %154 : vector<1x8xf32>
    %156 = math.rsqrt %155 : vector<1x8xf32>
    %157 = arith.mulf %141, %156 : vector<1x8xf32>
    %158 = vector.broadcast %157 : vector<1x8xf32> to vector<512x8xf32>
    %159 = arith.mulf %148, %158 : vector<512x8xf32>
    %160 = vector.broadcast %142 : vector<1x8xf32> to vector<512x8xf32>
    %161 = arith.addf %159, %160 : vector<512x8xf32>
    %cst_201 = arith.constant 0.000000e+00 : f32
    %162 = vector.broadcast %cst_201 : f32 to vector<512x8xf32>
    %163 = arith.maximumf %161, %162 : vector<512x8xf32>
    %164 = vector.shape_cast %163 : vector<512x8xf32> to vector<2x16x16x8xf32>
    %c0_202 = arith.constant 0 : index
    %c0_203 = arith.constant 0 : index
    %c0_204 = arith.constant 0 : index
    %c0_205 = arith.constant 0 : index
    %165 = vector.load %arg8[%c0_202, %c0_203, %c0_204, %c0_205] : memref<2x16x16x8xf32, #tpu.memory_space<vmem>>, vector<2x16x16x8xf32>
    tpu.vector_store %arg8[%c0_202, %c0_203, %c0_204, %c0_205], %164 {strides = array<i32>} : memref<2x16x16x8xf32, #tpu.memory_space<vmem>>, vector<2x16x16x8xf32>,
    return
  }
  func.func @transform_0(%arg0: i32) -> (i32, i32, i32, i32) {
    %c0_i32 = arith.constant 0 : i32
    %c0_i32_0 = arith.constant 0 : i32
    %c0_i32_1 = arith.constant 0 : i32
    %c0_i32_2 = arith.constant 0 : i32
    %c0_i32_3 = arith.constant 0 : i32
    return %c0_i32, %c0_i32_0, %c0_i32_1, %c0_i32_2 : i32, i32, i32, i32
  }
  func.func @transform_1(%arg0: i32) -> (i32, i32, i32, i32) {
    %c0_i32 = arith.constant 0 : i32
    %c0_i32_0 = arith.constant 0 : i32
    %c0_i32_1 = arith.constant 0 : i32
    %c0_i32_2 = arith.constant 0 : i32
    %c0_i32_3 = arith.constant 0 : i32
    return %c0_i32, %c0_i32_0, %c0_i32_1, %c0_i32_2 : i32, i32, i32, i32
  }
  func.func @transform_2(%arg0: i32) -> (i32, i32) {
    %c0_i32 = arith.constant 0 : i32
    %c0_i32_0 = arith.constant 0 : i32
    %c0_i32_1 = arith.constant 0 : i32
    return %c0_i32, %c0_i32_0 : i32, i32
  }
  func.func @transform_3(%arg0: i32) -> (i32, i32) {
    %c0_i32 = arith.constant 0 : i32
    %c0_i32_0 = arith.constant 0 : i32
    %c0_i32_1 = arith.constant 0 : i32
    return %c0_i32, %c0_i32_0 : i32, i32
  }
  func.func @transform_4(%arg0: i32) -> (i32, i32, i32, i32) {
    %c0_i32 = arith.constant 0 : i32
    %c0_i32_0 = arith.constant 0 : i32
    %c0_i32_1 = arith.constant 0 : i32
    %c0_i32_2 = arith.constant 0 : i32
    %c0_i32_3 = arith.constant 0 : i32
    return %c0_i32, %c0_i32_0, %c0_i32_1, %c0_i32_2 : i32, i32, i32, i32
  }
  func.func @transform_5(%arg0: i32) -> (i32, i32) {
    %c0_i32 = arith.constant 0 : i32
    %c0_i32_0 = arith.constant 0 : i32
    %c0_i32_1 = arith.constant 0 : i32
    return %c0_i32, %c0_i32_0 : i32, i32
  }
  func.func @transform_6(%arg0: i32) -> (i32, i32) {
    %c0_i32 = arith.constant 0 : i32
    %c0_i32_0 = arith.constant 0 : i32
    %c0_i32_1 = arith.constant 0 : i32
    return %c0_i32, %c0_i32_0 : i32, i32
  }
  func.func @transform_7(%arg0: i32) -> (i32, i32, i32, i32) {
    %c0_i32 = arith.constant 0 : i32
    %c0_i32_0 = arith.constant 0 : i32
    %c0_i32_1 = arith.constant 0 : i32
    %c0_i32_2 = arith.constant 0 : i32
    %c0_i32_3 = arith.constant 0 : i32
    return %c0_i32, %c0_i32_0, %c0_i32_1, %c0_i32_2 : i32, i32, i32, i32
  }
}

</mosaic_0001>

<bundles_post_ra>
// kernel: cv_block.1
= control target key start
LH: loop header
LB: loop body
LE: loop exit
PB: predicated region body
PF: predicated region fallthrough
CT: control target
= control target key end

     0   :  { %vm588_vm0 = vcmask 1043456   ;;  %vm26_vm1 = vcmask 31744   ;;  %vm29_vm2 = vcmask 25600   ;;  %v25795_v1 = vmov 0.0   ;;  %s25787_s1 = inlined_call_operand.vmem [shape: f32[3,3,4,8], index: 1, kind: input, shape index: {}]   ;;  %s25788_s0 = inlined_call_operand.vmem [shape: f32[2,16,16,4], index: 0, kind: input, shape index: {}]   ;;  %s25789_s4 = inlined_call_operand.vmem [shape: f32[3,3,8,8], index: 4, kind: input, shape index: {}]   ;;  %s25790_s2 = inlined_call_operand.vmem [shape: f32[1,8], index: 2, kind: input, shape index: {}]   ;;  %s25791_s3 = inlined_call_operand.vmem [shape: f32[1,8], index: 3, kind: input, shape index: {}]   ;;  %s25792_s5 = inlined_call_operand.vmem [shape: f32[1,8], index: 5, kind: input, shape index: {}]   ;;  %s25793_s6 = inlined_call_operand.vmem [shape: f32[1,8], index: 6, kind: input, shape index: {}]   ;;  %s25794_s7 = inlined_call_operand.vmem [shape: f32[2,16,16,8], index: 7, kind: output, shape index: {}]  }
   0x1   :  { %v19402_v0 = vld [vmem:[%s25787_s1 + $0x4] sm:$0xf]  ;;  %27 = vst.msk [vmem:[#allocation2] sm:$0xff] %vm26_vm1, %v25795_v1  ;;  %28 = vst.msk [vmem:[#allocation2 + $0x8] sm:$0xff] %vm26_vm1, %v25795_v1  ;;  %v19551_v2 = vld [vmem:[%s25787_s1] sm:$0xf] }
   0x2   :  { %31 = vst.msk [vmem:[#allocation2 + $0x18] sm:$0xff] %vm26_vm1, %v25795_v1  ;;  %32 = vst.msk [vmem:[#allocation2 + $0x20] sm:$0xff] %vm26_vm1, %v25795_v1  ;;  %v136_v3 = vld [vmem:[%s25788_s0] sm:$0xff]  ;;  %16565 = vmatprep.subr.msk.mxu0 %vm588_vm0, %v19402_v0  ;;  %v137_v4 = vld [vmem:[%s25788_s0 + $0x8] sm:$0xff]  ;;  %vm6530_vm3 = vcmask 64512   ;;  %vm7136_vm4 = vcmask 58368  }
   0x3   :  { %34 = vst.msk [vmem:[#allocation2 + $0x30] sm:$0xff] %vm26_vm1, %v25795_v1  ;;  %35 = vst.msk [vmem:[#allocation2 + $0x38] sm:$0xff] %vm26_vm1, %v25795_v1  ;;  %v138_v5 = vld [vmem:[%s25788_s0 + $0x10] sm:$0xff]  ;;  %v139_v6 = vld [vmem:[%s25788_s0 + $0x18] sm:$0xff]  ;;  %16566 = vmatpush3.msk.msra.mxu0 %vm588_vm0, %v19402_v0 }
   0x4   :  { %37 = vst.msk [vmem:[#allocation2 + $0x48] sm:$0xff] %vm26_vm1, %v25795_v1  ;;  %38 = vst.msk [vmem:[#allocation2 + $0x50] sm:$0xff] %vm26_vm1, %v25795_v1  ;;  %v140_v7 = vld [vmem:[%s25788_s0 + $0x20] sm:$0xff]  ;;  %v141_v8 = vld [vmem:[%s25788_s0 + $0x28] sm:$0xff]  ;;  %16663 = vmatprep.subr.msk.mxu0 %vm588_vm0, %v19551_v2 }
   0x5   :  { %40 = vst.msk [vmem:[#allocation2 + $0x60] sm:$0xff] %vm26_vm1, %v25795_v1  ;;  %41 = vst.msk [vmem:[#allocation2 + $0x68] sm:$0xff] %vm26_vm1, %v25795_v1  ;;  %v142_v9 = vld [vmem:[%s25788_s0 + $0x30] sm:$0xff]  ;;  %v143_v10 = vld [vmem:[%s25788_s0 + $0x38] sm:$0xff] }
   0x6   :  { %43 = vst.msk [vmem:[#allocation2 + $0x78] sm:$0xff] %vm26_vm1, %v25795_v1  ;;  %44 = vst.msk [vmem:[#allocation2 + $0x80] sm:$0xff] %vm26_vm1, %v25795_v1  ;;  %v144_v11 = vld [vmem:[%s25788_s0 + $0x40] sm:$0xff]  ;;  %v145_v12 = vld [vmem:[%s25788_s0 + $0x48] sm:$0xff] }
   0x7   :  { %46 = vst.msk [vmem:[#allocation2 + $0x90] sm:$0xff] %vm26_vm1, %v25795_v1  ;;  %47 = vst.msk [vmem:[#allocation2 + $0x98] sm:$0xff] %vm26_vm1, %v25795_v1  ;;  %v146_v13 = vld [vmem:[%s25788_s0 + $0x50] sm:$0xff]  ;;  %v147_v14 = vld [vmem:[%s25788_s0 + $0x58] sm:$0xff] }
   0x8   :  { %49 = vst.msk [vmem:[#allocation2 + $0xa8] sm:$0xff] %vm26_vm1, %v25795_v1  ;;  %50 = vst.msk [vmem:[#allocation2 + $0xb0] sm:$0xff] %vm26_vm1, %v25795_v1  ;;  %v148_v15 = vld [vmem:[%s25788_s0 + $0x60] sm:$0xff]  ;;  %v149_v16 = vld [vmem:[%s25788_s0 + $0x68] sm:$0xff] }
   0x9   :  { %52 = vst.msk [vmem:[#allocation2 + $0xc0] sm:$0xff] %vm26_vm1, %v25795_v1  ;;  %53 = vst.msk [vmem:[#allocation2 + $0xc8] sm:$0xff] %vm26_vm1, %v25795_v1  ;;  %v150_v17 = vld [vmem:[%s25788_s0 + $0x70] sm:$0xff]  ;;  %v151_v18 = vld [vmem:[%s25788_s0 + $0x78] sm:$0xff] }
   0xa   :  { %55 = vst.msk [vmem:[#allocation2 + $0xd8] sm:$0xff] %vm26_vm1, %v25795_v1  ;;  %56 = vst.msk [vmem:[#allocation2 + $0xe0] sm:$0xff] %vm26_vm1, %v25795_v1  ;;  %v152_v19 = vld [vmem:[%s25788_s0 + $0x80] sm:$0xff]  ;;  %v153_v20 = vld [vmem:[%s25788_s0 + $0x88] sm:$0xff] }
   0xb   :  { %58 = vst.msk [vmem:[#allocation2 + $0xf0] sm:$0xff] %vm26_vm1, %v25795_v1  ;;  %59 = vst.msk [vmem:[#allocation2 + $0xf8] sm:$0xff] %vm26_vm1, %v25795_v1  ;;  %v154_v21 = vld [vmem:[%s25788_s0 + $0x90] sm:$0xff]  ;;  %v330_v22 = vld [vmem:[#allocation2 + $0x1] sm:$0xff] }
   0xc   :  { %61 = vst.msk [vmem:[#allocation2 + $0x108] sm:$0xff] %vm26_vm1, %v25795_v1  ;;  %62 = vst.msk [vmem:[#allocation2 + $0x110] sm:$0xff] %vm26_vm1, %v25795_v1  ;;  %v155_v24 = vld [vmem:[%s25788_s0 + $0x98] sm:$0xff]  ;;  %16567 = vmatprep.mubr.msk.f32.mxu0 %vm26_vm1, %v330_v22  ;;  %v156_v26 = vld [vmem:[%s25788_s0 + $0xa0] sm:$0xff] }
   0xd   :  { %64 = vst.msk [vmem:[#allocation2 + $0x120] sm:$0xff] %vm26_vm1, %v25795_v1  ;;  %65 = vst.msk [vmem:[#allocation2 + $0x128] sm:$0xff] %vm26_vm1, %v25795_v1  ;;  %v157_v27 = vld [vmem:[%s25788_s0 + $0xa8] sm:$0xff]  ;;  %v158_v32 = vld [vmem:[%s25788_s0 + $0xb0] sm:$0xff] }
   0xe   :  { %67 = vst.msk [vmem:[#allocation2 + $0x138] sm:$0xff] %vm26_vm1, %v25795_v1  ;;  %68 = vst.msk [vmem:[#allocation2 + $0x140] sm:$0xff] %vm26_vm1, %v25795_v1  ;;  %v159_v33 = vld [vmem:[%s25788_s0 + $0xb8] sm:$0xff]  ;;  %v160_v34 = vld [vmem:[%s25788_s0 + $0xc0] sm:$0xff] }
   0xf   :  { %70 = vst.msk [vmem:[#allocation2 + $0x150] sm:$0xff] %vm26_vm1, %v25795_v1  ;;  %71 = vst.msk [vmem:[#allocation2 + $0x158] sm:$0xff] %vm26_vm1, %v25795_v1  ;;  %v161_v35 = vld [vmem:[%s25788_s0 + $0xc8] sm:$0xff]  ;;  %v162_v36 = vld [vmem:[%s25788_s0 + $0xd0] sm:$0xff] }
  0x10   :  { %73 = vst.msk [vmem:[#allocation2 + $0x168] sm:$0xff] %vm26_vm1, %v25795_v1  ;;  %74 = vst.msk [vmem:[#allocation2 + $0x170] sm:$0xff] %vm26_vm1, %v25795_v1  ;;  %v163_v37 = vld [vmem:[%s25788_s0 + $0xd8] sm:$0xff]  ;;  %v164_v39 = vld [vmem:[%s25788_s0 + $0xe0] sm:$0xff] }
  0x11   :  { %76 = vst.msk [vmem:[#allocation2 + $0x180] sm:$0xff] %vm26_vm1, %v25795_v1  ;;  %77 = vst.msk [vmem:[#allocation2 + $0x188] sm:$0xff] %vm26_vm1, %v25795_v1  ;;  %v165_v40 = vld [vmem:[%s25788_s0 + $0xe8] sm:$0xff]  ;;  %v168_v42 = vld [vmem:[%s25788_s0 + $0x100] sm:$0xff] }
  0x12   :  { %79 = vst.msk [vmem:[#allocation2 + $0x198] sm:$0xff] %vm26_vm1, %v25795_v1  ;;  %80 = vst.msk [vmem:[#allocation2 + $0x1a0] sm:$0xff] %vm26_vm1, %v25795_v1  ;;  %v169_v43 = vld [vmem:[%s25788_s0 + $0x108] sm:$0xff]  ;;  %v170_v45 = vld [vmem:[%s25788_s0 + $0x110] sm:$0xff] }
  0x13   :  { %82 = vst.msk [vmem:[#allocation2 + $0x1b0] sm:$0xff] %vm26_vm1, %v25795_v1  ;;  %83 = vst.msk [vmem:[#allocation2 + $0x1b8] sm:$0xff] %vm26_vm1, %v25795_v1  ;;  %v171_v46 = vld [vmem:[%s25788_s0 + $0x118] sm:$0xff]  ;;  %v172_v47 = vld [vmem:[%s25788_s0 + $0x120] sm:$0xff] }
  0x14   :  { %85 = vst.msk [vmem:[#allocation2 + $0x1c8] sm:$0xff] %vm26_vm1, %v25795_v1  ;;  %86 = vst.msk [vmem:[#allocation2 + $0x1d0] sm:$0xff] %vm26_vm1, %v25795_v1  ;;  %v173_v48 = vld [vmem:[%s25788_s0 + $0x128] sm:$0xff]  ;;  %v174_v49 = vld [vmem:[%s25788_s0 + $0x130] sm:$0xff] }
  0x15   :  { %88 = vst.msk [vmem:[#allocation2 + $0x1e0] sm:$0xff] %vm26_vm1, %v25795_v1  ;;  %89 = vst.msk [vmem:[#allocation2 + $0x1e8] sm:$0xff] %vm26_vm1, %v25795_v1  ;;  %v175_v50 = vld [vmem:[%s25788_s0 + $0x138] sm:$0xff]  ;;  %v176_v51 = vld [vmem:[%s25788_s0 + $0x140] sm:$0xff] }
  0x16   :  { %91 = vst.msk [vmem:[#allocation2 + $0x1f8] sm:$0xff] %vm26_vm1, %v25795_v1  ;;  %92 = vst.msk [vmem:[#allocation2 + $0x200] sm:$0xff] %vm26_vm1, %v25795_v1  ;;  %v177_v52 = vld [vmem:[%s25788_s0 + $0x148] sm:$0xff]  ;;  %v178_v53 = vld [vmem:[%s25788_s0 + $0x150] sm:$0xff] }
  0x17   :  { %94 = vst.msk [vmem:[#allocation2 + $0x210] sm:$0xff] %vm26_vm1, %v25795_v1  ;;  %95 = vst.msk [vmem:[#allocation2 + $0x218] sm:$0xff] %vm26_vm1, %v25795_v1  ;;  %v179_v55 = vld [vmem:[%s25788_s0 + $0x158] sm:$0xff]  ;;  %v180_v56 = vld [vmem:[%s25788_s0 + $0x160] sm:$0xff] }
  0x18   :  { %97 = vst.msk [vmem:[#allocation2 + $0x228] sm:$0xff] %vm26_vm1, %v25795_v1  ;;  %98 = vst.msk [vmem:[#allocation2 + $0x230] sm:$0xff] %vm26_vm1, %v25795_v1  ;;  %v181_v57 = vld [vmem:[%s25788_s0 + $0x168] sm:$0xff]  ;;  %v182_v59 = vld [vmem:[%s25788_s0 + $0x170] sm:$0xff] }
  0x19   :  { %100 = vst.msk [vmem:[#allocation2 + $0x240] sm:$0xff] %vm26_vm1, %v25795_v1  ;;  %101 = vst.msk [vmem:[#allocation2 + $0x248] sm:$0xff] %vm26_vm1, %v25795_v1  ;;  %v183_v61 = vld [vmem:[%s25788_s0 + $0x178] sm:$0xff]  ;;  %v184_v0 = vld [vmem:[%s25788_s0 + $0x180] sm:$0xff] }
  0x1a   :  { %103 = vst.msk [vmem:[#allocation2 + $0x258] sm:$0xff] %vm26_vm1, %v25795_v1  ;;  %104 = vst.msk [vmem:[#allocation2 + $0x260] sm:$0xff] %vm26_vm1, %v25795_v1 }
  0x1b   :  { %106 = vst.msk [vmem:[#allocation2 + $0x270] sm:$0xff] %vm26_vm1, %v25795_v1  ;;  %107 = vst.msk [vmem:[#allocation2 + $0x278] sm:$0xff] %vm26_vm1, %v25795_v1 }
  0x1c   :  { %109 = vst.msk [vmem:[#allocation2 + $0x288] sm:$0xff] %vm26_vm1, %v25795_v1  ;;  %110 = vst.msk [vmem:[#allocation2 + $0x290] sm:$0xff] %vm26_vm1, %v25795_v1 }
  0x1d   :  { %112 = vst.msk [vmem:[#allocation2 + $0x2a0] sm:$0xff] %vm26_vm1, %v25795_v1  ;;  %113 = vst.msk [vmem:[#allocation2 + $0x2a8] sm:$0xff] %vm26_vm1, %v25795_v1 }
  0x1e   :  { %115 = vst.msk [vmem:[#allocation2 + $0x2b8] sm:$0xff] %vm26_vm1, %v25795_v1  ;;  %116 = vst.msk [vmem:[#allocation2 + $0x2c0] sm:$0xff] %vm26_vm1, %v25795_v1 }
  0x1f   :  { %118 = vst.msk [vmem:[#allocation2 + $0x2d0] sm:$0xff] %vm26_vm1, %v25795_v1  ;;  %119 = vst.msk [vmem:[#allocation2 + $0x2d8] sm:$0xff] %vm26_vm1, %v25795_v1 }
  0x20   :  { %121 = vst.msk [vmem:[#allocation2 + $0x2e8] sm:$0xff] %vm26_vm1, %v25795_v1  ;;  %122 = vst.msk [vmem:[#allocation2 + $0x2f0] sm:$0xff] %vm26_vm1, %v25795_v1 }
  0x21   :  { %124 = vst.msk [vmem:[#allocation2 + $0x300] sm:$0xff] %vm26_vm1, %v25795_v1  ;;  %125 = vst.msk [vmem:[#allocation2 + $0x308] sm:$0xff] %vm26_vm1, %v25795_v1 }
  0x22   :  { %127 = vst.msk [vmem:[#allocation2 + $0x318] sm:$0xff] %vm26_vm1, %v25795_v1  ;;  %128 = vst.msk [vmem:[#allocation2 + $0x320] sm:$0xff] %vm26_vm1, %v25795_v1 }
  0x23   :  { %130 = vst.msk [vmem:[#allocation2 + $0x330] sm:$0xff] %vm26_vm1, %v25795_v1  ;;  %131 = vst.msk [vmem:[#allocation2 + $0x338] sm:$0xff] %vm26_vm1, %v25795_v1 }
  0x24   :  { %133 = vst.msk [vmem:[#allocation2 + $0x348] sm:$0xff] %vm26_vm1, %v25795_v1  ;;  %134 = vst.msk [vmem:[#allocation2 + $0x350] sm:$0xff] %vm26_vm1, %v25795_v1 }
  0x25   :  { %30 = vst.msk [vmem:[#allocation2 + $0x10] sm:$0x3] %vm29_vm2, %v25795_v1  ;;  %33 = vst.msk [vmem:[#allocation2 + $0x28] sm:$0x3] %vm29_vm2, %v25795_v1 }
  0x26   :  { %36 = vst.msk [vmem:[#allocation2 + $0x40] sm:$0x3] %vm29_vm2, %v25795_v1  ;;  %39 = vst.msk [vmem:[#allocation2 + $0x58] sm:$0x3] %vm29_vm2, %v25795_v1 }
  0x27   :  { %42 = vst.msk [vmem:[#allocation2 + $0x70] sm:$0x3] %vm29_vm2, %v25795_v1  ;;  %45 = vst.msk [vmem:[#allocation2 + $0x88] sm:$0x3] %vm29_vm2, %v25795_v1 }
  0x28   :  { %48 = vst.msk [vmem:[#allocation2 + $0xa0] sm:$0x3] %vm29_vm2, %v25795_v1  ;;  %51 = vst.msk [vmem:[#allocation2 + $0xb8] sm:$0x3] %vm29_vm2, %v25795_v1 }
  0x29   :  { %54 = vst.msk [vmem:[#allocation2 + $0xd0] sm:$0x3] %vm29_vm2, %v25795_v1  ;;  %57 = vst.msk [vmem:[#allocation2 + $0xe8] sm:$0x3] %vm29_vm2, %v25795_v1 }
  0x2a   :  { %60 = vst.msk [vmem:[#allocation2 + $0x100] sm:$0x3] %vm29_vm2, %v25795_v1  ;;  %63 = vst.msk [vmem:[#allocation2 + $0x118] sm:$0x3] %vm29_vm2, %v25795_v1 }
  0x2b   :  { %66 = vst.msk [vmem:[#allocation2 + $0x130] sm:$0x3] %vm29_vm2, %v25795_v1  ;;  %69 = vst.msk [vmem:[#allocation2 + $0x148] sm:$0x3] %vm29_vm2, %v25795_v1 }
  0x2c   :  { %72 = vst.msk [vmem:[#allocation2 + $0x160] sm:$0x3] %vm29_vm2, %v25795_v1  ;;  %75 = vst.msk [vmem:[#allocation2 + $0x178] sm:$0x3] %vm29_vm2, %v25795_v1  ;;  %v331_v23 = vld [vmem:[#allocation2 + $0x9] sm:$0xff] }
  0x2d   :  { %78 = vst.msk [vmem:[#allocation2 + $0x190] sm:$0x3] %vm29_vm2, %v25795_v1  ;;  %81 = vst.msk [vmem:[#allocation2 + $0x1a8] sm:$0x3] %vm29_vm2, %v25795_v1  ;;  %16568 = vmatmul.mubr.msk.f32.vlgmr.msra.gmra.mrb[0].mxu0 %vm26_vm1, %v331_v23 }
  0x2e   :  { %84 = vst.msk [vmem:[#allocation2 + $0x1c0] sm:$0x3] %vm29_vm2, %v25795_v1  ;;  %87 = vst.msk [vmem:[#allocation2 + $0x1d8] sm:$0x3] %vm29_vm2, %v25795_v1  ;;  %16664 = vmatpush3.msk.msra.mxu0 %vm588_vm0, %v19551_v2  ;;  %v185_v2 = vld [vmem:[%s25788_s0 + $0x188] sm:$0xff] }
  0x2f   :  { %90 = vst.msk [vmem:[#allocation2 + $0x1f0] sm:$0x3] %vm29_vm2, %v25795_v1  ;;  %93 = vst.msk [vmem:[#allocation2 + $0x208] sm:$0x3] %vm29_vm2, %v25795_v1 }
  0x30   :  { %96 = vst.msk [vmem:[#allocation2 + $0x220] sm:$0x3] %vm29_vm2, %v25795_v1  ;;  %99 = vst.msk [vmem:[#allocation2 + $0x238] sm:$0x3] %vm29_vm2, %v25795_v1 }
  0x31   :  { %102 = vst.msk [vmem:[#allocation2 + $0x250] sm:$0x3] %vm29_vm2, %v25795_v1  ;;  %105 = vst.msk [vmem:[#allocation2 + $0x268] sm:$0x3] %vm29_vm2, %v25795_v1 }
  0x32   :  { %108 = vst.msk [vmem:[#allocation2 + $0x280] sm:$0x3] %vm29_vm2, %v25795_v1  ;;  %111 = vst.msk [vmem:[#allocation2 + $0x298] sm:$0x3] %vm29_vm2, %v25795_v1 }
  0x33   :  { %114 = vst.msk [vmem:[#allocation2 + $0x2b0] sm:$0x3] %vm29_vm2, %v25795_v1  ;;  %117 = vst.msk [vmem:[#allocation2 + $0x2c8] sm:$0x3] %vm29_vm2, %v25795_v1 }
  0x34   :  { %120 = vst.msk [vmem:[#allocation2 + $0x2e0] sm:$0x3] %vm29_vm2, %v25795_v1  ;;  %123 = vst.msk [vmem:[#allocation2 + $0x2f8] sm:$0x3] %vm29_vm2, %v25795_v1 }
  0x35   :  { %126 = vst.msk [vmem:[#allocation2 + $0x310] sm:$0x3] %vm29_vm2, %v25795_v1  ;;  %129 = vst.msk [vmem:[#allocation2 + $0x328] sm:$0x3] %vm29_vm2, %v25795_v1 }
  0x36   :  { %132 = vst.msk [vmem:[#allocation2 + $0x340] sm:$0x3] %vm29_vm2, %v25795_v1  ;;  %135 = vst.msk [vmem:[#allocation2 + $0x358] sm:$0x3] %vm29_vm2, %v25795_v1 }
  0x37   :  { %201 = vst.msk [vmem:[#allocation2 + $0x19] sm:$0xff] %vm26_vm1, %v136_v3  ;;  %202 = vst.msk [vmem:[#allocation2 + $0x21] sm:$0xff] %vm26_vm1, %v137_v4  ;;  %v186_v3 = vld [vmem:[%s25788_s0 + $0x190] sm:$0xff]  ;;  %v187_v4 = vld [vmem:[%s25788_s0 + $0x198] sm:$0xff] }
  0x38   :  { %203 = vst.msk [vmem:[#allocation2 + $0x31] sm:$0xff] %vm26_vm1, %v138_v5  ;;  %204 = vst.msk [vmem:[#allocation2 + $0x39] sm:$0xff] %vm26_vm1, %v139_v6  ;;  %v188_v5 = vld [vmem:[%s25788_s0 + $0x1a0] sm:$0xff]  ;;  %v189_v6 = vld [vmem:[%s25788_s0 + $0x1a8] sm:$0xff] }
  0x39   :  { %205 = vst.msk [vmem:[#allocation2 + $0x49] sm:$0xff] %vm26_vm1, %v140_v7  ;;  %206 = vst.msk [vmem:[#allocation2 + $0x51] sm:$0xff] %vm26_vm1, %v141_v8  ;;  %v190_v8 = vld [vmem:[%s25788_s0 + $0x1b0] sm:$0xff] }
  0x3a   :  { %207 = vst.msk [vmem:[#allocation2 + $0x61] sm:$0xff] %vm26_vm1, %v142_v9  ;;  %208 = vst.msk [vmem:[#allocation2 + $0x69] sm:$0xff] %vm26_vm1, %v143_v10  ;;  %v191_v9 = vld [vmem:[%s25788_s0 + $0x1b8] sm:$0xff] }
  0x3b   :  { %209 = vst.msk [vmem:[#allocation2 + $0x79] sm:$0xff] %vm26_vm1, %v144_v11  ;;  %210 = vst.msk [vmem:[#allocation2 + $0x81] sm:$0xff] %vm26_vm1, %v145_v12  ;;  %v192_v11 = vld [vmem:[%s25788_s0 + $0x1c0] sm:$0xff]  ;;  %v193_v12 = vld [vmem:[%s25788_s0 + $0x1c8] sm:$0xff] }
  0x3c   :  { %211 = vst.msk [vmem:[#allocation2 + $0x91] sm:$0xff] %vm26_vm1, %v146_v13  ;;  %212 = vst.msk [vmem:[#allocation2 + $0x99] sm:$0xff] %vm26_vm1, %v147_v14  ;;  %v194_v13 = vld [vmem:[%s25788_s0 + $0x1d0] sm:$0xff]  ;;  %v195_v14 = vld [vmem:[%s25788_s0 + $0x1d8] sm:$0xff] }
  0x3d   :  { %213 = vst.msk [vmem:[#allocation2 + $0xa9] sm:$0xff] %vm26_vm1, %v148_v15  ;;  %214 = vst.msk [vmem:[#allocation2 + $0xb1] sm:$0xff] %vm26_vm1, %v149_v16  ;;  %v196_v15 = vld [vmem:[%s25788_s0 + $0x1e0] sm:$0xff]  ;;  %v197_v16 = vld [vmem:[%s25788_s0 + $0x1e8] sm:$0xff] }
  0x3e   :  { %215 = vst.msk [vmem:[#allocation2 + $0xc1] sm:$0xff] %vm26_vm1, %v150_v17  ;;  %216 = vst.msk [vmem:[#allocation2 + $0xc9] sm:$0xff] %vm26_vm1, %v151_v18  ;;  %v332_v25 = vld [vmem:[#allocation2 + $0x19] sm:$0xff]  ;;  %v333_v28 = vld [vmem:[#allocation2 + $0x21] sm:$0xff] }
  0x3f   :  { %217 = vst.msk [vmem:[#allocation2 + $0xd9] sm:$0xff] %vm26_vm1, %v152_v19  ;;  %218 = vst.msk [vmem:[#allocation2 + $0xe1] sm:$0xff] %vm26_vm1, %v153_v20  ;;  %16570 = vmatprep.mubr.msk.f32.mxu0 %vm26_vm1, %v332_v25  ;;  %v334_v29 = vld [vmem:[#allocation2 + $0x31] sm:$0xff]  ;;  %v335_v30 = vld [vmem:[#allocation2 + $0x39] sm:$0xff] }
  0x40   :  { %219 = vst.msk [vmem:[#allocation2 + $0xf1] sm:$0xff] %vm26_vm1, %v154_v21  ;;  %220 = vst.msk [vmem:[#allocation2 + $0xf9] sm:$0xff] %vm26_vm1, %v155_v24  ;;  %16571 = vmatmul.mubr.msk.f32.gmra.mrb[2].mxu0 %vm26_vm1, %v333_v28  ;;  %v336_v31 = vld [vmem:[#allocation2 + $0x49] sm:$0xff]  ;;  %v337_v38 = vld [vmem:[#allocation2 + $0x51] sm:$0xff] }
  0x41   :  { %221 = vst.msk [vmem:[#allocation2 + $0x109] sm:$0xff] %vm26_vm1, %v156_v26  ;;  %222 = vst.msk [vmem:[#allocation2 + $0x111] sm:$0xff] %vm26_vm1, %v157_v27  ;;  %16573 = vmatprep.mubr.msk.f32.mxu0 %vm26_vm1, %v334_v29  ;;  %v338_v41 = vld [vmem:[#allocation2 + $0x61] sm:$0xff]  ;;  %v339_v44 = vld [vmem:[#allocation2 + $0x69] sm:$0xff] }
  0x42   :  { %223 = vst.msk [vmem:[#allocation2 + $0x121] sm:$0xff] %vm26_vm1, %v158_v32  ;;  %224 = vst.msk [vmem:[#allocation2 + $0x129] sm:$0xff] %vm26_vm1, %v159_v33  ;;  %v340_v54 = vld [vmem:[#allocation2 + $0x79] sm:$0xff]  ;;  %v341_v58 = vld [vmem:[#allocation2 + $0x81] sm:$0xff] }
  0x43   :  { %225 = vst.msk [vmem:[#allocation2 + $0x139] sm:$0xff] %vm26_vm1, %v160_v34  ;;  %226 = vst.msk [vmem:[#allocation2 + $0x141] sm:$0xff] %vm26_vm1, %v161_v35  ;;  %v342_v60 = vld [vmem:[#allocation2 + $0x91] sm:$0xff]  ;;  %v343_v62 = vld [vmem:[#allocation2 + $0x99] sm:$0xff] }
  0x44   :  { %16574 = vmatmul.mubr.msk.f32.gmra.mrb[4].mxu0 %vm26_vm1, %v335_v30  ;;  %227 = vst.msk [vmem:[#allocation2 + $0x151] sm:$0xff] %vm26_vm1, %v162_v36  ;;  %228 = vst.msk [vmem:[#allocation2 + $0x159] sm:$0xff] %vm26_vm1, %v163_v37  ;;  %v344_v63 = vld [vmem:[#allocation2 + $0xa9] sm:$0xff]  ;;  %v345_v7 = vld [vmem:[#allocation2 + $0xb1] sm:$0xff] }
  0x45   :  { %16576 = vmatprep.mubr.msk.f32.mxu0 %vm26_vm1, %v336_v31  ;;  %229 = vst.msk [vmem:[#allocation2 + $0x169] sm:$0xff] %vm26_vm1, %v164_v39  ;;  %230 = vst.msk [vmem:[#allocation2 + $0x171] sm:$0xff] %vm26_vm1, %v165_v40  ;;  %v346_v10 = vld [vmem:[#allocation2 + $0xc1] sm:$0xff]  ;;  %v347_v18 = vld [vmem:[#allocation2 + $0xc9] sm:$0xff] }
  0x46   :  { %233 = vst.msk [vmem:[#allocation2 + $0x1c9] sm:$0xff] %vm26_vm1, %v168_v42  ;;  %234 = vst.msk [vmem:[#allocation2 + $0x1d1] sm:$0xff] %vm26_vm1, %v169_v43  ;;  %v19891_v17 = vld [vmem:[%s25787_s1 + $0x8] sm:$0xf]  ;;  %v348_v19 = vld [vmem:[#allocation2 + $0xd9] sm:$0xff] }
  0x47   :  { %235 = vst.msk [vmem:[#allocation2 + $0x1e1] sm:$0xff] %vm26_vm1, %v170_v45  ;;  %236 = vst.msk [vmem:[#allocation2 + $0x1e9] sm:$0xff] %vm26_vm1, %v171_v46  ;;  %16761 = vmatprep.subr.msk.mxu0 %vm588_vm0, %v19891_v17  ;;  %v349_v20 = vld [vmem:[#allocation2 + $0xe1] sm:$0xff]  ;;  %v350_v21 = vld [vmem:[#allocation2 + $0xf1] sm:$0xff] }
  0x48   :  { %16577 = vmatmul.mubr.msk.f32.gmra.mrb[6].mxu0 %vm26_vm1, %v337_v38  ;;  %237 = vst.msk [vmem:[#allocation2 + $0x1f9] sm:$0xff] %vm26_vm1, %v172_v47  ;;  %238 = vst.msk [vmem:[#allocation2 + $0x201] sm:$0xff] %vm26_vm1, %v173_v48  ;;  %v351_v22 = vld [vmem:[#allocation2 + $0xf9] sm:$0xff]  ;;  %v352_v23 = vld [vmem:[#allocation2 + $0x109] sm:$0xff] }
  0x49   :  { %16579 = vmatprep.mubr.msk.f32.mxu0 %vm26_vm1, %v338_v41  ;;  %239 = vst.msk [vmem:[#allocation2 + $0x211] sm:$0xff] %vm26_vm1, %v174_v49  ;;  %240 = vst.msk [vmem:[#allocation2 + $0x219] sm:$0xff] %vm26_vm1, %v175_v50  ;;  %v353_v24 = vld [vmem:[#allocation2 + $0x111] sm:$0xff]  ;;  %v354_v25 = vld [vmem:[#allocation2 + $0x121] sm:$0xff] }
  0x4a   :  { %241 = vst.msk [vmem:[#allocation2 + $0x229] sm:$0xff] %vm26_vm1, %v176_v51  ;;  %242 = vst.msk [vmem:[#allocation2 + $0x231] sm:$0xff] %vm26_vm1, %v177_v52  ;;  %v355_v26 = vld [vmem:[#allocation2 + $0x129] sm:$0xff]  ;;  %v356_v27 = vld [vmem:[#allocation2 + $0x139] sm:$0xff] }
  0x4b   :  { %243 = vst.msk [vmem:[#allocation2 + $0x241] sm:$0xff] %vm26_vm1, %v178_v53  ;;  %244 = vst.msk [vmem:[#allocation2 + $0x249] sm:$0xff] %vm26_vm1, %v179_v55  ;;  %v357_v28 = vld [vmem:[#allocation2 + $0x141] sm:$0xff]  ;;  %v358_v29 = vld [vmem:[#allocation2 + $0x151] sm:$0xff] }
  0x4c   :  { %16580 = vmatmul.mubr.msk.f32.gmra.mrb[8].mxu0 %vm26_vm1, %v339_v44  ;;  %245 = vst.msk [vmem:[#allocation2 + $0x259] sm:$0xff] %vm26_vm1, %v180_v56  ;;  %246 = vst.msk [vmem:[#allocation2 + $0x261] sm:$0xff] %vm26_vm1, %v181_v57  ;;  %v359_v30 = vld [vmem:[#allocation2 + $0x159] sm:$0xff]  ;;  %v360_v31 = vld [vmem:[#allocation2 + $0x169] sm:$0xff] }
  0x4d   :  { %16582 = vmatprep.mubr.msk.f32.mxu0 %vm26_vm1, %v340_v54  ;;  %247 = vst.msk [vmem:[#allocation2 + $0x271] sm:$0xff] %vm26_vm1, %v182_v59  ;;  %248 = vst.msk [vmem:[#allocation2 + $0x279] sm:$0xff] %vm26_vm1, %v183_v61  ;;  %v361_v32 = vld [vmem:[#allocation2 + $0x171] sm:$0xff]  ;;  %v363_v34 = vld [vmem:[#allocation2 + $0x1b9] sm:$0xff] }
  0x4e   :  { %249 = vst.msk [vmem:[#allocation2 + $0x289] sm:$0xff] %vm26_vm1, %v184_v0  ;;  %250 = vst.msk [vmem:[#allocation2 + $0x291] sm:$0xff] %vm26_vm1, %v185_v2  ;;  %v362_v33 = vld [vmem:[#allocation2 + $0x1b1] sm:$0xff]  ;;  %v364_v35 = vld [vmem:[#allocation2 + $0x1c9] sm:$0xff] }
  0x4f   :  { %251 = vst.msk [vmem:[#allocation2 + $0x2a1] sm:$0xff] %vm26_vm1, %v186_v3  ;;  %252 = vst.msk [vmem:[#allocation2 + $0x2a9] sm:$0xff] %vm26_vm1, %v187_v4  ;;  %v365_v36 = vld [vmem:[#allocation2 + $0x1d1] sm:$0xff]  ;;  %v366_v37 = vld [vmem:[#allocation2 + $0x1e1] sm:$0xff] }
  0x50   :  { %16583 = vmatmul.mubr.msk.f32.gmra.mrb[10].mxu0 %vm26_vm1, %v341_v58  ;;  %253 = vst.msk [vmem:[#allocation2 + $0x2b9] sm:$0xff] %vm26_vm1, %v188_v5  ;;  %254 = vst.msk [vmem:[#allocation2 + $0x2c1] sm:$0xff] %vm26_vm1, %v189_v6  ;;  %v367_v38 = vld [vmem:[#allocation2 + $0x1e9] sm:$0xff]  ;;  %v368_v39 = vld [vmem:[#allocation2 + $0x1f9] sm:$0xff] }
  0x51   :  { %16585 = vmatprep.mubr.msk.f32.mxu0 %vm26_vm1, %v342_v60  ;;  %255 = vst.msk [vmem:[#allocation2 + $0x2d1] sm:$0xff] %vm26_vm1, %v190_v8  ;;  %256 = vst.msk [vmem:[#allocation2 + $0x2d9] sm:$0xff] %vm26_vm1, %v191_v9  ;;  %v369_v40 = vld [vmem:[#allocation2 + $0x201] sm:$0xff]  ;;  %v370_v41 = vld [vmem:[#allocation2 + $0x211] sm:$0xff] }
  0x52   :  { %257 = vst.msk [vmem:[#allocation2 + $0x2e9] sm:$0xff] %vm26_vm1, %v192_v11  ;;  %258 = vst.msk [vmem:[#allocation2 + $0x2f1] sm:$0xff] %vm26_vm1, %v193_v12  ;;  %v371_v42 = vld [vmem:[#allocation2 + $0x219] sm:$0xff]  ;;  %v372_v43 = vld [vmem:[#allocation2 + $0x229] sm:$0xff] }
  0x53   :  { %259 = vst.msk [vmem:[#allocation2 + $0x301] sm:$0xff] %vm26_vm1, %v194_v13  ;;  %260 = vst.msk [vmem:[#allocation2 + $0x309] sm:$0xff] %vm26_vm1, %v195_v14  ;;  %v373_v44 = vld [vmem:[#allocation2 + $0x231] sm:$0xff]  ;;  %v374_v45 = vld [vmem:[#allocation2 + $0x241] sm:$0xff] }
  0x54   :  { %16586 = vmatmul.mubr.msk.f32.gmra.mrb[12].mxu0 %vm26_vm1, %v343_v62  ;;  %261 = vst.msk [vmem:[#allocation2 + $0x319] sm:$0xff] %vm26_vm1, %v196_v15  ;;  %262 = vst.msk [vmem:[#allocation2 + $0x321] sm:$0xff] %vm26_vm1, %v197_v16  ;;  %v375_v46 = vld [vmem:[#allocation2 + $0x249] sm:$0xff]  ;;  %v376_v47 = vld [vmem:[#allocation2 + $0x259] sm:$0xff] }
  0x55   :  { %16588 = vmatprep.mubr.msk.f32.mxu0 %vm26_vm1, %v344_v63  ;;  %v377_v48 = vld [vmem:[#allocation2 + $0x261] sm:$0xff]  ;;  %v378_v49 = vld [vmem:[#allocation2 + $0x271] sm:$0xff]  ;;  %v379_v50 = vld [vmem:[#allocation2 + $0x279] sm:$0xff] }
  0x56   :  { %v380_v51 = vld [vmem:[#allocation2 + $0x289] sm:$0xff]  ;;  %v381_v52 = vld [vmem:[#allocation2 + $0x291] sm:$0xff]  ;;  %v382_v53 = vld [vmem:[#allocation2 + $0x2a1] sm:$0xff] }
  0x57   :  { %v383_v54 = vld [vmem:[#allocation2 + $0x2a9] sm:$0xff]  ;;  %v384_v55 = vld [vmem:[#allocation2 + $0x2b9] sm:$0xff]  ;;  %v385_v56 = vld [vmem:[#allocation2 + $0x2c1] sm:$0xff] }
  0x58   :  { %16589 = vmatmul.mubr.msk.f32.gmra.mrb[14].mxu0 %vm26_vm1, %v345_v7  ;;  %v386_v57 = vld [vmem:[#allocation2 + $0x2d1] sm:$0xff]  ;;  %v387_v58 = vld [vmem:[#allocation2 + $0x2d9] sm:$0xff]  ;;  %v266_v3 = vld [vmem:[#allocation2 + $0x8] sm:$0xff] }
  0x59   :  { %16591 = vmatprep.mubr.msk.f32.mxu0 %vm26_vm1, %v346_v10  ;;  %v388_v59 = vld [vmem:[#allocation2 + $0x2e9] sm:$0xff]  ;;  %v389_v60 = vld [vmem:[#allocation2 + $0x2f1] sm:$0xff]  ;;  %v265_v2 = vld [vmem:[#allocation2] sm:$0xff] }
  0x5a   :  { %v390_v61 = vld [vmem:[#allocation2 + $0x301] sm:$0xff]  ;;  %v391_v62 = vld [vmem:[#allocation2 + $0x309] sm:$0xff]  ;;  %v19945_v4 = vld [vmem:[#allocation2 + $0x18] sm:$0xff] }
  0x5b   :  { %v392_v63 = vld [vmem:[#allocation2 + $0x319] sm:$0xff]  ;;  %v393_v0 = vld [vmem:[#allocation2 + $0x321] sm:$0xff]  ;;  %v19950_v5 = vld [vmem:[%s25787_s1 + $0xc] sm:$0xf] }
  0x5c   :  { %16592 = vmatmul.mubr.msk.f32.gmra.mrb[16].mxu0 %vm26_vm1, %v347_v18  ;;  %v19957_v6 = vld [vmem:[#allocation2 + $0x20] sm:$0xff]  ;;  %v19959_v7 = vld [vmem:[#allocation2 + $0x30] sm:$0xff]  ;;  %v19967_v8 = vld [vmem:[#allocation2 + $0x38] sm:$0xff] }
  0x5d   :  { %16594 = vmatprep.mubr.msk.f32.mxu0 %vm26_vm1, %v348_v19  ;;  %v19969_v9 = vld [vmem:[#allocation2 + $0x48] sm:$0xff]  ;;  %v19975_v10 = vld [vmem:[#allocation2 + $0x50] sm:$0xff]  ;;  %v19977_v11 = vld [vmem:[#allocation2 + $0x60] sm:$0xff] }
  0x5e   :  { %v19983_v12 = vld [vmem:[#allocation2 + $0x68] sm:$0xff]  ;;  %v19985_v13 = vld [vmem:[#allocation2 + $0x78] sm:$0xff]  ;;  %v19991_v14 = vld [vmem:[#allocation2 + $0x80] sm:$0xff] }
  0x5f   :  { %v19993_v15 = vld [vmem:[#allocation2 + $0x90] sm:$0xff]  ;;  %v19999_v16 = vld [vmem:[#allocation2 + $0x98] sm:$0xff]  ;;  %v20009_v19 = vld [vmem:[#allocation2 + $0xc0] sm:$0xff] }
  0x60   :  { %16595 = vmatmul.mubr.msk.f32.gmra.mrb[18].mxu0 %vm26_vm1, %v349_v20  ;;  %v20007_v18 = vld [vmem:[#allocation2 + $0xb0] sm:$0xff]  ;;  %v20015_v20 = vld [vmem:[#allocation2 + $0xc8] sm:$0xff]  ;;  %v20198_v1 = vld [vmem:[#allocation2 + $0x1a] sm:$0xff] }
  0x61   :  { %16597 = vmatprep.mubr.msk.f32.mxu0 %vm26_vm1, %v350_v21  ;;  %v20017_v21 = vld [vmem:[#allocation2 + $0xd8] sm:$0xff]  ;;  %26022 = vst [vmem:[#allocation8_spill] sm:$0xff] %v20198_v1 }
  0x64   :  { %16598 = vmatmul.mubr.msk.f32.gmra.mrb[20].mxu0 %vm26_vm1, %v351_v22  ;;  %v20023_v22 = vld [vmem:[#allocation2 + $0xe0] sm:$0xff] }
  0x65   :  { %16600 = vmatprep.mubr.msk.f32.mxu0 %vm26_vm1, %v352_v23  ;;  %v20025_v23 = vld [vmem:[#allocation2 + $0xf0] sm:$0xff] }
  0x68   :  { %16601 = vmatmul.mubr.msk.f32.gmra.mrb[22].mxu0 %vm26_vm1, %v353_v24  ;;  %v20031_v24 = vld [vmem:[#allocation2 + $0xf8] sm:$0xff] }
  0x69   :  { %16603 = vmatprep.mubr.msk.f32.mxu0 %vm26_vm1, %v354_v25  ;;  %v20033_v25 = vld [vmem:[#allocation2 + $0x108] sm:$0xff] }
  0x6c   :  { %16604 = vmatmul.mubr.msk.f32.gmra.mrb[24].mxu0 %vm26_vm1, %v355_v26  ;;  %v20039_v26 = vld [vmem:[#allocation2 + $0x110] sm:$0xff] }
  0x6d   :  { %16606 = vmatprep.mubr.msk.f32.mxu0 %vm26_vm1, %v356_v27  ;;  %v20041_v27 = vld [vmem:[#allocation2 + $0x120] sm:$0xff] }
  0x70   :  { %16607 = vmatmul.mubr.msk.f32.gmra.mrb[26].mxu0 %vm26_vm1, %v357_v28  ;;  %v20047_v28 = vld [vmem:[#allocation2 + $0x128] sm:$0xff] }
  0x71   :  { %16609 = vmatprep.mubr.msk.f32.mxu0 %vm26_vm1, %v358_v29  ;;  %v20049_v29 = vld [vmem:[#allocation2 + $0x138] sm:$0xff] }
  0x74   :  { %16610 = vmatmul.mubr.msk.f32.gmra.mrb[28].mxu0 %vm26_vm1, %v359_v30  ;;  %v20055_v30 = vld [vmem:[#allocation2 + $0x140] sm:$0xff] }
  0x75   :  { %16612 = vmatprep.mubr.msk.f32.mxu0 %vm26_vm1, %v360_v31  ;;  %v20057_v31 = vld [vmem:[#allocation2 + $0x150] sm:$0xff] }
  0x78   :  { %16613 = vmatmul.mubr.msk.f32.gmra.mrb[30].mxu0 %vm26_vm1, %v361_v32  ;;  %v20063_v32 = vld [vmem:[#allocation2 + $0x158] sm:$0xff] }
  0x79   :  { %16615 = vmatprep.mubr.msk.f32.mxu0 %vm26_vm1, %v362_v33  ;;  %v20065_v33 = vld [vmem:[#allocation2 + $0x168] sm:$0xff] }
  0x7c   :  { %16616 = vmatmul.mubr.msk.f32.gmra.mrb[32].mxu0 %vm26_vm1, %v363_v34  ;;  %v20071_v34 = vld [vmem:[#allocation2 + $0x170] sm:$0xff] }
  0x7d   :  { %16618 = vmatprep.mubr.msk.f32.mxu0 %vm26_vm1, %v364_v35  ;;  %v297_v35 = vld [vmem:[#allocation2 + $0x1b0] sm:$0xff] }
  0x80   :  { %16619 = vmatmul.mubr.msk.f32.gmra.mrb[34].mxu0 %vm26_vm1, %v365_v36  ;;  %v298_v36 = vld [vmem:[#allocation2 + $0x1b8] sm:$0xff] }
  0x81   :  { %16621 = vmatprep.mubr.msk.f32.mxu0 %vm26_vm1, %v366_v37  ;;  %v20076_v37 = vld [vmem:[#allocation2 + $0x1c8] sm:$0xff] }
  0x84   :  { %16622 = vmatmul.mubr.msk.f32.gmra.mrb[36].mxu0 %vm26_vm1, %v367_v38  ;;  %v20081_v38 = vld [vmem:[#allocation2 + $0x1d0] sm:$0xff] }
  0x85   :  { %16624 = vmatprep.mubr.msk.f32.mxu0 %vm26_vm1, %v368_v39  ;;  %v20083_v39 = vld [vmem:[#allocation2 + $0x1e0] sm:$0xff] }
  0x88   :  { %16625 = vmatmul.mubr.msk.f32.gmra.mrb[38].mxu0 %vm26_vm1, %v369_v40  ;;  %v20089_v40 = vld [vmem:[#allocation2 + $0x1e8] sm:$0xff] }
  0x89   :  { %16627 = vmatprep.mubr.msk.f32.mxu0 %vm26_vm1, %v370_v41  ;;  %v20091_v41 = vld [vmem:[#allocation2 + $0x1f8] sm:$0xff] }
  0x8c   :  { %16628 = vmatmul.mubr.msk.f32.gmra.mrb[40].mxu0 %vm26_vm1, %v371_v42  ;;  %v20097_v42 = vld [vmem:[#allocation2 + $0x200] sm:$0xff] }
  0x8d   :  { %16630 = vmatprep.mubr.msk.f32.mxu0 %vm26_vm1, %v372_v43  ;;  %v20099_v43 = vld [vmem:[#allocation2 + $0x210] sm:$0xff] }
  0x90   :  { %16631 = vmatmul.mubr.msk.f32.gmra.mrb[42].mxu0 %vm26_vm1, %v373_v44  ;;  %v20105_v44 = vld [vmem:[#allocation2 + $0x218] sm:$0xff] }
  0x91   :  { %16633 = vmatprep.mubr.msk.f32.mxu0 %vm26_vm1, %v374_v45  ;;  %v20107_v45 = vld [vmem:[#allocation2 + $0x228] sm:$0xff] }
  0x94   :  { %16634 = vmatmul.mubr.msk.f32.gmra.mrb[44].mxu0 %vm26_vm1, %v375_v46  ;;  %v20113_v46 = vld [vmem:[#allocation2 + $0x230] sm:$0xff] }
  0x95   :  { %16636 = vmatprep.mubr.msk.f32.mxu0 %vm26_vm1, %v376_v47  ;;  %v20115_v47 = vld [vmem:[#allocation2 + $0x240] sm:$0xff] }
  0x98   :  { %16637 = vmatmul.mubr.msk.f32.gmra.mrb[46].mxu0 %vm26_vm1, %v377_v48  ;;  %v20121_v48 = vld [vmem:[#allocation2 + $0x248] sm:$0xff] }
  0x99   :  { %16639 = vmatprep.mubr.msk.f32.mxu0 %vm26_vm1, %v378_v49  ;;  %v20123_v49 = vld [vmem:[#allocation2 + $0x258] sm:$0xff] }
  0x9c   :  { %16640 = vmatmul.mubr.msk.f32.gmra.mrb[48].mxu0 %vm26_vm1, %v379_v50  ;;  %v20129_v50 = vld [vmem:[#allocation2 + $0x260] sm:$0xff] }
  0x9d   :  { %16642 = vmatprep.mubr.msk.f32.mxu0 %vm26_vm1, %v380_v51  ;;  %v20131_v51 = vld [vmem:[#allocation2 + $0x270] sm:$0xff] }
  0xa0   :  { %16643 = vmatmul.mubr.msk.f32.gmra.mrb[50].mxu0 %vm26_vm1, %v381_v52  ;;  %v20137_v52 = vld [vmem:[#allocation2 + $0x278] sm:$0xff] }
  0xa1   :  { %16645 = vmatprep.mubr.msk.f32.mxu0 %vm26_vm1, %v382_v53  ;;  %v20139_v53 = vld [vmem:[#allocation2 + $0x288] sm:$0xff] }
  0xa4   :  { %16646 = vmatmul.mubr.msk.f32.gmra.mrb[52].mxu0 %vm26_vm1, %v383_v54  ;;  %v20145_v54 = vld [vmem:[#allocation2 + $0x290] sm:$0xff] }
  0xa5   :  { %16648 = vmatprep.mubr.msk.f32.mxu0 %vm26_vm1, %v384_v55  ;;  %v20147_v55 = vld [vmem:[#allocation2 + $0x2a0] sm:$0xff] }
  0xa8   :  { %16649 = vmatmul.mubr.msk.f32.gmra.mrb[54].mxu0 %vm26_vm1, %v385_v56  ;;  %v20153_v56 = vld [vmem:[#allocation2 + $0x2a8] sm:$0xff] }
  0xa9   :  { %16651 = vmatprep.mubr.msk.f32.mxu0 %vm26_vm1, %v386_v57  ;;  %v20155_v57 = vld [vmem:[#allocation2 + $0x2b8] sm:$0xff] }
  0xac   :  { %16652 = vmatmul.mubr.msk.f32.gmra.mrb[56].mxu0 %vm26_vm1, %v387_v58  ;;  %v20161_v58 = vld [vmem:[#allocation2 + $0x2c0] sm:$0xff] }
  0xad   :  { %16654 = vmatprep.mubr.msk.f32.mxu0 %vm26_vm1, %v388_v59  ;;  %v20163_v59 = vld [vmem:[#allocation2 + $0x2d0] sm:$0xff] }
  0xb0   :  { %16655 = vmatmul.mubr.msk.f32.gmra.mrb[58].mxu0 %vm26_vm1, %v389_v60  ;;  %v20169_v60 = vld [vmem:[#allocation2 + $0x2d8] sm:$0xff] }
  0xb1   :  { %16657 = vmatprep.mubr.msk.f32.mxu0 %vm26_vm1, %v390_v61  ;;  %v20171_v61 = vld [vmem:[#allocation2 + $0x2e8] sm:$0xff] }
  0xb4   :  { %16658 = vmatmul.mubr.msk.f32.gmra.mrb[60].mxu0 %vm26_vm1, %v391_v62  ;;  %v20177_v62 = vld [vmem:[#allocation2 + $0x2f0] sm:$0xff] }
  0xb5   :  { %16660 = vmatprep.mubr.msk.f32.mxu0 %vm26_vm1, %v392_v63  ;;  %v20179_v63 = vld [vmem:[#allocation2 + $0x300] sm:$0xff] }
  0xb6   :  { %26018 = vst [vmem:[#allocation4_spill] sm:$0xff] %v20179_v63 }
  0xb8   :  { %16661 = vmatmul.mubr.msk.f32.gmra.mrb[62].mxu0 %vm26_vm1, %v393_v0  ;;  %v20185_v0 = vld [vmem:[#allocation2 + $0x308] sm:$0xff] }
  0xb9   :  { %16665 = vmatprep.mubr.msk.f32.mxu0 %vm26_vm1, %v265_v2  ;;  %26019 = vst [vmem:[#allocation5_spill] sm:$0xff] %v20185_v0  ;;  %v20187_v2 = vld [vmem:[#allocation2 + $0x318] sm:$0xff] }
  0xba   :  { %26020 = vst [vmem:[#allocation6_spill] sm:$0xff] %v20187_v2 }
  0xbc   :  { %16666 = vmatmul.mubr.msk.f32.vlgmr.msra.gmra.mrb[0].mxu0 %vm26_vm1, %v266_v3  ;;  %v20193_v3 = vld [vmem:[#allocation2 + $0x320] sm:$0xff] }
  0xbd   :  { %16762 = vmatpush3.msk.msra.mxu0 %vm588_vm0, %v19891_v17  ;;  %16668 = vmatprep.mubr.msk.f32.mxu0 %vm26_vm1, %v19945_v4  ;;  %v20001_v17 = vld [vmem:[#allocation2 + $0xa8] sm:$0xff]  ;;  %26021 = vst [vmem:[#allocation7_spill] sm:$0xff] %v20193_v3 }
  0xbe   :  { %16859 = vmatprep.subr.msk.mxu0 %vm588_vm0, %v19950_v5 }
  0xc0   :  { %16669 = vmatmul.mubr.msk.f32.gmra.mrb[2].mxu0 %vm26_vm1, %v19957_v6 }
  0xc1   :  { %16671 = vmatprep.mubr.msk.f32.mxu0 %vm26_vm1, %v19959_v7 }
  0xc4   :  { %16672 = vmatmul.mubr.msk.f32.gmra.mrb[4].mxu0 %vm26_vm1, %v19967_v8 }
  0xc5   :  { %16674 = vmatprep.mubr.msk.f32.mxu0 %vm26_vm1, %v19969_v9 }
  0xc8   :  { %16675 = vmatmul.mubr.msk.f32.gmra.mrb[6].mxu0 %vm26_vm1, %v19975_v10 }
  0xc9   :  { %16677 = vmatprep.mubr.msk.f32.mxu0 %vm26_vm1, %v19977_v11 }
  0xcc   :  { %16678 = vmatmul.mubr.msk.f32.gmra.mrb[8].mxu0 %vm26_vm1, %v19983_v12 }
  0xcd   :  { %16680 = vmatprep.mubr.msk.f32.mxu0 %vm26_vm1, %v19985_v13 }
  0xd0   :  { %16681 = vmatmul.mubr.msk.f32.gmra.mrb[10].mxu0 %vm26_vm1, %v19991_v14 }
  0xd1   :  { %16683 = vmatprep.mubr.msk.f32.mxu0 %vm26_vm1, %v19993_v15 }
  0xd4   :  { %16684 = vmatmul.mubr.msk.f32.gmra.mrb[12].mxu0 %vm26_vm1, %v19999_v16 }
  0xd5   :  { %16686 = vmatprep.mubr.msk.f32.mxu0 %vm26_vm1, %v20001_v17 }
  0xd8   :  { %16687 = vmatmul.mubr.msk.f32.gmra.mrb[14].mxu0 %vm26_vm1, %v20007_v18 }
  0xd9   :  { %16689 = vmatprep.mubr.msk.f32.mxu0 %vm26_vm1, %v20009_v19 }
  0xdc   :  { %16690 = vmatmul.mubr.msk.f32.gmra.mrb[16].mxu0 %vm26_vm1, %v20015_v20 }
  0xdd   :  { %16692 = vmatprep.mubr.msk.f32.mxu0 %vm26_vm1, %v20017_v21 }
  0xe0   :  { %16693 = vmatmul.mubr.msk.f32.gmra.mrb[18].mxu0 %vm26_vm1, %v20023_v22 }
  0xe1   :  { %16695 = vmatprep.mubr.msk.f32.mxu0 %vm26_vm1, %v20025_v23 }
  0xe4   :  { %16696 = vmatmul.mubr.msk.f32.gmra.mrb[20].mxu0 %vm26_vm1, %v20031_v24 }
  0xe5   :  { %16698 = vmatprep.mubr.msk.f32.mxu0 %vm26_vm1, %v20033_v25 }
  0xe8   :  { %16699 = vmatmul.mubr.msk.f32.gmra.mrb[22].mxu0 %vm26_vm1, %v20039_v26 }
  0xe9   :  { %16701 = vmatprep.mubr.msk.f32.mxu0 %vm26_vm1, %v20041_v27 }
  0xec   :  { %16702 = vmatmul.mubr.msk.f32.gmra.mrb[24].mxu0 %vm26_vm1, %v20047_v28 }
  0xed   :  { %16704 = vmatprep.mubr.msk.f32.mxu0 %vm26_vm1, %v20049_v29 }
  0xf0   :  { %16705 = vmatmul.mubr.msk.f32.gmra.mrb[26].mxu0 %vm26_vm1, %v20055_v30 }
  0xf1   :  { %16707 = vmatprep.mubr.msk.f32.mxu0 %vm26_vm1, %v20057_v31 }
  0xf4   :  { %16708 = vmatmul.mubr.msk.f32.gmra.mrb[28].mxu0 %vm26_vm1, %v20063_v32 }
  0xf5   :  { %16710 = vmatprep.mubr.msk.f32.mxu0 %vm26_vm1, %v20065_v33 }
  0xf8   :  { %16711 = vmatmul.mubr.msk.f32.gmra.mrb[30].mxu0 %vm26_vm1, %v20071_v34 }
  0xf9   :  { %16713 = vmatprep.mubr.msk.f32.mxu0 %vm26_vm1, %v297_v35  ;;  %v1557_v35 = vld [vmem:[#allocation2 + $0x2] sm:$0xff] }
  0xfc   :  { %16714 = vmatmul.mubr.msk.f32.gmra.mrb[32].mxu0 %vm26_vm1, %v298_v36  ;;  %v1558_v36 = vld [vmem:[#allocation2 + $0xa] sm:$0xff] }
  0xfd   :  { %16716 = vmatprep.mubr.msk.f32.mxu0 %vm26_vm1, %v20076_v37 }
 0x100   :  { %16717 = vmatmul.mubr.msk.f32.gmra.mrb[34].mxu0 %vm26_vm1, %v20081_v38 }
 0x101   :  { %16719 = vmatprep.mubr.msk.f32.mxu0 %vm26_vm1, %v20083_v39 }
 0x104   :  { %16720 = vmatmul.mubr.msk.f32.gmra.mrb[36].mxu0 %vm26_vm1, %v20089_v40 }
 0x105   :  { %16722 = vmatprep.mubr.msk.f32.mxu0 %vm26_vm1, %v20091_v41 }
 0x108   :  { %16723 = vmatmul.mubr.msk.f32.gmra.mrb[38].mxu0 %vm26_vm1, %v20097_v42 }
 0x109   :  { %16725 = vmatprep.mubr.msk.f32.mxu0 %vm26_vm1, %v20099_v43 }
 0x10c   :  { %16726 = vmatmul.mubr.msk.f32.gmra.mrb[40].mxu0 %vm26_vm1, %v20105_v44 }
 0x10d   :  { %16728 = vmatprep.mubr.msk.f32.mxu0 %vm26_vm1, %v20107_v45 }
 0x110   :  { %16729 = vmatmul.mubr.msk.f32.gmra.mrb[42].mxu0 %vm26_vm1, %v20113_v46 }
 0x111   :  { %16731 = vmatprep.mubr.msk.f32.mxu0 %vm26_vm1, %v20115_v47 }
 0x114   :  { %16732 = vmatmul.mubr.msk.f32.gmra.mrb[44].mxu0 %vm26_vm1, %v20121_v48 }
 0x115   :  { %16734 = vmatprep.mubr.msk.f32.mxu0 %vm26_vm1, %v20123_v49 }
 0x118   :  { %16735 = vmatmul.mubr.msk.f32.gmra.mrb[46].mxu0 %vm26_vm1, %v20129_v50 }
 0x119   :  { %16737 = vmatprep.mubr.msk.f32.mxu0 %vm26_vm1, %v20131_v51 }
 0x11c   :  { %16738 = vmatmul.mubr.msk.f32.gmra.mrb[48].mxu0 %vm26_vm1, %v20137_v52 }
 0x11d   :  { %16740 = vmatprep.mubr.msk.f32.mxu0 %vm26_vm1, %v20139_v53 }
 0x120   :  { %16741 = vmatmul.mubr.msk.f32.gmra.mrb[50].mxu0 %vm26_vm1, %v20145_v54 }
 0x121   :  { %16743 = vmatprep.mubr.msk.f32.mxu0 %vm26_vm1, %v20147_v55 }
 0x124   :  { %16744 = vmatmul.mubr.msk.f32.gmra.mrb[52].mxu0 %vm26_vm1, %v20153_v56 }
 0x125   :  { %16746 = vmatprep.mubr.msk.f32.mxu0 %vm26_vm1, %v20155_v57 }
 0x128   :  { %16747 = vmatmul.mubr.msk.f32.gmra.mrb[54].mxu0 %vm26_vm1, %v20161_v58 }
 0x129   :  { %16749 = vmatprep.mubr.msk.f32.mxu0 %vm26_vm1, %v20163_v59 }
 0x12c   :  { %16750 = vmatmul.mubr.msk.f32.gmra.mrb[56].mxu0 %vm26_vm1, %v20169_v60 }
 0x12d   :  { %16752 = vmatprep.mubr.msk.f32.mxu0 %vm26_vm1, %v20171_v61 }
 0x130   :  { %16753 = vmatmul.mubr.msk.f32.gmra.mrb[58].mxu0 %vm26_vm1, %v20177_v62 }
 0x131   :  { %16755 = vmatprep.mubr.msk.f32.mxu0 %vm26_vm1, %v20179_v63  ;;  %v20203_v63 = vld [vmem:[%s25787_s1 + $0x10] sm:$0xf] }
 0x134   :  { %16756 = vmatmul.mubr.msk.f32.gmra.mrb[60].mxu0 %vm26_vm1, %v20185_v0  ;;  %v1589_v0 = vld [vmem:[#allocation2 + $0x1b2] sm:$0xff] }
 0x135   :  { %16758 = vmatprep.mubr.msk.f32.mxu0 %vm26_vm1, %v20187_v2  ;;  %v20210_v2 = vld [vmem:[#allocation2 + $0x22] sm:$0xff] }
 0x136   :  { %26023 = vst [vmem:[#allocation9_spill] sm:$0xff] %v20210_v2 }
 0x138   :  { %16759 = vmatmul.mubr.msk.f32.gmra.mrb[62].mxu0 %vm26_vm1, %v20193_v3  ;;  %v20212_v3 = vld [vmem:[#allocation2 + $0x32] sm:$0xff] }
 0x139   :  { %16763 = vmatprep.mubr.msk.f32.mxu0 %vm26_vm1, %v1557_v35  ;;  %26024 = vst [vmem:[#allocation10_spill] sm:$0xff] %v20212_v3  ;;  %v20220_v35 = vld [vmem:[#allocation2 + $0x3a] sm:$0xff] }
 0x13a   :  { %26025 = vst [vmem:[#allocation11_spill] sm:$0xff] %v20220_v35 }
 0x13c   :  { %16764 = vmatmul.mubr.msk.f32.vlgmr.msra.gmra.mrb[0].mxu0 %vm26_vm1, %v1558_v36  ;;  %v20222_v36 = vld [vmem:[#allocation2 + $0x4a] sm:$0xff] }
 0x13d   :  { %16860 = vmatpush3.msk.msra.mxu0 %vm588_vm0, %v19950_v5  ;;  %16766 = vmatprep.mubr.msk.f32.mxu0 %vm26_vm1, %v20198_v1  ;;  %26026 = vst [vmem:[#allocation12_spill] sm:$0xff] %v20222_v36  ;;  %v20228_v5 = vld [vmem:[#allocation2 + $0x52] sm:$0xff]  ;;  %v20230_v1 = vld [vmem:[#allocation2 + $0x62] sm:$0xff] }
 0x13e   :  { %16957 = vmatprep.subr.msk.mxu0 %vm588_vm0, %v20203_v63  ;;  %26027 = vst [vmem:[#allocation13_spill] sm:$0xff] %v20228_v5  ;;  %26028 = vst [vmem:[#allocation14_spill] sm:$0xff] %v20230_v1 }
 0x140   :  { %16767 = vmatmul.mubr.msk.f32.gmra.mrb[2].mxu0 %vm26_vm1, %v20210_v2  ;;  %v20238_v2 = vld [vmem:[#allocation2 + $0x7a] sm:$0xff] }
 0x141   :  { %16769 = vmatprep.mubr.msk.f32.mxu0 %vm26_vm1, %v20212_v3  ;;  %v20236_v3 = vld [vmem:[#allocation2 + $0x6a] sm:$0xff]  ;;  %26030 = vst [vmem:[#allocation16_spill] sm:$0xff] %v20238_v2 }
 0x142   :  { %26029 = vst [vmem:[#allocation15_spill] sm:$0xff] %v20236_v3 }
 0x144   :  { %16770 = vmatmul.mubr.msk.f32.gmra.mrb[4].mxu0 %vm26_vm1, %v20220_v35  ;;  %v20246_v35 = vld [vmem:[#allocation2 + $0x92] sm:$0xff] }
 0x145   :  { %16772 = vmatprep.mubr.msk.f32.mxu0 %vm26_vm1, %v20222_v36  ;;  %v20244_v36 = vld [vmem:[#allocation2 + $0x82] sm:$0xff]  ;;  %26032 = vst [vmem:[#allocation18_spill] sm:$0xff] %v20246_v35 }
 0x146   :  { %26031 = vst [vmem:[#allocation17_spill] sm:$0xff] %v20244_v36 }
 0x148   :  { %16773 = vmatmul.mubr.msk.f32.gmra.mrb[6].mxu0 %vm26_vm1, %v20228_v5  ;;  %v20254_v5 = vld [vmem:[#allocation2 + $0xaa] sm:$0xff] }
 0x149   :  { %16775 = vmatprep.mubr.msk.f32.mxu0 %vm26_vm1, %v20230_v1  ;;  %v20252_v1 = vld [vmem:[#allocation2 + $0x9a] sm:$0xff]  ;;  %26034 = vst [vmem:[#allocation20_spill] sm:$0xff] %v20254_v5 }
 0x14a   :  { %26033 = vst [vmem:[#allocation19_spill] sm:$0xff] %v20252_v1 }
 0x14c   :  { %16776 = vmatmul.mubr.msk.f32.gmra.mrb[8].mxu0 %vm26_vm1, %v20236_v3  ;;  %v20262_v3 = vld [vmem:[#allocation2 + $0xc2] sm:$0xff] }
 0x14d   :  { %16778 = vmatprep.mubr.msk.f32.mxu0 %vm26_vm1, %v20238_v2  ;;  %v20260_v2 = vld [vmem:[#allocation2 + $0xb2] sm:$0xff]  ;;  %26036 = vst [vmem:[#allocation22_spill] sm:$0xff] %v20262_v3 }
 0x14e   :  { %26035 = vst [vmem:[#allocation21_spill] sm:$0xff] %v20260_v2 }
 0x150   :  { %16779 = vmatmul.mubr.msk.f32.gmra.mrb[10].mxu0 %vm26_vm1, %v20244_v36  ;;  %v20270_v36 = vld [vmem:[#allocation2 + $0xda] sm:$0xff] }
 0x151   :  { %16781 = vmatprep.mubr.msk.f32.mxu0 %vm26_vm1, %v20246_v35  ;;  %v20268_v35 = vld [vmem:[#allocation2 + $0xca] sm:$0xff]  ;;  %26038 = vst [vmem:[#allocation24_spill] sm:$0xff] %v20270_v36 }
 0x152   :  { %26037 = vst [vmem:[#allocation23_spill] sm:$0xff] %v20268_v35 }
 0x154   :  { %16782 = vmatmul.mubr.msk.f32.gmra.mrb[12].mxu0 %vm26_vm1, %v20252_v1  ;;  %v20278_v1 = vld [vmem:[#allocation2 + $0xf2] sm:$0xff] }
 0x155   :  { %16784 = vmatprep.mubr.msk.f32.mxu0 %vm26_vm1, %v20254_v5  ;;  %v20276_v5 = vld [vmem:[#allocation2 + $0xe2] sm:$0xff]  ;;  %26040 = vst [vmem:[#allocation26_spill] sm:$0xff] %v20278_v1 }
 0x156   :  { %26039 = vst [vmem:[#allocation25_spill] sm:$0xff] %v20276_v5 }
 0x158   :  { %16785 = vmatmul.mubr.msk.f32.gmra.mrb[14].mxu0 %vm26_vm1, %v20260_v2  ;;  %v20286_v2 = vld [vmem:[#allocation2 + $0x10a] sm:$0xff] }
 0x159   :  { %16787 = vmatprep.mubr.msk.f32.mxu0 %vm26_vm1, %v20262_v3  ;;  %v20284_v3 = vld [vmem:[#allocation2 + $0xfa] sm:$0xff]  ;;  %26042 = vst [vmem:[#allocation28_spill] sm:$0xff] %v20286_v2 }
 0x15a   :  { %26041 = vst [vmem:[#allocation27_spill] sm:$0xff] %v20284_v3 }
 0x15c   :  { %16788 = vmatmul.mubr.msk.f32.gmra.mrb[16].mxu0 %vm26_vm1, %v20268_v35  ;;  %v20294_v35 = vld [vmem:[#allocation2 + $0x122] sm:$0xff] }
 0x15d   :  { %16790 = vmatprep.mubr.msk.f32.mxu0 %vm26_vm1, %v20270_v36  ;;  %v20292_v36 = vld [vmem:[#allocation2 + $0x112] sm:$0xff]  ;;  %26044 = vst [vmem:[#allocation30_spill] sm:$0xff] %v20294_v35 }
 0x15e   :  { %26043 = vst [vmem:[#allocation29_spill] sm:$0xff] %v20292_v36 }
 0x160   :  { %16791 = vmatmul.mubr.msk.f32.gmra.mrb[18].mxu0 %vm26_vm1, %v20276_v5  ;;  %v20302_v5 = vld [vmem:[#allocation2 + $0x13a] sm:$0xff] }
 0x161   :  { %16793 = vmatprep.mubr.msk.f32.mxu0 %vm26_vm1, %v20278_v1  ;;  %v20300_v1 = vld [vmem:[#allocation2 + $0x12a] sm:$0xff]  ;;  %26046 = vst [vmem:[#allocation32_spill] sm:$0xff] %v20302_v5 }
 0x162   :  { %26045 = vst [vmem:[#allocation31_spill] sm:$0xff] %v20300_v1 }
 0x164   :  { %16794 = vmatmul.mubr.msk.f32.gmra.mrb[20].mxu0 %vm26_vm1, %v20284_v3  ;;  %v20310_v3 = vld [vmem:[#allocation2 + $0x152] sm:$0xff] }
 0x165   :  { %16796 = vmatprep.mubr.msk.f32.mxu0 %vm26_vm1, %v20286_v2  ;;  %v20308_v2 = vld [vmem:[#allocation2 + $0x142] sm:$0xff]  ;;  %26048 = vst [vmem:[#allocation34_spill] sm:$0xff] %v20310_v3 }
 0x166   :  { %26047 = vst [vmem:[#allocation33_spill] sm:$0xff] %v20308_v2 }
 0x168   :  { %16797 = vmatmul.mubr.msk.f32.gmra.mrb[22].mxu0 %vm26_vm1, %v20292_v36  ;;  %v166_v36 = vld [vmem:[%s25788_s0 + $0xf0] sm:$0xff] }
 0x169   :  { %16799 = vmatprep.mubr.msk.f32.mxu0 %vm26_vm1, %v20294_v35  ;;  %231 = vst.msk [vmem:[#allocation2 + $0x181] sm:$0xff] %vm26_vm1, %v166_v36  ;;  %v167_v35 = vld [vmem:[%s25788_s0 + $0xf8] sm:$0xff] }
 0x16a   :  { %232 = vst.msk [vmem:[#allocation2 + $0x189] sm:$0xff] %vm26_vm1, %v167_v35  ;;  %v20332_v36 = vld [vmem:[#allocation2 + $0x172] sm:$0xff]  ;;  %v1590_v35 = vld [vmem:[#allocation2 + $0x1ba] sm:$0xff] }
 0x16b   :  { %26050 = vst [vmem:[#allocation36_spill] sm:$0xff] %v20332_v36 }
 0x16c   :  { %16800 = vmatmul.mubr.msk.f32.gmra.mrb[24].mxu0 %vm26_vm1, %v20300_v1  ;;  %v20326_v1 = vld [vmem:[#allocation2 + $0x16a] sm:$0xff] }
 0x16d   :  { %16802 = vmatprep.mubr.msk.f32.mxu0 %vm26_vm1, %v20302_v5  ;;  %v20324_v5 = vld [vmem:[#allocation2 + $0x15a] sm:$0xff] }
 0x16e   :  { %26049 = vst [vmem:[#allocation35_spill] sm:$0xff] %v20324_v5 }
 0x170   :  { %16803 = vmatmul.mubr.msk.f32.gmra.mrb[26].mxu0 %vm26_vm1, %v20308_v2  ;;  %v20344_v2 = vld [vmem:[#allocation2 + $0x1e2] sm:$0xff] }
 0x171   :  { %16805 = vmatprep.mubr.msk.f32.mxu0 %vm26_vm1, %v20310_v3  ;;  %v20337_v3 = vld [vmem:[#allocation2 + $0x1ca] sm:$0xff]  ;;  %26053 = vst [vmem:[#allocation39_spill] sm:$0xff] %v20344_v2 }
 0x172   :  { %26051 = vst [vmem:[#allocation37_spill] sm:$0xff] %v20337_v3 }
 0x174   :  { %16806 = vmatmul.mubr.msk.f32.gmra.mrb[28].mxu0 %vm26_vm1, %v20324_v5  ;;  %v20342_v5 = vld [vmem:[#allocation2 + $0x1d2] sm:$0xff] }
 0x175   :  { %16808 = vmatprep.mubr.msk.f32.mxu0 %vm26_vm1, %v20326_v1  ;;  %26052 = vst [vmem:[#allocation38_spill] sm:$0xff] %v20342_v5 }
 0x178   :  { %16809 = vmatmul.mubr.msk.f32.gmra.mrb[30].mxu0 %vm26_vm1, %v20332_v36  ;;  %v20350_v36 = vld [vmem:[#allocation2 + $0x1ea] sm:$0xff] }
 0x179   :  { %16811 = vmatprep.mubr.msk.f32.mxu0 %vm26_vm1, %v1589_v0  ;;  %26054 = vst [vmem:[#allocation40_spill] sm:$0xff] %v20350_v36  ;;  %v20352_v0 = vld [vmem:[#allocation2 + $0x1fa] sm:$0xff] }
 0x17a   :  { %26055 = vst [vmem:[#allocation41_spill] sm:$0xff] %v20352_v0 }
 0x17c   :  { %16812 = vmatmul.mubr.msk.f32.gmra.mrb[32].mxu0 %vm26_vm1, %v1590_v35  ;;  %v20358_v35 = vld [vmem:[#allocation2 + $0x202] sm:$0xff] }
 0x17d   :  { %16814 = vmatprep.mubr.msk.f32.mxu0 %vm26_vm1, %v20337_v3  ;;  %26056 = vst [vmem:[#allocation42_spill] sm:$0xff] %v20358_v35  ;;  %v20360_v3 = vld [vmem:[#allocation2 + $0x212] sm:$0xff] }
 0x17e   :  { %26057 = vst [vmem:[#allocation43_spill] sm:$0xff] %v20360_v3 }
 0x180   :  { %16815 = vmatmul.mubr.msk.f32.gmra.mrb[34].mxu0 %vm26_vm1, %v20342_v5  ;;  %v20368_v5 = vld [vmem:[#allocation2 + $0x22a] sm:$0xff] }
 0x181   :  { %16817 = vmatprep.mubr.msk.f32.mxu0 %vm26_vm1, %v20344_v2  ;;  %v20366_v2 = vld [vmem:[#allocation2 + $0x21a] sm:$0xff]  ;;  %26059 = vst [vmem:[#allocation45_spill] sm:$0xff] %v20368_v5 }
 0x182   :  { %26058 = vst [vmem:[#allocation44_spill] sm:$0xff] %v20366_v2 }
 0x184   :  { %16818 = vmatmul.mubr.msk.f32.gmra.mrb[36].mxu0 %vm26_vm1, %v20350_v36  ;;  %v20376_v36 = vld [vmem:[#allocation2 + $0x242] sm:$0xff] }
 0x185   :  { %16820 = vmatprep.mubr.msk.f32.mxu0 %vm26_vm1, %v20352_v0  ;;  %v20374_v0 = vld [vmem:[#allocation2 + $0x232] sm:$0xff]  ;;  %26061 = vst [vmem:[#allocation47_spill] sm:$0xff] %v20376_v36 }
 0x186   :  { %26060 = vst [vmem:[#allocation46_spill] sm:$0xff] %v20374_v0 }
 0x188   :  { %16821 = vmatmul.mubr.msk.f32.gmra.mrb[38].mxu0 %vm26_vm1, %v20358_v35  ;;  %v20384_v35 = vld [vmem:[#allocation2 + $0x25a] sm:$0xff] }
 0x189   :  { %16823 = vmatprep.mubr.msk.f32.mxu0 %vm26_vm1, %v20360_v3  ;;  %v20382_v3 = vld [vmem:[#allocation2 + $0x24a] sm:$0xff]  ;;  %26063 = vst [vmem:[#allocation49_spill] sm:$0xff] %v20384_v35 }
 0x18a   :  { %26062 = vst [vmem:[#allocation48_spill] sm:$0xff] %v20382_v3 }
 0x18c   :  { %16824 = vmatmul.mubr.msk.f32.gmra.mrb[40].mxu0 %vm26_vm1, %v20366_v2  ;;  %v20392_v2 = vld [vmem:[#allocation2 + $0x272] sm:$0xff] }
 0x18d   :  { %16826 = vmatprep.mubr.msk.f32.mxu0 %vm26_vm1, %v20368_v5  ;;  %v20390_v5 = vld [vmem:[#allocation2 + $0x262] sm:$0xff]  ;;  %26065 = vst [vmem:[#allocation51_spill] sm:$0xff] %v20392_v2 }
 0x18e   :  { %26064 = vst [vmem:[#allocation50_spill] sm:$0xff] %v20390_v5 }
 0x190   :  { %16827 = vmatmul.mubr.msk.f32.gmra.mrb[42].mxu0 %vm26_vm1, %v20374_v0  ;;  %v20400_v0 = vld [vmem:[#allocation2 + $0x28a] sm:$0xff] }
 0x191   :  { %16829 = vmatprep.mubr.msk.f32.mxu0 %vm26_vm1, %v20376_v36  ;;  %v20398_v36 = vld [vmem:[#allocation2 + $0x27a] sm:$0xff]  ;;  %26067 = vst [vmem:[#allocation53_spill] sm:$0xff] %v20400_v0 }
 0x192   :  { %26066 = vst [vmem:[#allocation52_spill] sm:$0xff] %v20398_v36 }
 0x194   :  { %16830 = vmatmul.mubr.msk.f32.gmra.mrb[44].mxu0 %vm26_vm1, %v20382_v3  ;;  %v20408_v3 = vld [vmem:[#allocation2 + $0x2a2] sm:$0xff] }
 0x195   :  { %16832 = vmatprep.mubr.msk.f32.mxu0 %vm26_vm1, %v20384_v35  ;;  %v20406_v35 = vld [vmem:[#allocation2 + $0x292] sm:$0xff]  ;;  %26069 = vst [vmem:[#allocation55_spill] sm:$0xff] %v20408_v3 }
 0x196   :  { %26068 = vst [vmem:[#allocation54_spill] sm:$0xff] %v20406_v35 }
 0x198   :  { %16833 = vmatmul.mubr.msk.f32.gmra.mrb[46].mxu0 %vm26_vm1, %v20390_v5  ;;  %v20416_v5 = vld [vmem:[#allocation2 + $0x2ba] sm:$0xff] }
 0x199   :  { %16835 = vmatprep.mubr.msk.f32.mxu0 %vm26_vm1, %v20392_v2  ;;  %v20414_v2 = vld [vmem:[#allocation2 + $0x2aa] sm:$0xff]  ;;  %26071 = vst [vmem:[#allocation57_spill] sm:$0xff] %v20416_v5 }
 0x19a   :  { %26070 = vst [vmem:[#allocation56_spill] sm:$0xff] %v20414_v2 }
 0x19c   :  { %16836 = vmatmul.mubr.msk.f32.gmra.mrb[48].mxu0 %vm26_vm1, %v20398_v36  ;;  %v20424_v36 = vld [vmem:[#allocation2 + $0x2d2] sm:$0xff] }
 0x19d   :  { %16838 = vmatprep.mubr.msk.f32.mxu0 %vm26_vm1, %v20400_v0  ;;  %v20422_v0 = vld [vmem:[#allocation2 + $0x2c2] sm:$0xff]  ;;  %26073 = vst [vmem:[#allocation59_spill] sm:$0xff] %v20424_v36 }
 0x19e   :  { %26072 = vst [vmem:[#allocation58_spill] sm:$0xff] %v20422_v0 }
 0x1a0   :  { %16839 = vmatmul.mubr.msk.f32.gmra.mrb[50].mxu0 %vm26_vm1, %v20406_v35  ;;  %v20432_v35 = vld [vmem:[#allocation2 + $0x2ea] sm:$0xff] }
 0x1a1   :  { %16841 = vmatprep.mubr.msk.f32.mxu0 %vm26_vm1, %v20408_v3  ;;  %v20430_v3 = vld [vmem:[#allocation2 + $0x2da] sm:$0xff]  ;;  %26075 = vst [vmem:[#allocation61_spill] sm:$0xff] %v20432_v35 }
 0x1a2   :  { %26074 = vst [vmem:[#allocation60_spill] sm:$0xff] %v20430_v3 }
 0x1a4   :  { %16842 = vmatmul.mubr.msk.f32.gmra.mrb[52].mxu0 %vm26_vm1, %v20414_v2  ;;  %v20440_v2 = vld [vmem:[#allocation2 + $0x302] sm:$0xff] }
 0x1a5   :  { %16844 = vmatprep.mubr.msk.f32.mxu0 %vm26_vm1, %v20416_v5  ;;  %v20438_v5 = vld [vmem:[#allocation2 + $0x2f2] sm:$0xff] }
 0x1a8   :  { %16845 = vmatmul.mubr.msk.f32.gmra.mrb[54].mxu0 %vm26_vm1, %v20422_v0  ;;  %v198_v0 = vld [vmem:[%s25788_s0 + $0x1f0] sm:$0xff] }
 0x1a9   :  { %16847 = vmatprep.mubr.msk.f32.mxu0 %vm26_vm1, %v20424_v36  ;;  %263 = vst.msk [vmem:[#allocation2 + $0x331] sm:$0xff] %vm26_vm1, %v198_v0  ;;  %v199_v36 = vld [vmem:[%s25788_s0 + $0x1f8] sm:$0xff]  ;;  %v20462_v0 = vld [vmem:[#allocation2 + $0x322] sm:$0xff] }
 0x1aa   :  { %264 = vst.msk [vmem:[#allocation2 + $0x339] sm:$0xff] %vm26_vm1, %v199_v36  ;;  %v20471_v36 = vld [vmem:[%s25787_s1 + $0x14] sm:$0xf] }
 0x1ac   :  { %16848 = vmatmul.mubr.msk.f32.gmra.mrb[56].mxu0 %vm26_vm1, %v20430_v3  ;;  %v20456_v3 = vld [vmem:[#allocation2 + $0x31a] sm:$0xff] }
 0x1ad   :  { %16850 = vmatprep.mubr.msk.f32.mxu0 %vm26_vm1, %v20432_v35  ;;  %v20454_v35 = vld [vmem:[#allocation2 + $0x30a] sm:$0xff] }
 0x1b0   :  { %16851 = vmatmul.mubr.msk.f32.gmra.mrb[58].mxu0 %vm26_vm1, %v20438_v5 }
 0x1b1   :  { %16853 = vmatprep.mubr.msk.f32.mxu0 %vm26_vm1, %v20440_v2 }
 0x1b4   :  { %16854 = vmatmul.mubr.msk.f32.gmra.mrb[60].mxu0 %vm26_vm1, %v20454_v35 }
 0x1b5   :  { %16856 = vmatprep.mubr.msk.f32.mxu0 %vm26_vm1, %v20456_v3 }
 0x1b8   :  { %16857 = vmatmul.mubr.msk.f32.gmra.mrb[62].mxu0 %vm26_vm1, %v20462_v0 }
 0x1b9   :  { %16861 = vmatprep.mubr.msk.f32.mxu0 %vm26_vm1, %v19945_v4  ;;  %v20533_v4 = vld [vmem:[#allocation2 + $0x180] sm:$0xff] }
 0x1bc   :  { %16862 = vmatmul.mubr.msk.f32.vlgmr.msra.gmra.mrb[0].mxu0 %vm26_vm1, %v19957_v6  ;;  %v20539_v6 = vld [vmem:[#allocation2 + $0x188] sm:$0xff] }
 0x1bd   :  { %16958 = vmatpush3.msk.msra.mxu0 %vm588_vm0, %v20203_v63  ;;  %16864 = vmatprep.mubr.msk.f32.mxu0 %vm26_vm1, %v19959_v7  ;;  %v26076_v7 = vld [vmem:[#allocation4_spill] sm:$0xff] }
 0x1be   :  { %17055 = vmatprep.subr.msk.mxu0 %vm588_vm0, %v20471_v36  ;;  %v20796_v63 = vld [vmem:[#allocation2 + $0x279] sm:$0xff] }
 0x1c0   :  { %16865 = vmatmul.mubr.msk.f32.gmra.mrb[2].mxu0 %vm26_vm1, %v19967_v8  ;;  %v26077_v8 = vld [vmem:[#allocation5_spill] sm:$0xff] }
 0x1c1   :  { %16867 = vmatprep.mubr.msk.f32.mxu0 %vm26_vm1, %v19969_v9  ;;  %v26078_v9 = vld [vmem:[#allocation6_spill] sm:$0xff] }
 0x1c4   :  { %16868 = vmatmul.mubr.msk.f32.gmra.mrb[4].mxu0 %vm26_vm1, %v19975_v10  ;;  %v20601_v10 = vld [vmem:[#allocation2 + $0x330] sm:$0xff] }
 0x1c5   :  { %16870 = vmatprep.mubr.msk.f32.mxu0 %vm26_vm1, %v19977_v11  ;;  %v26079_v11 = vld [vmem:[#allocation7_spill] sm:$0xff] }
 0x1c8   :  { %16871 = vmatmul.mubr.msk.f32.gmra.mrb[6].mxu0 %vm26_vm1, %v19983_v12  ;;  %v20607_v12 = vld [vmem:[#allocation2 + $0x338] sm:$0xff] }
 0x1c9   :  { %16873 = vmatprep.mubr.msk.f32.mxu0 %vm26_vm1, %v19985_v13  ;;  %v2977_v13 = vld [vmem:[#allocation2 + $0x19] sm:$0xff] }
 0x1cc   :  { %16874 = vmatmul.mubr.msk.f32.gmra.mrb[8].mxu0 %vm26_vm1, %v19991_v14  ;;  %v2978_v14 = vld [vmem:[#allocation2 + $0x21] sm:$0xff] }
 0x1cd   :  { %16876 = vmatprep.mubr.msk.f32.mxu0 %vm26_vm1, %v19993_v15  ;;  %v20612_v15 = vld [vmem:[#allocation2 + $0x31] sm:$0xff] }
 0x1d0   :  { %16877 = vmatmul.mubr.msk.f32.gmra.mrb[10].mxu0 %vm26_vm1, %v19999_v16  ;;  %v20617_v16 = vld [vmem:[%s25787_s1 + $0x18] sm:$0xf] }
 0x1d1   :  { %16879 = vmatprep.mubr.msk.f32.mxu0 %vm26_vm1, %v20001_v17  ;;  %v20624_v17 = vld [vmem:[#allocation2 + $0x39] sm:$0xff] }
 0x1d4   :  { %16880 = vmatmul.mubr.msk.f32.gmra.mrb[12].mxu0 %vm26_vm1, %v20007_v18  ;;  %v20626_v18 = vld [vmem:[#allocation2 + $0x49] sm:$0xff] }
 0x1d5   :  { %16882 = vmatprep.mubr.msk.f32.mxu0 %vm26_vm1, %v20009_v19  ;;  %v20634_v19 = vld [vmem:[#allocation2 + $0x51] sm:$0xff] }
 0x1d8   :  { %16883 = vmatmul.mubr.msk.f32.gmra.mrb[14].mxu0 %vm26_vm1, %v20015_v20  ;;  %v20636_v20 = vld [vmem:[#allocation2 + $0x61] sm:$0xff] }
 0x1d9   :  { %16885 = vmatprep.mubr.msk.f32.mxu0 %vm26_vm1, %v20017_v21  ;;  %v20642_v21 = vld [vmem:[#allocation2 + $0x69] sm:$0xff] }
 0x1dc   :  { %16886 = vmatmul.mubr.msk.f32.gmra.mrb[16].mxu0 %vm26_vm1, %v20023_v22  ;;  %v20644_v22 = vld [vmem:[#allocation2 + $0x79] sm:$0xff] }
 0x1dd   :  { %16888 = vmatprep.mubr.msk.f32.mxu0 %vm26_vm1, %v20025_v23  ;;  %v20650_v23 = vld [vmem:[#allocation2 + $0x81] sm:$0xff] }
 0x1e0   :  { %16889 = vmatmul.mubr.msk.f32.gmra.mrb[18].mxu0 %vm26_vm1, %v20031_v24  ;;  %v20652_v24 = vld [vmem:[#allocation2 + $0x91] sm:$0xff] }
 0x1e1   :  { %16891 = vmatprep.mubr.msk.f32.mxu0 %vm26_vm1, %v20033_v25  ;;  %v20658_v25 = vld [vmem:[#allocation2 + $0x99] sm:$0xff] }
 0x1e4   :  { %16892 = vmatmul.mubr.msk.f32.gmra.mrb[20].mxu0 %vm26_vm1, %v20039_v26  ;;  %v20660_v26 = vld [vmem:[#allocation2 + $0xa9] sm:$0xff] }
 0x1e5   :  { %16894 = vmatprep.mubr.msk.f32.mxu0 %vm26_vm1, %v20041_v27  ;;  %v20666_v27 = vld [vmem:[#allocation2 + $0xb1] sm:$0xff] }
 0x1e8   :  { %16895 = vmatmul.mubr.msk.f32.gmra.mrb[22].mxu0 %vm26_vm1, %v20047_v28  ;;  %v20668_v28 = vld [vmem:[#allocation2 + $0xc1] sm:$0xff] }
 0x1e9   :  { %16897 = vmatprep.mubr.msk.f32.mxu0 %vm26_vm1, %v20049_v29  ;;  %v20674_v29 = vld [vmem:[#allocation2 + $0xc9] sm:$0xff] }
 0x1ec   :  { %16898 = vmatmul.mubr.msk.f32.gmra.mrb[24].mxu0 %vm26_vm1, %v20055_v30  ;;  %v20676_v30 = vld [vmem:[#allocation2 + $0xd9] sm:$0xff] }
 0x1ed   :  { %16900 = vmatprep.mubr.msk.f32.mxu0 %vm26_vm1, %v20057_v31  ;;  %v20682_v31 = vld [vmem:[#allocation2 + $0xe1] sm:$0xff] }
 0x1f0   :  { %16901 = vmatmul.mubr.msk.f32.gmra.mrb[26].mxu0 %vm26_vm1, %v20063_v32  ;;  %v20684_v32 = vld [vmem:[#allocation2 + $0xf1] sm:$0xff] }
 0x1f1   :  { %16903 = vmatprep.mubr.msk.f32.mxu0 %vm26_vm1, %v20065_v33  ;;  %v20690_v33 = vld [vmem:[#allocation2 + $0xf9] sm:$0xff] }
 0x1f4   :  { %16904 = vmatmul.mubr.msk.f32.gmra.mrb[28].mxu0 %vm26_vm1, %v20071_v34  ;;  %v20692_v34 = vld [vmem:[#allocation2 + $0x109] sm:$0xff] }
 0x1f5   :  { %16906 = vmatprep.mubr.msk.f32.mxu0 %vm26_vm1, %v20533_v4 }
 0x1f8   :  { %16907 = vmatmul.mubr.msk.f32.gmra.mrb[30].mxu0 %vm26_vm1, %v20539_v6 }
 0x1f9   :  { %16909 = vmatprep.mubr.msk.f32.mxu0 %vm26_vm1, %v20076_v37  ;;  %v20698_v37 = vld [vmem:[#allocation2 + $0x111] sm:$0xff] }
 0x1fc   :  { %16910 = vmatmul.mubr.msk.f32.gmra.mrb[32].mxu0 %vm26_vm1, %v20081_v38  ;;  %v20700_v38 = vld [vmem:[#allocation2 + $0x121] sm:$0xff] }
 0x1fd   :  { %16912 = vmatprep.mubr.msk.f32.mxu0 %vm26_vm1, %v20083_v39  ;;  %v20706_v39 = vld [vmem:[#allocation2 + $0x129] sm:$0xff] }
 0x200   :  { %16913 = vmatmul.mubr.msk.f32.gmra.mrb[34].mxu0 %vm26_vm1, %v20089_v40  ;;  %v20708_v40 = vld [vmem:[#allocation2 + $0x139] sm:$0xff] }
 0x201   :  { %16915 = vmatprep.mubr.msk.f32.mxu0 %vm26_vm1, %v20091_v41  ;;  %v20714_v41 = vld [vmem:[#allocation2 + $0x141] sm:$0xff] }
 0x204   :  { %16916 = vmatmul.mubr.msk.f32.gmra.mrb[36].mxu0 %vm26_vm1, %v20097_v42  ;;  %v20716_v42 = vld [vmem:[#allocation2 + $0x151] sm:$0xff] }
 0x205   :  { %16918 = vmatprep.mubr.msk.f32.mxu0 %vm26_vm1, %v20099_v43  ;;  %v20722_v43 = vld [vmem:[#allocation2 + $0x159] sm:$0xff] }
 0x208   :  { %16919 = vmatmul.mubr.msk.f32.gmra.mrb[38].mxu0 %vm26_vm1, %v20105_v44  ;;  %v20724_v44 = vld [vmem:[#allocation2 + $0x169] sm:$0xff] }
 0x209   :  { %16921 = vmatprep.mubr.msk.f32.mxu0 %vm26_vm1, %v20107_v45  ;;  %v20730_v45 = vld [vmem:[#allocation2 + $0x171] sm:$0xff] }
 0x20c   :  { %16922 = vmatmul.mubr.msk.f32.gmra.mrb[40].mxu0 %vm26_vm1, %v20113_v46  ;;  %v20732_v46 = vld [vmem:[#allocation2 + $0x181] sm:$0xff] }
 0x20d   :  { %16924 = vmatprep.mubr.msk.f32.mxu0 %vm26_vm1, %v20115_v47  ;;  %v20738_v47 = vld [vmem:[#allocation2 + $0x189] sm:$0xff] }
 0x210   :  { %16925 = vmatmul.mubr.msk.f32.gmra.mrb[42].mxu0 %vm26_vm1, %v20121_v48  ;;  %v3009_v48 = vld [vmem:[#allocation2 + $0x1c9] sm:$0xff] }
 0x211   :  { %16927 = vmatprep.mubr.msk.f32.mxu0 %vm26_vm1, %v20123_v49  ;;  %v3010_v49 = vld [vmem:[#allocation2 + $0x1d1] sm:$0xff] }
 0x214   :  { %16928 = vmatmul.mubr.msk.f32.gmra.mrb[44].mxu0 %vm26_vm1, %v20129_v50  ;;  %v20743_v50 = vld [vmem:[#allocation2 + $0x1e1] sm:$0xff] }
 0x215   :  { %16930 = vmatprep.mubr.msk.f32.mxu0 %vm26_vm1, %v20131_v51  ;;  %v20748_v51 = vld [vmem:[#allocation2 + $0x1e9] sm:$0xff] }
 0x218   :  { %16931 = vmatmul.mubr.msk.f32.gmra.mrb[46].mxu0 %vm26_vm1, %v20137_v52  ;;  %v20750_v52 = vld [vmem:[#allocation2 + $0x1f9] sm:$0xff] }
 0x219   :  { %16933 = vmatprep.mubr.msk.f32.mxu0 %vm26_vm1, %v20139_v53  ;;  %v20756_v53 = vld [vmem:[#allocation2 + $0x201] sm:$0xff] }
 0x21c   :  { %16934 = vmatmul.mubr.msk.f32.gmra.mrb[48].mxu0 %vm26_vm1, %v20145_v54  ;;  %v20758_v54 = vld [vmem:[#allocation2 + $0x211] sm:$0xff] }
 0x21d   :  { %16936 = vmatprep.mubr.msk.f32.mxu0 %vm26_vm1, %v20147_v55  ;;  %v20764_v55 = vld [vmem:[#allocation2 + $0x219] sm:$0xff] }
 0x220   :  { %16937 = vmatmul.mubr.msk.f32.gmra.mrb[50].mxu0 %vm26_vm1, %v20153_v56  ;;  %v20766_v56 = vld [vmem:[#allocation2 + $0x229] sm:$0xff] }
 0x221   :  { %16939 = vmatprep.mubr.msk.f32.mxu0 %vm26_vm1, %v20155_v57  ;;  %v20772_v57 = vld [vmem:[#allocation2 + $0x231] sm:$0xff] }
 0x224   :  { %16940 = vmatmul.mubr.msk.f32.gmra.mrb[52].mxu0 %vm26_vm1, %v20161_v58  ;;  %v20774_v58 = vld [vmem:[#allocation2 + $0x241] sm:$0xff] }
 0x225   :  { %16942 = vmatprep.mubr.msk.f32.mxu0 %vm26_vm1, %v20163_v59  ;;  %v20780_v59 = vld [vmem:[#allocation2 + $0x249] sm:$0xff] }
 0x228   :  { %16943 = vmatmul.mubr.msk.f32.gmra.mrb[54].mxu0 %vm26_vm1, %v20169_v60  ;;  %v20782_v60 = vld [vmem:[#allocation2 + $0x259] sm:$0xff] }
 0x229   :  { %16945 = vmatprep.mubr.msk.f32.mxu0 %vm26_vm1, %v20171_v61  ;;  %v20788_v61 = vld [vmem:[#allocation2 + $0x261] sm:$0xff] }
 0x22c   :  { %16946 = vmatmul.mubr.msk.f32.gmra.mrb[56].mxu0 %vm26_vm1, %v20177_v62  ;;  %v20790_v62 = vld [vmem:[#allocation2 + $0x271] sm:$0xff] }
 0x22d   :  { %16948 = vmatprep.mubr.msk.f32.mxu0 %vm26_vm1, %v26076_v7  ;;  %v20804_v7 = vld [vmem:[#allocation2 + $0x291] sm:$0xff] }
 0x22e   :  { %26080 = vst [vmem:[#allocation4_spill] sm:$0xff] %v20804_v7 }
 0x230   :  { %16949 = vmatmul.mubr.msk.f32.gmra.mrb[58].mxu0 %vm26_vm1, %v26077_v8  ;;  %v20806_v8 = vld [vmem:[#allocation2 + $0x2a1] sm:$0xff] }
 0x231   :  { %16951 = vmatprep.mubr.msk.f32.mxu0 %vm26_vm1, %v26078_v9  ;;  %26081 = vst [vmem:[#allocation5_spill] sm:$0xff] %v20806_v8  ;;  %v20812_v9 = vld [vmem:[#allocation2 + $0x2a9] sm:$0xff] }
 0x232   :  { %26082 = vst [vmem:[#allocation6_spill] sm:$0xff] %v20812_v9 }
 0x234   :  { %16952 = vmatmul.mubr.msk.f32.gmra.mrb[60].mxu0 %vm26_vm1, %v26079_v11  ;;  %v20814_v11 = vld [vmem:[#allocation2 + $0x2b9] sm:$0xff] }
 0x235   :  { %16954 = vmatprep.mubr.msk.f32.mxu0 %vm26_vm1, %v20601_v10  ;;  %26083 = vst [vmem:[#allocation7_spill] sm:$0xff] %v20814_v11 }
 0x238   :  { %16955 = vmatmul.mubr.msk.f32.gmra.mrb[62].mxu0 %vm26_vm1, %v20607_v12 }
 0x239   :  { %16959 = vmatprep.mubr.msk.f32.mxu0 %vm26_vm1, %v2977_v13  ;;  %v20820_v13 = vld [vmem:[#allocation2 + $0x2c1] sm:$0xff] }
 0x23a   :  { %26084 = vst [vmem:[#allocation62_spill] sm:$0xff] %v20820_v13 }
 0x23c   :  { %16960 = vmatmul.mubr.msk.f32.vlgmr.msra.gmra.mrb[0].mxu0 %vm26_vm1, %v2978_v14  ;;  %v20822_v14 = vld [vmem:[#allocation2 + $0x2d1] sm:$0xff] }
 0x23d   :  { %17056 = vmatpush3.msk.msra.mxu0 %vm588_vm0, %v20471_v36  ;;  %16962 = vmatprep.mubr.msk.f32.mxu0 %vm26_vm1, %v20612_v15  ;;  %v20798_v36 = vld [vmem:[#allocation2 + $0x289] sm:$0xff]  ;;  %26085 = vst [vmem:[#allocation63_spill] sm:$0xff] %v20822_v14 }
 0x23e   :  { %17153 = vmatprep.subr.msk.mxu0 %vm588_vm0, %v20617_v16 }
 0x240   :  { %16963 = vmatmul.mubr.msk.f32.gmra.mrb[2].mxu0 %vm26_vm1, %v20624_v17 }
 0x241   :  { %16965 = vmatprep.mubr.msk.f32.mxu0 %vm26_vm1, %v20626_v18 }
 0x244   :  { %16966 = vmatmul.mubr.msk.f32.gmra.mrb[4].mxu0 %vm26_vm1, %v20634_v19 }
 0x245   :  { %16968 = vmatprep.mubr.msk.f32.mxu0 %vm26_vm1, %v20636_v20 }
 0x248   :  { %16969 = vmatmul.mubr.msk.f32.gmra.mrb[6].mxu0 %vm26_vm1, %v20642_v21 }
 0x249   :  { %16971 = vmatprep.mubr.msk.f32.mxu0 %vm26_vm1, %v20644_v22 }
 0x24c   :  { %16972 = vmatmul.mubr.msk.f32.gmra.mrb[8].mxu0 %vm26_vm1, %v20650_v23 }
 0x24d   :  { %16974 = vmatprep.mubr.msk.f32.mxu0 %vm26_vm1, %v20652_v24 }
 0x250   :  { %16975 = vmatmul.mubr.msk.f32.gmra.mrb[10].mxu0 %vm26_vm1, %v20658_v25 }
 0x251   :  { %16977 = vmatprep.mubr.msk.f32.mxu0 %vm26_vm1, %v20660_v26 }
 0x254   :  { %16978 = vmatmul.mubr.msk.f32.gmra.mrb[12].mxu0 %vm26_vm1, %v20666_v27 }
 0x255   :  { %16980 = vmatprep.mubr.msk.f32.mxu0 %vm26_vm1, %v20668_v28 }
 0x258   :  { %16981 = vmatmul.mubr.msk.f32.gmra.mrb[14].mxu0 %vm26_vm1, %v20674_v29 }
 0x259   :  { %16983 = vmatprep.mubr.msk.f32.mxu0 %vm26_vm1, %v20676_v30 }
 0x25c   :  { %16984 = vmatmul.mubr.msk.f32.gmra.mrb[16].mxu0 %vm26_vm1, %v20682_v31 }
 0x25d   :  { %16986 = vmatprep.mubr.msk.f32.mxu0 %vm26_vm1, %v20684_v32 }
 0x260   :  { %16987 = vmatmul.mubr.msk.f32.gmra.mrb[18].mxu0 %vm26_vm1, %v20690_v33 }
 0x261   :  { %16989 = vmatprep.mubr.msk.f32.mxu0 %vm26_vm1, %v20692_v34 }
 0x264   :  { %16990 = vmatmul.mubr.msk.f32.gmra.mrb[20].mxu0 %vm26_vm1, %v20698_v37 }
 0x265   :  { %16992 = vmatprep.mubr.msk.f32.mxu0 %vm26_vm1, %v20700_v38 }
 0x268   :  { %16993 = vmatmul.mubr.msk.f32.gmra.mrb[22].mxu0 %vm26_vm1, %v20706_v39 }
 0x269   :  { %16995 = vmatprep.mubr.msk.f32.mxu0 %vm26_vm1, %v20708_v40 }
 0x26c   :  { %16996 = vmatmul.mubr.msk.f32.gmra.mrb[24].mxu0 %vm26_vm1, %v20714_v41 }
 0x26d   :  { %16998 = vmatprep.mubr.msk.f32.mxu0 %vm26_vm1, %v20716_v42 }
 0x270   :  { %16999 = vmatmul.mubr.msk.f32.gmra.mrb[26].mxu0 %vm26_vm1, %v20722_v43 }
 0x271   :  { %17001 = vmatprep.mubr.msk.f32.mxu0 %vm26_vm1, %v20724_v44 }
 0x274   :  { %17002 = vmatmul.mubr.msk.f32.gmra.mrb[28].mxu0 %vm26_vm1, %v20730_v45 }
 0x275   :  { %17004 = vmatprep.mubr.msk.f32.mxu0 %vm26_vm1, %v20732_v46 }
 0x278   :  { %17005 = vmatmul.mubr.msk.f32.gmra.mrb[30].mxu0 %vm26_vm1, %v20738_v47 }
 0x279   :  { %17007 = vmatprep.mubr.msk.f32.mxu0 %vm26_vm1, %v3009_v48  ;;  %v20828_v48 = vld [vmem:[#allocation2 + $0x2d9] sm:$0xff] }
 0x27a   :  { %26086 = vst [vmem:[#allocation64_spill] sm:$0xff] %v20828_v48 }
 0x27c   :  { %17008 = vmatmul.mubr.msk.f32.gmra.mrb[32].mxu0 %vm26_vm1, %v3010_v49  ;;  %v20830_v49 = vld [vmem:[#allocation2 + $0x2e9] sm:$0xff] }
 0x27d   :  { %17010 = vmatprep.mubr.msk.f32.mxu0 %vm26_vm1, %v20743_v50  ;;  %26087 = vst [vmem:[#allocation65_spill] sm:$0xff] %v20830_v49 }
 0x280   :  { %17011 = vmatmul.mubr.msk.f32.gmra.mrb[34].mxu0 %vm26_vm1, %v20748_v51 }
 0x281   :  { %17013 = vmatprep.mubr.msk.f32.mxu0 %vm26_vm1, %v20750_v52 }
 0x284   :  { %17014 = vmatmul.mubr.msk.f32.gmra.mrb[36].mxu0 %vm26_vm1, %v20756_v53 }
 0x285   :  { %17016 = vmatprep.mubr.msk.f32.mxu0 %vm26_vm1, %v20758_v54 }
 0x288   :  { %17017 = vmatmul.mubr.msk.f32.gmra.mrb[38].mxu0 %vm26_vm1, %v20764_v55 }
 0x289   :  { %17019 = vmatprep.mubr.msk.f32.mxu0 %vm26_vm1, %v20766_v56 }
 0x28c   :  { %17020 = vmatmul.mubr.msk.f32.gmra.mrb[40].mxu0 %vm26_vm1, %v20772_v57 }
 0x28d   :  { %17022 = vmatprep.mubr.msk.f32.mxu0 %vm26_vm1, %v20774_v58 }
 0x290   :  { %17023 = vmatmul.mubr.msk.f32.gmra.mrb[42].mxu0 %vm26_vm1, %v20780_v59 }
 0x291   :  { %17025 = vmatprep.mubr.msk.f32.mxu0 %vm26_vm1, %v20782_v60 }
 0x294   :  { %17026 = vmatmul.mubr.msk.f32.gmra.mrb[44].mxu0 %vm26_vm1, %v20788_v61 }
 0x295   :  { %17028 = vmatprep.mubr.msk.f32.mxu0 %vm26_vm1, %v20790_v62 }
 0x298   :  { %17029 = vmatmul.mubr.msk.f32.gmra.mrb[46].mxu0 %vm26_vm1, %v20796_v63 }
 0x299   :  { %17031 = vmatprep.mubr.msk.f32.mxu0 %vm26_vm1, %v20798_v36 }
 0x29c   :  { %17032 = vmatmul.mubr.msk.f32.gmra.mrb[48].mxu0 %vm26_vm1, %v20804_v7  ;;  %v26105_v7 = vld [vmem:[#allocation18_spill] sm:$0xff] }
 0x29d   :  { %17034 = vmatprep.mubr.msk.f32.mxu0 %vm26_vm1, %v20806_v8  ;;  %v26101_v8 = vld [vmem:[#allocation14_spill] sm:$0xff] }
 0x2a0   :  { %17035 = vmatmul.mubr.msk.f32.gmra.mrb[50].mxu0 %vm26_vm1, %v20812_v9  ;;  %v20838_v9 = vld [vmem:[#allocation2 + $0x301] sm:$0xff] }
 0x2a1   :  { %17037 = vmatprep.mubr.msk.f32.mxu0 %vm26_vm1, %v20814_v11  ;;  %v20836_v11 = vld [vmem:[#allocation2 + $0x2f1] sm:$0xff]  ;;  %26089 = vst [vmem:[#allocation67_spill] sm:$0xff] %v20838_v9 }
 0x2a2   :  { %26088 = vst [vmem:[#allocation66_spill] sm:$0xff] %v20836_v11 }
 0x2a4   :  { %17038 = vmatmul.mubr.msk.f32.gmra.mrb[52].mxu0 %vm26_vm1, %v20820_v13  ;;  %v20846_v13 = vld [vmem:[#allocation2 + $0x319] sm:$0xff] }
 0x2a5   :  { %17040 = vmatprep.mubr.msk.f32.mxu0 %vm26_vm1, %v20822_v14  ;;  %v20844_v14 = vld [vmem:[#allocation2 + $0x309] sm:$0xff]  ;;  %26091 = vst [vmem:[#allocation69_spill] sm:$0xff] %v20846_v13 }
 0x2a6   :  { %26090 = vst [vmem:[#allocation68_spill] sm:$0xff] %v20844_v14 }
 0x2a8   :  { %17041 = vmatmul.mubr.msk.f32.gmra.mrb[54].mxu0 %vm26_vm1, %v20828_v48  ;;  %v20854_v48 = vld [vmem:[#allocation2 + $0x331] sm:$0xff] }
 0x2a9   :  { %17043 = vmatprep.mubr.msk.f32.mxu0 %vm26_vm1, %v20830_v49  ;;  %v20852_v49 = vld [vmem:[#allocation2 + $0x321] sm:$0xff]  ;;  %26093 = vst [vmem:[#allocation71_spill] sm:$0xff] %v20854_v48 }
 0x2aa   :  { %26092 = vst [vmem:[#allocation70_spill] sm:$0xff] %v20852_v49 }
 0x2ac   :  { %17044 = vmatmul.mubr.msk.f32.gmra.mrb[56].mxu0 %vm26_vm1, %v20836_v11  ;;  %v26095_v11 = vld [vmem:[#allocation8_spill] sm:$0xff] }
 0x2ad   :  { %17046 = vmatprep.mubr.msk.f32.mxu0 %vm26_vm1, %v20838_v9  ;;  %v20860_v9 = vld [vmem:[#allocation2 + $0x339] sm:$0xff] }
 0x2ae   :  { %26094 = vst [vmem:[#allocation72_spill] sm:$0xff] %v20860_v9 }
 0x2b0   :  { %17047 = vmatmul.mubr.msk.f32.gmra.mrb[58].mxu0 %vm26_vm1, %v20844_v14  ;;  %v26096_v14 = vld [vmem:[#allocation9_spill] sm:$0xff] }
 0x2b1   :  { %17049 = vmatprep.mubr.msk.f32.mxu0 %vm26_vm1, %v20846_v13  ;;  %v20869_v13 = vld [vmem:[%s25787_s1 + $0x1c] sm:$0xf] }
 0x2b4   :  { %17050 = vmatmul.mubr.msk.f32.gmra.mrb[60].mxu0 %vm26_vm1, %v20852_v49  ;;  %v26100_v49 = vld [vmem:[#allocation13_spill] sm:$0xff] }
 0x2b5   :  { %17052 = vmatprep.mubr.msk.f32.mxu0 %vm26_vm1, %v20854_v48  ;;  %v26097_v48 = vld [vmem:[#allocation10_spill] sm:$0xff] }
 0x2b8   :  { %17053 = vmatmul.mubr.msk.f32.gmra.mrb[62].mxu0 %vm26_vm1, %v20860_v9  ;;  %v26098_v9 = vld [vmem:[#allocation11_spill] sm:$0xff] }
 0x2b9   :  { %17057 = vmatprep.mubr.msk.f32.mxu0 %vm26_vm1, %v26095_v11  ;;  %v26099_v11 = vld [vmem:[#allocation12_spill] sm:$0xff] }
 0x2bc   :  { %17058 = vmatmul.mubr.msk.f32.vlgmr.msra.gmra.mrb[0].mxu0 %vm26_vm1, %v26096_v14  ;;  %v26102_v14 = vld [vmem:[#allocation15_spill] sm:$0xff] }
 0x2bd   :  { %17154 = vmatpush3.msk.msra.mxu0 %vm588_vm0, %v20617_v16  ;;  %17060 = vmatprep.mubr.msk.f32.mxu0 %vm26_vm1, %v26097_v48  ;;  %v26103_v16 = vld [vmem:[#allocation16_spill] sm:$0xff]  ;;  %v26104_v48 = vld [vmem:[#allocation17_spill] sm:$0xff] }
 0x2be   :  { %17251 = vmatprep.subr.msk.mxu0 %vm588_vm0, %v20869_v13 }
 0x2c0   :  { %17061 = vmatmul.mubr.msk.f32.gmra.mrb[2].mxu0 %vm26_vm1, %v26098_v9  ;;  %v26106_v9 = vld [vmem:[#allocation19_spill] sm:$0xff] }
 0x2c1   :  { %17063 = vmatprep.mubr.msk.f32.mxu0 %vm26_vm1, %v26099_v11  ;;  %v26107_v11 = vld [vmem:[#allocation20_spill] sm:$0xff] }
 0x2c4   :  { %17064 = vmatmul.mubr.msk.f32.gmra.mrb[4].mxu0 %vm26_vm1, %v26100_v49  ;;  %v26108_v49 = vld [vmem:[#allocation21_spill] sm:$0xff] }
 0x2c5   :  { %17066 = vmatprep.mubr.msk.f32.mxu0 %vm26_vm1, %v26101_v8  ;;  %v26109_v8 = vld [vmem:[#allocation22_spill] sm:$0xff] }
 0x2c8   :  { %17067 = vmatmul.mubr.msk.f32.gmra.mrb[6].mxu0 %vm26_vm1, %v26102_v14  ;;  %v26110_v14 = vld [vmem:[#allocation23_spill] sm:$0xff] }
 0x2c9   :  { %17069 = vmatprep.mubr.msk.f32.mxu0 %vm26_vm1, %v26103_v16  ;;  %v26111_v16 = vld [vmem:[#allocation24_spill] sm:$0xff] }
 0x2cc   :  { %17070 = vmatmul.mubr.msk.f32.gmra.mrb[8].mxu0 %vm26_vm1, %v26104_v48  ;;  %v26112_v48 = vld [vmem:[#allocation25_spill] sm:$0xff] }
 0x2cd   :  { %17072 = vmatprep.mubr.msk.f32.mxu0 %vm26_vm1, %v26105_v7  ;;  %v26113_v7 = vld [vmem:[#allocation26_spill] sm:$0xff] }
 0x2d0   :  { %17073 = vmatmul.mubr.msk.f32.gmra.mrb[10].mxu0 %vm26_vm1, %v26106_v9  ;;  %v26114_v9 = vld [vmem:[#allocation27_spill] sm:$0xff] }
 0x2d1   :  { %17075 = vmatprep.mubr.msk.f32.mxu0 %vm26_vm1, %v26107_v11  ;;  %v26115_v11 = vld [vmem:[#allocation28_spill] sm:$0xff] }
 0x2d4   :  { %17076 = vmatmul.mubr.msk.f32.gmra.mrb[12].mxu0 %vm26_vm1, %v26108_v49  ;;  %v26116_v49 = vld [vmem:[#allocation29_spill] sm:$0xff] }
 0x2d5   :  { %17078 = vmatprep.mubr.msk.f32.mxu0 %vm26_vm1, %v26109_v8  ;;  %v26117_v8 = vld [vmem:[#allocation30_spill] sm:$0xff] }
 0x2d8   :  { %17079 = vmatmul.mubr.msk.f32.gmra.mrb[14].mxu0 %vm26_vm1, %v26110_v14  ;;  %v26118_v14 = vld [vmem:[#allocation31_spill] sm:$0xff] }
 0x2d9   :  { %17081 = vmatprep.mubr.msk.f32.mxu0 %vm26_vm1, %v26111_v16  ;;  %v26119_v16 = vld [vmem:[#allocation32_spill] sm:$0xff] }
 0x2dc   :  { %17082 = vmatmul.mubr.msk.f32.gmra.mrb[16].mxu0 %vm26_vm1, %v26112_v48  ;;  %v26120_v48 = vld [vmem:[#allocation33_spill] sm:$0xff] }
 0x2dd   :  { %17084 = vmatprep.mubr.msk.f32.mxu0 %vm26_vm1, %v26113_v7  ;;  %v26121_v7 = vld [vmem:[#allocation34_spill] sm:$0xff] }
 0x2e0   :  { %17085 = vmatmul.mubr.msk.f32.gmra.mrb[18].mxu0 %vm26_vm1, %v26114_v9  ;;  %v26122_v9 = vld [vmem:[#allocation35_spill] sm:$0xff] }
 0x2e1   :  { %17087 = vmatprep.mubr.msk.f32.mxu0 %vm26_vm1, %v26115_v11  ;;  %v20931_v11 = vld [vmem:[#allocation2 + $0x182] sm:$0xff] }
 0x2e4   :  { %17088 = vmatmul.mubr.msk.f32.gmra.mrb[20].mxu0 %vm26_vm1, %v26116_v49  ;;  %v26123_v49 = vld [vmem:[#allocation36_spill] sm:$0xff] }
 0x2e5   :  { %17090 = vmatprep.mubr.msk.f32.mxu0 %vm26_vm1, %v26117_v8  ;;  %v20937_v8 = vld [vmem:[#allocation2 + $0x18a] sm:$0xff] }
 0x2e6   :  { %26124 = vst [vmem:[#allocation8_spill] sm:$0xff] %v20937_v8 }
 0x2e8   :  { %17091 = vmatmul.mubr.msk.f32.gmra.mrb[22].mxu0 %vm26_vm1, %v26118_v14  ;;  %v26125_v14 = vld [vmem:[#allocation37_spill] sm:$0xff] }
 0x2e9   :  { %17093 = vmatprep.mubr.msk.f32.mxu0 %vm26_vm1, %v26119_v16  ;;  %v26126_v16 = vld [vmem:[#allocation38_spill] sm:$0xff] }
 0x2ec   :  { %17094 = vmatmul.mubr.msk.f32.gmra.mrb[24].mxu0 %vm26_vm1, %v26120_v48  ;;  %v26128_v48 = vld [vmem:[#allocation40_spill] sm:$0xff] }
 0x2ed   :  { %17096 = vmatprep.mubr.msk.f32.mxu0 %vm26_vm1, %v26121_v7  ;;  %v26129_v7 = vld [vmem:[#allocation41_spill] sm:$0xff] }
 0x2f0   :  { %17097 = vmatmul.mubr.msk.f32.gmra.mrb[26].mxu0 %vm26_vm1, %v26122_v9  ;;  %v26130_v9 = vld [vmem:[#allocation42_spill] sm:$0xff] }
 0x2f1   :  { %17099 = vmatprep.mubr.msk.f32.mxu0 %vm26_vm1, %v20326_v1  ;;  %v26127_v1 = vld [vmem:[#allocation39_spill] sm:$0xff] }
 0x2f4   :  { %17100 = vmatmul.mubr.msk.f32.gmra.mrb[28].mxu0 %vm26_vm1, %v26123_v49  ;;  %v26131_v49 = vld [vmem:[#allocation43_spill] sm:$0xff] }
 0x2f5   :  { %17102 = vmatprep.mubr.msk.f32.mxu0 %vm26_vm1, %v20931_v11 }
 0x2f8   :  { %17103 = vmatmul.mubr.msk.f32.gmra.mrb[30].mxu0 %vm26_vm1, %v20937_v8  ;;  %v26132_v8 = vld [vmem:[#allocation44_spill] sm:$0xff] }
 0x2f9   :  { %17105 = vmatprep.mubr.msk.f32.mxu0 %vm26_vm1, %v26125_v14  ;;  %v26133_v14 = vld [vmem:[#allocation45_spill] sm:$0xff] }
 0x2fc   :  { %17106 = vmatmul.mubr.msk.f32.gmra.mrb[32].mxu0 %vm26_vm1, %v26126_v16  ;;  %v26134_v16 = vld [vmem:[#allocation46_spill] sm:$0xff] }
 0x2fd   :  { %17108 = vmatprep.mubr.msk.f32.mxu0 %vm26_vm1, %v26127_v1  ;;  %v26135_v1 = vld [vmem:[#allocation47_spill] sm:$0xff] }
 0x300   :  { %17109 = vmatmul.mubr.msk.f32.gmra.mrb[34].mxu0 %vm26_vm1, %v26128_v48  ;;  %v26136_v48 = vld [vmem:[#allocation48_spill] sm:$0xff] }
 0x301   :  { %17111 = vmatprep.mubr.msk.f32.mxu0 %vm26_vm1, %v26129_v7  ;;  %v26137_v7 = vld [vmem:[#allocation49_spill] sm:$0xff] }
 0x304   :  { %17112 = vmatmul.mubr.msk.f32.gmra.mrb[36].mxu0 %vm26_vm1, %v26130_v9  ;;  %v26138_v9 = vld [vmem:[#allocation50_spill] sm:$0xff] }
 0x305   :  { %17114 = vmatprep.mubr.msk.f32.mxu0 %vm26_vm1, %v26131_v49  ;;  %v26139_v49 = vld [vmem:[#allocation51_spill] sm:$0xff] }
 0x308   :  { %17115 = vmatmul.mubr.msk.f32.gmra.mrb[38].mxu0 %vm26_vm1, %v26132_v8  ;;  %v26140_v8 = vld [vmem:[#allocation52_spill] sm:$0xff] }
 0x309   :  { %17117 = vmatprep.mubr.msk.f32.mxu0 %vm26_vm1, %v26133_v14  ;;  %v26141_v14 = vld [vmem:[#allocation53_spill] sm:$0xff] }
 0x30c   :  { %17118 = vmatmul.mubr.msk.f32.gmra.mrb[40].mxu0 %vm26_vm1, %v26134_v16  ;;  %v26142_v16 = vld [vmem:[#allocation54_spill] sm:$0xff] }
 0x30d   :  { %17120 = vmatprep.mubr.msk.f32.mxu0 %vm26_vm1, %v26135_v1  ;;  %v26143_v1 = vld [vmem:[#allocation55_spill] sm:$0xff] }
 0x310   :  { %17121 = vmatmul.mubr.msk.f32.gmra.mrb[42].mxu0 %vm26_vm1, %v26136_v48  ;;  %v26144_v48 = vld [vmem:[#allocation56_spill] sm:$0xff] }
 0x311   :  { %17123 = vmatprep.mubr.msk.f32.mxu0 %vm26_vm1, %v26137_v7  ;;  %v26145_v7 = vld [vmem:[#allocation57_spill] sm:$0xff] }
 0x314   :  { %17124 = vmatmul.mubr.msk.f32.gmra.mrb[44].mxu0 %vm26_vm1, %v26138_v9  ;;  %v26146_v9 = vld [vmem:[#allocation58_spill] sm:$0xff] }
 0x315   :  { %17126 = vmatprep.mubr.msk.f32.mxu0 %vm26_vm1, %v26139_v49  ;;  %v26147_v49 = vld [vmem:[#allocation59_spill] sm:$0xff] }
 0x318   :  { %17127 = vmatmul.mubr.msk.f32.gmra.mrb[46].mxu0 %vm26_vm1, %v26140_v8  ;;  %v26148_v8 = vld [vmem:[#allocation60_spill] sm:$0xff] }
 0x319   :  { %17129 = vmatprep.mubr.msk.f32.mxu0 %vm26_vm1, %v26141_v14  ;;  %v26149_v14 = vld [vmem:[#allocation61_spill] sm:$0xff] }
 0x31c   :  { %17130 = vmatmul.mubr.msk.f32.gmra.mrb[48].mxu0 %vm26_vm1, %v26142_v16  ;;  %v20999_v16 = vld [vmem:[#allocation2 + $0x332] sm:$0xff] }
 0x31d   :  { %17132 = vmatprep.mubr.msk.f32.mxu0 %vm26_vm1, %v26143_v1  ;;  %v21005_v1 = vld [vmem:[#allocation2 + $0x33a] sm:$0xff] }
 0x320   :  { %17133 = vmatmul.mubr.msk.f32.gmra.mrb[50].mxu0 %vm26_vm1, %v26144_v48  ;;  %v4402_v48 = vld [vmem:[#allocation2 + $0x60] sm:$0xff] }
 0x321   :  { %17135 = vmatprep.mubr.msk.f32.mxu0 %vm26_vm1, %v26145_v7  ;;  %v4403_v7 = vld [vmem:[#allocation2 + $0x68] sm:$0xff] }
 0x324   :  { %17136 = vmatmul.mubr.msk.f32.gmra.mrb[52].mxu0 %vm26_vm1, %v26146_v9  ;;  %v4404_v9 = vld [vmem:[#allocation2 + $0x78] sm:$0xff] }
 0x325   :  { %17138 = vmatprep.mubr.msk.f32.mxu0 %vm26_vm1, %v26147_v49  ;;  %v4405_v49 = vld [vmem:[#allocation2 + $0x80] sm:$0xff] }
 0x328   :  { %17139 = vmatmul.mubr.msk.f32.gmra.mrb[54].mxu0 %vm26_vm1, %v26148_v8  ;;  %v4406_v8 = vld [vmem:[#allocation2 + $0x90] sm:$0xff] }
 0x329   :  { %17141 = vmatprep.mubr.msk.f32.mxu0 %vm26_vm1, %v26149_v14  ;;  %v4408_v14 = vld [vmem:[#allocation2 + $0xa8] sm:$0xff] }
 0x32c   :  { %17142 = vmatmul.mubr.msk.f32.gmra.mrb[56].mxu0 %vm26_vm1, %v20438_v5  ;;  %v4398_v5 = vld [vmem:[#allocation2 + $0x30] sm:$0xff] }
 0x32d   :  { %17144 = vmatprep.mubr.msk.f32.mxu0 %vm26_vm1, %v20440_v2  ;;  %v4399_v2 = vld [vmem:[#allocation2 + $0x38] sm:$0xff] }
 0x330   :  { %17145 = vmatmul.mubr.msk.f32.gmra.mrb[58].mxu0 %vm26_vm1, %v20454_v35  ;;  %v4400_v35 = vld [vmem:[#allocation2 + $0x48] sm:$0xff] }
 0x331   :  { %17147 = vmatprep.mubr.msk.f32.mxu0 %vm26_vm1, %v20456_v3  ;;  %v21013_v3 = vld [vmem:[%s25787_s1 + $0x20] sm:$0xf] }
 0x334   :  { %17148 = vmatmul.mubr.msk.f32.gmra.mrb[60].mxu0 %vm26_vm1, %v20462_v0  ;;  %v4401_v0 = vld [vmem:[#allocation2 + $0x50] sm:$0xff] }
 0x335   :  { %17150 = vmatprep.mubr.msk.f32.mxu0 %vm26_vm1, %v20999_v16 }
 0x338   :  { %17151 = vmatmul.mubr.msk.f32.gmra.mrb[62].mxu0 %vm26_vm1, %v21005_v1 }
 0x339   :  { %17155 = vmatprep.mubr.msk.f32.mxu0 %vm26_vm1, %v4398_v5  ;;  %v4409_v5 = vld [vmem:[#allocation2 + $0xb0] sm:$0xff] }
 0x33c   :  { %17156 = vmatmul.mubr.msk.f32.vlgmr.msra.gmra.mrb[0].mxu0 %vm26_vm1, %v4399_v2  ;;  %v4410_v2 = vld [vmem:[#allocation2 + $0xc0] sm:$0xff] }
 0x33d   :  { %17252 = vmatpush3.msk.msra.mxu0 %vm588_vm0, %v20869_v13  ;;  %17158 = vmatprep.mubr.msk.f32.mxu0 %vm26_vm1, %v4400_v35  ;;  %v4407_v13 = vld [vmem:[#allocation2 + $0x98] sm:$0xff]  ;;  %v4411_v35 = vld [vmem:[#allocation2 + $0xc8] sm:$0xff] }
 0x33e   :  { %17349 = vmatprep.subr.msk.mxu0 %vm588_vm0, %v21013_v3 }
 0x340   :  { %17159 = vmatmul.mubr.msk.f32.gmra.mrb[2].mxu0 %vm26_vm1, %v4401_v0  ;;  %v4412_v0 = vld [vmem:[#allocation2 + $0xd8] sm:$0xff] }
 0x341   :  { %17161 = vmatprep.mubr.msk.f32.mxu0 %vm26_vm1, %v4402_v48  ;;  %v4413_v48 = vld [vmem:[#allocation2 + $0xe0] sm:$0xff] }
 0x344   :  { %17162 = vmatmul.mubr.msk.f32.gmra.mrb[4].mxu0 %vm26_vm1, %v4403_v7  ;;  %v4414_v7 = vld [vmem:[#allocation2 + $0xf0] sm:$0xff] }
 0x345   :  { %17164 = vmatprep.mubr.msk.f32.mxu0 %vm26_vm1, %v4404_v9  ;;  %v4415_v9 = vld [vmem:[#allocation2 + $0xf8] sm:$0xff] }
 0x348   :  { %17165 = vmatmul.mubr.msk.f32.gmra.mrb[6].mxu0 %vm26_vm1, %v4405_v49  ;;  %v4416_v49 = vld [vmem:[#allocation2 + $0x108] sm:$0xff] }
 0x349   :  { %17167 = vmatprep.mubr.msk.f32.mxu0 %vm26_vm1, %v4406_v8  ;;  %v4417_v8 = vld [vmem:[#allocation2 + $0x110] sm:$0xff] }
 0x34c   :  { %17168 = vmatmul.mubr.msk.f32.gmra.mrb[8].mxu0 %vm26_vm1, %v4407_v13  ;;  %v4418_v13 = vld [vmem:[#allocation2 + $0x120] sm:$0xff] }
 0x34d   :  { %17170 = vmatprep.mubr.msk.f32.mxu0 %vm26_vm1, %v4408_v14  ;;  %v4419_v14 = vld [vmem:[#allocation2 + $0x128] sm:$0xff] }
 0x350   :  { %17171 = vmatmul.mubr.msk.f32.gmra.mrb[10].mxu0 %vm26_vm1, %v4409_v5  ;;  %v4420_v5 = vld [vmem:[#allocation2 + $0x138] sm:$0xff] }
 0x351   :  { %17173 = vmatprep.mubr.msk.f32.mxu0 %vm26_vm1, %v4410_v2  ;;  %v4421_v2 = vld [vmem:[#allocation2 + $0x140] sm:$0xff] }
 0x354   :  { %17174 = vmatmul.mubr.msk.f32.gmra.mrb[12].mxu0 %vm26_vm1, %v4411_v35  ;;  %v4422_v35 = vld [vmem:[#allocation2 + $0x150] sm:$0xff] }
 0x355   :  { %17176 = vmatprep.mubr.msk.f32.mxu0 %vm26_vm1, %v4412_v0  ;;  %v4423_v0 = vld [vmem:[#allocation2 + $0x158] sm:$0xff] }
 0x358   :  { %17177 = vmatmul.mubr.msk.f32.gmra.mrb[14].mxu0 %vm26_vm1, %v4413_v48  ;;  %v4424_v48 = vld [vmem:[#allocation2 + $0x168] sm:$0xff] }
 0x359   :  { %17179 = vmatprep.mubr.msk.f32.mxu0 %vm26_vm1, %v4414_v7  ;;  %v4425_v7 = vld [vmem:[#allocation2 + $0x170] sm:$0xff] }
 0x35c   :  { %17180 = vmatmul.mubr.msk.f32.gmra.mrb[16].mxu0 %vm26_vm1, %v4415_v9  ;;  %v4428_v9 = vld [vmem:[#allocation2 + $0x198] sm:$0xff] }
 0x35d   :  { %17182 = vmatprep.mubr.msk.f32.mxu0 %vm26_vm1, %v4416_v49  ;;  %v4429_v49 = vld [vmem:[#allocation2 + $0x1a0] sm:$0xff] }
 0x360   :  { %17183 = vmatmul.mubr.msk.f32.gmra.mrb[18].mxu0 %vm26_vm1, %v4417_v8  ;;  %v4430_v8 = vld [vmem:[#allocation2 + $0x1e0] sm:$0xff] }
 0x361   :  { %17185 = vmatprep.mubr.msk.f32.mxu0 %vm26_vm1, %v4418_v13  ;;  %v4431_v13 = vld [vmem:[#allocation2 + $0x1e8] sm:$0xff] }
 0x364   :  { %17186 = vmatmul.mubr.msk.f32.gmra.mrb[20].mxu0 %vm26_vm1, %v4419_v14  ;;  %v4432_v14 = vld [vmem:[#allocation2 + $0x1f8] sm:$0xff] }
 0x365   :  { %17188 = vmatprep.mubr.msk.f32.mxu0 %vm26_vm1, %v4420_v5  ;;  %v4433_v5 = vld [vmem:[#allocation2 + $0x200] sm:$0xff] }
 0x368   :  { %17189 = vmatmul.mubr.msk.f32.gmra.mrb[22].mxu0 %vm26_vm1, %v4421_v2  ;;  %v4436_v2 = vld [vmem:[#allocation2 + $0x228] sm:$0xff] }
 0x369   :  { %17191 = vmatprep.mubr.msk.f32.mxu0 %vm26_vm1, %v4422_v35  ;;  %v4437_v35 = vld [vmem:[#allocation2 + $0x230] sm:$0xff] }
 0x36c   :  { %17192 = vmatmul.mubr.msk.f32.gmra.mrb[24].mxu0 %vm26_vm1, %v4423_v0  ;;  %v4438_v0 = vld [vmem:[#allocation2 + $0x240] sm:$0xff] }
 0x36d   :  { %17194 = vmatprep.mubr.msk.f32.mxu0 %vm26_vm1, %v4424_v48  ;;  %v4439_v48 = vld [vmem:[#allocation2 + $0x248] sm:$0xff] }
 0x370   :  { %17195 = vmatmul.mubr.msk.f32.gmra.mrb[26].mxu0 %vm26_vm1, %v4425_v7  ;;  %v4440_v7 = vld [vmem:[#allocation2 + $0x258] sm:$0xff] }
 0x371   :  { %17197 = vmatprep.mubr.msk.f32.mxu0 %vm26_vm1, %v20533_v4  ;;  %v4434_v4 = vld [vmem:[#allocation2 + $0x210] sm:$0xff] }
 0x374   :  { %17198 = vmatmul.mubr.msk.f32.gmra.mrb[28].mxu0 %vm26_vm1, %v20539_v6  ;;  %v4435_v6 = vld [vmem:[#allocation2 + $0x218] sm:$0xff] }
 0x375   :  { %17200 = vmatprep.mubr.msk.f32.mxu0 %vm26_vm1, %v4428_v9  ;;  %v4441_v9 = vld [vmem:[#allocation2 + $0x260] sm:$0xff] }
 0x378   :  { %17201 = vmatmul.mubr.msk.f32.gmra.mrb[30].mxu0 %vm26_vm1, %v4429_v49  ;;  %v4442_v49 = vld [vmem:[#allocation2 + $0x270] sm:$0xff] }
 0x379   :  { %17203 = vmatprep.mubr.msk.f32.mxu0 %vm26_vm1, %v4430_v8  ;;  %v4443_v8 = vld [vmem:[#allocation2 + $0x278] sm:$0xff] }
 0x37c   :  { %17204 = vmatmul.mubr.msk.f32.gmra.mrb[32].mxu0 %vm26_vm1, %v4431_v13  ;;  %v4444_v13 = vld [vmem:[#allocation2 + $0x288] sm:$0xff] }
 0x37d   :  { %17206 = vmatprep.mubr.msk.f32.mxu0 %vm26_vm1, %v4432_v14  ;;  %v4445_v14 = vld [vmem:[#allocation2 + $0x290] sm:$0xff] }
 0x380   :  { %17207 = vmatmul.mubr.msk.f32.gmra.mrb[34].mxu0 %vm26_vm1, %v4433_v5  ;;  %v4446_v5 = vld [vmem:[#allocation2 + $0x2a0] sm:$0xff] }
 0x381   :  { %17209 = vmatprep.mubr.msk.f32.mxu0 %vm26_vm1, %v4434_v4  ;;  %v4447_v4 = vld [vmem:[#allocation2 + $0x2a8] sm:$0xff] }
 0x384   :  { %17210 = vmatmul.mubr.msk.f32.gmra.mrb[36].mxu0 %vm26_vm1, %v4435_v6  ;;  %v4448_v6 = vld [vmem:[#allocation2 + $0x2b8] sm:$0xff] }
 0x385   :  { %17212 = vmatprep.mubr.msk.f32.mxu0 %vm26_vm1, %v4436_v2  ;;  %v4449_v2 = vld [vmem:[#allocation2 + $0x2c0] sm:$0xff] }
 0x388   :  { %17213 = vmatmul.mubr.msk.f32.gmra.mrb[38].mxu0 %vm26_vm1, %v4437_v35  ;;  %v4450_v35 = vld [vmem:[#allocation2 + $0x2d0] sm:$0xff] }
 0x389   :  { %17215 = vmatprep.mubr.msk.f32.mxu0 %vm26_vm1, %v4438_v0  ;;  %v4451_v0 = vld [vmem:[#allocation2 + $0x2d8] sm:$0xff] }
 0x38c   :  { %17216 = vmatmul.mubr.msk.f32.gmra.mrb[40].mxu0 %vm26_vm1, %v4439_v48  ;;  %v4452_v48 = vld [vmem:[#allocation2 + $0x2e8] sm:$0xff] }
 0x38d   :  { %17218 = vmatprep.mubr.msk.f32.mxu0 %vm26_vm1, %v4440_v7  ;;  %v4453_v7 = vld [vmem:[#allocation2 + $0x2f0] sm:$0xff] }
 0x390   :  { %17219 = vmatmul.mubr.msk.f32.gmra.mrb[42].mxu0 %vm26_vm1, %v4441_v9  ;;  %v4454_v9 = vld [vmem:[#allocation2 + $0x300] sm:$0xff] }
 0x391   :  { %17221 = vmatprep.mubr.msk.f32.mxu0 %vm26_vm1, %v4442_v49  ;;  %v4455_v49 = vld [vmem:[#allocation2 + $0x308] sm:$0xff] }
 0x394   :  { %17222 = vmatmul.mubr.msk.f32.gmra.mrb[44].mxu0 %vm26_vm1, %v4443_v8  ;;  %v4456_v8 = vld [vmem:[#allocation2 + $0x318] sm:$0xff] }
 0x395   :  { %17224 = vmatprep.mubr.msk.f32.mxu0 %vm26_vm1, %v4444_v13  ;;  %v4457_v13 = vld [vmem:[#allocation2 + $0x320] sm:$0xff] }
 0x398   :  { %17225 = vmatmul.mubr.msk.f32.gmra.mrb[46].mxu0 %vm26_vm1, %v4445_v14  ;;  %v4460_v14 = vld [vmem:[#allocation2 + $0x348] sm:$0xff] }
 0x399   :  { %17227 = vmatprep.mubr.msk.f32.mxu0 %vm26_vm1, %v4446_v5  ;;  %v4461_v5 = vld [vmem:[#allocation2 + $0x350] sm:$0xff] }
 0x39c   :  { %17228 = vmatmul.mubr.msk.f32.gmra.mrb[48].mxu0 %vm26_vm1, %v4447_v4  ;;  %v26165_v4 = vld [vmem:[#allocation8_spill] sm:$0xff] }
 0x39d   :  { %17230 = vmatprep.mubr.msk.f32.mxu0 %vm26_vm1, %v4448_v6  ;;  %v5849_v6 = vld [vmem:[#allocation2 + $0x1a2] sm:$0xff] }
 0x3a0   :  { %17231 = vmatmul.mubr.msk.f32.gmra.mrb[50].mxu0 %vm26_vm1, %v4449_v2  ;;  %v5850_v2 = vld [vmem:[#allocation2 + $0x1e2] sm:$0xff] }
 0x3a1   :  { %17233 = vmatprep.mubr.msk.f32.mxu0 %vm26_vm1, %v4450_v35  ;;  %v5851_v35 = vld [vmem:[#allocation2 + $0x1ea] sm:$0xff] }
 0x3a4   :  { %17234 = vmatmul.mubr.msk.f32.gmra.mrb[52].mxu0 %vm26_vm1, %v4451_v0  ;;  %v5852_v0 = vld [vmem:[#allocation2 + $0x1fa] sm:$0xff] }
 0x3a5   :  { %17236 = vmatprep.mubr.msk.f32.mxu0 %vm26_vm1, %v4452_v48  ;;  %v5853_v48 = vld [vmem:[#allocation2 + $0x202] sm:$0xff] }
 0x3a8   :  { %17237 = vmatmul.mubr.msk.f32.gmra.mrb[54].mxu0 %vm26_vm1, %v4453_v7  ;;  %v5855_v7 = vld [vmem:[#allocation2 + $0x21a] sm:$0xff] }
 0x3a9   :  { %17239 = vmatprep.mubr.msk.f32.mxu0 %vm26_vm1, %v4454_v9  ;;  %v5856_v9 = vld [vmem:[#allocation2 + $0x22a] sm:$0xff] }
 0x3ac   :  { %17240 = vmatmul.mubr.msk.f32.gmra.mrb[56].mxu0 %vm26_vm1, %v4455_v49  ;;  %v5857_v49 = vld [vmem:[#allocation2 + $0x232] sm:$0xff] }
 0x3ad   :  { %17242 = vmatprep.mubr.msk.f32.mxu0 %vm26_vm1, %v4456_v8  ;;  %v5858_v8 = vld [vmem:[#allocation2 + $0x242] sm:$0xff] }
 0x3b0   :  { %17243 = vmatmul.mubr.msk.f32.gmra.mrb[58].mxu0 %vm26_vm1, %v4457_v13  ;;  %v5859_v13 = vld [vmem:[#allocation2 + $0x24a] sm:$0xff] }
 0x3b1   :  { %17245 = vmatprep.mubr.msk.f32.mxu0 %vm26_vm1, %v20601_v10  ;;  %v5138_v10 = vld [vmem:[#allocation2 + $0x199] sm:$0xff] }
 0x3b4   :  { %17246 = vmatmul.mubr.msk.f32.gmra.mrb[60].mxu0 %vm26_vm1, %v20607_v12  ;;  %v5139_v12 = vld [vmem:[#allocation2 + $0x1a1] sm:$0xff] }
 0x3b5   :  { %17248 = vmatprep.mubr.msk.f32.mxu0 %vm26_vm1, %v4460_v14  ;;  %v5860_v14 = vld [vmem:[#allocation2 + $0x25a] sm:$0xff] }
 0x3b8   :  { %17249 = vmatmul.mubr.msk.f32.gmra.mrb[62].mxu0 %vm26_vm1, %v4461_v5  ;;  %v5861_v5 = vld [vmem:[#allocation2 + $0x262] sm:$0xff] }
 0x3b9   :  { %17253 = vmatprep.mubr.msk.f32.mxu0 %vm26_vm1, %v20612_v15  ;;  %v26150_v15 = vld [vmem:[#allocation4_spill] sm:$0xff] }
 0x3bc   :  { %17254 = vmatmul.mubr.msk.f32.vlgmr.msra.gmra.mrb[0].mxu0 %vm26_vm1, %v20624_v17  ;;  %v26151_v17 = vld [vmem:[#allocation5_spill] sm:$0xff] }
 0x3bd   :  { %17350 = vmatpush3.msk.msra.mxu0 %vm588_vm0, %v21013_v3  ;;  %17256 = vmatprep.mubr.msk.f32.mxu0 %vm26_vm1, %v20626_v18  ;;  %v26152_v18 = vld [vmem:[#allocation6_spill] sm:$0xff]  ;;  %v5848_v3 = vld [vmem:[#allocation2 + $0x19a] sm:$0xff] }
 0x3c0   :  { %17257 = vmatmul.mubr.msk.f32.gmra.mrb[2].mxu0 %vm26_vm1, %v20634_v19  ;;  %v26153_v19 = vld [vmem:[#allocation7_spill] sm:$0xff] }
 0x3c1   :  { %17259 = vmatprep.mubr.msk.f32.mxu0 %vm26_vm1, %v20636_v20  ;;  %v26154_v20 = vld [vmem:[#allocation62_spill] sm:$0xff] }
 0x3c4   :  { %17260 = vmatmul.mubr.msk.f32.gmra.mrb[4].mxu0 %vm26_vm1, %v20642_v21  ;;  %v26155_v21 = vld [vmem:[#allocation63_spill] sm:$0xff] }
 0x3c5   :  { %17262 = vmatprep.mubr.msk.f32.mxu0 %vm26_vm1, %v20644_v22  ;;  %v26156_v22 = vld [vmem:[#allocation64_spill] sm:$0xff] }
 0x3c8   :  { %17263 = vmatmul.mubr.msk.f32.gmra.mrb[6].mxu0 %vm26_vm1, %v20650_v23  ;;  %v26157_v23 = vld [vmem:[#allocation65_spill] sm:$0xff] }
 0x3c9   :  { %17265 = vmatprep.mubr.msk.f32.mxu0 %vm26_vm1, %v20652_v24  ;;  %v26158_v24 = vld [vmem:[#allocation66_spill] sm:$0xff] }
 0x3cc   :  { %17266 = vmatmul.mubr.msk.f32.gmra.mrb[8].mxu0 %vm26_vm1, %v20658_v25  ;;  %v26159_v25 = vld [vmem:[#allocation67_spill] sm:$0xff] }
 0x3cd   :  { %17268 = vmatprep.mubr.msk.f32.mxu0 %vm26_vm1, %v20660_v26  ;;  %v26160_v26 = vld [vmem:[#allocation68_spill] sm:$0xff] }
 0x3d0   :  { %17269 = vmatmul.mubr.msk.f32.gmra.mrb[10].mxu0 %vm26_vm1, %v20666_v27  ;;  %v26161_v27 = vld [vmem:[#allocation69_spill] sm:$0xff] }
 0x3d1   :  { %17271 = vmatprep.mubr.msk.f32.mxu0 %vm26_vm1, %v20668_v28  ;;  %v26162_v28 = vld [vmem:[#allocation70_spill] sm:$0xff] }
 0x3d4   :  { %17272 = vmatmul.mubr.msk.f32.gmra.mrb[12].mxu0 %vm26_vm1, %v20674_v29  ;;  %v26163_v29 = vld [vmem:[#allocation71_spill] sm:$0xff] }
 0x3d5   :  { %17274 = vmatprep.mubr.msk.f32.mxu0 %vm26_vm1, %v20676_v30  ;;  %v5170_v30 = vld [vmem:[#allocation2 + $0x349] sm:$0xff] }
 0x3d8   :  { %17275 = vmatmul.mubr.msk.f32.gmra.mrb[14].mxu0 %vm26_vm1, %v20682_v31  ;;  %v26164_v31 = vld [vmem:[#allocation72_spill] sm:$0xff] }
 0x3d9   :  { %17277 = vmatprep.mubr.msk.f32.mxu0 %vm26_vm1, %v20684_v32  ;;  %v5171_v32 = vld [vmem:[#allocation2 + $0x351] sm:$0xff] }
 0x3dc   :  { %17278 = vmatmul.mubr.msk.f32.gmra.mrb[16].mxu0 %vm26_vm1, %v20690_v33  ;;  %v5818_v33 = vld [vmem:[#allocation2 + $0x32] sm:$0xff] }
 0x3dd   :  { %17280 = vmatprep.mubr.msk.f32.mxu0 %vm26_vm1, %v20692_v34  ;;  %v5819_v34 = vld [vmem:[#allocation2 + $0x3a] sm:$0xff] }
 0x3e0   :  { %17281 = vmatmul.mubr.msk.f32.gmra.mrb[18].mxu0 %vm26_vm1, %v20698_v37  ;;  %v5820_v37 = vld [vmem:[#allocation2 + $0x4a] sm:$0xff] }
 0x3e1   :  { %17283 = vmatprep.mubr.msk.f32.mxu0 %vm26_vm1, %v20700_v38  ;;  %v5821_v38 = vld [vmem:[#allocation2 + $0x52] sm:$0xff] }
 0x3e4   :  { %17284 = vmatmul.mubr.msk.f32.gmra.mrb[20].mxu0 %vm26_vm1, %v20706_v39  ;;  %v5822_v39 = vld [vmem:[#allocation2 + $0x62] sm:$0xff] }
 0x3e5   :  { %17286 = vmatprep.mubr.msk.f32.mxu0 %vm26_vm1, %v20708_v40  ;;  %v5823_v40 = vld [vmem:[#allocation2 + $0x6a] sm:$0xff] }
 0x3e8   :  { %17287 = vmatmul.mubr.msk.f32.gmra.mrb[22].mxu0 %vm26_vm1, %v20714_v41  ;;  %v5824_v41 = vld [vmem:[#allocation2 + $0x7a] sm:$0xff] }
 0x3e9   :  { %17289 = vmatprep.mubr.msk.f32.mxu0 %vm26_vm1, %v20716_v42  ;;  %v5825_v42 = vld [vmem:[#allocation2 + $0x82] sm:$0xff] }
 0x3ec   :  { %17290 = vmatmul.mubr.msk.f32.gmra.mrb[24].mxu0 %vm26_vm1, %v20722_v43  ;;  %v5826_v43 = vld [vmem:[#allocation2 + $0x92] sm:$0xff] }
 0x3ed   :  { %17292 = vmatprep.mubr.msk.f32.mxu0 %vm26_vm1, %v20724_v44  ;;  %v5827_v44 = vld [vmem:[#allocation2 + $0x9a] sm:$0xff] }
 0x3f0   :  { %17293 = vmatmul.mubr.msk.f32.gmra.mrb[26].mxu0 %vm26_vm1, %v20730_v45  ;;  %v5828_v45 = vld [vmem:[#allocation2 + $0xaa] sm:$0xff] }
 0x3f1   :  { %17295 = vmatprep.mubr.msk.f32.mxu0 %vm26_vm1, %v20732_v46  ;;  %v5829_v46 = vld [vmem:[#allocation2 + $0xb2] sm:$0xff] }
 0x3f4   :  { %17296 = vmatmul.mubr.msk.f32.gmra.mrb[28].mxu0 %vm26_vm1, %v20738_v47  ;;  %v5830_v47 = vld [vmem:[#allocation2 + $0xc2] sm:$0xff] }
 0x3f5   :  { %17298 = vmatprep.mubr.msk.f32.mxu0 %vm26_vm1, %v5138_v10  ;;  %v21257_v10 = vld [vmem:[#allocation2 + $0x272] sm:$0xff] }
 0x3f8   :  { %17299 = vmatmul.mubr.msk.f32.gmra.mrb[30].mxu0 %vm26_vm1, %v5139_v12  ;;  %v26166_v12 = vmov 0.0  }
 0x3f9   :  { %17301 = vmatprep.mubr.msk.f32.mxu0 %vm26_vm1, %v20743_v50  ;;  %v5831_v50 = vld [vmem:[#allocation2 + $0xca] sm:$0xff]  ;;  %7139 = vst.msk [vmem:[#allocation3 + $0x20] sm:$0xff] %vm6530_vm3, %v26166_v12  ;;  %7134 = vst.msk [vmem:[#allocation3] sm:$0xff] %vm6530_vm3, %v26166_v12 }
 0x3fa   :  { %7135 = vst.msk [vmem:[#allocation3 + $0x8] sm:$0xff] %vm6530_vm3, %v26166_v12  ;;  %7138 = vst.msk [vmem:[#allocation3 + $0x18] sm:$0xff] %vm6530_vm3, %v26166_v12 }
 0x3fb   :  { %7141 = vst.msk [vmem:[#allocation3 + $0x30] sm:$0xff] %vm6530_vm3, %v26166_v12  ;;  %7142 = vst.msk [vmem:[#allocation3 + $0x38] sm:$0xff] %vm6530_vm3, %v26166_v12 }
 0x3fc   :  { %17302 = vmatmul.mubr.msk.f32.gmra.mrb[32].mxu0 %vm26_vm1, %v20748_v51  ;;  %v5832_v51 = vld [vmem:[#allocation2 + $0xda] sm:$0xff]  ;;  %7144 = vst.msk [vmem:[#allocation3 + $0x48] sm:$0xff] %vm6530_vm3, %v26166_v12  ;;  %7145 = vst.msk [vmem:[#allocation3 + $0x50] sm:$0xff] %vm6530_vm3, %v26166_v12 }
 0x3fd   :  { %17304 = vmatprep.mubr.msk.f32.mxu0 %vm26_vm1, %v20750_v52  ;;  %v5833_v52 = vld [vmem:[#allocation2 + $0xe2] sm:$0xff]  ;;  %7147 = vst.msk [vmem:[#allocation3 + $0x60] sm:$0xff] %vm6530_vm3, %v26166_v12  ;;  %7148 = vst.msk [vmem:[#allocation3 + $0x68] sm:$0xff] %vm6530_vm3, %v26166_v12 }
 0x3fe   :  { %7150 = vst.msk [vmem:[#allocation3 + $0x78] sm:$0xff] %vm6530_vm3, %v26166_v12  ;;  %7151 = vst.msk [vmem:[#allocation3 + $0x80] sm:$0xff] %vm6530_vm3, %v26166_v12 }
 0x3ff   :  { %7153 = vst.msk [vmem:[#allocation3 + $0x90] sm:$0xff] %vm6530_vm3, %v26166_v12  ;;  %7154 = vst.msk [vmem:[#allocation3 + $0x98] sm:$0xff] %vm6530_vm3, %v26166_v12 }
 0x400   :  { %17305 = vmatmul.mubr.msk.f32.gmra.mrb[34].mxu0 %vm26_vm1, %v20756_v53  ;;  %v5834_v53 = vld [vmem:[#allocation2 + $0xf2] sm:$0xff]  ;;  %7156 = vst.msk [vmem:[#allocation3 + $0xa8] sm:$0xff] %vm6530_vm3, %v26166_v12  ;;  %7157 = vst.msk [vmem:[#allocation3 + $0xb0] sm:$0xff] %vm6530_vm3, %v26166_v12 }
 0x401   :  { %17307 = vmatprep.mubr.msk.f32.mxu0 %vm26_vm1, %v20758_v54  ;;  %v5835_v54 = vld [vmem:[#allocation2 + $0xfa] sm:$0xff]  ;;  %7159 = vst.msk [vmem:[#allocation3 + $0xc0] sm:$0xff] %vm6530_vm3, %v26166_v12  ;;  %7160 = vst.msk [vmem:[#allocation3 + $0xc8] sm:$0xff] %vm6530_vm3, %v26166_v12 }
 0x402   :  { %7162 = vst.msk [vmem:[#allocation3 + $0xd8] sm:$0xff] %vm6530_vm3, %v26166_v12  ;;  %7163 = vst.msk [vmem:[#allocation3 + $0xe0] sm:$0xff] %vm6530_vm3, %v26166_v12 }
 0x403   :  { %7165 = vst.msk [vmem:[#allocation3 + $0xf0] sm:$0xff] %vm6530_vm3, %v26166_v12  ;;  %7166 = vst.msk [vmem:[#allocation3 + $0xf8] sm:$0xff] %vm6530_vm3, %v26166_v12 }
 0x404   :  { %17308 = vmatmul.mubr.msk.f32.gmra.mrb[36].mxu0 %vm26_vm1, %v20764_v55  ;;  %v5836_v55 = vld [vmem:[#allocation2 + $0x10a] sm:$0xff]  ;;  %7168 = vst.msk [vmem:[#allocation3 + $0x108] sm:$0xff] %vm6530_vm3, %v26166_v12  ;;  %7169 = vst.msk [vmem:[#allocation3 + $0x110] sm:$0xff] %vm6530_vm3, %v26166_v12 }
 0x405   :  { %17310 = vmatprep.mubr.msk.f32.mxu0 %vm26_vm1, %v20766_v56  ;;  %v5837_v56 = vld [vmem:[#allocation2 + $0x112] sm:$0xff]  ;;  %7171 = vst.msk [vmem:[#allocation3 + $0x120] sm:$0xff] %vm6530_vm3, %v26166_v12  ;;  %7172 = vst.msk [vmem:[#allocation3 + $0x128] sm:$0xff] %vm6530_vm3, %v26166_v12 }
 0x406   :  { %7174 = vst.msk [vmem:[#allocation3 + $0x138] sm:$0xff] %vm6530_vm3, %v26166_v12  ;;  %7175 = vst.msk [vmem:[#allocation3 + $0x140] sm:$0xff] %vm6530_vm3, %v26166_v12 }
 0x407   :  { %7177 = vst.msk [vmem:[#allocation3 + $0x150] sm:$0xff] %vm6530_vm3, %v26166_v12  ;;  %7178 = vst.msk [vmem:[#allocation3 + $0x158] sm:$0xff] %vm6530_vm3, %v26166_v12 }
 0x408   :  { %17311 = vmatmul.mubr.msk.f32.gmra.mrb[38].mxu0 %vm26_vm1, %v20772_v57  ;;  %v5838_v57 = vld [vmem:[#allocation2 + $0x122] sm:$0xff]  ;;  %7180 = vst.msk [vmem:[#allocation3 + $0x168] sm:$0xff] %vm6530_vm3, %v26166_v12  ;;  %7181 = vst.msk [vmem:[#allocation3 + $0x170] sm:$0xff] %vm6530_vm3, %v26166_v12 }
 0x409   :  { %17313 = vmatprep.mubr.msk.f32.mxu0 %vm26_vm1, %v20774_v58  ;;  %v5839_v58 = vld [vmem:[#allocation2 + $0x12a] sm:$0xff]  ;;  %7183 = vst.msk [vmem:[#allocation3 + $0x180] sm:$0xff] %vm6530_vm3, %v26166_v12  ;;  %7184 = vst.msk [vmem:[#allocation3 + $0x188] sm:$0xff] %vm6530_vm3, %v26166_v12 }
 0x40a   :  { %7186 = vst.msk [vmem:[#allocation3 + $0x198] sm:$0xff] %vm6530_vm3, %v26166_v12  ;;  %7187 = vst.msk [vmem:[#allocation3 + $0x1a0] sm:$0xff] %vm6530_vm3, %v26166_v12 }
 0x40b   :  { %7189 = vst.msk [vmem:[#allocation3 + $0x1b0] sm:$0xff] %vm6530_vm3, %v26166_v12  ;;  %7190 = vst.msk [vmem:[#allocation3 + $0x1b8] sm:$0xff] %vm6530_vm3, %v26166_v12 }
 0x40c   :  { %17314 = vmatmul.mubr.msk.f32.gmra.mrb[40].mxu0 %vm26_vm1, %v20780_v59  ;;  %v5840_v59 = vld [vmem:[#allocation2 + $0x13a] sm:$0xff]  ;;  %7192 = vst.msk [vmem:[#allocation3 + $0x1c8] sm:$0xff] %vm6530_vm3, %v26166_v12  ;;  %7193 = vst.msk [vmem:[#allocation3 + $0x1d0] sm:$0xff] %vm6530_vm3, %v26166_v12 }
 0x40d   :  { %17316 = vmatprep.mubr.msk.f32.mxu0 %vm26_vm1, %v20782_v60  ;;  %v5841_v60 = vld [vmem:[#allocation2 + $0x142] sm:$0xff]  ;;  %7195 = vst.msk [vmem:[#allocation3 + $0x1e0] sm:$0xff] %vm6530_vm3, %v26166_v12  ;;  %7196 = vst.msk [vmem:[#allocation3 + $0x1e8] sm:$0xff] %vm6530_vm3, %v26166_v12 }
 0x40e   :  { %7198 = vst.msk [vmem:[#allocation3 + $0x1f8] sm:$0xff] %vm6530_vm3, %v26166_v12  ;;  %7199 = vst.msk [vmem:[#allocation3 + $0x200] sm:$0xff] %vm6530_vm3, %v26166_v12 }
 0x40f   :  { %7201 = vst.msk [vmem:[#allocation3 + $0x210] sm:$0xff] %vm6530_vm3, %v26166_v12  ;;  %7202 = vst.msk [vmem:[#allocation3 + $0x218] sm:$0xff] %vm6530_vm3, %v26166_v12 }
 0x410   :  { %17317 = vmatmul.mubr.msk.f32.gmra.mrb[42].mxu0 %vm26_vm1, %v20788_v61  ;;  %v5842_v61 = vld [vmem:[#allocation2 + $0x152] sm:$0xff]  ;;  %7204 = vst.msk [vmem:[#allocation3 + $0x228] sm:$0xff] %vm6530_vm3, %v26166_v12  ;;  %7205 = vst.msk [vmem:[#allocation3 + $0x230] sm:$0xff] %vm6530_vm3, %v26166_v12 }
 0x411   :  { %17319 = vmatprep.mubr.msk.f32.mxu0 %vm26_vm1, %v20790_v62  ;;  %v5843_v62 = vld [vmem:[#allocation2 + $0x15a] sm:$0xff]  ;;  %7207 = vst.msk [vmem:[#allocation3 + $0x240] sm:$0xff] %vm6530_vm3, %v26166_v12  ;;  %7208 = vst.msk [vmem:[#allocation3 + $0x248] sm:$0xff] %vm6530_vm3, %v26166_v12 }
 0x412   :  { %7210 = vst.msk [vmem:[#allocation3 + $0x258] sm:$0xff] %vm6530_vm3, %v26166_v12  ;;  %7211 = vst.msk [vmem:[#allocation3 + $0x260] sm:$0xff] %vm6530_vm3, %v26166_v12 }
 0x413   :  { %7213 = vst.msk [vmem:[#allocation3 + $0x270] sm:$0xff] %vm6530_vm3, %v26166_v12  ;;  %7214 = vst.msk [vmem:[#allocation3 + $0x278] sm:$0xff] %vm6530_vm3, %v26166_v12 }
 0x414   :  { %17320 = vmatmul.mubr.msk.f32.gmra.mrb[44].mxu0 %vm26_vm1, %v20796_v63  ;;  %v5844_v63 = vld [vmem:[#allocation2 + $0x16a] sm:$0xff]  ;;  %7216 = vst.msk [vmem:[#allocation3 + $0x288] sm:$0xff] %vm6530_vm3, %v26166_v12  ;;  %7217 = vst.msk [vmem:[#allocation3 + $0x290] sm:$0xff] %vm6530_vm3, %v26166_v12 }
 0x415   :  { %17322 = vmatprep.mubr.msk.f32.mxu0 %vm26_vm1, %v20798_v36  ;;  %v5845_v36 = vld [vmem:[#allocation2 + $0x172] sm:$0xff]  ;;  %7219 = vst.msk [vmem:[#allocation3 + $0x2a0] sm:$0xff] %vm6530_vm3, %v26166_v12  ;;  %7220 = vst.msk [vmem:[#allocation3 + $0x2a8] sm:$0xff] %vm6530_vm3, %v26166_v12 }
 0x416   :  { %7222 = vst.msk [vmem:[#allocation3 + $0x2b8] sm:$0xff] %vm6530_vm3, %v26166_v12  ;;  %7223 = vst.msk [vmem:[#allocation3 + $0x2c0] sm:$0xff] %vm6530_vm3, %v26166_v12 }
 0x417   :  { %7225 = vst.msk [vmem:[#allocation3 + $0x2d0] sm:$0xff] %vm6530_vm3, %v26166_v12  ;;  %7226 = vst.msk [vmem:[#allocation3 + $0x2d8] sm:$0xff] %vm6530_vm3, %v26166_v12 }
 0x418   :  { %17323 = vmatmul.mubr.msk.f32.gmra.mrb[46].mxu0 %vm26_vm1, %v26150_v15  ;;  %7228 = vst.msk [vmem:[#allocation3 + $0x2e8] sm:$0xff] %vm6530_vm3, %v26166_v12  ;;  %7229 = vst.msk [vmem:[#allocation3 + $0x2f0] sm:$0xff] %vm6530_vm3, %v26166_v12  ;;  %v5863_v15 = vld [vmem:[#allocation2 + $0x27a] sm:$0xff] }
 0x419   :  { %17325 = vmatprep.mubr.msk.f32.mxu0 %vm26_vm1, %v26151_v17  ;;  %7231 = vst.msk [vmem:[#allocation3 + $0x300] sm:$0xff] %vm6530_vm3, %v26166_v12  ;;  %7232 = vst.msk [vmem:[#allocation3 + $0x308] sm:$0xff] %vm6530_vm3, %v26166_v12  ;;  %v5864_v17 = vld [vmem:[#allocation2 + $0x28a] sm:$0xff] }
 0x41a   :  { %7234 = vst.msk [vmem:[#allocation3 + $0x318] sm:$0xff] %vm6530_vm3, %v26166_v12  ;;  %7235 = vst.msk [vmem:[#allocation3 + $0x320] sm:$0xff] %vm6530_vm3, %v26166_v12 }
 0x41b   :  { %7237 = vst.msk [vmem:[#allocation3 + $0x330] sm:$0xff] %vm6530_vm3, %v26166_v12  ;;  %7238 = vst.msk [vmem:[#allocation3 + $0x338] sm:$0xff] %vm6530_vm3, %v26166_v12 }
 0x41c   :  { %17326 = vmatmul.mubr.msk.f32.gmra.mrb[48].mxu0 %vm26_vm1, %v26152_v18  ;;  %7240 = vst.msk [vmem:[#allocation3 + $0x348] sm:$0xff] %vm6530_vm3, %v26166_v12  ;;  %7241 = vst.msk [vmem:[#allocation3 + $0x350] sm:$0xff] %vm6530_vm3, %v26166_v12  ;;  %v5865_v18 = vld [vmem:[#allocation2 + $0x292] sm:$0xff] }
 0x41d   :  { %17328 = vmatprep.mubr.msk.f32.mxu0 %vm26_vm1, %v26153_v19  ;;  %7140 = vst.msk [vmem:[#allocation3 + $0x28] sm:$0x3] %vm7136_vm4, %v26166_v12  ;;  %7137 = vst.msk [vmem:[#allocation3 + $0x10] sm:$0x3] %vm7136_vm4, %v26166_v12  ;;  %v5866_v19 = vld [vmem:[#allocation2 + $0x2a2] sm:$0xff] }
 0x41e   :  { %7143 = vst.msk [vmem:[#allocation3 + $0x40] sm:$0x3] %vm7136_vm4, %v26166_v12  ;;  %7146 = vst.msk [vmem:[#allocation3 + $0x58] sm:$0x3] %vm7136_vm4, %v26166_v12 }
 0x41f   :  { %7149 = vst.msk [vmem:[#allocation3 + $0x70] sm:$0x3] %vm7136_vm4, %v26166_v12  ;;  %7152 = vst.msk [vmem:[#allocation3 + $0x88] sm:$0x3] %vm7136_vm4, %v26166_v12 }
 0x420   :  { %17329 = vmatmul.mubr.msk.f32.gmra.mrb[50].mxu0 %vm26_vm1, %v26154_v20  ;;  %7155 = vst.msk [vmem:[#allocation3 + $0xa0] sm:$0x3] %vm7136_vm4, %v26166_v12  ;;  %7158 = vst.msk [vmem:[#allocation3 + $0xb8] sm:$0x3] %vm7136_vm4, %v26166_v12  ;;  %v5867_v20 = vld [vmem:[#allocation2 + $0x2aa] sm:$0xff] }
 0x421   :  { %17331 = vmatprep.mubr.msk.f32.mxu0 %vm26_vm1, %v26155_v21  ;;  %7161 = vst.msk [vmem:[#allocation3 + $0xd0] sm:$0x3] %vm7136_vm4, %v26166_v12  ;;  %7164 = vst.msk [vmem:[#allocation3 + $0xe8] sm:$0x3] %vm7136_vm4, %v26166_v12  ;;  %v5868_v21 = vld [vmem:[#allocation2 + $0x2ba] sm:$0xff] }
 0x422   :  { %7167 = vst.msk [vmem:[#allocation3 + $0x100] sm:$0x3] %vm7136_vm4, %v26166_v12  ;;  %7170 = vst.msk [vmem:[#allocation3 + $0x118] sm:$0x3] %vm7136_vm4, %v26166_v12 }
 0x423   :  { %7173 = vst.msk [vmem:[#allocation3 + $0x130] sm:$0x3] %vm7136_vm4, %v26166_v12  ;;  %7176 = vst.msk [vmem:[#allocation3 + $0x148] sm:$0x3] %vm7136_vm4, %v26166_v12 }
 0x424   :  { %17332 = vmatmul.mubr.msk.f32.gmra.mrb[52].mxu0 %vm26_vm1, %v26156_v22  ;;  %7179 = vst.msk [vmem:[#allocation3 + $0x160] sm:$0x3] %vm7136_vm4, %v26166_v12  ;;  %7182 = vst.msk [vmem:[#allocation3 + $0x178] sm:$0x3] %vm7136_vm4, %v26166_v12  ;;  %v5869_v22 = vld [vmem:[#allocation2 + $0x2c2] sm:$0xff] }
 0x425   :  { %17334 = vmatprep.mubr.msk.f32.mxu0 %vm26_vm1, %v26157_v23  ;;  %7185 = vst.msk [vmem:[#allocation3 + $0x190] sm:$0x3] %vm7136_vm4, %v26166_v12  ;;  %7188 = vst.msk [vmem:[#allocation3 + $0x1a8] sm:$0x3] %vm7136_vm4, %v26166_v12  ;;  %v5870_v23 = vld [vmem:[#allocation2 + $0x2d2] sm:$0xff] }
 0x426   :  { %7191 = vst.msk [vmem:[#allocation3 + $0x1c0] sm:$0x3] %vm7136_vm4, %v26166_v12  ;;  %7194 = vst.msk [vmem:[#allocation3 + $0x1d8] sm:$0x3] %vm7136_vm4, %v26166_v12 }
 0x427   :  { %7197 = vst.msk [vmem:[#allocation3 + $0x1f0] sm:$0x3] %vm7136_vm4, %v26166_v12  ;;  %7200 = vst.msk [vmem:[#allocation3 + $0x208] sm:$0x3] %vm7136_vm4, %v26166_v12 }
 0x428   :  { %17335 = vmatmul.mubr.msk.f32.gmra.mrb[54].mxu0 %vm26_vm1, %v26158_v24  ;;  %7203 = vst.msk [vmem:[#allocation3 + $0x220] sm:$0x3] %vm7136_vm4, %v26166_v12  ;;  %7206 = vst.msk [vmem:[#allocation3 + $0x238] sm:$0x3] %vm7136_vm4, %v26166_v12  ;;  %v5871_v24 = vld [vmem:[#allocation2 + $0x2da] sm:$0xff] }
 0x429   :  { %17337 = vmatprep.mubr.msk.f32.mxu0 %vm26_vm1, %v26159_v25  ;;  %7209 = vst.msk [vmem:[#allocation3 + $0x250] sm:$0x3] %vm7136_vm4, %v26166_v12  ;;  %7212 = vst.msk [vmem:[#allocation3 + $0x268] sm:$0x3] %vm7136_vm4, %v26166_v12  ;;  %v5872_v25 = vld [vmem:[#allocation2 + $0x2ea] sm:$0xff] }
 0x42a   :  { %7215 = vst.msk [vmem:[#allocation3 + $0x280] sm:$0x3] %vm7136_vm4, %v26166_v12  ;;  %7218 = vst.msk [vmem:[#allocation3 + $0x298] sm:$0x3] %vm7136_vm4, %v26166_v12 }
 0x42b   :  { %7221 = vst.msk [vmem:[#allocation3 + $0x2b0] sm:$0x3] %vm7136_vm4, %v26166_v12  ;;  %7224 = vst.msk [vmem:[#allocation3 + $0x2c8] sm:$0x3] %vm7136_vm4, %v26166_v12 }
 0x42c   :  { %17338 = vmatmul.mubr.msk.f32.gmra.mrb[56].mxu0 %vm26_vm1, %v26160_v26  ;;  %7227 = vst.msk [vmem:[#allocation3 + $0x2e0] sm:$0x3] %vm7136_vm4, %v26166_v12  ;;  %7230 = vst.msk [vmem:[#allocation3 + $0x2f8] sm:$0x3] %vm7136_vm4, %v26166_v12  ;;  %v5873_v26 = vld [vmem:[#allocation2 + $0x2f2] sm:$0xff] }
 0x42d   :  { %17340 = vmatprep.mubr.msk.f32.mxu0 %vm26_vm1, %v26161_v27  ;;  %7233 = vst.msk [vmem:[#allocation3 + $0x310] sm:$0x3] %vm7136_vm4, %v26166_v12  ;;  %7236 = vst.msk [vmem:[#allocation3 + $0x328] sm:$0x3] %vm7136_vm4, %v26166_v12  ;;  %v5874_v27 = vld [vmem:[#allocation2 + $0x302] sm:$0xff] }
 0x42e   :  { %7239 = vst.msk [vmem:[#allocation3 + $0x340] sm:$0x3] %vm7136_vm4, %v26166_v12  ;;  %7242 = vst.msk [vmem:[#allocation3 + $0x358] sm:$0x3] %vm7136_vm4, %v26166_v12 }
 0x430   :  { %17341 = vmatmul.mubr.msk.f32.gmra.mrb[58].mxu0 %vm26_vm1, %v26162_v28  ;;  %v5875_v28 = vld [vmem:[#allocation2 + $0x30a] sm:$0xff] }
 0x431   :  { %17343 = vmatprep.mubr.msk.f32.mxu0 %vm26_vm1, %v26163_v29  ;;  %v5876_v29 = vld [vmem:[#allocation2 + $0x31a] sm:$0xff] }
 0x434   :  { %17344 = vmatmul.mubr.msk.f32.gmra.mrb[60].mxu0 %vm26_vm1, %v26164_v31  ;;  %v5880_v31 = vld [vmem:[#allocation2 + $0x34a] sm:$0xff] }
 0x435   :  { %17346 = vmatprep.mubr.msk.f32.mxu0 %vm26_vm1, %v5170_v30  ;;  %v5877_v30 = vld [vmem:[#allocation2 + $0x322] sm:$0xff] }
 0x438   :  { %17347 = vmatmul.mubr.msk.f32.gmra.mrb[62].mxu0 %vm26_vm1, %v5171_v32  ;;  %v5881_v32 = vld [vmem:[#allocation2 + $0x352] sm:$0xff] }
 0x439   :  { %17351 = vmatprep.mubr.msk.f32.mxu0 %vm26_vm1, %v5818_v33 }
 0x43c   :  { %17352 = vmatmul.mubr.msk.f32.vlgmr.msra.gmra.mrb[0].mxu0 %vm26_vm1, %v5819_v34 }
 0x43d   :  { %17354 = vmatprep.mubr.msk.f32.mxu0 %vm26_vm1, %v5820_v37 }
 0x440   :  { %17355 = vmatmul.mubr.msk.f32.gmra.mrb[2].mxu0 %vm26_vm1, %v5821_v38 }
 0x441   :  { %17357 = vmatprep.mubr.msk.f32.mxu0 %vm26_vm1, %v5822_v39 }
 0x444   :  { %17358 = vmatmul.mubr.msk.f32.gmra.mrb[4].mxu0 %vm26_vm1, %v5823_v40 }
 0x445   :  { %17360 = vmatprep.mubr.msk.f32.mxu0 %vm26_vm1, %v5824_v41 }
 0x448   :  { %17361 = vmatmul.mubr.msk.f32.gmra.mrb[6].mxu0 %vm26_vm1, %v5825_v42 }
 0x449   :  { %17363 = vmatprep.mubr.msk.f32.mxu0 %vm26_vm1, %v5826_v43 }
 0x44c   :  { %17364 = vmatmul.mubr.msk.f32.gmra.mrb[8].mxu0 %vm26_vm1, %v5827_v44 }
 0x44d   :  { %17366 = vmatprep.mubr.msk.f32.mxu0 %vm26_vm1, %v5828_v45 }
 0x450   :  { %17367 = vmatmul.mubr.msk.f32.gmra.mrb[10].mxu0 %vm26_vm1, %v5829_v46 }
 0x451   :  { %17369 = vmatprep.mubr.msk.f32.mxu0 %vm26_vm1, %v5830_v47 }
 0x454   :  { %17370 = vmatmul.mubr.msk.f32.gmra.mrb[12].mxu0 %vm26_vm1, %v5831_v50 }
 0x455   :  { %17372 = vmatprep.mubr.msk.f32.mxu0 %vm26_vm1, %v5832_v51 }
 0x458   :  { %17373 = vmatmul.mubr.msk.f32.gmra.mrb[14].mxu0 %vm26_vm1, %v5833_v52 }
 0x459   :  { %17375 = vmatprep.mubr.msk.f32.mxu0 %vm26_vm1, %v5834_v53 }
 0x45c   :  { %17376 = vmatmul.mubr.msk.f32.gmra.mrb[16].mxu0 %vm26_vm1, %v5835_v54 }
 0x45d   :  { %17378 = vmatprep.mubr.msk.f32.mxu0 %vm26_vm1, %v5836_v55 }
 0x460   :  { %17379 = vmatmul.mubr.msk.f32.gmra.mrb[18].mxu0 %vm26_vm1, %v5837_v56 }
 0x461   :  { %17381 = vmatprep.mubr.msk.f32.mxu0 %vm26_vm1, %v5838_v57 }
 0x464   :  { %17382 = vmatmul.mubr.msk.f32.gmra.mrb[20].mxu0 %vm26_vm1, %v5839_v58 }
 0x465   :  { %17384 = vmatprep.mubr.msk.f32.mxu0 %vm26_vm1, %v5840_v59 }
 0x468   :  { %17385 = vmatmul.mubr.msk.f32.gmra.mrb[22].mxu0 %vm26_vm1, %v5841_v60 }
 0x469   :  { %17387 = vmatprep.mubr.msk.f32.mxu0 %vm26_vm1, %v5842_v61 }
 0x46c   :  { %17388 = vmatmul.mubr.msk.f32.gmra.mrb[24].mxu0 %vm26_vm1, %v5843_v62 }
 0x46d   :  { %17390 = vmatprep.mubr.msk.f32.mxu0 %vm26_vm1, %v5844_v63 }
 0x470   :  { %17391 = vmatmul.mubr.msk.f32.gmra.mrb[26].mxu0 %vm26_vm1, %v5845_v36 }
 0x471   :  { %17393 = vmatprep.mubr.msk.f32.mxu0 %vm26_vm1, %v20931_v11  ;;  %v5854_v11 = vld [vmem:[#allocation2 + $0x212] sm:$0xff] }
 0x474   :  { %17394 = vmatmul.mubr.msk.f32.gmra.mrb[28].mxu0 %vm26_vm1, %v26165_v4 }
 0x475   :  { %17396 = vmatprep.mubr.msk.f32.mxu0 %vm26_vm1, %v5848_v3 }
 0x478   :  { %17397 = vmatmul.mubr.msk.f32.gmra.mrb[30].mxu0 %vm26_vm1, %v5849_v6 }
 0x479   :  { %17399 = vmatprep.mubr.msk.f32.mxu0 %vm26_vm1, %v5850_v2 }
 0x47c   :  { %17400 = vmatmul.mubr.msk.f32.gmra.mrb[32].mxu0 %vm26_vm1, %v5851_v35 }
 0x47d   :  { %17402 = vmatprep.mubr.msk.f32.mxu0 %vm26_vm1, %v5852_v0 }
 0x480   :  { %17403 = vmatmul.mubr.msk.f32.gmra.mrb[34].mxu0 %vm26_vm1, %v5853_v48 }
 0x481   :  { %17405 = vmatprep.mubr.msk.f32.mxu0 %vm26_vm1, %v5854_v11 }
 0x484   :  { %17406 = vmatmul.mubr.msk.f32.gmra.mrb[36].mxu0 %vm26_vm1, %v5855_v7 }
 0x485   :  { %17408 = vmatprep.mubr.msk.f32.mxu0 %vm26_vm1, %v5856_v9 }
 0x488   :  { %17409 = vmatmul.mubr.msk.f32.gmra.mrb[38].mxu0 %vm26_vm1, %v5857_v49 }
 0x489   :  { %17411 = vmatprep.mubr.msk.f32.mxu0 %vm26_vm1, %v5858_v8 }
 0x48c   :  { %17412 = vmatmul.mubr.msk.f32.gmra.mrb[40].mxu0 %vm26_vm1, %v5859_v13 }
 0x48d   :  { %17414 = vmatprep.mubr.msk.f32.mxu0 %vm26_vm1, %v5860_v14 }
 0x490   :  { %17415 = vmatmul.mubr.msk.f32.gmra.mrb[42].mxu0 %vm26_vm1, %v5861_v5 }
 0x491   :  { %17417 = vmatprep.mubr.msk.f32.mxu0 %vm26_vm1, %v21257_v10 }
 0x494   :  { %17418 = vmatmul.mubr.msk.f32.gmra.mrb[44].mxu0 %vm26_vm1, %v5863_v15 }
 0x495   :  { %17420 = vmatprep.mubr.msk.f32.mxu0 %vm26_vm1, %v5864_v17 }
 0x498   :  { %17421 = vmatmul.mubr.msk.f32.gmra.mrb[46].mxu0 %vm26_vm1, %v5865_v18 }
 0x499   :  { %17423 = vmatprep.mubr.msk.f32.mxu0 %vm26_vm1, %v5866_v19 }
 0x49c   :  { %17424 = vmatmul.mubr.msk.f32.gmra.mrb[48].mxu0 %vm26_vm1, %v5867_v20 }
 0x49d   :  { %17426 = vmatprep.mubr.msk.f32.mxu0 %vm26_vm1, %v5868_v21 }
 0x4a0   :  { %17427 = vmatmul.mubr.msk.f32.gmra.mrb[50].mxu0 %vm26_vm1, %v5869_v22 }
 0x4a1   :  { %17429 = vmatprep.mubr.msk.f32.mxu0 %vm26_vm1, %v5870_v23 }
 0x4a4   :  { %17430 = vmatmul.mubr.msk.f32.gmra.mrb[52].mxu0 %vm26_vm1, %v5871_v24 }
 0x4a5   :  { %17432 = vmatprep.mubr.msk.f32.mxu0 %vm26_vm1, %v5872_v25 }
 0x4a8   :  { %17433 = vmatmul.mubr.msk.f32.gmra.mrb[54].mxu0 %vm26_vm1, %v5873_v26 }
 0x4a9   :  { %17435 = vmatprep.mubr.msk.f32.mxu0 %vm26_vm1, %v5874_v27 }
 0x4ac   :  { %17436 = vmatmul.mubr.msk.f32.gmra.mrb[56].mxu0 %vm26_vm1, %v5875_v28 }
 0x4ad   :  { %17438 = vmatprep.mubr.msk.f32.mxu0 %vm26_vm1, %v5876_v29 }
 0x4b0   :  { %17439 = vmatmul.mubr.msk.f32.gmra.mrb[58].mxu0 %vm26_vm1, %v5877_v30 }
 0x4b1   :  { %17441 = vmatprep.mubr.msk.f32.mxu0 %vm26_vm1, %v20999_v16 }
 0x4b4   :  { %17442 = vmatmul.mubr.msk.f32.gmra.mrb[60].mxu0 %vm26_vm1, %v21005_v1 }
 0x4b5   :  { %17444 = vmatprep.mubr.msk.f32.mxu0 %vm26_vm1, %v5880_v31 }
 0x4b8   :  { %17445 = vmatmul.mubr.msk.f32.gmra.mrb[62].mxu0 %vm26_vm1, %v5881_v32 }
 0x50f   :  { %v21499_v33 = vpop.f32.mrb[0].mxu0 }
 0x510   :  { %v6532_v34 = vsel %vm6530_vm3, %v21499_v33, 0.0  ;;  %v21503_v37 = vpop.f32.mrb[1].mxu0 }
 0x511   :  { %v6531_v38 = vsel %vm6530_vm3, %v21503_v37, 0.0 }
 0x512   :  { %v6533_v16 = vadd.f32 %v6532_v34, %v6531_v38 }
 0x513   :  { %v21507_v39 = vpop.f32.mrb[2].mxu0 }
 0x514   :  { %v21509_v40 = vpop.f32.mrb[3].mxu0  ;;  %v6536_v42 = vsel %vm6530_vm3, %v21507_v39, 0.0 }
 0x515   :  { %v6534_v1 = vsel %vm6530_vm3, %v21509_v40, 0.0 }
 0x516   :  { %v6535_v41 = vadd.f32 %v6534_v1, %v6533_v16 }
 0x517   :  { %v21515_v43 = vpop.f32.mrb[4].mxu0 }
 0x518   :  { %v6537_v44 = vadd.f32 %v6536_v42, %v6535_v41  ;;  %v21517_v45 = vpop.f32.mrb[5].mxu0  ;;  %v6540_v50 = vsel %vm6530_vm3, %v21515_v43, 0.0 }
 0x519   :  { %v6538_v46 = vsel %vm6530_vm3, %v21517_v45, 0.0 }
 0x51a   :  { %v6539_v47 = vadd.f32 %v6538_v46, %v6537_v44 }
 0x51b   :  { %v21523_v51 = vpop.f32.mrb[6].mxu0 }
 0x51c   :  { %v21525_v52 = vpop.f32.mrb[7].mxu0  ;;  %v6541_v53 = vadd.f32 %v6540_v50, %v6539_v47  ;;  %v6544_v56 = vsel %vm6530_vm3, %v21523_v51, 0.0 }
 0x51d   :  { %v6542_v54 = vsel %vm6530_vm3, %v21525_v52, 0.0 }
 0x51e   :  { %v6543_v55 = vadd.f32 %v6542_v54, %v6541_v53 }
 0x51f   :  { %v21531_v57 = vpop.f32.mrb[8].mxu0 }
 0x520   :  { %v21533_v58 = vpop.f32.mrb[9].mxu0  ;;  %v6545_v59 = vadd.f32 %v6544_v56, %v6543_v55  ;;  %v6548_v62 = vsel %vm6530_vm3, %v21531_v57, 0.0 }
 0x521   :  { %v6546_v60 = vsel %vm6530_vm3, %v21533_v58, 0.0 }
 0x522   :  { %v6547_v61 = vadd.f32 %v6546_v60, %v6545_v59 }
 0x523   :  { %v21539_v63 = vpop.f32.mrb[10].mxu0 }
 0x524   :  { %v21541_v36 = vpop.f32.mrb[11].mxu0  ;;  %v6549_v3 = vadd.f32 %v6548_v62, %v6547_v61  ;;  %v6552_v2 = vsel %vm6530_vm3, %v21539_v63, 0.0 }
 0x525   :  { %v6550_v4 = vsel %vm6530_vm3, %v21541_v36, 0.0 }
 0x526   :  { %v6551_v6 = vadd.f32 %v6550_v4, %v6549_v3 }
 0x527   :  { %v21547_v35 = vpop.f32.mrb[12].mxu0 }
 0x528   :  { %v21549_v0 = vpop.f32.mrb[13].mxu0  ;;  %v6553_v48 = vadd.f32 %v6552_v2, %v6551_v6  ;;  %v6556_v9 = vsel %vm6530_vm3, %v21547_v35, 0.0 }
 0x529   :  { %v6554_v11 = vsel %vm6530_vm3, %v21549_v0, 0.0 }
 0x52a   :  { %v6555_v7 = vadd.f32 %v6554_v11, %v6553_v48 }
 0x52b   :  { %v21555_v49 = vpop.f32.mrb[14].mxu0 }
 0x52c   :  { %v21557_v8 = vpop.f32.mrb[15].mxu0  ;;  %v6557_v13 = vadd.f32 %v6556_v9, %v6555_v7  ;;  %v6560_v10 = vsel %vm6530_vm3, %v21555_v49, 0.0 }
 0x52d   :  { %v6558_v14 = vsel %vm6530_vm3, %v21557_v8, 0.0 }
 0x52e   :  { %v6559_v5 = vadd.f32 %v6558_v14, %v6557_v13 }
 0x52f   :  { %v21563_v12 = vpop.f32.mrb[16].mxu0 }
 0x530   :  { %v21565_v15 = vpop.f32.mrb[17].mxu0  ;;  %v6561_v17 = vadd.f32 %v6560_v10, %v6559_v5  ;;  %v6564_v20 = vsel %vm6530_vm3, %v21563_v12, 0.0 }
 0x531   :  { %v6562_v18 = vsel %vm6530_vm3, %v21565_v15, 0.0 }
 0x532   :  { %v6563_v19 = vadd.f32 %v6562_v18, %v6561_v17 }
 0x533   :  { %v21571_v21 = vpop.f32.mrb[18].mxu0 }
 0x534   :  { %v21573_v22 = vpop.f32.mrb[19].mxu0  ;;  %v6565_v23 = vadd.f32 %v6564_v20, %v6563_v19  ;;  %v6568_v26 = vsel %vm6530_vm3, %v21571_v21, 0.0 }
 0x535   :  { %v6566_v24 = vsel %vm6530_vm3, %v21573_v22, 0.0 }
 0x536   :  { %v6567_v25 = vadd.f32 %v6566_v24, %v6565_v23 }
 0x537   :  { %v21579_v27 = vpop.f32.mrb[20].mxu0 }
 0x538   :  { %v21581_v28 = vpop.f32.mrb[21].mxu0  ;;  %v6569_v29 = vadd.f32 %v6568_v26, %v6567_v25  ;;  %v6572_v32 = vsel %vm6530_vm3, %v21579_v27, 0.0 }
 0x539   :  { %v6570_v30 = vsel %vm6530_vm3, %v21581_v28, 0.0 }
 0x53a   :  { %v6571_v31 = vadd.f32 %v6570_v30, %v6569_v29 }
 0x53b   :  { %v21587_v34 = vpop.f32.mrb[22].mxu0 }
 0x53c   :  { %v21589_v38 = vpop.f32.mrb[23].mxu0  ;;  %v6573_v16 = vadd.f32 %v6572_v32, %v6571_v31  ;;  %v6576_v42 = vsel %vm6530_vm3, %v21587_v34, 0.0 }
 0x53d   :  { %v6574_v1 = vsel %vm6530_vm3, %v21589_v38, 0.0 }
 0x53e   :  { %v6575_v41 = vadd.f32 %v6574_v1, %v6573_v16 }
 0x53f   :  { %v21595_v44 = vpop.f32.mrb[24].mxu0 }
 0x540   :  { %v21597_v46 = vpop.f32.mrb[25].mxu0  ;;  %v6577_v47 = vadd.f32 %v6576_v42, %v6575_v41  ;;  %v6580_v54 = vsel %vm6530_vm3, %v21595_v44, 0.0 }
 0x541   :  { %v6578_v50 = vsel %vm6530_vm3, %v21597_v46, 0.0 }
 0x542   :  { %v6579_v53 = vadd.f32 %v6578_v50, %v6577_v47 }
 0x543   :  { %v21603_v55 = vpop.f32.mrb[26].mxu0 }
 0x544   :  { %v21605_v56 = vpop.f32.mrb[27].mxu0  ;;  %v6581_v59 = vadd.f32 %v6580_v54, %v6579_v53  ;;  %v6584_v62 = vsel %vm6530_vm3, %v21603_v55, 0.0 }
 0x545   :  { %v6582_v60 = vsel %vm6530_vm3, %v21605_v56, 0.0 }
 0x546   :  { %v6583_v61 = vadd.f32 %v6582_v60, %v6581_v59 }
 0x547   :  { %v21611_v3 = vpop.f32.mrb[28].mxu0 }
 0x548   :  { %v21613_v4 = vpop.f32.mrb[29].mxu0  ;;  %v6585_v6 = vadd.f32 %v6584_v62, %v6583_v61  ;;  %v6588_v11 = vsel %vm6530_vm3, %v21611_v3, 0.0 }
 0x549   :  { %v6586_v2 = vsel %vm6530_vm3, %v21613_v4, 0.0 }
 0x54a   :  { %v6587_v48 = vadd.f32 %v6586_v2, %v6585_v6 }
 0x54b   :  { %v21619_v7 = vpop.f32.mrb[30].mxu0 }
 0x54c   :  { %v21621_v9 = vpop.f32.mrb[31].mxu0  ;;  %v6589_v13 = vadd.f32 %v6588_v11, %v6587_v48  ;;  %v6592_v10 = vsel %vm6530_vm3, %v21619_v7, 0.0 }
 0x54d   :  { %v6590_v14 = vsel %vm6530_vm3, %v21621_v9, 0.0 }
 0x54e   :  { %v6591_v5 = vadd.f32 %v6590_v14, %v6589_v13 }
 0x54f   :  { %v21627_v17 = vpop.f32.mrb[32].mxu0 }
 0x550   :  { %v21629_v18 = vpop.f32.mrb[33].mxu0  ;;  %v6593_v19 = vadd.f32 %v6592_v10, %v6591_v5  ;;  %v6596_v24 = vsel %vm6530_vm3, %v21627_v17, 0.0 }
 0x551   :  { %v6594_v20 = vsel %vm6530_vm3, %v21629_v18, 0.0 }
 0x552   :  { %v6595_v23 = vadd.f32 %v6594_v20, %v6593_v19 }
 0x553   :  { %v21635_v25 = vpop.f32.mrb[34].mxu0 }
 0x554   :  { %v21637_v26 = vpop.f32.mrb[35].mxu0  ;;  %v6597_v29 = vadd.f32 %v6596_v24, %v6595_v23  ;;  %v6600_v32 = vsel %vm6530_vm3, %v21635_v25, 0.0 }
 0x555   :  { %v6598_v30 = vsel %vm6530_vm3, %v21637_v26, 0.0 }
 0x556   :  { %v6599_v31 = vadd.f32 %v6598_v30, %v6597_v29 }
 0x557   :  { %v21643_v16 = vpop.f32.mrb[36].mxu0 }
 0x558   :  { %v21645_v1 = vpop.f32.mrb[37].mxu0  ;;  %v6601_v41 = vadd.f32 %v6600_v32, %v6599_v31  ;;  %v6604_v50 = vsel %vm6530_vm3, %v21643_v16, 0.0 }
 0x559   :  { %v6602_v42 = vsel %vm6530_vm3, %v21645_v1, 0.0 }
 0x55a   :  { %v6603_v47 = vadd.f32 %v6602_v42, %v6601_v41 }
 0x55b   :  { %v21651_v53 = vpop.f32.mrb[38].mxu0 }
 0x55c   :  { %v21653_v54 = vpop.f32.mrb[39].mxu0  ;;  %v6605_v59 = vadd.f32 %v6604_v50, %v6603_v47  ;;  %v6608_v62 = vsel %vm6530_vm3, %v21651_v53, 0.0 }
 0x55d   :  { %v6606_v60 = vsel %vm6530_vm3, %v21653_v54, 0.0 }
 0x55e   :  { %v6607_v61 = vadd.f32 %v6606_v60, %v6605_v59 }
 0x55f   :  { %v21659_v6 = vpop.f32.mrb[40].mxu0 }
 0x560   :  { %v21661_v2 = vpop.f32.mrb[41].mxu0  ;;  %v6609_v48 = vadd.f32 %v6608_v62, %v6607_v61  ;;  %v6612_v14 = vsel %vm6530_vm3, %v21659_v6, 0.0 }
 0x561   :  { %v6610_v11 = vsel %vm6530_vm3, %v21661_v2, 0.0 }
 0x562   :  { %v6611_v13 = vadd.f32 %v6610_v11, %v6609_v48 }
 0x563   :  { %v21667_v5 = vpop.f32.mrb[42].mxu0 }
 0x564   :  { %v21669_v10 = vpop.f32.mrb[43].mxu0  ;;  %v6613_v19 = vadd.f32 %v6612_v14, %v6611_v13  ;;  %v6616_v24 = vsel %vm6530_vm3, %v21667_v5, 0.0 }
 0x565   :  { %v6614_v20 = vsel %vm6530_vm3, %v21669_v10, 0.0 }
 0x566   :  { %v6615_v23 = vadd.f32 %v6614_v20, %v6613_v19 }
 0x567   :  { %v21675_v29 = vpop.f32.mrb[44].mxu0 }
 0x568   :  { %v21677_v30 = vpop.f32.mrb[45].mxu0  ;;  %v6617_v31 = vadd.f32 %v6616_v24, %v6615_v23  ;;  %v6620_v42 = vsel %vm6530_vm3, %v21675_v29, 0.0 }
 0x569   :  { %v6618_v32 = vsel %vm6530_vm3, %v21677_v30, 0.0 }
 0x56a   :  { %v6619_v41 = vadd.f32 %v6618_v32, %v6617_v31 }
 0x56b   :  { %v21683_v47 = vpop.f32.mrb[46].mxu0 }
 0x56c   :  { %26167 = vst [vmem:[#allocation9_spill] sm:$0xff] %v21683_v47  ;;  %v21685_v50 = vpop.f32.mrb[47].mxu0  ;;  %v6621_v59 = vadd.f32 %v6620_v42, %v6619_v41  ;;  %v6624_v62 = vsel %vm6530_vm3, %v21683_v47, 0.0 }
 0x56d   :  { %v6622_v60 = vsel %vm6530_vm3, %v21685_v50, 0.0 }
 0x56e   :  { %v6623_v61 = vadd.f32 %v6622_v60, %v6621_v59 }
 0x56f   :  { %v21691_v48 = vpop.f32.mrb[48].mxu0 }
 0x570   :  { %26168 = vst [vmem:[#allocation10_spill] sm:$0xff] %v21691_v48  ;;  %v21693_v11 = vpop.f32.mrb[49].mxu0  ;;  %v6625_v13 = vadd.f32 %v6624_v62, %v6623_v61  ;;  %v6628_v20 = vsel %vm6530_vm3, %v21691_v48, 0.0 }
 0x571   :  { %26169 = vst [vmem:[#allocation11_spill] sm:$0xff] %v21693_v11  ;;  %v6626_v14 = vsel %vm6530_vm3, %v21693_v11, 0.0 }
 0x572   :  { %v6627_v19 = vadd.f32 %v6626_v14, %v6625_v13 }
 0x573   :  { %v21699_v23 = vpop.f32.mrb[50].mxu0 }
 0x574   :  { %26170 = vst [vmem:[#allocation12_spill] sm:$0xff] %v21699_v23  ;;  %v21701_v24 = vpop.f32.mrb[51].mxu0  ;;  %v6629_v31 = vadd.f32 %v6628_v20, %v6627_v19  ;;  %v6632_v42 = vsel %vm6530_vm3, %v21699_v23, 0.0 }
 0x575   :  { %26171 = vst [vmem:[#allocation13_spill] sm:$0xff] %v21701_v24  ;;  %v6630_v32 = vsel %vm6530_vm3, %v21701_v24, 0.0 }
 0x576   :  { %v6631_v41 = vadd.f32 %v6630_v32, %v6629_v31 }
 0x577   :  { %v21707_v59 = vpop.f32.mrb[52].mxu0 }
 0x578   :  { %26172 = vst [vmem:[#allocation14_spill] sm:$0xff] %v21707_v59  ;;  %v21709_v60 = vpop.f32.mrb[53].mxu0  ;;  %v6633_v61 = vadd.f32 %v6632_v42, %v6631_v41  ;;  %v6636_v14 = vsel %vm6530_vm3, %v21707_v59, 0.0 }
 0x579   :  { %26173 = vst [vmem:[#allocation15_spill] sm:$0xff] %v21709_v60  ;;  %v6634_v62 = vsel %vm6530_vm3, %v21709_v60, 0.0 }
 0x57a   :  { %v6635_v13 = vadd.f32 %v6634_v62, %v6633_v61 }
 0x57b   :  { %v21715_v19 = vpop.f32.mrb[54].mxu0 }
 0x57c   :  { %26174 = vst [vmem:[#allocation16_spill] sm:$0xff] %v21715_v19  ;;  %v21717_v20 = vpop.f32.mrb[55].mxu0  ;;  %v6637_v31 = vadd.f32 %v6636_v14, %v6635_v13  ;;  %v6640_v24 = vsel %vm6530_vm3, %v21715_v19, 0.0 }
 0x57d   :  { %26175 = vst [vmem:[#allocation17_spill] sm:$0xff] %v21717_v20  ;;  %v6638_v32 = vsel %vm6530_vm3, %v21717_v20, 0.0 }
 0x57e   :  { %v6639_v23 = vadd.f32 %v6638_v32, %v6637_v31 }
 0x57f   :  { %v21723_v41 = vpop.f32.mrb[56].mxu0 }
 0x580   :  { %26176 = vst [vmem:[#allocation18_spill] sm:$0xff] %v21723_v41  ;;  %v21725_v42 = vpop.f32.mrb[57].mxu0  ;;  %v6641_v61 = vadd.f32 %v6640_v24, %v6639_v23  ;;  %v6644_v60 = vsel %vm6530_vm3, %v21723_v41, 0.0 }
 0x581   :  { %26177 = vst [vmem:[#allocation19_spill] sm:$0xff] %v21725_v42  ;;  %v6642_v62 = vsel %vm6530_vm3, %v21725_v42, 0.0 }
 0x582   :  { %v6643_v59 = vadd.f32 %v6642_v62, %v6641_v61 }
 0x583   :  { %v21731_v13 = vpop.f32.mrb[58].mxu0 }
 0x584   :  { %26178 = vst [vmem:[#allocation20_spill] sm:$0xff] %v21731_v13  ;;  %v21733_v14 = vpop.f32.mrb[59].mxu0  ;;  %v6645_v31 = vadd.f32 %v6644_v60, %v6643_v59  ;;  %v6648_v20 = vsel %vm6530_vm3, %v21731_v13, 0.0 }
 0x585   :  { %26179 = vst [vmem:[#allocation21_spill] sm:$0xff] %v21733_v14  ;;  %v6646_v32 = vsel %vm6530_vm3, %v21733_v14, 0.0 }
 0x586   :  { %v6647_v19 = vadd.f32 %v6646_v32, %v6645_v31 }
 0x587   :  { %v21739_v23 = vpop.f32.mrb[60].mxu0 }
 0x588   :  { %26180 = vst [vmem:[#allocation22_spill] sm:$0xff] %v21739_v23  ;;  %v21741_v24 = vpop.f32.mrb[61].mxu0  ;;  %v6649_v61 = vadd.f32 %v6648_v20, %v6647_v19  ;;  %v6652_v42 = vsel %vm6530_vm3, %v21739_v23, 0.0 }
 0x589   :  { %26181 = vst [vmem:[#allocation23_spill] sm:$0xff] %v21741_v24  ;;  %v6650_v62 = vsel %vm6530_vm3, %v21741_v24, 0.0 }
 0x58a   :  { %v6651_v41 = vadd.f32 %v6650_v62, %v6649_v61 }
 0x58b   :  { %v21747_v59 = vpop.f32.mrb[62].mxu0 }
 0x58c   :  { %v21749_v60 = vpop.f32.mrb[63].mxu0  ;;  %v6653_v31 = vadd.f32 %v6652_v42, %v6651_v41  ;;  %v6656_v14 = vsel %vm6530_vm3, %v21747_v59, 0.0 }
 0x58d   :  { %v6654_v32 = vsel %vm6530_vm3, %v21749_v60, 0.0 }
 0x58e   :  { %v6655_v13 = vadd.f32 %v6654_v32, %v6653_v31  ;;  %v26192_v31 = vld [vmem:[#allocation13_spill] sm:$0xff]  ;;  %v26194_v32 = vld [vmem:[#allocation12_spill] sm:$0xff] }
 0x590   :  { %v6657_v19 = vadd.f32 %v6656_v14, %v6655_v13  ;;  %v26188_v14 = vld [vmem:[#allocation11_spill] sm:$0xff] }
 0x592   :  { %v6658_v20 = vrot.slane %v6657_v19, 4 }
 0x594   :  { %v6659_v48 = vadd.f32 %v6658_v20, %v6657_v19  ;;  %v26196_v19 = vld [vmem:[#allocation15_spill] sm:$0xff] }
 0x596   :  { %v6660_v24 = vrot.slane %v6659_v48, 2 }
 0x598   :  { %v6661_v61 = vadd.f32 %v6660_v24, %v6659_v48  ;;  %v26190_v24 = vld [vmem:[#allocation10_spill] sm:$0xff] }
 0x59a   :  { %v6662_v62 = vrot.slane %v6661_v61, 1 }
 0x59c   :  { %v6663_v11 = vadd.f32 %v6662_v62, %v6661_v61  ;;  %v26198_v61 = vld [vmem:[#allocation14_spill] sm:$0xff] }
 0x59e   :  { %v21755_v23 = vmul.f32 0.001953125, %v6663_v11  ;;  %v26186_v11 = vld [vmem:[#allocation9_spill] sm:$0xff] }
 0x5a0   :  { %v21759_v47 = vsub.f32 %v21503_v37, %v21755_v23  ;;  %v21763_v41 = vsub.f32 %v21499_v33, %v21755_v23  ;;  %v21767_v42 = vsub.f32 %v21509_v40, %v21755_v23  ;;  %v21771_v13 = vsub.f32 %v21507_v39, %v21755_v23 }
 0x5a1   :  { %v21775_v48 = vsub.f32 %v21517_v45, %v21755_v23  ;;  %v21779_v37 = vsub.f32 %v21515_v43, %v21755_v23  ;;  %v21783_v33 = vsub.f32 %v21525_v52, %v21755_v23  ;;  %v21787_v40 = vsub.f32 %v21523_v51, %v21755_v23 }
 0x5a2   :  { %26182 = vst [vmem:[#allocation24_spill] sm:$0xff] %v21759_v47  ;;  %26183 = vst [vmem:[#allocation25_spill] sm:$0xff] %v21763_v41  ;;  %v21791_v39 = vsub.f32 %v21533_v58, %v21755_v23  ;;  %v21795_v45 = vsub.f32 %v21531_v57, %v21755_v23  ;;  %v21799_v43 = vsub.f32 %v21541_v36, %v21755_v23 }
 0x5a3   :  { %26184 = vst [vmem:[#allocation26_spill] sm:$0xff] %v21767_v42  ;;  %26185 = vst [vmem:[#allocation27_spill] sm:$0xff] %v21771_v13  ;;  %v21803_v52 = vsub.f32 %v21539_v63, %v21755_v23  ;;  %v21807_v51 = vsub.f32 %v21549_v0, %v21755_v23  ;;  %v21811_v58 = vsub.f32 %v21547_v35, %v21755_v23 }
 0x5a4   :  { %v21815_v57 = vsub.f32 %v21557_v8, %v21755_v23  ;;  %v21819_v36 = vsub.f32 %v21555_v49, %v21755_v23  ;;  %v21823_v63 = vsub.f32 %v21565_v15, %v21755_v23  ;;  %v21827_v0 = vsub.f32 %v21563_v12, %v21755_v23 }
 0x5a5   :  { %v21831_v35 = vsub.f32 %v21573_v22, %v21755_v23  ;;  %v21835_v8 = vsub.f32 %v21571_v21, %v21755_v23  ;;  %v21839_v49 = vsub.f32 %v21581_v28, %v21755_v23  ;;  %v21843_v15 = vsub.f32 %v21579_v27, %v21755_v23 }
 0x5a6   :  { %v21847_v12 = vsub.f32 %v21589_v38, %v21755_v23  ;;  %v21851_v22 = vsub.f32 %v21587_v34, %v21755_v23  ;;  %v21855_v21 = vsub.f32 %v21597_v46, %v21755_v23  ;;  %v21859_v28 = vsub.f32 %v21595_v44, %v21755_v23 }
 0x5a7   :  { %v21863_v27 = vsub.f32 %v21605_v56, %v21755_v23  ;;  %v21867_v38 = vsub.f32 %v21603_v55, %v21755_v23  ;;  %v21871_v34 = vsub.f32 %v21613_v4, %v21755_v23  ;;  %v21875_v46 = vsub.f32 %v21611_v3, %v21755_v23 }
 0x5a8   :  { %v21879_v44 = vsub.f32 %v21621_v9, %v21755_v23  ;;  %v21883_v56 = vsub.f32 %v21619_v7, %v21755_v23  ;;  %v21887_v55 = vsub.f32 %v21629_v18, %v21755_v23  ;;  %v21891_v4 = vsub.f32 %v21627_v17, %v21755_v23 }
 0x5a9   :  { %v21895_v3 = vsub.f32 %v21637_v26, %v21755_v23  ;;  %v21899_v9 = vsub.f32 %v21635_v25, %v21755_v23  ;;  %v21903_v7 = vsub.f32 %v21645_v1, %v21755_v23  ;;  %v21907_v18 = vsub.f32 %v21643_v16, %v21755_v23 }
 0x5aa   :  { %v21911_v17 = vsub.f32 %v21653_v54, %v21755_v23  ;;  %v21915_v26 = vsub.f32 %v21651_v53, %v21755_v23  ;;  %v21919_v25 = vsub.f32 %v21661_v2, %v21755_v23  ;;  %v21923_v1 = vsub.f32 %v21659_v6, %v21755_v23 }
 0x5ab   :  { %v21927_v16 = vsub.f32 %v21669_v10, %v21755_v23  ;;  %v21931_v54 = vsub.f32 %v21667_v5, %v21755_v23  ;;  %v21935_v53 = vsub.f32 %v21677_v30, %v21755_v23  ;;  %v21939_v2 = vsub.f32 %v21675_v29, %v21755_v23 }
 0x5ac   :  { %v21943_v6 = vsub.f32 %v21685_v50, %v21755_v23  ;;  %v21947_v10 = vsub.f32 %v26186_v11, %v21755_v23  ;;  %v21951_v5 = vsub.f32 %v26188_v14, %v21755_v23  ;;  %v21955_v30 = vsub.f32 %v26190_v24, %v21755_v23  ;;  %v26200_v11 = vld [vmem:[#allocation17_spill] sm:$0xff]  ;;  %v26202_v24 = vld [vmem:[#allocation16_spill] sm:$0xff] }
 0x5ad   :  { %v21959_v29 = vsub.f32 %v26192_v31, %v21755_v23  ;;  %v21963_v50 = vsub.f32 %v26194_v32, %v21755_v23  ;;  %v21967_v20 = vsub.f32 %v26196_v19, %v21755_v23  ;;  %v21971_v62 = vsub.f32 %v26198_v61, %v21755_v23 }
 0x5ae   :  { %26187 = vst [vmem:[#allocation28_spill] sm:$0xff] %v21947_v10  ;;  %26189 = vst [vmem:[#allocation29_spill] sm:$0xff] %v21951_v5  ;;  %v21975_v14 = vsub.f32 %v26200_v11, %v21755_v23  ;;  %v21979_v31 = vsub.f32 %v26202_v24, %v21755_v23 }
 0x5af   :  { %26191 = vst [vmem:[#allocation30_spill] sm:$0xff] %v21955_v30  ;;  %26193 = vst [vmem:[#allocation31_spill] sm:$0xff] %v21959_v29  ;;  %v26204_v29 = vld [vmem:[#allocation19_spill] sm:$0xff] }
 0x5b0   :  { %26195 = vst [vmem:[#allocation32_spill] sm:$0xff] %v21963_v50  ;;  %26197 = vst [vmem:[#allocation33_spill] sm:$0xff] %v21967_v20  ;;  %v21983_v32 = vsub.f32 %v26204_v29, %v21755_v23  ;;  %v26206_v50 = vld [vmem:[#allocation18_spill] sm:$0xff]  ;;  %v26208_v20 = vld [vmem:[#allocation21_spill] sm:$0xff] }
 0x5b1   :  { %26199 = vst [vmem:[#allocation34_spill] sm:$0xff] %v21971_v62  ;;  %26201 = vst [vmem:[#allocation35_spill] sm:$0xff] %v21975_v14  ;;  %v21987_v19 = vsub.f32 %v26206_v50, %v21755_v23  ;;  %v21991_v61 = vsub.f32 %v26208_v20, %v21755_v23  ;;  %v26210_v62 = vld [vmem:[#allocation20_spill] sm:$0xff]  ;;  %v26212_v14 = vld [vmem:[#allocation23_spill] sm:$0xff]  ;;  %v22007_v50 = vsub.f32 %v21749_v60, %v21755_v23 }
 0x5b2   :  { %26203 = vst [vmem:[#allocation36_spill] sm:$0xff] %v21979_v31  ;;  %26205 = vst [vmem:[#allocation37_spill] sm:$0xff] %v21983_v32  ;;  %v21995_v11 = vsub.f32 %v26210_v62, %v21755_v23  ;;  %v21999_v24 = vsub.f32 %v26212_v14, %v21755_v23  ;;  %v26214_v31 = vld [vmem:[#allocation22_spill] sm:$0xff]  ;;  %v22011_v20 = vsub.f32 %v21747_v59, %v21755_v23 }
 0x5b3   :  { %26207 = vst [vmem:[#allocation38_spill] sm:$0xff] %v21987_v19  ;;  %26209 = vst [vmem:[#allocation39_spill] sm:$0xff] %v21991_v61  ;;  %v22003_v29 = vsub.f32 %v26214_v31, %v21755_v23  ;;  %v6729_v62 = vmul.f32 %v21759_v47, %v21759_v47  ;;  %v6731_v14 = vmul.f32 %v21767_v42, %v21767_v42 }
 0x5b4   :  { %26211 = vst [vmem:[#allocation40_spill] sm:$0xff] %v21995_v11  ;;  %26213 = vst [vmem:[#allocation41_spill] sm:$0xff] %v21999_v24  ;;  %v6730_v11 = vmul.f32 %v21763_v41, %v21763_v41  ;;  %v6732_v31 = vmul.f32 %v21771_v13, %v21771_v13  ;;  %v6733_v23 = vmul.f32 %v21775_v48, %v21775_v48 }
 0x5b5   :  { %26215 = vst [vmem:[#allocation42_spill] sm:$0xff] %v22003_v29  ;;  %26216 = vst [vmem:[#allocation43_spill] sm:$0xff] %v22007_v50  ;;  %v6793_v29 = vsel %vm6530_vm3, %v6729_v62, 0.0  ;;  %v6796_v59 = vsel %vm6530_vm3, %v6731_v14, 0.0  ;;  %v6734_v41 = vmul.f32 %v21779_v37, %v21779_v37  ;;  %v6735_v13 = vmul.f32 %v21783_v33, %v21783_v33 }
 0x5b6   :  { %26217 = vst [vmem:[#allocation44_spill] sm:$0xff] %v22011_v20  ;;  %v6794_v60 = vsel %vm6530_vm3, %v6730_v11, 0.0  ;;  %v6798_v20 = vsel %vm6530_vm3, %v6732_v31, 0.0  ;;  %v6800_v62 = vsel %vm6530_vm3, %v6733_v23, 0.0  ;;  %v6736_v11 = vmul.f32 %v21787_v40, %v21787_v40 }
 0x5b7   :  { %v6795_v50 = vadd.f32 %v6794_v60, %v6793_v29  ;;  %v6802_v29 = vsel %vm6530_vm3, %v6734_v41, 0.0  ;;  %v6804_v14 = vsel %vm6530_vm3, %v6735_v13, 0.0  ;;  %v6740_v41 = vmul.f32 %v21803_v52, %v21803_v52 }
 0x5b8   :  { %v6741_v13 = vmul.f32 %v21807_v51, %v21807_v51 }
 0x5b9   :  { %v6797_v47 = vadd.f32 %v6796_v59, %v6795_v50  ;;  %v6737_v50 = vmul.f32 %v21791_v39, %v21791_v39 }
 0x5bb   :  { %v6799_v42 = vadd.f32 %v6798_v20, %v6797_v47  ;;  %v6738_v47 = vmul.f32 %v21795_v45, %v21795_v45  ;;  %v6806_v20 = vsel %vm6530_vm3, %v6736_v11, 0.0  ;;  %v6808_v23 = vsel %vm6530_vm3, %v6737_v50, 0.0 }
 0x5bc   :  { %v6742_v11 = vmul.f32 %v21811_v58, %v21811_v58  ;;  %v6743_v50 = vmul.f32 %v21815_v57, %v21815_v57 }
 0x5bd   :  { %v6801_v24 = vadd.f32 %v6800_v62, %v6799_v42  ;;  %v6739_v42 = vmul.f32 %v21799_v43, %v21799_v43 }
 0x5bf   :  { %v6803_v60 = vadd.f32 %v6802_v29, %v6801_v24  ;;  %v6810_v24 = vsel %vm6530_vm3, %v6738_v47, 0.0  ;;  %v6744_v47 = vmul.f32 %v21819_v36, %v21819_v36 }
 0x5c1   :  { %v6805_v59 = vadd.f32 %v6804_v14, %v6803_v60  ;;  %v6812_v60 = vsel %vm6530_vm3, %v6739_v42, 0.0  ;;  %v6745_v42 = vmul.f32 %v21823_v63, %v21823_v63 }
 0x5c3   :  { %v6807_v31 = vadd.f32 %v6806_v20, %v6805_v59  ;;  %v6814_v59 = vsel %vm6530_vm3, %v6740_v41, 0.0  ;;  %v6746_v41 = vmul.f32 %v21827_v0, %v21827_v0 }
 0x5c5   :  { %v6809_v62 = vadd.f32 %v6808_v23, %v6807_v31  ;;  %v6816_v31 = vsel %vm6530_vm3, %v6741_v13, 0.0  ;;  %v6747_v13 = vmul.f32 %v21831_v35, %v21831_v35 }
 0x5c7   :  { %v6811_v29 = vadd.f32 %v6810_v24, %v6809_v62  ;;  %v6818_v62 = vsel %vm6530_vm3, %v6742_v11, 0.0  ;;  %v6748_v11 = vmul.f32 %v21835_v8, %v21835_v8 }
 0x5c9   :  { %v6813_v14 = vadd.f32 %v6812_v60, %v6811_v29  ;;  %v6820_v29 = vsel %vm6530_vm3, %v6743_v50, 0.0  ;;  %v6749_v50 = vmul.f32 %v21839_v49, %v21839_v49 }
 0x5cb   :  { %v6815_v20 = vadd.f32 %v6814_v59, %v6813_v14  ;;  %v6822_v14 = vsel %vm6530_vm3, %v6744_v47, 0.0  ;;  %v6750_v47 = vmul.f32 %v21843_v15, %v21843_v15 }
 0x5cd   :  { %v6817_v23 = vadd.f32 %v6816_v31, %v6815_v20  ;;  %v6824_v20 = vsel %vm6530_vm3, %v6745_v42, 0.0  ;;  %v6751_v42 = vmul.f32 %v21847_v12, %v21847_v12 }
 0x5cf   :  { %v6819_v24 = vadd.f32 %v6818_v62, %v6817_v23  ;;  %v6826_v23 = vsel %vm6530_vm3, %v6746_v41, 0.0  ;;  %v6752_v41 = vmul.f32 %v21851_v22, %v21851_v22 }
 0x5d1   :  { %v6821_v60 = vadd.f32 %v6820_v29, %v6819_v24  ;;  %v6828_v24 = vsel %vm6530_vm3, %v6747_v13, 0.0  ;;  %v6753_v13 = vmul.f32 %v21855_v21, %v21855_v21 }
 0x5d3   :  { %v6823_v59 = vadd.f32 %v6822_v14, %v6821_v60  ;;  %v6830_v60 = vsel %vm6530_vm3, %v6748_v11, 0.0  ;;  %v6754_v11 = vmul.f32 %v21859_v28, %v21859_v28 }
 0x5d5   :  { %v6825_v31 = vadd.f32 %v6824_v20, %v6823_v59  ;;  %v6832_v59 = vsel %vm6530_vm3, %v6749_v50, 0.0  ;;  %v6755_v50 = vmul.f32 %v21863_v27, %v21863_v27 }
 0x5d7   :  { %v6827_v62 = vadd.f32 %v6826_v23, %v6825_v31  ;;  %v6834_v31 = vsel %vm6530_vm3, %v6750_v47, 0.0  ;;  %v6756_v47 = vmul.f32 %v21867_v38, %v21867_v38 }
 0x5d9   :  { %v6829_v29 = vadd.f32 %v6828_v24, %v6827_v62  ;;  %v6836_v62 = vsel %vm6530_vm3, %v6751_v42, 0.0  ;;  %v6757_v42 = vmul.f32 %v21871_v34, %v21871_v34 }
 0x5db   :  { %v6831_v14 = vadd.f32 %v6830_v60, %v6829_v29  ;;  %v6838_v29 = vsel %vm6530_vm3, %v6752_v41, 0.0  ;;  %v6758_v41 = vmul.f32 %v21875_v46, %v21875_v46 }
 0x5dd   :  { %v6833_v20 = vadd.f32 %v6832_v59, %v6831_v14  ;;  %v6840_v14 = vsel %vm6530_vm3, %v6753_v13, 0.0  ;;  %v6759_v13 = vmul.f32 %v21879_v44, %v21879_v44 }
 0x5df   :  { %v6835_v23 = vadd.f32 %v6834_v31, %v6833_v20  ;;  %v6842_v20 = vsel %vm6530_vm3, %v6754_v11, 0.0  ;;  %v6760_v11 = vmul.f32 %v21883_v56, %v21883_v56 }
 0x5e1   :  { %v6837_v24 = vadd.f32 %v6836_v62, %v6835_v23  ;;  %v6844_v23 = vsel %vm6530_vm3, %v6755_v50, 0.0  ;;  %v6761_v50 = vmul.f32 %v21887_v55, %v21887_v55 }
 0x5e3   :  { %v6839_v60 = vadd.f32 %v6838_v29, %v6837_v24  ;;  %v6846_v24 = vsel %vm6530_vm3, %v6756_v47, 0.0  ;;  %v6762_v47 = vmul.f32 %v21891_v4, %v21891_v4 }
 0x5e5   :  { %v6841_v59 = vadd.f32 %v6840_v14, %v6839_v60  ;;  %v6848_v60 = vsel %vm6530_vm3, %v6757_v42, 0.0  ;;  %v6763_v42 = vmul.f32 %v21895_v3, %v21895_v3 }
 0x5e7   :  { %v6843_v31 = vadd.f32 %v6842_v20, %v6841_v59  ;;  %v6850_v59 = vsel %vm6530_vm3, %v6758_v41, 0.0  ;;  %v6764_v41 = vmul.f32 %v21899_v9, %v21899_v9 }
 0x5e9   :  { %v6845_v62 = vadd.f32 %v6844_v23, %v6843_v31  ;;  %v6852_v31 = vsel %vm6530_vm3, %v6759_v13, 0.0  ;;  %v6765_v13 = vmul.f32 %v21903_v7, %v21903_v7 }
 0x5eb   :  { %v6847_v29 = vadd.f32 %v6846_v24, %v6845_v62  ;;  %v6854_v62 = vsel %vm6530_vm3, %v6760_v11, 0.0  ;;  %v6766_v11 = vmul.f32 %v21907_v18, %v21907_v18 }
 0x5ed   :  { %v6849_v14 = vadd.f32 %v6848_v60, %v6847_v29  ;;  %v6856_v29 = vsel %vm6530_vm3, %v6761_v50, 0.0  ;;  %v6767_v50 = vmul.f32 %v21911_v17, %v21911_v17 }
 0x5ef   :  { %v6851_v20 = vadd.f32 %v6850_v59, %v6849_v14  ;;  %v6858_v14 = vsel %vm6530_vm3, %v6762_v47, 0.0  ;;  %v6768_v47 = vmul.f32 %v21915_v26, %v21915_v26 }
 0x5f1   :  { %v6853_v23 = vadd.f32 %v6852_v31, %v6851_v20  ;;  %v6860_v20 = vsel %vm6530_vm3, %v6763_v42, 0.0  ;;  %v6769_v42 = vmul.f32 %v21919_v25, %v21919_v25 }
 0x5f3   :  { %v6855_v24 = vadd.f32 %v6854_v62, %v6853_v23  ;;  %v6862_v23 = vsel %vm6530_vm3, %v6764_v41, 0.0  ;;  %v6770_v41 = vmul.f32 %v21923_v1, %v21923_v1 }
 0x5f5   :  { %v6857_v60 = vadd.f32 %v6856_v29, %v6855_v24  ;;  %v6864_v24 = vsel %vm6530_vm3, %v6765_v13, 0.0  ;;  %v6771_v13 = vmul.f32 %v21927_v16, %v21927_v16 }
 0x5f7   :  { %v6859_v59 = vadd.f32 %v6858_v14, %v6857_v60  ;;  %v6866_v60 = vsel %vm6530_vm3, %v6766_v11, 0.0  ;;  %v14810_v11 = vld [vmem:[%s25789_s4 + $0x8] sm:$0xff] }
 0x5f8   :  { %17447 = vmatprep.subr.mxu1 %v14810_v11 }
 0x5f9   :  { %v6861_v31 = vadd.f32 %v6860_v20, %v6859_v59  ;;  %v6868_v59 = vsel %vm6530_vm3, %v6767_v50, 0.0  ;;  %v7372_v50 = vld [vmem:[%s25789_s4] sm:$0xff]  ;;  %17448 = vmatpush3.msra.mxu1 %v14810_v11 }
 0x5fa   :  { %17545 = vmatprep.subr.mxu1 %v7372_v50 }
 0x5fb   :  { %v6863_v62 = vadd.f32 %v6862_v23, %v6861_v31  ;;  %v6870_v31 = vsel %vm6530_vm3, %v6768_v47, 0.0  ;;  %v6874_v47 = vsel %vm6530_vm3, %v6770_v41, 0.0 }
 0x5fd   :  { %v6865_v29 = vadd.f32 %v6864_v24, %v6863_v62  ;;  %v6872_v62 = vsel %vm6530_vm3, %v6769_v42, 0.0 }
 0x5ff   :  { %v6867_v14 = vadd.f32 %v6866_v60, %v6865_v29  ;;  %v7373_v29 = vld [vmem:[#allocation3 + $0x1] sm:$0xff]  ;;  %v6772_v60 = vmul.f32 %v21931_v54, %v21931_v54 }
 0x600   :  { %17449 = vmatprep.mubr.msk.f32.mxu1 %vm6530_vm3, %v7373_v29 }
 0x601   :  { %v6869_v20 = vadd.f32 %v6868_v59, %v6867_v14  ;;  %v7374_v14 = vld [vmem:[#allocation3 + $0x9] sm:$0xff]  ;;  %v6773_v59 = vmul.f32 %v21935_v53, %v21935_v53  ;;  %v6878_v41 = vsel %vm6530_vm3, %v6772_v60, 0.0  ;;  %v6778_v60 = vmul.f32 %v21955_v30, %v21955_v30 }
 0x602   :  { %17450 = vmatmul.mubr.msk.f32.vlgmr.msra.gmra.mrb[0].mxu1 %vm6530_vm3, %v7374_v14 }
 0x603   :  { %v6871_v23 = vadd.f32 %v6870_v31, %v6869_v20  ;;  %v6876_v20 = vsel %vm6530_vm3, %v6771_v13, 0.0  ;;  %17546 = vmatpush3.msra.mxu1 %v7372_v50  ;;  %v6880_v11 = vsel %vm6530_vm3, %v6773_v59, 0.0  ;;  %v6776_v13 = vmul.f32 %v21947_v10, %v21947_v10  ;;  %v26218_v59 = vld [vmem:[#allocation31_spill] sm:$0xff] }
 0x604   :  { %v6777_v50 = vmul.f32 %v21951_v5, %v21951_v5 }
 0x605   :  { %v6873_v24 = vadd.f32 %v6872_v62, %v6871_v23  ;;  %v6774_v23 = vmul.f32 %v21939_v2, %v21939_v2 }
 0x607   :  { %v6875_v42 = vadd.f32 %v6874_v47, %v6873_v24  ;;  %v6775_v24 = vmul.f32 %v21943_v6, %v21943_v6  ;;  %v6882_v47 = vsel %vm6530_vm3, %v6774_v23, 0.0  ;;  %v26219_v23 = vld [vmem:[#allocation32_spill] sm:$0xff] }
 0x609   :  { %v6877_v31 = vadd.f32 %v6876_v20, %v6875_v42  ;;  %v6884_v42 = vsel %vm6530_vm3, %v6775_v24, 0.0  ;;  %v26220_v24 = vld [vmem:[#allocation33_spill] sm:$0xff] }
 0x60b   :  { %v6879_v62 = vadd.f32 %v6878_v41, %v6877_v31  ;;  %v6886_v31 = vsel %vm6530_vm3, %v6776_v13, 0.0  ;;  %v26221_v13 = vld [vmem:[#allocation34_spill] sm:$0xff] }
 0x60d   :  { %v6881_v29 = vadd.f32 %v6880_v11, %v6879_v62  ;;  %v6779_v62 = vmul.f32 %v26218_v59, %v26218_v59  ;;  %v6888_v11 = vsel %vm6530_vm3, %v6777_v50, 0.0  ;;  %v26222_v50 = vld [vmem:[#allocation35_spill] sm:$0xff] }
 0x60f   :  { %v6883_v14 = vadd.f32 %v6882_v47, %v6881_v29  ;;  %v6780_v29 = vmul.f32 %v26219_v23, %v26219_v23  ;;  %v6890_v47 = vsel %vm6530_vm3, %v6778_v60, 0.0  ;;  %v26223_v60 = vld [vmem:[#allocation36_spill] sm:$0xff] }
 0x611   :  { %v6885_v20 = vadd.f32 %v6884_v42, %v6883_v14  ;;  %v6781_v14 = vmul.f32 %v26220_v24, %v26220_v24  ;;  %v6892_v42 = vsel %vm6530_vm3, %v6779_v62, 0.0 }
 0x613   :  { %v6887_v41 = vadd.f32 %v6886_v31, %v6885_v20  ;;  %v6782_v20 = vmul.f32 %v26221_v13, %v26221_v13  ;;  %v6894_v31 = vsel %vm6530_vm3, %v6780_v29, 0.0 }
 0x615   :  { %v6889_v10 = vadd.f32 %v6888_v11, %v6887_v41  ;;  %v6783_v41 = vmul.f32 %v26222_v50, %v26222_v50  ;;  %v6896_v11 = vsel %vm6530_vm3, %v6781_v14, 0.0 }
 0x617   :  { %v6891_v5 = vadd.f32 %v6890_v47, %v6889_v10  ;;  %v6784_v10 = vmul.f32 %v26223_v60, %v26223_v60  ;;  %v6898_v47 = vsel %vm6530_vm3, %v6782_v20, 0.0  ;;  %v6900_v62 = vsel %vm6530_vm3, %v6783_v41, 0.0  ;;  %v26224_v20 = vld [vmem:[#allocation40_spill] sm:$0xff]  ;;  %v26225_v41 = vld [vmem:[#allocation41_spill] sm:$0xff] }
 0x619   :  { %v6893_v30 = vadd.f32 %v6892_v42, %v6891_v5  ;;  %v6785_v5 = vmul.f32 %v21983_v32, %v21983_v32  ;;  %v6902_v29 = vsel %vm6530_vm3, %v6784_v10, 0.0  ;;  %v26226_v10 = vld [vmem:[#allocation42_spill] sm:$0xff] }
 0x61b   :  { %v6895_v59 = vadd.f32 %v6894_v31, %v6893_v30  ;;  %v6786_v30 = vmul.f32 %v21987_v19, %v21987_v19  ;;  %v6904_v14 = vsel %vm6530_vm3, %v6785_v5, 0.0  ;;  %v26227_v5 = vld [vmem:[#allocation43_spill] sm:$0xff] }
 0x61d   :  { %v6897_v23 = vadd.f32 %v6896_v11, %v6895_v59  ;;  %v6787_v59 = vmul.f32 %v21991_v61, %v21991_v61 }
 0x61f   :  { %v6899_v24 = vadd.f32 %v6898_v47, %v6897_v23  ;;  %v6788_v23 = vmul.f32 %v26224_v20, %v26224_v20  ;;  %v6906_v47 = vsel %vm6530_vm3, %v6786_v30, 0.0  ;;  %v26228_v30 = vld [vmem:[#allocation44_spill] sm:$0xff] }
 0x621   :  { %v6901_v42 = vadd.f32 %v6900_v62, %v6899_v24  ;;  %v6789_v24 = vmul.f32 %v26225_v41, %v26225_v41  ;;  %v6908_v62 = vsel %vm6530_vm3, %v6787_v59, 0.0 }
 0x623   :  { %v6903_v31 = vadd.f32 %v6902_v29, %v6901_v42  ;;  %v6790_v42 = vmul.f32 %v26226_v10, %v26226_v10  ;;  %v6910_v29 = vsel %vm6530_vm3, %v6788_v23, 0.0 }
 0x625   :  { %v6905_v11 = vadd.f32 %v6904_v14, %v6903_v31  ;;  %v6791_v31 = vmul.f32 %v26227_v5, %v26227_v5  ;;  %v6912_v14 = vsel %vm6530_vm3, %v6789_v24, 0.0 }
 0x627   :  { %v6907_v32 = vadd.f32 %v6906_v47, %v6905_v11  ;;  %v6792_v11 = vmul.f32 %v26228_v30, %v26228_v30  ;;  %v6914_v47 = vsel %vm6530_vm3, %v6790_v42, 0.0 }
 0x629   :  { %v6909_v19 = vadd.f32 %v6908_v62, %v6907_v32  ;;  %v6916_v32 = vsel %vm6530_vm3, %v6791_v31, 0.0  ;;  %v6918_v62 = vsel %vm6530_vm3, %v6792_v11, 0.0 }
 0x62b   :  { %v6911_v61 = vadd.f32 %v6910_v29, %v6909_v19 }
 0x62d   :  { %v6913_v20 = vadd.f32 %v6912_v14, %v6911_v61  ;;  %v6931_v14 = vlaneseq }
 0x62f   :  { %v6915_v41 = vadd.f32 %v6914_v47, %v6913_v20  ;;  %v22213_v30 = vshrl.u32 %v6931_v14, 7  ;;  %v6528_v20 = vld [vmem:[%s25790_s2] sm:$0x1]  ;;  %v26231_v47 = vld [vmem:[#allocation25_spill] sm:$0xff] }
 0x631   :  { %v6917_v59 = vadd.f32 %v6916_v32, %v6915_v41  ;;  %26229 = vst [vmem:[#allocation45_spill] sm:$0xff] %v22213_v30  ;;  %v25907_v41 = vsub.s32 0, %v22213_v30  ;;  %v26248_v30 = vld [vmem:[#allocation37_spill] sm:$0xff] }
 0x633   :  { %v6919_v10 = vadd.f32 %v6918_v62, %v6917_v59  ;;  %v26232_v59 = vld [vmem:[#allocation26_spill] sm:$0xff] }
 0x635   :  { %v6920_v23 = vrot.slane %v6919_v10, 4 }
 0x637   :  { %v6921_v19 = vadd.f32 %v6920_v23, %v6919_v10  ;;  %v26233_v23 = vld [vmem:[#allocation27_spill] sm:$0xff] }
 0x639   :  { %v6922_v29 = vrot.slane %v6921_v19, 2 }
 0x63b   :  { %v6923_v60 = vadd.f32 %v6922_v29, %v6921_v19 }
 0x63d   :  { %v6924_v50 = vrot.slane %v6923_v60, 1 }
 0x63f   :  { %v6925_v13 = vadd.f32 %v6924_v50, %v6923_v60  ;;  %v26230_v60 = vld [vmem:[#allocation24_spill] sm:$0xff] }
 0x641   :  { %v6926_v24 = vmul.f32 0.001953125, %v6925_v13  ;;  %v22226_v13 = vld [vmem:[%s25791_s3] ss:$0 sm:$0xff] }
 0x643   :  { %v6927_v61 = vadd.f32 1e-05, %v6926_v24 }
 0x645   :  { %19354 = vrsqrt.f32 %v6927_v61 }
 0x64f   :  { %v19355_v42 = vpop.eup %19354 }
 0x650   :  { %v6929_v31 = vmul.f32 %v19355_v42, %v6528_v20 }
 0x652   :  { %v22221_v10 = vrot.slane %v6929_v31, %v25907_v41  ;;  %v26234_v31 = vld [vmem:[#allocation28_spill] sm:$0xff] }
 0x653   :  { %v26246_v41 = vld [vmem:[#allocation36_spill] sm:$0xff] }
 0x654   :  { %v6998_v50 = vmul.f32 %v22221_v10, %v26227_v5  ;;  %v22232_v11 = vmul.f32 %v22221_v10, %v26230_v60  ;;  %v22236_v32 = vmul.f32 %v22221_v10, %v26231_v47  ;;  %v22240_v62 = vmul.f32 %v22221_v10, %v26232_v59  ;;  %v26236_v60 = vld [vmem:[#allocation30_spill] sm:$0xff]  ;;  %v26237_v47 = vld [vmem:[#allocation31_spill] sm:$0xff]  ;;  %v26238_v59 = vld [vmem:[#allocation32_spill] sm:$0xff] }
 0x655   :  { %v22244_v19 = vmul.f32 %v22221_v10, %v26233_v23  ;;  %v22248_v29 = vmul.f32 %v22221_v10, %v21775_v48  ;;  %v22252_v5 = vmul.f32 %v22221_v10, %v21779_v37  ;;  %v22256_v24 = vmul.f32 %v22221_v10, %v21783_v33  ;;  %v26240_v23 = vld [vmem:[#allocation33_spill] sm:$0xff] }
 0x656   :  { %v7068_v61 = vadd.f32 %v22226_v13, %v6998_v50  ;;  %v22261_v14 = vmul.f32 %v22221_v10, %v21787_v40  ;;  %v22265_v20 = vmul.f32 %v22221_v10, %v21791_v39  ;;  %v22269_v48 = vmul.f32 %v22221_v10, %v21795_v45  ;;  %v26235_v50 = vld [vmem:[#allocation29_spill] sm:$0xff] }
 0x657   :  { %v22273_v37 = vmul.f32 %v22221_v10, %v21799_v43  ;;  %v22277_v33 = vmul.f32 %v22221_v10, %v21803_v52  ;;  %v22281_v40 = vmul.f32 %v22221_v10, %v21807_v51  ;;  %v22285_v39 = vmul.f32 %v22221_v10, %v21811_v58 }
 0x658   :  { %v7132_v42 = vmax.f32 %v7068_v61, 0.0  ;;  %v22289_v45 = vmul.f32 %v22221_v10, %v21815_v57  ;;  %v22293_v43 = vmul.f32 %v22221_v10, %v21819_v36  ;;  %v22297_v52 = vmul.f32 %v22221_v10, %v21823_v63 }
 0x659   :  { %v22301_v51 = vmul.f32 %v22221_v10, %v21827_v0  ;;  %v22305_v58 = vmul.f32 %v22221_v10, %v21831_v35  ;;  %v22309_v57 = vmul.f32 %v22221_v10, %v21835_v8  ;;  %v22313_v36 = vmul.f32 %v22221_v10, %v21839_v49 }
 0x65a   :  { %7306 = vst.msk [vmem:[#allocation3 + $0x331] sm:$0xff] %vm6530_vm3, %v7132_v42  ;;  %v22318_v63 = vmul.f32 %v22221_v10, %v21843_v15  ;;  %v22322_v0 = vmul.f32 %v22221_v10, %v21847_v12  ;;  %v22326_v35 = vmul.f32 %v22221_v10, %v21851_v22  ;;  %v22330_v8 = vmul.f32 %v22221_v10, %v21855_v21  ;;  %v26242_v42 = vld [vmem:[#allocation34_spill] sm:$0xff] }
 0x65b   :  { %v22334_v49 = vmul.f32 %v22221_v10, %v21859_v28  ;;  %v22338_v15 = vmul.f32 %v22221_v10, %v21863_v27  ;;  %v22342_v12 = vmul.f32 %v22221_v10, %v21867_v38  ;;  %v22346_v22 = vmul.f32 %v22221_v10, %v21871_v34 }
 0x65c   :  { %v22350_v21 = vmul.f32 %v22221_v10, %v21875_v46  ;;  %v22354_v28 = vmul.f32 %v22221_v10, %v21879_v44  ;;  %v22358_v27 = vmul.f32 %v22221_v10, %v21883_v56  ;;  %v22362_v38 = vmul.f32 %v22221_v10, %v21887_v55 }
 0x65d   :  { %v22366_v34 = vmul.f32 %v22221_v10, %v21891_v4  ;;  %v22370_v46 = vmul.f32 %v22221_v10, %v21895_v3  ;;  %v22374_v44 = vmul.f32 %v22221_v10, %v21899_v9  ;;  %v22378_v56 = vmul.f32 %v22221_v10, %v21903_v7 }
 0x65e   :  { %v22382_v55 = vmul.f32 %v22221_v10, %v21907_v18  ;;  %v22386_v4 = vmul.f32 %v22221_v10, %v21911_v17  ;;  %v22390_v3 = vmul.f32 %v22221_v10, %v21915_v26  ;;  %v22394_v9 = vmul.f32 %v22221_v10, %v21919_v25 }
 0x65f   :  { %v22398_v7 = vmul.f32 %v22221_v10, %v21923_v1  ;;  %v22402_v18 = vmul.f32 %v22221_v10, %v21927_v16  ;;  %v22406_v17 = vmul.f32 %v22221_v10, %v21931_v54  ;;  %v22410_v26 = vmul.f32 %v22221_v10, %v21935_v53 }
 0x660   :  { %v22414_v25 = vmul.f32 %v22221_v10, %v21939_v2  ;;  %v22418_v1 = vmul.f32 %v22221_v10, %v21943_v6  ;;  %v22422_v16 = vmul.f32 %v22221_v10, %v26234_v31  ;;  %v22426_v54 = vmul.f32 %v22221_v10, %v26235_v50  ;;  %v26244_v50 = vld [vmem:[#allocation35_spill] sm:$0xff] }
 0x661   :  { %v22430_v53 = vmul.f32 %v22221_v10, %v26236_v60  ;;  %v22434_v2 = vmul.f32 %v22221_v10, %v26237_v47  ;;  %v22438_v6 = vmul.f32 %v22221_v10, %v26238_v59  ;;  %v22442_v61 = vmul.f32 %v22221_v10, %v26240_v23 }
 0x662   :  { %v22446_v31 = vmul.f32 %v22221_v10, %v26242_v42  ;;  %v22450_v60 = vmul.f32 %v22221_v10, %v26244_v50  ;;  %v22454_v47 = vmul.f32 %v22221_v10, %v26246_v41  ;;  %v22458_v59 = vmul.f32 %v22221_v10, %v26248_v30 }
 0x663   :  { %26239 = vst [vmem:[#allocation46_spill] sm:$0xff] %v22438_v6  ;;  %26241 = vst [vmem:[#allocation47_spill] sm:$0xff] %v22442_v61  ;;  %v26250_v6 = vld [vmem:[#allocation38_spill] sm:$0xff]  ;;  %v26251_v61 = vld [vmem:[#allocation39_spill] sm:$0xff] }
 0x664   :  { %26243 = vst [vmem:[#allocation48_spill] sm:$0xff] %v22446_v31  ;;  %26245 = vst [vmem:[#allocation49_spill] sm:$0xff] %v22450_v60  ;;  %v22462_v23 = vmul.f32 %v22221_v10, %v26250_v6  ;;  %v22466_v42 = vmul.f32 %v22221_v10, %v26251_v61  ;;  %v26252_v31 = vld [vmem:[#allocation40_spill] sm:$0xff]  ;;  %v26253_v60 = vld [vmem:[#allocation41_spill] sm:$0xff]  ;;  %v22486_v61 = vadd.f32 %v22226_v13, %v22232_v11 }
 0x665   :  { %26247 = vst [vmem:[#allocation50_spill] sm:$0xff] %v22454_v47  ;;  %26249 = vst [vmem:[#allocation51_spill] sm:$0xff] %v22458_v59  ;;  %v22470_v50 = vmul.f32 %v22221_v10, %v26252_v31  ;;  %v22474_v41 = vmul.f32 %v22221_v10, %v26253_v60  ;;  %v26254_v47 = vld [vmem:[#allocation42_spill] sm:$0xff]  ;;  %v26255_v59 = vld [vmem:[#allocation44_spill] sm:$0xff]  ;;  %v22490_v31 = vadd.f32 %v22226_v13, %v22236_v32 }
 0x666   :  { %v22478_v30 = vmul.f32 %v22221_v10, %v26254_v47  ;;  %v22482_v6 = vmul.f32 %v22221_v10, %v26255_v59  ;;  %v22494_v60 = vadd.f32 %v22226_v13, %v22240_v62  ;;  %v22498_v47 = vadd.f32 %v22226_v13, %v22244_v19 }
 0x667   :  { %v22502_v10 = vadd.f32 %v22226_v13, %v22248_v29  ;;  %v22506_v11 = vadd.f32 %v22226_v13, %v22252_v5  ;;  %v22510_v32 = vadd.f32 %v22226_v13, %v22256_v24  ;;  %v22514_v62 = vadd.f32 %v22226_v13, %v22261_v14 }
 0x668   :  { %v22518_v19 = vadd.f32 %v22226_v13, %v22265_v20  ;;  %v22522_v29 = vadd.f32 %v22226_v13, %v22269_v48  ;;  %v22526_v5 = vadd.f32 %v22226_v13, %v22273_v37  ;;  %v22530_v24 = vadd.f32 %v22226_v13, %v22277_v33 }
 0x669   :  { %v22534_v14 = vadd.f32 %v22226_v13, %v22281_v40  ;;  %v22538_v20 = vadd.f32 %v22226_v13, %v22285_v39  ;;  %v22542_v48 = vadd.f32 %v22226_v13, %v22289_v45  ;;  %v22546_v37 = vadd.f32 %v22226_v13, %v22293_v43 }
 0x66a   :  { %v22550_v33 = vadd.f32 %v22226_v13, %v22297_v52  ;;  %v22554_v40 = vadd.f32 %v22226_v13, %v22301_v51  ;;  %v22558_v39 = vadd.f32 %v22226_v13, %v22305_v58  ;;  %v22562_v45 = vadd.f32 %v22226_v13, %v22309_v57  ;;  %v26261_v59 = vld [vmem:[#allocation46_spill] sm:$0xff] }
 0x66b   :  { %v22566_v43 = vadd.f32 %v22226_v13, %v22313_v36  ;;  %v22570_v52 = vadd.f32 %v22226_v13, %v22318_v63  ;;  %v22574_v51 = vadd.f32 %v22226_v13, %v22322_v0  ;;  %v22578_v58 = vadd.f32 %v22226_v13, %v22326_v35 }
 0x66c   :  { %v22582_v57 = vadd.f32 %v22226_v13, %v22330_v8  ;;  %v22586_v36 = vadd.f32 %v22226_v13, %v22334_v49  ;;  %v22590_v63 = vadd.f32 %v22226_v13, %v22338_v15  ;;  %v22594_v0 = vadd.f32 %v22226_v13, %v22342_v12 }
 0x66d   :  { %v22598_v35 = vadd.f32 %v22226_v13, %v22346_v22  ;;  %v22602_v8 = vadd.f32 %v22226_v13, %v22350_v21  ;;  %v22606_v49 = vadd.f32 %v22226_v13, %v22354_v28  ;;  %v22610_v15 = vadd.f32 %v22226_v13, %v22358_v27 }
 0x66e   :  { %v22614_v12 = vadd.f32 %v22226_v13, %v22362_v38  ;;  %v22618_v22 = vadd.f32 %v22226_v13, %v22366_v34  ;;  %v22622_v21 = vadd.f32 %v22226_v13, %v22370_v46  ;;  %v22626_v28 = vadd.f32 %v22226_v13, %v22374_v44 }
 0x66f   :  { %v22630_v27 = vadd.f32 %v22226_v13, %v22378_v56  ;;  %v22634_v38 = vadd.f32 %v22226_v13, %v22382_v55  ;;  %v22638_v34 = vadd.f32 %v22226_v13, %v22386_v4  ;;  %v22642_v46 = vadd.f32 %v22226_v13, %v22390_v3 }
 0x670   :  { %v22646_v44 = vadd.f32 %v22226_v13, %v22394_v9  ;;  %v22650_v56 = vadd.f32 %v22226_v13, %v22398_v7  ;;  %v22654_v55 = vadd.f32 %v22226_v13, %v22402_v18  ;;  %v22658_v4 = vadd.f32 %v22226_v13, %v22406_v17 }
 0x671   :  { %v22662_v3 = vadd.f32 %v22226_v13, %v22410_v26  ;;  %v22666_v9 = vadd.f32 %v22226_v13, %v22414_v25  ;;  %v22670_v7 = vadd.f32 %v22226_v13, %v22418_v1  ;;  %v22674_v18 = vadd.f32 %v22226_v13, %v22422_v16 }
 0x672   :  { %v22678_v17 = vadd.f32 %v22226_v13, %v22426_v54  ;;  %v22682_v26 = vadd.f32 %v22226_v13, %v22430_v53  ;;  %v22686_v25 = vadd.f32 %v22226_v13, %v22434_v2  ;;  %v22690_v1 = vadd.f32 %v22226_v13, %v26261_v59 }
 0x673   :  { %26256 = vst [vmem:[#allocation52_spill] sm:$0xff] %v22670_v7  ;;  %26257 = vst [vmem:[#allocation53_spill] sm:$0xff] %v22674_v18  ;;  %v26262_v7 = vld [vmem:[#allocation47_spill] sm:$0xff]  ;;  %v26263_v18 = vld [vmem:[#allocation48_spill] sm:$0xff] }
 0x674   :  { %26258 = vst [vmem:[#allocation54_spill] sm:$0xff] %v22678_v17  ;;  %26259 = vst [vmem:[#allocation55_spill] sm:$0xff] %v22682_v26  ;;  %v22694_v16 = vadd.f32 %v22226_v13, %v26262_v7  ;;  %v22698_v54 = vadd.f32 %v22226_v13, %v26263_v18  ;;  %v26264_v17 = vld [vmem:[#allocation49_spill] sm:$0xff]  ;;  %v26265_v26 = vld [vmem:[#allocation50_spill] sm:$0xff]  ;;  %v22714_v7 = vadd.f32 %v22226_v13, %v22462_v23 }
 0x675   :  { %26260 = vst [vmem:[#allocation56_spill] sm:$0xff] %v22686_v25  ;;  %v22702_v53 = vadd.f32 %v22226_v13, %v26264_v17  ;;  %v22706_v2 = vadd.f32 %v22226_v13, %v26265_v26  ;;  %v26266_v25 = vld [vmem:[#allocation51_spill] sm:$0xff]  ;;  %v22718_v18 = vadd.f32 %v22226_v13, %v22466_v42  ;;  %v22722_v17 = vadd.f32 %v22226_v13, %v22470_v50 }
 0x676   :  { %v22710_v59 = vadd.f32 %v22226_v13, %v26266_v25  ;;  %26267 = vst [vmem:[#allocation57_spill] sm:$0xff] %v22714_v7  ;;  %v22726_v26 = vadd.f32 %v22226_v13, %v22474_v41  ;;  %v22730_v25 = vadd.f32 %v22226_v13, %v22478_v30  ;;  %v22734_v23 = vadd.f32 %v22226_v13, %v22482_v6 }
 0x677   :  { %26268 = vst [vmem:[#allocation58_spill] sm:$0xff] %v22718_v18  ;;  %26269 = vst [vmem:[#allocation59_spill] sm:$0xff] %v22722_v17  ;;  %v7070_v7 = vmax.f32 %v22486_v61, 0.0  ;;  %v7071_v42 = vmax.f32 %v22490_v31, 0.0  ;;  %v7072_v18 = vmax.f32 %v22494_v60, 0.0  ;;  %v7073_v50 = vmax.f32 %v22498_v47, 0.0 }
 0x678   :  { %26270 = vst [vmem:[#allocation60_spill] sm:$0xff] %v22726_v26  ;;  %26271 = vst [vmem:[#allocation61_spill] sm:$0xff] %v22730_v25  ;;  %v7074_v17 = vmax.f32 %v22502_v10, 0.0  ;;  %v7075_v41 = vmax.f32 %v22506_v11, 0.0  ;;  %v7076_v26 = vmax.f32 %v22510_v32, 0.0  ;;  %v7077_v30 = vmax.f32 %v22514_v62, 0.0 }
 0x679   :  { %v7078_v25 = vmax.f32 %v22518_v19, 0.0  ;;  %v7079_v13 = vmax.f32 %v22522_v29, 0.0  ;;  %v7080_v6 = vmax.f32 %v22526_v5, 0.0  ;;  %7244 = vst.msk [vmem:[#allocation3 + $0x19] sm:$0xff] %vm6530_vm3, %v7070_v7  ;;  %7245 = vst.msk [vmem:[#allocation3 + $0x21] sm:$0xff] %vm6530_vm3, %v7071_v42  ;;  %v7081_v61 = vmax.f32 %v22530_v24, 0.0 }
 0x67a   :  { %7246 = vst.msk [vmem:[#allocation3 + $0x31] sm:$0xff] %vm6530_vm3, %v7072_v18  ;;  %v7082_v31 = vmax.f32 %v22534_v14, 0.0  ;;  %v7083_v60 = vmax.f32 %v22538_v20, 0.0  ;;  %v7084_v47 = vmax.f32 %v22542_v48, 0.0  ;;  %7247 = vst.msk [vmem:[#allocation3 + $0x39] sm:$0xff] %vm6530_vm3, %v7073_v50  ;;  %v7085_v10 = vmax.f32 %v22546_v37, 0.0 }
 0x67b   :  { %7248 = vst.msk [vmem:[#allocation3 + $0x49] sm:$0xff] %vm6530_vm3, %v7074_v17  ;;  %7249 = vst.msk [vmem:[#allocation3 + $0x51] sm:$0xff] %vm6530_vm3, %v7075_v41  ;;  %v7086_v11 = vmax.f32 %v22550_v33, 0.0  ;;  %v7087_v32 = vmax.f32 %v22554_v40, 0.0  ;;  %v7088_v62 = vmax.f32 %v22558_v39, 0.0  ;;  %v22769_v19 = vld [vmem:[%s25789_s4 + $0x10] sm:$0xff] }
 0x67c   :  { %7250 = vst.msk [vmem:[#allocation3 + $0x61] sm:$0xff] %vm6530_vm3, %v7076_v26  ;;  %7251 = vst.msk [vmem:[#allocation3 + $0x69] sm:$0xff] %vm6530_vm3, %v7077_v30  ;;  %v7089_v29 = vmax.f32 %v22562_v45, 0.0  ;;  %v7090_v5 = vmax.f32 %v22566_v43, 0.0  ;;  %v7091_v24 = vmax.f32 %v22570_v52, 0.0  ;;  %v7092_v14 = vmax.f32 %v22574_v51, 0.0  ;;  %17643 = vmatprep.subr.mxu1 %v22769_v19 }
 0x67d   :  { %7252 = vst.msk [vmem:[#allocation3 + $0x79] sm:$0xff] %vm6530_vm3, %v7078_v25  ;;  %7253 = vst.msk [vmem:[#allocation3 + $0x81] sm:$0xff] %vm6530_vm3, %v7079_v13  ;;  %v7093_v20 = vmax.f32 %v22578_v58, 0.0  ;;  %v7094_v48 = vmax.f32 %v22582_v57, 0.0  ;;  %v7095_v37 = vmax.f32 %v22586_v36, 0.0  ;;  %v7096_v33 = vmax.f32 %v22590_v63, 0.0 }
 0x67e   :  { %7254 = vst.msk [vmem:[#allocation3 + $0x91] sm:$0xff] %vm6530_vm3, %v7080_v6  ;;  %7255 = vst.msk [vmem:[#allocation3 + $0x99] sm:$0xff] %vm6530_vm3, %v7081_v61  ;;  %v7097_v40 = vmax.f32 %v22594_v0, 0.0  ;;  %v7098_v39 = vmax.f32 %v22598_v35, 0.0  ;;  %v7099_v45 = vmax.f32 %v22602_v8, 0.0  ;;  %v7100_v43 = vmax.f32 %v22606_v49, 0.0 }
 0x67f   :  { %7256 = vst.msk [vmem:[#allocation3 + $0xa9] sm:$0xff] %vm6530_vm3, %v7082_v31  ;;  %7257 = vst.msk [vmem:[#allocation3 + $0xb1] sm:$0xff] %vm6530_vm3, %v7083_v60  ;;  %v7101_v52 = vmax.f32 %v22610_v15, 0.0  ;;  %v7102_v51 = vmax.f32 %v22614_v12, 0.0  ;;  %v7103_v58 = vmax.f32 %v22618_v22, 0.0  ;;  %v7104_v57 = vmax.f32 %v22622_v21, 0.0 }
 0x680   :  { %7258 = vst.msk [vmem:[#allocation3 + $0xc1] sm:$0xff] %vm6530_vm3, %v7084_v47  ;;  %7259 = vst.msk [vmem:[#allocation3 + $0xc9] sm:$0xff] %vm6530_vm3, %v7085_v10  ;;  %v7105_v36 = vmax.f32 %v22626_v28, 0.0  ;;  %v7106_v63 = vmax.f32 %v22630_v27, 0.0  ;;  %v7107_v0 = vmax.f32 %v22634_v38, 0.0  ;;  %v7108_v35 = vmax.f32 %v22638_v34, 0.0 }
 0x681   :  { %7260 = vst.msk [vmem:[#allocation3 + $0xd9] sm:$0xff] %vm6530_vm3, %v7086_v11  ;;  %7261 = vst.msk [vmem:[#allocation3 + $0xe1] sm:$0xff] %vm6530_vm3, %v7087_v32  ;;  %v7375_v8 = vld [vmem:[#allocation3 + $0x19] sm:$0xff]  ;;  %v7376_v49 = vld [vmem:[#allocation3 + $0x21] sm:$0xff]  ;;  %v7109_v15 = vmax.f32 %v22642_v46, 0.0  ;;  %v7110_v12 = vmax.f32 %v22646_v44, 0.0 }
 0x682   :  { %7262 = vst.msk [vmem:[#allocation3 + $0xf1] sm:$0xff] %vm6530_vm3, %v7088_v62  ;;  %7263 = vst.msk [vmem:[#allocation3 + $0xf9] sm:$0xff] %vm6530_vm3, %v7089_v29  ;;  %v7111_v22 = vmax.f32 %v22650_v56, 0.0  ;;  %v7112_v21 = vmax.f32 %v22654_v55, 0.0  ;;  %17452 = vmatprep.mubr.msk.f32.mxu1 %vm6530_vm3, %v7375_v8  ;;  %v7113_v28 = vmax.f32 %v22658_v4, 0.0  ;;  %v7114_v27 = vmax.f32 %v22662_v3, 0.0 }
 0x683   :  { %7264 = vst.msk [vmem:[#allocation3 + $0x109] sm:$0xff] %vm6530_vm3, %v7090_v5  ;;  %7265 = vst.msk [vmem:[#allocation3 + $0x111] sm:$0xff] %vm6530_vm3, %v7091_v24  ;;  %v7115_v38 = vmax.f32 %v22666_v9, 0.0  ;;  %v26272_v34 = vld [vmem:[#allocation52_spill] sm:$0xff]  ;;  %17453 = vmatmul.mubr.msk.f32.gmra.mrb[2].mxu1 %vm6530_vm3, %v7376_v49  ;;  %v7377_v44 = vld [vmem:[#allocation3 + $0x31] sm:$0xff]  ;;  %v7121_v26 = vmax.f32 %v22690_v1, 0.0 }
 0x684   :  { %7266 = vst.msk [vmem:[#allocation3 + $0x121] sm:$0xff] %vm6530_vm3, %v7092_v14  ;;  %7267 = vst.msk [vmem:[#allocation3 + $0x129] sm:$0xff] %vm6530_vm3, %v7093_v20  ;;  %v7116_v46 = vmax.f32 %v26272_v34, 0.0  ;;  %v26273_v56 = vld [vmem:[#allocation53_spill] sm:$0xff]  ;;  %v26274_v4 = vld [vmem:[#allocation54_spill] sm:$0xff]  ;;  %17455 = vmatprep.mubr.msk.f32.mxu1 %vm6530_vm3, %v7377_v44  ;;  %v7122_v25 = vmax.f32 %v22694_v16, 0.0 }
 0x685   :  { %7268 = vst.msk [vmem:[#allocation3 + $0x139] sm:$0xff] %vm6530_vm3, %v7094_v48  ;;  %7269 = vst.msk [vmem:[#allocation3 + $0x141] sm:$0xff] %vm6530_vm3, %v7095_v37  ;;  %v7117_v55 = vmax.f32 %v26273_v56, 0.0  ;;  %v7118_v7 = vmax.f32 %v26274_v4, 0.0  ;;  %v26275_v3 = vld [vmem:[#allocation55_spill] sm:$0xff]  ;;  %v26276_v9 = vld [vmem:[#allocation56_spill] sm:$0xff] }
 0x686   :  { %7270 = vst.msk [vmem:[#allocation3 + $0x151] sm:$0xff] %vm6530_vm3, %v7096_v33  ;;  %7271 = vst.msk [vmem:[#allocation3 + $0x159] sm:$0xff] %vm6530_vm3, %v7097_v40  ;;  %v7119_v18 = vmax.f32 %v26275_v3, 0.0  ;;  %v7120_v17 = vmax.f32 %v26276_v9, 0.0  ;;  %v7123_v42 = vmax.f32 %v22698_v54, 0.0  ;;  %v7124_v50 = vmax.f32 %v22702_v53, 0.0 }
 0x687   :  { %7272 = vst.msk [vmem:[#allocation3 + $0x169] sm:$0xff] %vm6530_vm3, %v7098_v39  ;;  %7273 = vst.msk [vmem:[#allocation3 + $0x171] sm:$0xff] %vm6530_vm3, %v7099_v45  ;;  %v7125_v41 = vmax.f32 %v22706_v2, 0.0  ;;  %v7126_v30 = vmax.f32 %v22710_v59, 0.0  ;;  %v26277_v13 = vld [vmem:[#allocation57_spill] sm:$0xff]  ;;  %v26278_v6 = vld [vmem:[#allocation58_spill] sm:$0xff] }
 0x688   :  { %7274 = vst.msk [vmem:[#allocation3 + $0x181] sm:$0xff] %vm6530_vm3, %v7100_v43  ;;  %7275 = vst.msk [vmem:[#allocation3 + $0x189] sm:$0xff] %vm6530_vm3, %v7101_v52  ;;  %v7127_v1 = vmax.f32 %v26277_v13, 0.0  ;;  %v7128_v16 = vmax.f32 %v26278_v6, 0.0  ;;  %v7378_v54 = vld [vmem:[#allocation3 + $0x39] sm:$0xff]  ;;  %v26281_v2 = vld [vmem:[#allocation61_spill] sm:$0xff] }
 0x689   :  { %7276 = vst.msk [vmem:[#allocation3 + $0x1c9] sm:$0xff] %vm6530_vm3, %v7102_v51  ;;  %7277 = vst.msk [vmem:[#allocation3 + $0x1d1] sm:$0xff] %vm6530_vm3, %v7103_v58  ;;  %v26279_v53 = vld [vmem:[#allocation59_spill] sm:$0xff]  ;;  %v26280_v31 = vld [vmem:[#allocation60_spill] sm:$0xff]  ;;  %v7131_v47 = vmax.f32 %v26281_v2, 0.0  ;;  %v7133_v59 = vmax.f32 %v22734_v23, 0.0  ;;  %17456 = vmatmul.mubr.msk.f32.gmra.mrb[4].mxu1 %vm6530_vm3, %v7378_v54 }
 0x68a   :  { %7278 = vst.msk [vmem:[#allocation3 + $0x1e1] sm:$0xff] %vm6530_vm3, %v7104_v57  ;;  %7279 = vst.msk [vmem:[#allocation3 + $0x1e9] sm:$0xff] %vm6530_vm3, %v7105_v36  ;;  %v7129_v61 = vmax.f32 %v26279_v53, 0.0  ;;  %v7130_v60 = vmax.f32 %v26280_v31, 0.0  ;;  %v7379_v10 = vld [vmem:[#allocation3 + $0x49] sm:$0xff]  ;;  %v7380_v23 = vld [vmem:[#allocation3 + $0x51] sm:$0xff] }
 0x68b   :  { %7280 = vst.msk [vmem:[#allocation3 + $0x1f9] sm:$0xff] %vm6530_vm3, %v7106_v63  ;;  %7281 = vst.msk [vmem:[#allocation3 + $0x201] sm:$0xff] %vm6530_vm3, %v7107_v0  ;;  %17458 = vmatprep.mubr.msk.f32.mxu1 %vm6530_vm3, %v7379_v10  ;;  %v7381_v11 = vld [vmem:[#allocation3 + $0x61] sm:$0xff]  ;;  %v7382_v32 = vld [vmem:[#allocation3 + $0x69] sm:$0xff] }
 0x68c   :  { %7282 = vst.msk [vmem:[#allocation3 + $0x211] sm:$0xff] %vm6530_vm3, %v7108_v35  ;;  %7283 = vst.msk [vmem:[#allocation3 + $0x219] sm:$0xff] %vm6530_vm3, %v7109_v15  ;;  %v7383_v62 = vld [vmem:[#allocation3 + $0x79] sm:$0xff]  ;;  %v7384_v29 = vld [vmem:[#allocation3 + $0x81] sm:$0xff] }
 0x68d   :  { %7284 = vst.msk [vmem:[#allocation3 + $0x229] sm:$0xff] %vm6530_vm3, %v7110_v12  ;;  %7285 = vst.msk [vmem:[#allocation3 + $0x231] sm:$0xff] %vm6530_vm3, %v7111_v22  ;;  %17459 = vmatmul.mubr.msk.f32.gmra.mrb[6].mxu1 %vm6530_vm3, %v7380_v23  ;;  %v7385_v5 = vld [vmem:[#allocation3 + $0x91] sm:$0xff]  ;;  %v7386_v24 = vld [vmem:[#allocation3 + $0x99] sm:$0xff] }
 0x68e   :  { %7286 = vst.msk [vmem:[#allocation3 + $0x241] sm:$0xff] %vm6530_vm3, %v7112_v21  ;;  %7287 = vst.msk [vmem:[#allocation3 + $0x249] sm:$0xff] %vm6530_vm3, %v7113_v28  ;;  %17461 = vmatprep.mubr.msk.f32.mxu1 %vm6530_vm3, %v7381_v11  ;;  %v7387_v14 = vld [vmem:[#allocation3 + $0xa9] sm:$0xff]  ;;  %v7388_v20 = vld [vmem:[#allocation3 + $0xb1] sm:$0xff] }
 0x68f   :  { %7288 = vst.msk [vmem:[#allocation3 + $0x259] sm:$0xff] %vm6530_vm3, %v7114_v27  ;;  %7289 = vst.msk [vmem:[#allocation3 + $0x261] sm:$0xff] %vm6530_vm3, %v7115_v38  ;;  %v7389_v48 = vld [vmem:[#allocation3 + $0xc1] sm:$0xff]  ;;  %v7390_v37 = vld [vmem:[#allocation3 + $0xc9] sm:$0xff] }
 0x690   :  { %7290 = vst.msk [vmem:[#allocation3 + $0x271] sm:$0xff] %vm6530_vm3, %v7116_v46  ;;  %7291 = vst.msk [vmem:[#allocation3 + $0x279] sm:$0xff] %vm6530_vm3, %v7117_v55  ;;  %v7391_v33 = vld [vmem:[#allocation3 + $0xd9] sm:$0xff]  ;;  %v7392_v40 = vld [vmem:[#allocation3 + $0xe1] sm:$0xff] }
 0x691   :  { %7292 = vst.msk [vmem:[#allocation3 + $0x289] sm:$0xff] %vm6530_vm3, %v7118_v7  ;;  %7293 = vst.msk [vmem:[#allocation3 + $0x291] sm:$0xff] %vm6530_vm3, %v7119_v18  ;;  %17462 = vmatmul.mubr.msk.f32.gmra.mrb[8].mxu1 %vm6530_vm3, %v7382_v32  ;;  %v7393_v39 = vld [vmem:[#allocation3 + $0xf1] sm:$0xff]  ;;  %v7394_v45 = vld [vmem:[#allocation3 + $0xf9] sm:$0xff] }
 0x692   :  { %7294 = vst.msk [vmem:[#allocation3 + $0x2a1] sm:$0xff] %vm6530_vm3, %v7120_v17  ;;  %7295 = vst.msk [vmem:[#allocation3 + $0x2a9] sm:$0xff] %vm6530_vm3, %v7121_v26  ;;  %17464 = vmatprep.mubr.msk.f32.mxu1 %vm6530_vm3, %v7383_v62  ;;  %v7395_v43 = vld [vmem:[#allocation3 + $0x109] sm:$0xff]  ;;  %v7396_v52 = vld [vmem:[#allocation3 + $0x111] sm:$0xff] }
 0x693   :  { %7296 = vst.msk [vmem:[#allocation3 + $0x2b9] sm:$0xff] %vm6530_vm3, %v7122_v25  ;;  %7297 = vst.msk [vmem:[#allocation3 + $0x2c1] sm:$0xff] %vm6530_vm3, %v7123_v42  ;;  %v7397_v51 = vld [vmem:[#allocation3 + $0x121] sm:$0xff]  ;;  %v7398_v58 = vld [vmem:[#allocation3 + $0x129] sm:$0xff] }
 0x694   :  { %7298 = vst.msk [vmem:[#allocation3 + $0x2d1] sm:$0xff] %vm6530_vm3, %v7124_v50  ;;  %7299 = vst.msk [vmem:[#allocation3 + $0x2d9] sm:$0xff] %vm6530_vm3, %v7125_v41  ;;  %v7399_v57 = vld [vmem:[#allocation3 + $0x139] sm:$0xff]  ;;  %v7400_v36 = vld [vmem:[#allocation3 + $0x141] sm:$0xff] }
 0x695   :  { %7300 = vst.msk [vmem:[#allocation3 + $0x2e9] sm:$0xff] %vm6530_vm3, %v7126_v30  ;;  %7301 = vst.msk [vmem:[#allocation3 + $0x2f1] sm:$0xff] %vm6530_vm3, %v7127_v1  ;;  %17465 = vmatmul.mubr.msk.f32.gmra.mrb[10].mxu1 %vm6530_vm3, %v7384_v29  ;;  %v7401_v63 = vld [vmem:[#allocation3 + $0x151] sm:$0xff]  ;;  %v7402_v0 = vld [vmem:[#allocation3 + $0x159] sm:$0xff] }
 0x696   :  { %7302 = vst.msk [vmem:[#allocation3 + $0x301] sm:$0xff] %vm6530_vm3, %v7128_v16  ;;  %7303 = vst.msk [vmem:[#allocation3 + $0x309] sm:$0xff] %vm6530_vm3, %v7129_v61  ;;  %17467 = vmatprep.mubr.msk.f32.mxu1 %vm6530_vm3, %v7385_v5  ;;  %v7403_v35 = vld [vmem:[#allocation3 + $0x169] sm:$0xff]  ;;  %v7405_v8 = vld [vmem:[#allocation3 + $0x1b1] sm:$0xff] }
 0x697   :  { %7304 = vst.msk [vmem:[#allocation3 + $0x319] sm:$0xff] %vm6530_vm3, %v7130_v60  ;;  %7305 = vst.msk [vmem:[#allocation3 + $0x321] sm:$0xff] %vm6530_vm3, %v7131_v47  ;;  %v7404_v49 = vld [vmem:[#allocation3 + $0x171] sm:$0xff]  ;;  %v7406_v15 = vld [vmem:[#allocation3 + $0x1b9] sm:$0xff] }
 0x698   :  { %7307 = vst.msk [vmem:[#allocation3 + $0x339] sm:$0xff] %vm6530_vm3, %v7133_v59  ;;  %v7407_v12 = vld [vmem:[#allocation3 + $0x1c9] sm:$0xff]  ;;  %v7408_v22 = vld [vmem:[#allocation3 + $0x1d1] sm:$0xff]  ;;  %v7409_v21 = vld [vmem:[#allocation3 + $0x1e1] sm:$0xff] }
 0x699   :  { %17468 = vmatmul.mubr.msk.f32.gmra.mrb[12].mxu1 %vm6530_vm3, %v7386_v24  ;;  %v7410_v28 = vld [vmem:[#allocation3 + $0x1e9] sm:$0xff]  ;;  %v7411_v27 = vld [vmem:[#allocation3 + $0x1f9] sm:$0xff]  ;;  %v7412_v38 = vld [vmem:[#allocation3 + $0x201] sm:$0xff] }
 0x69a   :  { %17470 = vmatprep.mubr.msk.f32.mxu1 %vm6530_vm3, %v7387_v14  ;;  %v7413_v34 = vld [vmem:[#allocation3 + $0x211] sm:$0xff]  ;;  %v7414_v46 = vld [vmem:[#allocation3 + $0x219] sm:$0xff]  ;;  %v7415_v44 = vld [vmem:[#allocation3 + $0x229] sm:$0xff] }
 0x69b   :  { %v7416_v56 = vld [vmem:[#allocation3 + $0x231] sm:$0xff]  ;;  %v7417_v55 = vld [vmem:[#allocation3 + $0x241] sm:$0xff]  ;;  %v7418_v4 = vld [vmem:[#allocation3 + $0x249] sm:$0xff] }
 0x69c   :  { %v7419_v7 = vld [vmem:[#allocation3 + $0x259] sm:$0xff]  ;;  %v7420_v3 = vld [vmem:[#allocation3 + $0x261] sm:$0xff]  ;;  %v7421_v18 = vld [vmem:[#allocation3 + $0x271] sm:$0xff] }
 0x69d   :  { %17471 = vmatmul.mubr.msk.f32.gmra.mrb[14].mxu1 %vm6530_vm3, %v7388_v20  ;;  %v7422_v9 = vld [vmem:[#allocation3 + $0x279] sm:$0xff]  ;;  %v7423_v17 = vld [vmem:[#allocation3 + $0x289] sm:$0xff]  ;;  %v7424_v26 = vld [vmem:[#allocation3 + $0x291] sm:$0xff] }
 0x69e   :  { %17473 = vmatprep.mubr.msk.f32.mxu1 %vm6530_vm3, %v7389_v48  ;;  %v7425_v25 = vld [vmem:[#allocation3 + $0x2a1] sm:$0xff]  ;;  %v7426_v42 = vld [vmem:[#allocation3 + $0x2a9] sm:$0xff]  ;;  %v7427_v50 = vld [vmem:[#allocation3 + $0x2b9] sm:$0xff] }
 0x69f   :  { %v7428_v41 = vld [vmem:[#allocation3 + $0x2c1] sm:$0xff]  ;;  %v7429_v30 = vld [vmem:[#allocation3 + $0x2d1] sm:$0xff]  ;;  %v7430_v13 = vld [vmem:[#allocation3 + $0x2d9] sm:$0xff] }
 0x6a0   :  { %v7431_v1 = vld [vmem:[#allocation3 + $0x2e9] sm:$0xff]  ;;  %v7432_v6 = vld [vmem:[#allocation3 + $0x2f1] sm:$0xff]  ;;  %v7433_v16 = vld [vmem:[#allocation3 + $0x301] sm:$0xff] }
 0x6a1   :  { %17474 = vmatmul.mubr.msk.f32.gmra.mrb[16].mxu1 %vm6530_vm3, %v7390_v37  ;;  %v7434_v54 = vld [vmem:[#allocation3 + $0x309] sm:$0xff]  ;;  %v7435_v53 = vld [vmem:[#allocation3 + $0x319] sm:$0xff]  ;;  %v7436_v31 = vld [vmem:[#allocation3 + $0x321] sm:$0xff] }
 0x6a2   :  { %17476 = vmatprep.mubr.msk.f32.mxu1 %vm6530_vm3, %v7391_v33  ;;  %v7308_v61 = vld [vmem:[#allocation3] sm:$0xff]  ;;  %v7309_v60 = vld [vmem:[#allocation3 + $0x8] sm:$0xff]  ;;  %v22934_v2 = vld [vmem:[%s25789_s4 + $0x18] sm:$0xff] }
 0x6a3   :  { %v22937_v47 = vld [vmem:[#allocation3 + $0x18] sm:$0xff]  ;;  %v22943_v59 = vld [vmem:[#allocation3 + $0x20] sm:$0xff]  ;;  %v22947_v10 = vld [vmem:[#allocation3 + $0x30] sm:$0xff] }
 0x6a4   :  { %v22951_v23 = vld [vmem:[#allocation3 + $0x38] sm:$0xff]  ;;  %v22959_v11 = vld [vmem:[#allocation3 + $0x50] sm:$0xff]  ;;  %v22963_v32 = vld [vmem:[#allocation3 + $0x60] sm:$0xff] }
 0x6a5   :  { %17477 = vmatmul.mubr.msk.f32.gmra.mrb[18].mxu1 %vm6530_vm3, %v7392_v40  ;;  %v22967_v62 = vld [vmem:[#allocation3 + $0x68] sm:$0xff]  ;;  %v22971_v29 = vld [vmem:[#allocation3 + $0x78] sm:$0xff]  ;;  %v22975_v5 = vld [vmem:[#allocation3 + $0x80] sm:$0xff] }
 0x6a6   :  { %17479 = vmatprep.mubr.msk.f32.mxu1 %vm6530_vm3, %v7393_v39  ;;  %v22979_v24 = vld [vmem:[#allocation3 + $0x90] sm:$0xff]  ;;  %v22983_v14 = vld [vmem:[#allocation3 + $0x98] sm:$0xff]  ;;  %v22987_v20 = vld [vmem:[#allocation3 + $0xa8] sm:$0xff] }
 0x6a7   :  { %v22991_v48 = vld [vmem:[#allocation3 + $0xb0] sm:$0xff]  ;;  %v22995_v37 = vld [vmem:[#allocation3 + $0xc0] sm:$0xff]  ;;  %v22999_v33 = vld [vmem:[#allocation3 + $0xc8] sm:$0xff] }
 0x6a8   :  { %v23003_v40 = vld [vmem:[#allocation3 + $0xd8] sm:$0xff]  ;;  %v23007_v39 = vld [vmem:[#allocation3 + $0xe0] sm:$0xff] }
 0x6a9   :  { %17480 = vmatmul.mubr.msk.f32.gmra.mrb[20].mxu1 %vm6530_vm3, %v7394_v45  ;;  %v23011_v45 = vld [vmem:[#allocation3 + $0xf0] sm:$0xff] }
 0x6aa   :  { %17482 = vmatprep.mubr.msk.f32.mxu1 %vm6530_vm3, %v7395_v43  ;;  %v23015_v43 = vld [vmem:[#allocation3 + $0xf8] sm:$0xff] }
 0x6ad   :  { %17483 = vmatmul.mubr.msk.f32.gmra.mrb[22].mxu1 %vm6530_vm3, %v7396_v52  ;;  %v23019_v52 = vld [vmem:[#allocation3 + $0x108] sm:$0xff] }
 0x6ae   :  { %17485 = vmatprep.mubr.msk.f32.mxu1 %vm6530_vm3, %v7397_v51  ;;  %v23023_v51 = vld [vmem:[#allocation3 + $0x110] sm:$0xff] }
 0x6b1   :  { %17486 = vmatmul.mubr.msk.f32.gmra.mrb[24].mxu1 %vm6530_vm3, %v7398_v58  ;;  %v23027_v58 = vld [vmem:[#allocation3 + $0x120] sm:$0xff] }
 0x6b2   :  { %17488 = vmatprep.mubr.msk.f32.mxu1 %vm6530_vm3, %v7399_v57  ;;  %v23031_v57 = vld [vmem:[#allocation3 + $0x128] sm:$0xff] }
 0x6b5   :  { %17489 = vmatmul.mubr.msk.f32.gmra.mrb[26].mxu1 %vm6530_vm3, %v7400_v36  ;;  %v23035_v36 = vld [vmem:[#allocation3 + $0x138] sm:$0xff] }
 0x6b6   :  { %17491 = vmatprep.mubr.msk.f32.mxu1 %vm6530_vm3, %v7401_v63  ;;  %v23039_v63 = vld [vmem:[#allocation3 + $0x140] sm:$0xff] }
 0x6b9   :  { %17492 = vmatmul.mubr.msk.f32.gmra.mrb[28].mxu1 %vm6530_vm3, %v7402_v0  ;;  %v23043_v0 = vld [vmem:[#allocation3 + $0x150] sm:$0xff] }
 0x6ba   :  { %17494 = vmatprep.mubr.msk.f32.mxu1 %vm6530_vm3, %v7403_v35  ;;  %v23047_v35 = vld [vmem:[#allocation3 + $0x158] sm:$0xff] }
 0x6bd   :  { %17495 = vmatmul.mubr.msk.f32.gmra.mrb[30].mxu1 %vm6530_vm3, %v7404_v49  ;;  %v7340_v49 = vld [vmem:[#allocation3 + $0x1b0] sm:$0xff] }
 0x6be   :  { %17497 = vmatprep.mubr.msk.f32.mxu1 %vm6530_vm3, %v7405_v8  ;;  %v23051_v8 = vld [vmem:[#allocation3 + $0x168] sm:$0xff] }
 0x6c1   :  { %17498 = vmatmul.mubr.msk.f32.gmra.mrb[32].mxu1 %vm6530_vm3, %v7406_v15  ;;  %v23055_v15 = vld [vmem:[#allocation3 + $0x170] sm:$0xff] }
 0x6c2   :  { %17500 = vmatprep.mubr.msk.f32.mxu1 %vm6530_vm3, %v7407_v12  ;;  %v7341_v12 = vld [vmem:[#allocation3 + $0x1b8] sm:$0xff] }
 0x6c5   :  { %17501 = vmatmul.mubr.msk.f32.gmra.mrb[34].mxu1 %vm6530_vm3, %v7408_v22  ;;  %v23061_v22 = vld [vmem:[#allocation3 + $0x1c8] sm:$0xff] }
 0x6c6   :  { %17503 = vmatprep.mubr.msk.f32.mxu1 %vm6530_vm3, %v7409_v21  ;;  %v23065_v21 = vld [vmem:[#allocation3 + $0x1d0] sm:$0xff] }
 0x6c9   :  { %17504 = vmatmul.mubr.msk.f32.gmra.mrb[36].mxu1 %vm6530_vm3, %v7410_v28  ;;  %v23069_v28 = vld [vmem:[#allocation3 + $0x1e0] sm:$0xff] }
 0x6ca   :  { %17506 = vmatprep.mubr.msk.f32.mxu1 %vm6530_vm3, %v7411_v27  ;;  %v23073_v27 = vld [vmem:[#allocation3 + $0x1e8] sm:$0xff] }
 0x6cd   :  { %17507 = vmatmul.mubr.msk.f32.gmra.mrb[38].mxu1 %vm6530_vm3, %v7412_v38  ;;  %v23077_v38 = vld [vmem:[#allocation3 + $0x1f8] sm:$0xff] }
 0x6ce   :  { %17509 = vmatprep.mubr.msk.f32.mxu1 %vm6530_vm3, %v7413_v34  ;;  %v23081_v34 = vld [vmem:[#allocation3 + $0x200] sm:$0xff] }
 0x6d1   :  { %17510 = vmatmul.mubr.msk.f32.gmra.mrb[40].mxu1 %vm6530_vm3, %v7414_v46  ;;  %v23085_v46 = vld [vmem:[#allocation3 + $0x210] sm:$0xff] }
 0x6d2   :  { %17512 = vmatprep.mubr.msk.f32.mxu1 %vm6530_vm3, %v7415_v44  ;;  %v23089_v44 = vld [vmem:[#allocation3 + $0x218] sm:$0xff] }
 0x6d5   :  { %17513 = vmatmul.mubr.msk.f32.gmra.mrb[42].mxu1 %vm6530_vm3, %v7416_v56  ;;  %v23093_v56 = vld [vmem:[#allocation3 + $0x228] sm:$0xff] }
 0x6d6   :  { %17515 = vmatprep.mubr.msk.f32.mxu1 %vm6530_vm3, %v7417_v55  ;;  %v23097_v55 = vld [vmem:[#allocation3 + $0x230] sm:$0xff] }
 0x6d9   :  { %17516 = vmatmul.mubr.msk.f32.gmra.mrb[44].mxu1 %vm6530_vm3, %v7418_v4  ;;  %v23101_v4 = vld [vmem:[#allocation3 + $0x240] sm:$0xff] }
 0x6da   :  { %17518 = vmatprep.mubr.msk.f32.mxu1 %vm6530_vm3, %v7419_v7  ;;  %v23105_v7 = vld [vmem:[#allocation3 + $0x248] sm:$0xff] }
 0x6dd   :  { %17519 = vmatmul.mubr.msk.f32.gmra.mrb[46].mxu1 %vm6530_vm3, %v7420_v3  ;;  %v23109_v3 = vld [vmem:[#allocation3 + $0x258] sm:$0xff] }
 0x6de   :  { %17521 = vmatprep.mubr.msk.f32.mxu1 %vm6530_vm3, %v7421_v18  ;;  %v23113_v18 = vld [vmem:[#allocation3 + $0x260] sm:$0xff] }
 0x6e1   :  { %17522 = vmatmul.mubr.msk.f32.gmra.mrb[48].mxu1 %vm6530_vm3, %v7422_v9  ;;  %v23117_v9 = vld [vmem:[#allocation3 + $0x270] sm:$0xff] }
 0x6e2   :  { %17524 = vmatprep.mubr.msk.f32.mxu1 %vm6530_vm3, %v7423_v17  ;;  %v23121_v17 = vld [vmem:[#allocation3 + $0x278] sm:$0xff] }
 0x6e5   :  { %17525 = vmatmul.mubr.msk.f32.gmra.mrb[50].mxu1 %vm6530_vm3, %v7424_v26  ;;  %v23125_v26 = vld [vmem:[#allocation3 + $0x288] sm:$0xff] }
 0x6e6   :  { %17527 = vmatprep.mubr.msk.f32.mxu1 %vm6530_vm3, %v7425_v25  ;;  %v23129_v25 = vld [vmem:[#allocation3 + $0x290] sm:$0xff] }
 0x6e9   :  { %17528 = vmatmul.mubr.msk.f32.gmra.mrb[52].mxu1 %vm6530_vm3, %v7426_v42  ;;  %v23133_v42 = vld [vmem:[#allocation3 + $0x2a0] sm:$0xff] }
 0x6ea   :  { %17530 = vmatprep.mubr.msk.f32.mxu1 %vm6530_vm3, %v7427_v50  ;;  %v23137_v50 = vld [vmem:[#allocation3 + $0x2a8] sm:$0xff] }
 0x6ed   :  { %17531 = vmatmul.mubr.msk.f32.gmra.mrb[54].mxu1 %vm6530_vm3, %v7428_v41  ;;  %v23141_v41 = vld [vmem:[#allocation3 + $0x2b8] sm:$0xff] }
 0x6ee   :  { %17533 = vmatprep.mubr.msk.f32.mxu1 %vm6530_vm3, %v7429_v30  ;;  %v23145_v30 = vld [vmem:[#allocation3 + $0x2c0] sm:$0xff] }
 0x6f1   :  { %17534 = vmatmul.mubr.msk.f32.gmra.mrb[56].mxu1 %vm6530_vm3, %v7430_v13  ;;  %v23149_v13 = vld [vmem:[#allocation3 + $0x2d0] sm:$0xff] }
 0x6f2   :  { %17536 = vmatprep.mubr.msk.f32.mxu1 %vm6530_vm3, %v7431_v1  ;;  %v23153_v1 = vld [vmem:[#allocation3 + $0x2d8] sm:$0xff] }
 0x6f5   :  { %17537 = vmatmul.mubr.msk.f32.gmra.mrb[58].mxu1 %vm6530_vm3, %v7432_v6  ;;  %v23157_v6 = vld [vmem:[#allocation3 + $0x2e8] sm:$0xff] }
 0x6f6   :  { %17539 = vmatprep.mubr.msk.f32.mxu1 %vm6530_vm3, %v7433_v16  ;;  %v23161_v16 = vld [vmem:[#allocation3 + $0x2f0] sm:$0xff] }
 0x6f9   :  { %17540 = vmatmul.mubr.msk.f32.gmra.mrb[60].mxu1 %vm6530_vm3, %v7434_v54  ;;  %v23165_v54 = vld [vmem:[#allocation3 + $0x300] sm:$0xff] }
 0x6fa   :  { %17542 = vmatprep.mubr.msk.f32.mxu1 %vm6530_vm3, %v7435_v53  ;;  %v23169_v53 = vld [vmem:[#allocation3 + $0x308] sm:$0xff] }
 0x6fb   :  { %26282 = vst [vmem:[#allocation4_spill] sm:$0xff] %v23169_v53 }
 0x6fd   :  { %17543 = vmatmul.mubr.msk.f32.gmra.mrb[62].mxu1 %vm6530_vm3, %v7436_v31  ;;  %v8593_v31 = vld [vmem:[#allocation3 + $0x2] sm:$0xff] }
 0x6fe   :  { %17547 = vmatprep.mubr.msk.f32.mxu1 %vm6530_vm3, %v7308_v61  ;;  %v23173_v61 = vld [vmem:[#allocation3 + $0x318] sm:$0xff] }
 0x6ff   :  { %26283 = vst [vmem:[#allocation5_spill] sm:$0xff] %v23173_v61 }
 0x701   :  { %17548 = vmatmul.mubr.msk.f32.vlgmr.msra.gmra.mrb[0].mxu1 %vm6530_vm3, %v7309_v60  ;;  %v23177_v60 = vld [vmem:[#allocation3 + $0x320] sm:$0xff] }
 0x702   :  { %17644 = vmatpush3.msra.mxu1 %v22769_v19  ;;  %17550 = vmatprep.mubr.msk.f32.mxu1 %vm6530_vm3, %v22937_v47  ;;  %v22955_v19 = vld [vmem:[#allocation3 + $0x48] sm:$0xff]  ;;  %26284 = vst [vmem:[#allocation6_spill] sm:$0xff] %v23177_v60 }
 0x703   :  { %17741 = vmatprep.subr.mxu1 %v22934_v2 }
 0x705   :  { %17551 = vmatmul.mubr.msk.f32.gmra.mrb[2].mxu1 %vm6530_vm3, %v22943_v59 }
 0x706   :  { %17553 = vmatprep.mubr.msk.f32.mxu1 %vm6530_vm3, %v22947_v10 }
 0x709   :  { %17554 = vmatmul.mubr.msk.f32.gmra.mrb[4].mxu1 %vm6530_vm3, %v22951_v23 }
 0x70a   :  { %17556 = vmatprep.mubr.msk.f32.mxu1 %vm6530_vm3, %v22955_v19 }
 0x70d   :  { %17557 = vmatmul.mubr.msk.f32.gmra.mrb[6].mxu1 %vm6530_vm3, %v22959_v11 }
 0x70e   :  { %17559 = vmatprep.mubr.msk.f32.mxu1 %vm6530_vm3, %v22963_v32 }
 0x711   :  { %17560 = vmatmul.mubr.msk.f32.gmra.mrb[8].mxu1 %vm6530_vm3, %v22967_v62 }
 0x712   :  { %17562 = vmatprep.mubr.msk.f32.mxu1 %vm6530_vm3, %v22971_v29 }
 0x715   :  { %17563 = vmatmul.mubr.msk.f32.gmra.mrb[10].mxu1 %vm6530_vm3, %v22975_v5 }
 0x716   :  { %17565 = vmatprep.mubr.msk.f32.mxu1 %vm6530_vm3, %v22979_v24 }
 0x719   :  { %17566 = vmatmul.mubr.msk.f32.gmra.mrb[12].mxu1 %vm6530_vm3, %v22983_v14 }
 0x71a   :  { %17568 = vmatprep.mubr.msk.f32.mxu1 %vm6530_vm3, %v22987_v20 }
 0x71d   :  { %17569 = vmatmul.mubr.msk.f32.gmra.mrb[14].mxu1 %vm6530_vm3, %v22991_v48 }
 0x71e   :  { %17571 = vmatprep.mubr.msk.f32.mxu1 %vm6530_vm3, %v22995_v37 }
 0x721   :  { %17572 = vmatmul.mubr.msk.f32.gmra.mrb[16].mxu1 %vm6530_vm3, %v22999_v33 }
 0x722   :  { %17574 = vmatprep.mubr.msk.f32.mxu1 %vm6530_vm3, %v23003_v40 }
 0x725   :  { %17575 = vmatmul.mubr.msk.f32.gmra.mrb[18].mxu1 %vm6530_vm3, %v23007_v39 }
 0x726   :  { %17577 = vmatprep.mubr.msk.f32.mxu1 %vm6530_vm3, %v23011_v45 }
 0x729   :  { %17578 = vmatmul.mubr.msk.f32.gmra.mrb[20].mxu1 %vm6530_vm3, %v23015_v43 }
 0x72a   :  { %17580 = vmatprep.mubr.msk.f32.mxu1 %vm6530_vm3, %v23019_v52 }
 0x72d   :  { %17581 = vmatmul.mubr.msk.f32.gmra.mrb[22].mxu1 %vm6530_vm3, %v23023_v51 }
 0x72e   :  { %17583 = vmatprep.mubr.msk.f32.mxu1 %vm6530_vm3, %v23027_v58 }
 0x731   :  { %17584 = vmatmul.mubr.msk.f32.gmra.mrb[24].mxu1 %vm6530_vm3, %v23031_v57 }
 0x732   :  { %17586 = vmatprep.mubr.msk.f32.mxu1 %vm6530_vm3, %v23035_v36 }
 0x735   :  { %17587 = vmatmul.mubr.msk.f32.gmra.mrb[26].mxu1 %vm6530_vm3, %v23039_v63 }
 0x736   :  { %17589 = vmatprep.mubr.msk.f32.mxu1 %vm6530_vm3, %v23043_v0 }
 0x739   :  { %17590 = vmatmul.mubr.msk.f32.gmra.mrb[28].mxu1 %vm6530_vm3, %v23047_v35 }
 0x73a   :  { %17592 = vmatprep.mubr.msk.f32.mxu1 %vm6530_vm3, %v23051_v8 }
 0x73d   :  { %17593 = vmatmul.mubr.msk.f32.gmra.mrb[30].mxu1 %vm6530_vm3, %v23055_v15 }
 0x73e   :  { %17595 = vmatprep.mubr.msk.f32.mxu1 %vm6530_vm3, %v7340_v49  ;;  %v8594_v49 = vld [vmem:[#allocation3 + $0xa] sm:$0xff] }
 0x741   :  { %17596 = vmatmul.mubr.msk.f32.gmra.mrb[32].mxu1 %vm6530_vm3, %v7341_v12  ;;  %v23185_v12 = vld [vmem:[%s25789_s4 + $0x20] sm:$0xff] }
 0x742   :  { %17598 = vmatprep.mubr.msk.f32.mxu1 %vm6530_vm3, %v23061_v22 }
 0x745   :  { %17599 = vmatmul.mubr.msk.f32.gmra.mrb[34].mxu1 %vm6530_vm3, %v23065_v21 }
 0x746   :  { %17601 = vmatprep.mubr.msk.f32.mxu1 %vm6530_vm3, %v23069_v28 }
 0x749   :  { %17602 = vmatmul.mubr.msk.f32.gmra.mrb[36].mxu1 %vm6530_vm3, %v23073_v27 }
 0x74a   :  { %17604 = vmatprep.mubr.msk.f32.mxu1 %vm6530_vm3, %v23077_v38 }
 0x74d   :  { %17605 = vmatmul.mubr.msk.f32.gmra.mrb[38].mxu1 %vm6530_vm3, %v23081_v34 }
 0x74e   :  { %17607 = vmatprep.mubr.msk.f32.mxu1 %vm6530_vm3, %v23085_v46 }
 0x751   :  { %17608 = vmatmul.mubr.msk.f32.gmra.mrb[40].mxu1 %vm6530_vm3, %v23089_v44 }
 0x752   :  { %17610 = vmatprep.mubr.msk.f32.mxu1 %vm6530_vm3, %v23093_v56 }
 0x755   :  { %17611 = vmatmul.mubr.msk.f32.gmra.mrb[42].mxu1 %vm6530_vm3, %v23097_v55 }
 0x756   :  { %17613 = vmatprep.mubr.msk.f32.mxu1 %vm6530_vm3, %v23101_v4 }
 0x759   :  { %17614 = vmatmul.mubr.msk.f32.gmra.mrb[44].mxu1 %vm6530_vm3, %v23105_v7 }
 0x75a   :  { %17616 = vmatprep.mubr.msk.f32.mxu1 %vm6530_vm3, %v23109_v3 }
 0x75d   :  { %17617 = vmatmul.mubr.msk.f32.gmra.mrb[46].mxu1 %vm6530_vm3, %v23113_v18 }
 0x75e   :  { %17619 = vmatprep.mubr.msk.f32.mxu1 %vm6530_vm3, %v23117_v9 }
 0x761   :  { %17620 = vmatmul.mubr.msk.f32.gmra.mrb[48].mxu1 %vm6530_vm3, %v23121_v17 }
 0x762   :  { %17622 = vmatprep.mubr.msk.f32.mxu1 %vm6530_vm3, %v23125_v26 }
 0x765   :  { %17623 = vmatmul.mubr.msk.f32.gmra.mrb[50].mxu1 %vm6530_vm3, %v23129_v25 }
 0x766   :  { %17625 = vmatprep.mubr.msk.f32.mxu1 %vm6530_vm3, %v23133_v42 }
 0x769   :  { %17626 = vmatmul.mubr.msk.f32.gmra.mrb[52].mxu1 %vm6530_vm3, %v23137_v50 }
 0x76a   :  { %17628 = vmatprep.mubr.msk.f32.mxu1 %vm6530_vm3, %v23141_v41 }
 0x76d   :  { %17629 = vmatmul.mubr.msk.f32.gmra.mrb[54].mxu1 %vm6530_vm3, %v23145_v30 }
 0x76e   :  { %17631 = vmatprep.mubr.msk.f32.mxu1 %vm6530_vm3, %v23149_v13 }
 0x771   :  { %17632 = vmatmul.mubr.msk.f32.gmra.mrb[56].mxu1 %vm6530_vm3, %v23153_v1 }
 0x772   :  { %17634 = vmatprep.mubr.msk.f32.mxu1 %vm6530_vm3, %v23157_v6 }
 0x775   :  { %17635 = vmatmul.mubr.msk.f32.gmra.mrb[58].mxu1 %vm6530_vm3, %v23161_v16 }
 0x776   :  { %17637 = vmatprep.mubr.msk.f32.mxu1 %vm6530_vm3, %v23165_v54 }
 0x779   :  { %17638 = vmatmul.mubr.msk.f32.gmra.mrb[60].mxu1 %vm6530_vm3, %v23169_v53  ;;  %v23188_v53 = vld [vmem:[#allocation3 + $0x1a] sm:$0xff] }
 0x77a   :  { %17640 = vmatprep.mubr.msk.f32.mxu1 %vm6530_vm3, %v23173_v61  ;;  %26285 = vst [vmem:[#allocation7_spill] sm:$0xff] %v23188_v53  ;;  %v23306_v61 = vld [vmem:[#allocation3 + $0x172] sm:$0xff] }
 0x77b   :  { %26314 = vst [vmem:[#allocation24_spill] sm:$0xff] %v23306_v61 }
 0x77d   :  { %17641 = vmatmul.mubr.msk.f32.gmra.mrb[62].mxu1 %vm6530_vm3, %v23177_v60  ;;  %v23194_v60 = vld [vmem:[#allocation3 + $0x22] sm:$0xff] }
 0x77e   :  { %17645 = vmatprep.mubr.msk.f32.mxu1 %vm6530_vm3, %v8593_v31  ;;  %26286 = vst [vmem:[#allocation62_spill] sm:$0xff] %v23194_v60  ;;  %v23198_v31 = vld [vmem:[#allocation3 + $0x32] sm:$0xff] }
 0x77f   :  { %26287 = vst [vmem:[#allocation63_spill] sm:$0xff] %v23198_v31 }
 0x781   :  { %17646 = vmatmul.mubr.msk.f32.vlgmr.msra.gmra.mrb[0].mxu1 %vm6530_vm3, %v8594_v49  ;;  %v23202_v49 = vld [vmem:[#allocation3 + $0x3a] sm:$0xff] }
 0x782   :  { %17742 = vmatpush3.msra.mxu1 %v22934_v2  ;;  %17648 = vmatprep.mubr.msk.f32.mxu1 %vm6530_vm3, %v23188_v53  ;;  %26288 = vst [vmem:[#allocation64_spill] sm:$0xff] %v23202_v49  ;;  %v23206_v2 = vld [vmem:[#allocation3 + $0x4a] sm:$0xff]  ;;  %v23210_v53 = vld [vmem:[#allocation3 + $0x52] sm:$0xff] }
 0x783   :  { %17839 = vmatprep.subr.mxu1 %v23185_v12  ;;  %26289 = vst [vmem:[#allocation65_spill] sm:$0xff] %v23206_v2  ;;  %26290 = vst [vmem:[#allocation66_spill] sm:$0xff] %v23210_v53 }
 0x785   :  { %17649 = vmatmul.mubr.msk.f32.gmra.mrb[2].mxu1 %vm6530_vm3, %v23194_v60  ;;  %v23214_v60 = vld [vmem:[#allocation3 + $0x62] sm:$0xff] }
 0x786   :  { %17651 = vmatprep.mubr.msk.f32.mxu1 %vm6530_vm3, %v23198_v31  ;;  %26291 = vst [vmem:[#allocation67_spill] sm:$0xff] %v23214_v60  ;;  %v23218_v31 = vld [vmem:[#allocation3 + $0x6a] sm:$0xff] }
 0x787   :  { %26292 = vst [vmem:[#allocation68_spill] sm:$0xff] %v23218_v31 }
 0x789   :  { %17652 = vmatmul.mubr.msk.f32.gmra.mrb[4].mxu1 %vm6530_vm3, %v23202_v49  ;;  %v23222_v49 = vld [vmem:[#allocation3 + $0x7a] sm:$0xff] }
 0x78a   :  { %17654 = vmatprep.mubr.msk.f32.mxu1 %vm6530_vm3, %v23206_v2  ;;  %26293 = vst [vmem:[#allocation69_spill] sm:$0xff] %v23222_v49  ;;  %v23226_v2 = vld [vmem:[#allocation3 + $0x82] sm:$0xff] }
 0x78b   :  { %26294 = vst [vmem:[#allocation70_spill] sm:$0xff] %v23226_v2 }
 0x78d   :  { %17655 = vmatmul.mubr.msk.f32.gmra.mrb[6].mxu1 %vm6530_vm3, %v23210_v53  ;;  %v23230_v53 = vld [vmem:[#allocation3 + $0x92] sm:$0xff] }
 0x78e   :  { %17657 = vmatprep.mubr.msk.f32.mxu1 %vm6530_vm3, %v23214_v60  ;;  %26295 = vst [vmem:[#allocation71_spill] sm:$0xff] %v23230_v53  ;;  %v23234_v60 = vld [vmem:[#allocation3 + $0x9a] sm:$0xff] }
 0x78f   :  { %26296 = vst [vmem:[#allocation72_spill] sm:$0xff] %v23234_v60 }
 0x791   :  { %17658 = vmatmul.mubr.msk.f32.gmra.mrb[8].mxu1 %vm6530_vm3, %v23218_v31  ;;  %v23238_v31 = vld [vmem:[#allocation3 + $0xaa] sm:$0xff] }
 0x792   :  { %17660 = vmatprep.mubr.msk.f32.mxu1 %vm6530_vm3, %v23222_v49  ;;  %26297 = vst [vmem:[#allocation8_spill] sm:$0xff] %v23238_v31  ;;  %v23242_v49 = vld [vmem:[#allocation3 + $0xb2] sm:$0xff] }
 0x793   :  { %26298 = vst [vmem:[#allocation9_spill] sm:$0xff] %v23242_v49 }
 0x795   :  { %17661 = vmatmul.mubr.msk.f32.gmra.mrb[10].mxu1 %vm6530_vm3, %v23226_v2  ;;  %v23246_v2 = vld [vmem:[#allocation3 + $0xc2] sm:$0xff] }
 0x796   :  { %17663 = vmatprep.mubr.msk.f32.mxu1 %vm6530_vm3, %v23230_v53  ;;  %26299 = vst [vmem:[#allocation11_spill] sm:$0xff] %v23246_v2  ;;  %v23250_v53 = vld [vmem:[#allocation3 + $0xca] sm:$0xff] }
 0x797   :  { %26300 = vst [vmem:[#allocation10_spill] sm:$0xff] %v23250_v53 }
 0x799   :  { %17664 = vmatmul.mubr.msk.f32.gmra.mrb[12].mxu1 %vm6530_vm3, %v23234_v60  ;;  %v23254_v60 = vld [vmem:[#allocation3 + $0xda] sm:$0xff] }
 0x79a   :  { %17666 = vmatprep.mubr.msk.f32.mxu1 %vm6530_vm3, %v23238_v31  ;;  %26301 = vst [vmem:[#allocation13_spill] sm:$0xff] %v23254_v60  ;;  %v23258_v31 = vld [vmem:[#allocation3 + $0xe2] sm:$0xff] }
 0x79b   :  { %26302 = vst [vmem:[#allocation12_spill] sm:$0xff] %v23258_v31 }
 0x79d   :  { %17667 = vmatmul.mubr.msk.f32.gmra.mrb[14].mxu1 %vm6530_vm3, %v23242_v49  ;;  %v23262_v49 = vld [vmem:[#allocation3 + $0xf2] sm:$0xff] }
 0x79e   :  { %17669 = vmatprep.mubr.msk.f32.mxu1 %vm6530_vm3, %v23246_v2  ;;  %26303 = vst [vmem:[#allocation15_spill] sm:$0xff] %v23262_v49  ;;  %v23266_v2 = vld [vmem:[#allocation3 + $0xfa] sm:$0xff] }
 0x79f   :  { %26304 = vst [vmem:[#allocation14_spill] sm:$0xff] %v23266_v2 }
 0x7a1   :  { %17670 = vmatmul.mubr.msk.f32.gmra.mrb[16].mxu1 %vm6530_vm3, %v23250_v53  ;;  %v23270_v53 = vld [vmem:[#allocation3 + $0x10a] sm:$0xff] }
 0x7a2   :  { %17672 = vmatprep.mubr.msk.f32.mxu1 %vm6530_vm3, %v23254_v60  ;;  %26305 = vst [vmem:[#allocation17_spill] sm:$0xff] %v23270_v53  ;;  %v23274_v60 = vld [vmem:[#allocation3 + $0x112] sm:$0xff] }
 0x7a3   :  { %26306 = vst [vmem:[#allocation16_spill] sm:$0xff] %v23274_v60 }
 0x7a5   :  { %17673 = vmatmul.mubr.msk.f32.gmra.mrb[18].mxu1 %vm6530_vm3, %v23258_v31  ;;  %v23278_v31 = vld [vmem:[#allocation3 + $0x122] sm:$0xff] }
 0x7a6   :  { %17675 = vmatprep.mubr.msk.f32.mxu1 %vm6530_vm3, %v23262_v49  ;;  %26307 = vst [vmem:[#allocation19_spill] sm:$0xff] %v23278_v31  ;;  %v23282_v49 = vld [vmem:[#allocation3 + $0x12a] sm:$0xff] }
 0x7a7   :  { %26308 = vst [vmem:[#allocation18_spill] sm:$0xff] %v23282_v49 }
 0x7a9   :  { %17676 = vmatmul.mubr.msk.f32.gmra.mrb[20].mxu1 %vm6530_vm3, %v23266_v2  ;;  %v23286_v2 = vld [vmem:[#allocation3 + $0x13a] sm:$0xff] }
 0x7aa   :  { %17678 = vmatprep.mubr.msk.f32.mxu1 %vm6530_vm3, %v23270_v53  ;;  %26309 = vst [vmem:[#allocation21_spill] sm:$0xff] %v23286_v2  ;;  %v23290_v53 = vld [vmem:[#allocation3 + $0x142] sm:$0xff] }
 0x7ab   :  { %26310 = vst [vmem:[#allocation20_spill] sm:$0xff] %v23290_v53 }
 0x7ad   :  { %17679 = vmatmul.mubr.msk.f32.gmra.mrb[22].mxu1 %vm6530_vm3, %v23274_v60  ;;  %v23294_v60 = vld [vmem:[#allocation3 + $0x152] sm:$0xff] }
 0x7ae   :  { %17681 = vmatprep.mubr.msk.f32.mxu1 %vm6530_vm3, %v23278_v31  ;;  %26311 = vst [vmem:[#allocation23_spill] sm:$0xff] %v23294_v60  ;;  %v23298_v31 = vld [vmem:[#allocation3 + $0x15a] sm:$0xff] }
 0x7af   :  { %26312 = vst [vmem:[#allocation22_spill] sm:$0xff] %v23298_v31 }
 0x7b1   :  { %17682 = vmatmul.mubr.msk.f32.gmra.mrb[24].mxu1 %vm6530_vm3, %v23282_v49  ;;  %v23302_v49 = vld [vmem:[#allocation3 + $0x16a] sm:$0xff] }
 0x7b2   :  { %17684 = vmatprep.mubr.msk.f32.mxu1 %vm6530_vm3, %v23286_v2  ;;  %26313 = vst [vmem:[#allocation43_spill] sm:$0xff] %v23302_v49  ;;  %v8625_v2 = vld [vmem:[#allocation3 + $0x1b2] sm:$0xff] }
 0x7b5   :  { %17685 = vmatmul.mubr.msk.f32.gmra.mrb[26].mxu1 %vm6530_vm3, %v23290_v53  ;;  %v8626_v53 = vld [vmem:[#allocation3 + $0x1ba] sm:$0xff] }
 0x7b6   :  { %17687 = vmatprep.mubr.msk.f32.mxu1 %vm6530_vm3, %v23294_v60  ;;  %v23312_v60 = vld [vmem:[#allocation3 + $0x1ca] sm:$0xff] }
 0x7b9   :  { %17688 = vmatmul.mubr.msk.f32.gmra.mrb[28].mxu1 %vm6530_vm3, %v23298_v31  ;;  %v23316_v31 = vld [vmem:[#allocation3 + $0x1d2] sm:$0xff] }
 0x7ba   :  { %17690 = vmatprep.mubr.msk.f32.mxu1 %vm6530_vm3, %v23302_v49  ;;  %26315 = vst [vmem:[#allocation25_spill] sm:$0xff] %v23316_v31  ;;  %v23320_v49 = vld [vmem:[#allocation3 + $0x1e2] sm:$0xff] }
 0x7bb   :  { %26316 = vst [vmem:[#allocation26_spill] sm:$0xff] %v23320_v49 }
 0x7bd   :  { %17691 = vmatmul.mubr.msk.f32.gmra.mrb[30].mxu1 %vm6530_vm3, %v23306_v61  ;;  %v23324_v61 = vld [vmem:[#allocation3 + $0x1ea] sm:$0xff] }
 0x7be   :  { %17693 = vmatprep.mubr.msk.f32.mxu1 %vm6530_vm3, %v8625_v2  ;;  %26317 = vst [vmem:[#allocation27_spill] sm:$0xff] %v23324_v61  ;;  %v23332_v2 = vld [vmem:[#allocation3 + $0x202] sm:$0xff] }
 0x7bf   :  { %26319 = vst [vmem:[#allocation29_spill] sm:$0xff] %v23332_v2 }
 0x7c1   :  { %17694 = vmatmul.mubr.msk.f32.gmra.mrb[32].mxu1 %vm6530_vm3, %v8626_v53  ;;  %v23328_v53 = vld [vmem:[#allocation3 + $0x1fa] sm:$0xff] }
 0x7c2   :  { %17696 = vmatprep.mubr.msk.f32.mxu1 %vm6530_vm3, %v23312_v60  ;;  %26318 = vst [vmem:[#allocation28_spill] sm:$0xff] %v23328_v53 }
 0x7c5   :  { %17697 = vmatmul.mubr.msk.f32.gmra.mrb[34].mxu1 %vm6530_vm3, %v23316_v31  ;;  %v23336_v31 = vld [vmem:[#allocation3 + $0x212] sm:$0xff] }
 0x7c6   :  { %17699 = vmatprep.mubr.msk.f32.mxu1 %vm6530_vm3, %v23320_v49  ;;  %26320 = vst [vmem:[#allocation30_spill] sm:$0xff] %v23336_v31  ;;  %v23340_v49 = vld [vmem:[#allocation3 + $0x21a] sm:$0xff] }
 0x7c7   :  { %26321 = vst [vmem:[#allocation31_spill] sm:$0xff] %v23340_v49 }
 0x7c9   :  { %17700 = vmatmul.mubr.msk.f32.gmra.mrb[36].mxu1 %vm6530_vm3, %v23324_v61  ;;  %v23344_v61 = vld [vmem:[#allocation3 + $0x22a] sm:$0xff] }
 0x7ca   :  { %17702 = vmatprep.mubr.msk.f32.mxu1 %vm6530_vm3, %v23328_v53  ;;  %26322 = vst [vmem:[#allocation32_spill] sm:$0xff] %v23344_v61  ;;  %v23348_v53 = vld [vmem:[#allocation3 + $0x232] sm:$0xff] }
 0x7cb   :  { %26323 = vst [vmem:[#allocation33_spill] sm:$0xff] %v23348_v53 }
 0x7cd   :  { %17703 = vmatmul.mubr.msk.f32.gmra.mrb[38].mxu1 %vm6530_vm3, %v23332_v2  ;;  %v23352_v2 = vld [vmem:[#allocation3 + $0x242] sm:$0xff] }
 0x7ce   :  { %17705 = vmatprep.mubr.msk.f32.mxu1 %vm6530_vm3, %v23336_v31  ;;  %26324 = vst [vmem:[#allocation34_spill] sm:$0xff] %v23352_v2  ;;  %v23356_v31 = vld [vmem:[#allocation3 + $0x24a] sm:$0xff] }
 0x7cf   :  { %26325 = vst [vmem:[#allocation35_spill] sm:$0xff] %v23356_v31 }
 0x7d1   :  { %17706 = vmatmul.mubr.msk.f32.gmra.mrb[40].mxu1 %vm6530_vm3, %v23340_v49  ;;  %v23360_v49 = vld [vmem:[#allocation3 + $0x25a] sm:$0xff] }
 0x7d2   :  { %17708 = vmatprep.mubr.msk.f32.mxu1 %vm6530_vm3, %v23344_v61  ;;  %26326 = vst [vmem:[#allocation36_spill] sm:$0xff] %v23360_v49  ;;  %v23364_v61 = vld [vmem:[#allocation3 + $0x262] sm:$0xff] }
 0x7d3   :  { %26327 = vst [vmem:[#allocation37_spill] sm:$0xff] %v23364_v61 }
 0x7d5   :  { %17709 = vmatmul.mubr.msk.f32.gmra.mrb[42].mxu1 %vm6530_vm3, %v23348_v53  ;;  %v23368_v53 = vld [vmem:[#allocation3 + $0x272] sm:$0xff] }
 0x7d6   :  { %17711 = vmatprep.mubr.msk.f32.mxu1 %vm6530_vm3, %v23352_v2  ;;  %26328 = vst [vmem:[#allocation38_spill] sm:$0xff] %v23368_v53  ;;  %v23372_v2 = vld [vmem:[#allocation3 + $0x27a] sm:$0xff] }
 0x7d7   :  { %26329 = vst [vmem:[#allocation39_spill] sm:$0xff] %v23372_v2 }
 0x7d9   :  { %17712 = vmatmul.mubr.msk.f32.gmra.mrb[44].mxu1 %vm6530_vm3, %v23356_v31  ;;  %v23376_v31 = vld [vmem:[#allocation3 + $0x28a] sm:$0xff] }
 0x7da   :  { %17714 = vmatprep.mubr.msk.f32.mxu1 %vm6530_vm3, %v23360_v49  ;;  %26330 = vst [vmem:[#allocation40_spill] sm:$0xff] %v23376_v31  ;;  %v23380_v49 = vld [vmem:[#allocation3 + $0x292] sm:$0xff] }
 0x7db   :  { %26331 = vst [vmem:[#allocation41_spill] sm:$0xff] %v23380_v49 }
 0x7dd   :  { %17715 = vmatmul.mubr.msk.f32.gmra.mrb[46].mxu1 %vm6530_vm3, %v23364_v61  ;;  %v23384_v61 = vld [vmem:[#allocation3 + $0x2a2] sm:$0xff] }
 0x7de   :  { %17717 = vmatprep.mubr.msk.f32.mxu1 %vm6530_vm3, %v23368_v53  ;;  %26332 = vst [vmem:[#allocation42_spill] sm:$0xff] %v23384_v61  ;;  %v23388_v53 = vld [vmem:[#allocation3 + $0x2aa] sm:$0xff] }
 0x7df   :  { %26333 = vst [vmem:[#allocation44_spill] sm:$0xff] %v23388_v53 }
 0x7e1   :  { %17718 = vmatmul.mubr.msk.f32.gmra.mrb[48].mxu1 %vm6530_vm3, %v23372_v2  ;;  %v23392_v2 = vld [vmem:[#allocation3 + $0x2ba] sm:$0xff] }
 0x7e2   :  { %17720 = vmatprep.mubr.msk.f32.mxu1 %vm6530_vm3, %v23376_v31  ;;  %26334 = vst [vmem:[#allocation46_spill] sm:$0xff] %v23392_v2  ;;  %v23396_v31 = vld [vmem:[#allocation3 + $0x2c2] sm:$0xff] }
 0x7e3   :  { %26335 = vst [vmem:[#allocation47_spill] sm:$0xff] %v23396_v31 }
 0x7e5   :  { %17721 = vmatmul.mubr.msk.f32.gmra.mrb[50].mxu1 %vm6530_vm3, %v23380_v49  ;;  %v23400_v49 = vld [vmem:[#allocation3 + $0x2d2] sm:$0xff] }
 0x7e6   :  { %17723 = vmatprep.mubr.msk.f32.mxu1 %vm6530_vm3, %v23384_v61  ;;  %26336 = vst [vmem:[#allocation48_spill] sm:$0xff] %v23400_v49  ;;  %v23404_v61 = vld [vmem:[#allocation3 + $0x2da] sm:$0xff] }
 0x7e7   :  { %26337 = vst [vmem:[#allocation49_spill] sm:$0xff] %v23404_v61 }
 0x7e9   :  { %17724 = vmatmul.mubr.msk.f32.gmra.mrb[52].mxu1 %vm6530_vm3, %v23388_v53  ;;  %v23408_v53 = vld [vmem:[#allocation3 + $0x2ea] sm:$0xff] }
 0x7ea   :  { %17726 = vmatprep.mubr.msk.f32.mxu1 %vm6530_vm3, %v23392_v2  ;;  %26338 = vst [vmem:[#allocation50_spill] sm:$0xff] %v23408_v53  ;;  %v23412_v2 = vld [vmem:[#allocation3 + $0x2f2] sm:$0xff] }
 0x7ed   :  { %17727 = vmatmul.mubr.msk.f32.gmra.mrb[54].mxu1 %vm6530_vm3, %v23396_v31  ;;  %v23416_v31 = vld [vmem:[#allocation3 + $0x302] sm:$0xff] }
 0x7ee   :  { %17729 = vmatprep.mubr.msk.f32.mxu1 %vm6530_vm3, %v23400_v49  ;;  %26339 = vst [vmem:[#allocation51_spill] sm:$0xff] %v23416_v31  ;;  %v23420_v49 = vld [vmem:[#allocation3 + $0x30a] sm:$0xff] }
 0x7f1   :  { %17730 = vmatmul.mubr.msk.f32.gmra.mrb[56].mxu1 %vm6530_vm3, %v23404_v61  ;;  %v23424_v61 = vld [vmem:[#allocation3 + $0x31a] sm:$0xff] }
 0x7f2   :  { %17732 = vmatprep.mubr.msk.f32.mxu1 %vm6530_vm3, %v23408_v53  ;;  %v23428_v53 = vld [vmem:[#allocation3 + $0x322] sm:$0xff] }
 0x7f5   :  { %17733 = vmatmul.mubr.msk.f32.gmra.mrb[58].mxu1 %vm6530_vm3, %v23412_v2 }
 0x7f6   :  { %17735 = vmatprep.mubr.msk.f32.mxu1 %vm6530_vm3, %v23416_v31  ;;  %v23437_v31 = vld [vmem:[%s25789_s4 + $0x28] sm:$0xff] }
 0x7f9   :  { %17736 = vmatmul.mubr.msk.f32.gmra.mrb[60].mxu1 %vm6530_vm3, %v23420_v49 }
 0x7fa   :  { %17738 = vmatprep.mubr.msk.f32.mxu1 %vm6530_vm3, %v23424_v61 }
 0x7fd   :  { %17739 = vmatmul.mubr.msk.f32.gmra.mrb[62].mxu1 %vm6530_vm3, %v23428_v53 }
 0x7fe   :  { %17743 = vmatprep.mubr.msk.f32.mxu1 %vm6530_vm3, %v22937_v47  ;;  %v23499_v47 = vld [vmem:[#allocation3 + $0x180] sm:$0xff] }
 0x801   :  { %17744 = vmatmul.mubr.msk.f32.vlgmr.msra.gmra.mrb[0].mxu1 %vm6530_vm3, %v22943_v59  ;;  %v23503_v59 = vld [vmem:[#allocation3 + $0x188] sm:$0xff] }
 0x802   :  { %17840 = vmatpush3.msra.mxu1 %v23185_v12  ;;  %17746 = vmatprep.mubr.msk.f32.mxu1 %vm6530_vm3, %v22947_v10  ;;  %v26340_v10 = vld [vmem:[#allocation4_spill] sm:$0xff]  ;;  %v23766_v12 = vld [vmem:[#allocation3 + $0x291] sm:$0xff] }
 0x803   :  { %17937 = vmatprep.subr.mxu1 %v23437_v31 }
 0x805   :  { %17747 = vmatmul.mubr.msk.f32.gmra.mrb[2].mxu1 %vm6530_vm3, %v22951_v23  ;;  %v26341_v23 = vld [vmem:[#allocation5_spill] sm:$0xff] }
 0x806   :  { %17749 = vmatprep.mubr.msk.f32.mxu1 %vm6530_vm3, %v22955_v19  ;;  %v26342_v19 = vld [vmem:[#allocation6_spill] sm:$0xff] }
 0x809   :  { %17750 = vmatmul.mubr.msk.f32.gmra.mrb[4].mxu1 %vm6530_vm3, %v22959_v11  ;;  %v23567_v11 = vld [vmem:[#allocation3 + $0x330] sm:$0xff] }
 0x80a   :  { %17752 = vmatprep.mubr.msk.f32.mxu1 %vm6530_vm3, %v22963_v32  ;;  %v23571_v32 = vld [vmem:[#allocation3 + $0x338] sm:$0xff] }
 0x80d   :  { %17753 = vmatmul.mubr.msk.f32.gmra.mrb[6].mxu1 %vm6530_vm3, %v22967_v62  ;;  %v10007_v62 = vld [vmem:[#allocation3 + $0x19] sm:$0xff] }
 0x80e   :  { %17755 = vmatprep.mubr.msk.f32.mxu1 %vm6530_vm3, %v22971_v29  ;;  %v10008_v29 = vld [vmem:[#allocation3 + $0x21] sm:$0xff] }
 0x811   :  { %17756 = vmatmul.mubr.msk.f32.gmra.mrb[8].mxu1 %vm6530_vm3, %v22975_v5  ;;  %v23579_v5 = vld [vmem:[%s25789_s4 + $0x30] sm:$0xff] }
 0x812   :  { %17758 = vmatprep.mubr.msk.f32.mxu1 %vm6530_vm3, %v22979_v24  ;;  %v23582_v24 = vld [vmem:[#allocation3 + $0x31] sm:$0xff] }
 0x815   :  { %17759 = vmatmul.mubr.msk.f32.gmra.mrb[10].mxu1 %vm6530_vm3, %v22983_v14  ;;  %v23588_v14 = vld [vmem:[#allocation3 + $0x39] sm:$0xff] }
 0x816   :  { %17761 = vmatprep.mubr.msk.f32.mxu1 %vm6530_vm3, %v22987_v20  ;;  %v23592_v20 = vld [vmem:[#allocation3 + $0x49] sm:$0xff] }
 0x819   :  { %17762 = vmatmul.mubr.msk.f32.gmra.mrb[12].mxu1 %vm6530_vm3, %v22991_v48  ;;  %v23596_v48 = vld [vmem:[#allocation3 + $0x51] sm:$0xff] }
 0x81a   :  { %17764 = vmatprep.mubr.msk.f32.mxu1 %vm6530_vm3, %v22995_v37  ;;  %v23600_v37 = vld [vmem:[#allocation3 + $0x61] sm:$0xff] }
 0x81d   :  { %17765 = vmatmul.mubr.msk.f32.gmra.mrb[14].mxu1 %vm6530_vm3, %v22999_v33  ;;  %v23604_v33 = vld [vmem:[#allocation3 + $0x69] sm:$0xff] }
 0x81e   :  { %17767 = vmatprep.mubr.msk.f32.mxu1 %vm6530_vm3, %v23003_v40  ;;  %v23608_v40 = vld [vmem:[#allocation3 + $0x79] sm:$0xff] }
 0x821   :  { %17768 = vmatmul.mubr.msk.f32.gmra.mrb[16].mxu1 %vm6530_vm3, %v23007_v39  ;;  %v23612_v39 = vld [vmem:[#allocation3 + $0x81] sm:$0xff] }
 0x822   :  { %17770 = vmatprep.mubr.msk.f32.mxu1 %vm6530_vm3, %v23011_v45  ;;  %v23616_v45 = vld [vmem:[#allocation3 + $0x91] sm:$0xff] }
 0x825   :  { %17771 = vmatmul.mubr.msk.f32.gmra.mrb[18].mxu1 %vm6530_vm3, %v23015_v43  ;;  %v23620_v43 = vld [vmem:[#allocation3 + $0x99] sm:$0xff] }
 0x826   :  { %17773 = vmatprep.mubr.msk.f32.mxu1 %vm6530_vm3, %v23019_v52  ;;  %v23624_v52 = vld [vmem:[#allocation3 + $0xa9] sm:$0xff] }
 0x829   :  { %17774 = vmatmul.mubr.msk.f32.gmra.mrb[20].mxu1 %vm6530_vm3, %v23023_v51  ;;  %v23628_v51 = vld [vmem:[#allocation3 + $0xb1] sm:$0xff] }
 0x82a   :  { %17776 = vmatprep.mubr.msk.f32.mxu1 %vm6530_vm3, %v23027_v58  ;;  %v23632_v58 = vld [vmem:[#allocation3 + $0xc1] sm:$0xff] }
 0x82d   :  { %17777 = vmatmul.mubr.msk.f32.gmra.mrb[22].mxu1 %vm6530_vm3, %v23031_v57  ;;  %v23636_v57 = vld [vmem:[#allocation3 + $0xc9] sm:$0xff] }
 0x82e   :  { %17779 = vmatprep.mubr.msk.f32.mxu1 %vm6530_vm3, %v23035_v36  ;;  %v23640_v36 = vld [vmem:[#allocation3 + $0xd9] sm:$0xff] }
 0x831   :  { %17780 = vmatmul.mubr.msk.f32.gmra.mrb[24].mxu1 %vm6530_vm3, %v23039_v63  ;;  %v23644_v63 = vld [vmem:[#allocation3 + $0xe1] sm:$0xff] }
 0x832   :  { %17782 = vmatprep.mubr.msk.f32.mxu1 %vm6530_vm3, %v23043_v0  ;;  %v23648_v0 = vld [vmem:[#allocation3 + $0xf1] sm:$0xff] }
 0x835   :  { %17783 = vmatmul.mubr.msk.f32.gmra.mrb[26].mxu1 %vm6530_vm3, %v23047_v35  ;;  %v23652_v35 = vld [vmem:[#allocation3 + $0xf9] sm:$0xff] }
 0x836   :  { %17785 = vmatprep.mubr.msk.f32.mxu1 %vm6530_vm3, %v23051_v8  ;;  %v23656_v8 = vld [vmem:[#allocation3 + $0x109] sm:$0xff] }
 0x839   :  { %17786 = vmatmul.mubr.msk.f32.gmra.mrb[28].mxu1 %vm6530_vm3, %v23055_v15  ;;  %v23660_v15 = vld [vmem:[#allocation3 + $0x111] sm:$0xff] }
 0x83a   :  { %17788 = vmatprep.mubr.msk.f32.mxu1 %vm6530_vm3, %v23499_v47 }
 0x83d   :  { %17789 = vmatmul.mubr.msk.f32.gmra.mrb[30].mxu1 %vm6530_vm3, %v23503_v59 }
 0x83e   :  { %17791 = vmatprep.mubr.msk.f32.mxu1 %vm6530_vm3, %v23061_v22  ;;  %v23664_v22 = vld [vmem:[#allocation3 + $0x121] sm:$0xff] }
 0x841   :  { %17792 = vmatmul.mubr.msk.f32.gmra.mrb[32].mxu1 %vm6530_vm3, %v23065_v21  ;;  %v23668_v21 = vld [vmem:[#allocation3 + $0x129] sm:$0xff] }
 0x842   :  { %17794 = vmatprep.mubr.msk.f32.mxu1 %vm6530_vm3, %v23069_v28  ;;  %v23672_v28 = vld [vmem:[#allocation3 + $0x139] sm:$0xff] }
 0x845   :  { %17795 = vmatmul.mubr.msk.f32.gmra.mrb[34].mxu1 %vm6530_vm3, %v23073_v27  ;;  %v23676_v27 = vld [vmem:[#allocation3 + $0x141] sm:$0xff] }
 0x846   :  { %17797 = vmatprep.mubr.msk.f32.mxu1 %vm6530_vm3, %v23077_v38  ;;  %v23680_v38 = vld [vmem:[#allocation3 + $0x151] sm:$0xff] }
 0x849   :  { %17798 = vmatmul.mubr.msk.f32.gmra.mrb[36].mxu1 %vm6530_vm3, %v23081_v34  ;;  %v23684_v34 = vld [vmem:[#allocation3 + $0x159] sm:$0xff] }
 0x84a   :  { %17800 = vmatprep.mubr.msk.f32.mxu1 %vm6530_vm3, %v23085_v46  ;;  %v23688_v46 = vld [vmem:[#allocation3 + $0x169] sm:$0xff] }
 0x84d   :  { %17801 = vmatmul.mubr.msk.f32.gmra.mrb[38].mxu1 %vm6530_vm3, %v23089_v44  ;;  %v23692_v44 = vld [vmem:[#allocation3 + $0x171] sm:$0xff] }
 0x84e   :  { %17803 = vmatprep.mubr.msk.f32.mxu1 %vm6530_vm3, %v23093_v56  ;;  %v23696_v56 = vld [vmem:[#allocation3 + $0x181] sm:$0xff] }
 0x851   :  { %17804 = vmatmul.mubr.msk.f32.gmra.mrb[40].mxu1 %vm6530_vm3, %v23097_v55  ;;  %v23700_v55 = vld [vmem:[#allocation3 + $0x189] sm:$0xff] }
 0x852   :  { %17806 = vmatprep.mubr.msk.f32.mxu1 %vm6530_vm3, %v23101_v4  ;;  %v10039_v4 = vld [vmem:[#allocation3 + $0x1c9] sm:$0xff] }
 0x855   :  { %17807 = vmatmul.mubr.msk.f32.gmra.mrb[42].mxu1 %vm6530_vm3, %v23105_v7  ;;  %v10040_v7 = vld [vmem:[#allocation3 + $0x1d1] sm:$0xff] }
 0x856   :  { %17809 = vmatprep.mubr.msk.f32.mxu1 %vm6530_vm3, %v23109_v3  ;;  %v23706_v3 = vld [vmem:[#allocation3 + $0x1e1] sm:$0xff] }
 0x859   :  { %17810 = vmatmul.mubr.msk.f32.gmra.mrb[44].mxu1 %vm6530_vm3, %v23113_v18  ;;  %v23710_v18 = vld [vmem:[#allocation3 + $0x1e9] sm:$0xff] }
 0x85a   :  { %17812 = vmatprep.mubr.msk.f32.mxu1 %vm6530_vm3, %v23117_v9  ;;  %v23714_v9 = vld [vmem:[#allocation3 + $0x1f9] sm:$0xff] }
 0x85d   :  { %17813 = vmatmul.mubr.msk.f32.gmra.mrb[46].mxu1 %vm6530_vm3, %v23121_v17  ;;  %v23718_v17 = vld [vmem:[#allocation3 + $0x201] sm:$0xff] }
 0x85e   :  { %17815 = vmatprep.mubr.msk.f32.mxu1 %vm6530_vm3, %v23125_v26  ;;  %v23722_v26 = vld [vmem:[#allocation3 + $0x211] sm:$0xff] }
 0x861   :  { %17816 = vmatmul.mubr.msk.f32.gmra.mrb[48].mxu1 %vm6530_vm3, %v23129_v25  ;;  %v23726_v25 = vld [vmem:[#allocation3 + $0x219] sm:$0xff] }
 0x862   :  { %17818 = vmatprep.mubr.msk.f32.mxu1 %vm6530_vm3, %v23133_v42  ;;  %v23730_v42 = vld [vmem:[#allocation3 + $0x229] sm:$0xff] }
 0x865   :  { %17819 = vmatmul.mubr.msk.f32.gmra.mrb[50].mxu1 %vm6530_vm3, %v23137_v50  ;;  %v23734_v50 = vld [vmem:[#allocation3 + $0x231] sm:$0xff] }
 0x866   :  { %17821 = vmatprep.mubr.msk.f32.mxu1 %vm6530_vm3, %v23141_v41  ;;  %v23738_v41 = vld [vmem:[#allocation3 + $0x241] sm:$0xff] }
 0x869   :  { %17822 = vmatmul.mubr.msk.f32.gmra.mrb[52].mxu1 %vm6530_vm3, %v23145_v30  ;;  %v23742_v30 = vld [vmem:[#allocation3 + $0x249] sm:$0xff] }
 0x86a   :  { %17824 = vmatprep.mubr.msk.f32.mxu1 %vm6530_vm3, %v23149_v13  ;;  %v23746_v13 = vld [vmem:[#allocation3 + $0x259] sm:$0xff] }
 0x86d   :  { %17825 = vmatmul.mubr.msk.f32.gmra.mrb[54].mxu1 %vm6530_vm3, %v23153_v1  ;;  %v23750_v1 = vld [vmem:[#allocation3 + $0x261] sm:$0xff] }
 0x86e   :  { %17827 = vmatprep.mubr.msk.f32.mxu1 %vm6530_vm3, %v23157_v6  ;;  %v23754_v6 = vld [vmem:[#allocation3 + $0x271] sm:$0xff] }
 0x871   :  { %17828 = vmatmul.mubr.msk.f32.gmra.mrb[56].mxu1 %vm6530_vm3, %v23161_v16  ;;  %v23758_v16 = vld [vmem:[#allocation3 + $0x279] sm:$0xff] }
 0x872   :  { %17830 = vmatprep.mubr.msk.f32.mxu1 %vm6530_vm3, %v23165_v54  ;;  %v23762_v54 = vld [vmem:[#allocation3 + $0x289] sm:$0xff] }
 0x875   :  { %17831 = vmatmul.mubr.msk.f32.gmra.mrb[58].mxu1 %vm6530_vm3, %v26340_v10  ;;  %v23774_v10 = vld [vmem:[#allocation3 + $0x2a9] sm:$0xff] }
 0x876   :  { %17833 = vmatprep.mubr.msk.f32.mxu1 %vm6530_vm3, %v26341_v23  ;;  %26344 = vst [vmem:[#allocation53_spill] sm:$0xff] %v23774_v10  ;;  %v23778_v23 = vld [vmem:[#allocation3 + $0x2b9] sm:$0xff] }
 0x877   :  { %26345 = vst [vmem:[#allocation54_spill] sm:$0xff] %v23778_v23 }
 0x879   :  { %17834 = vmatmul.mubr.msk.f32.gmra.mrb[60].mxu1 %vm6530_vm3, %v26342_v19  ;;  %v23782_v19 = vld [vmem:[#allocation3 + $0x2c1] sm:$0xff] }
 0x87a   :  { %17836 = vmatprep.mubr.msk.f32.mxu1 %vm6530_vm3, %v23567_v11  ;;  %26346 = vst [vmem:[#allocation55_spill] sm:$0xff] %v23782_v19 }
 0x87d   :  { %17837 = vmatmul.mubr.msk.f32.gmra.mrb[62].mxu1 %vm6530_vm3, %v23571_v32 }
 0x87e   :  { %17841 = vmatprep.mubr.msk.f32.mxu1 %vm6530_vm3, %v10007_v62  ;;  %v23786_v62 = vld [vmem:[#allocation3 + $0x2d1] sm:$0xff] }
 0x87f   :  { %26347 = vst [vmem:[#allocation56_spill] sm:$0xff] %v23786_v62 }
 0x881   :  { %17842 = vmatmul.mubr.msk.f32.vlgmr.msra.gmra.mrb[0].mxu1 %vm6530_vm3, %v10008_v29  ;;  %v23790_v29 = vld [vmem:[#allocation3 + $0x2d9] sm:$0xff] }
 0x882   :  { %17938 = vmatpush3.msra.mxu1 %v23437_v31  ;;  %17844 = vmatprep.mubr.msk.f32.mxu1 %vm6530_vm3, %v23582_v24  ;;  %v23770_v31 = vld [vmem:[#allocation3 + $0x2a1] sm:$0xff]  ;;  %26348 = vst [vmem:[#allocation57_spill] sm:$0xff] %v23790_v29 }
 0x883   :  { %18035 = vmatprep.subr.mxu1 %v23579_v5  ;;  %26343 = vst [vmem:[#allocation52_spill] sm:$0xff] %v23770_v31 }
 0x885   :  { %17845 = vmatmul.mubr.msk.f32.gmra.mrb[2].mxu1 %vm6530_vm3, %v23588_v14 }
 0x886   :  { %17847 = vmatprep.mubr.msk.f32.mxu1 %vm6530_vm3, %v23592_v20 }
 0x889   :  { %17848 = vmatmul.mubr.msk.f32.gmra.mrb[4].mxu1 %vm6530_vm3, %v23596_v48 }
 0x88a   :  { %17850 = vmatprep.mubr.msk.f32.mxu1 %vm6530_vm3, %v23600_v37 }
 0x88d   :  { %17851 = vmatmul.mubr.msk.f32.gmra.mrb[6].mxu1 %vm6530_vm3, %v23604_v33 }
 0x88e   :  { %17853 = vmatprep.mubr.msk.f32.mxu1 %vm6530_vm3, %v23608_v40 }
 0x891   :  { %17854 = vmatmul.mubr.msk.f32.gmra.mrb[8].mxu1 %vm6530_vm3, %v23612_v39 }
 0x892   :  { %17856 = vmatprep.mubr.msk.f32.mxu1 %vm6530_vm3, %v23616_v45 }
 0x895   :  { %17857 = vmatmul.mubr.msk.f32.gmra.mrb[10].mxu1 %vm6530_vm3, %v23620_v43 }
 0x896   :  { %17859 = vmatprep.mubr.msk.f32.mxu1 %vm6530_vm3, %v23624_v52 }
 0x899   :  { %17860 = vmatmul.mubr.msk.f32.gmra.mrb[12].mxu1 %vm6530_vm3, %v23628_v51 }
 0x89a   :  { %17862 = vmatprep.mubr.msk.f32.mxu1 %vm6530_vm3, %v23632_v58 }
 0x89d   :  { %17863 = vmatmul.mubr.msk.f32.gmra.mrb[14].mxu1 %vm6530_vm3, %v23636_v57 }
 0x89e   :  { %17865 = vmatprep.mubr.msk.f32.mxu1 %vm6530_vm3, %v23640_v36 }
 0x8a1   :  { %17866 = vmatmul.mubr.msk.f32.gmra.mrb[16].mxu1 %vm6530_vm3, %v23644_v63 }
 0x8a2   :  { %17868 = vmatprep.mubr.msk.f32.mxu1 %vm6530_vm3, %v23648_v0 }
 0x8a5   :  { %17869 = vmatmul.mubr.msk.f32.gmra.mrb[18].mxu1 %vm6530_vm3, %v23652_v35 }
 0x8a6   :  { %17871 = vmatprep.mubr.msk.f32.mxu1 %vm6530_vm3, %v23656_v8 }
 0x8a9   :  { %17872 = vmatmul.mubr.msk.f32.gmra.mrb[20].mxu1 %vm6530_vm3, %v23660_v15 }
 0x8aa   :  { %17874 = vmatprep.mubr.msk.f32.mxu1 %vm6530_vm3, %v23664_v22 }
 0x8ad   :  { %17875 = vmatmul.mubr.msk.f32.gmra.mrb[22].mxu1 %vm6530_vm3, %v23668_v21 }
 0x8ae   :  { %17877 = vmatprep.mubr.msk.f32.mxu1 %vm6530_vm3, %v23672_v28 }
 0x8b1   :  { %17878 = vmatmul.mubr.msk.f32.gmra.mrb[24].mxu1 %vm6530_vm3, %v23676_v27 }
 0x8b2   :  { %17880 = vmatprep.mubr.msk.f32.mxu1 %vm6530_vm3, %v23680_v38 }
 0x8b5   :  { %17881 = vmatmul.mubr.msk.f32.gmra.mrb[26].mxu1 %vm6530_vm3, %v23684_v34 }
 0x8b6   :  { %17883 = vmatprep.mubr.msk.f32.mxu1 %vm6530_vm3, %v23688_v46 }
 0x8b9   :  { %17884 = vmatmul.mubr.msk.f32.gmra.mrb[28].mxu1 %vm6530_vm3, %v23692_v44 }
 0x8ba   :  { %17886 = vmatprep.mubr.msk.f32.mxu1 %vm6530_vm3, %v23696_v56 }
 0x8bd   :  { %17887 = vmatmul.mubr.msk.f32.gmra.mrb[30].mxu1 %vm6530_vm3, %v23700_v55 }
 0x8be   :  { %17889 = vmatprep.mubr.msk.f32.mxu1 %vm6530_vm3, %v10039_v4  ;;  %v23794_v4 = vld [vmem:[#allocation3 + $0x2e9] sm:$0xff] }
 0x8bf   :  { %26349 = vst [vmem:[#allocation58_spill] sm:$0xff] %v23794_v4 }
 0x8c1   :  { %17890 = vmatmul.mubr.msk.f32.gmra.mrb[32].mxu1 %vm6530_vm3, %v10040_v7  ;;  %v23798_v7 = vld [vmem:[#allocation3 + $0x2f1] sm:$0xff] }
 0x8c2   :  { %17892 = vmatprep.mubr.msk.f32.mxu1 %vm6530_vm3, %v23706_v3  ;;  %26350 = vst [vmem:[#allocation59_spill] sm:$0xff] %v23798_v7 }
 0x8c5   :  { %17893 = vmatmul.mubr.msk.f32.gmra.mrb[34].mxu1 %vm6530_vm3, %v23710_v18 }
 0x8c6   :  { %17895 = vmatprep.mubr.msk.f32.mxu1 %vm6530_vm3, %v23714_v9 }
 0x8c9   :  { %17896 = vmatmul.mubr.msk.f32.gmra.mrb[36].mxu1 %vm6530_vm3, %v23718_v17 }
 0x8ca   :  { %17898 = vmatprep.mubr.msk.f32.mxu1 %vm6530_vm3, %v23722_v26 }
 0x8cd   :  { %17899 = vmatmul.mubr.msk.f32.gmra.mrb[38].mxu1 %vm6530_vm3, %v23726_v25 }
 0x8ce   :  { %17901 = vmatprep.mubr.msk.f32.mxu1 %vm6530_vm3, %v23730_v42 }
 0x8d1   :  { %17902 = vmatmul.mubr.msk.f32.gmra.mrb[40].mxu1 %vm6530_vm3, %v23734_v50 }
 0x8d2   :  { %17904 = vmatprep.mubr.msk.f32.mxu1 %vm6530_vm3, %v23738_v41 }
 0x8d5   :  { %17905 = vmatmul.mubr.msk.f32.gmra.mrb[42].mxu1 %vm6530_vm3, %v23742_v30 }
 0x8d6   :  { %17907 = vmatprep.mubr.msk.f32.mxu1 %vm6530_vm3, %v23746_v13 }
 0x8d9   :  { %17908 = vmatmul.mubr.msk.f32.gmra.mrb[44].mxu1 %vm6530_vm3, %v23750_v1 }
 0x8da   :  { %17910 = vmatprep.mubr.msk.f32.mxu1 %vm6530_vm3, %v23754_v6 }
 0x8dd   :  { %17911 = vmatmul.mubr.msk.f32.gmra.mrb[46].mxu1 %vm6530_vm3, %v23758_v16 }
 0x8de   :  { %17913 = vmatprep.mubr.msk.f32.mxu1 %vm6530_vm3, %v23762_v54 }
 0x8e1   :  { %17914 = vmatmul.mubr.msk.f32.gmra.mrb[48].mxu1 %vm6530_vm3, %v23766_v12 }
 0x8e2   :  { %17916 = vmatprep.mubr.msk.f32.mxu1 %vm6530_vm3, %v23770_v31  ;;  %v26367_v31 = vld [vmem:[#allocation71_spill] sm:$0xff] }
 0x8e5   :  { %17917 = vmatmul.mubr.msk.f32.gmra.mrb[50].mxu1 %vm6530_vm3, %v23774_v10  ;;  %v26363_v10 = vld [vmem:[#allocation67_spill] sm:$0xff] }
 0x8e6   :  { %17919 = vmatprep.mubr.msk.f32.mxu1 %vm6530_vm3, %v23778_v23  ;;  %v26358_v23 = vld [vmem:[#allocation62_spill] sm:$0xff] }
 0x8e9   :  { %17920 = vmatmul.mubr.msk.f32.gmra.mrb[52].mxu1 %vm6530_vm3, %v23782_v19  ;;  %v23802_v19 = vld [vmem:[#allocation3 + $0x301] sm:$0xff] }
 0x8ea   :  { %17922 = vmatprep.mubr.msk.f32.mxu1 %vm6530_vm3, %v23786_v62  ;;  %26351 = vst [vmem:[#allocation60_spill] sm:$0xff] %v23802_v19  ;;  %v23806_v62 = vld [vmem:[#allocation3 + $0x309] sm:$0xff] }
 0x8eb   :  { %26352 = vst [vmem:[#allocation61_spill] sm:$0xff] %v23806_v62 }
 0x8ed   :  { %17923 = vmatmul.mubr.msk.f32.gmra.mrb[54].mxu1 %vm6530_vm3, %v23790_v29  ;;  %v23810_v29 = vld [vmem:[#allocation3 + $0x319] sm:$0xff] }
 0x8ee   :  { %17925 = vmatprep.mubr.msk.f32.mxu1 %vm6530_vm3, %v23794_v4  ;;  %26353 = vst [vmem:[#allocation4_spill] sm:$0xff] %v23810_v29  ;;  %v23814_v4 = vld [vmem:[#allocation3 + $0x321] sm:$0xff] }
 0x8ef   :  { %26354 = vst [vmem:[#allocation5_spill] sm:$0xff] %v23814_v4 }
 0x8f1   :  { %17926 = vmatmul.mubr.msk.f32.gmra.mrb[56].mxu1 %vm6530_vm3, %v23798_v7  ;;  %v23818_v7 = vld [vmem:[#allocation3 + $0x331] sm:$0xff] }
 0x8f2   :  { %17928 = vmatprep.mubr.msk.f32.mxu1 %vm6530_vm3, %v23802_v19  ;;  %26355 = vst [vmem:[#allocation6_spill] sm:$0xff] %v23818_v7  ;;  %v23822_v19 = vld [vmem:[#allocation3 + $0x339] sm:$0xff] }
 0x8f3   :  { %26356 = vst [vmem:[#allocation73_spill] sm:$0xff] %v23822_v19 }
 0x8f5   :  { %17929 = vmatmul.mubr.msk.f32.gmra.mrb[58].mxu1 %vm6530_vm3, %v23806_v62  ;;  %v26357_v62 = vld [vmem:[#allocation7_spill] sm:$0xff] }
 0x8f6   :  { %17931 = vmatprep.mubr.msk.f32.mxu1 %vm6530_vm3, %v23810_v29  ;;  %v23831_v29 = vld [vmem:[%s25789_s4 + $0x38] sm:$0xff] }
 0x8f9   :  { %17932 = vmatmul.mubr.msk.f32.gmra.mrb[60].mxu1 %vm6530_vm3, %v23814_v4  ;;  %v26359_v4 = vld [vmem:[#allocation63_spill] sm:$0xff] }
 0x8fa   :  { %17934 = vmatprep.mubr.msk.f32.mxu1 %vm6530_vm3, %v23818_v7  ;;  %v26360_v7 = vld [vmem:[#allocation64_spill] sm:$0xff] }
 0x8fd   :  { %17935 = vmatmul.mubr.msk.f32.gmra.mrb[62].mxu1 %vm6530_vm3, %v23822_v19  ;;  %v26361_v19 = vld [vmem:[#allocation65_spill] sm:$0xff] }
 0x8fe   :  { %17939 = vmatprep.mubr.msk.f32.mxu1 %vm6530_vm3, %v26357_v62  ;;  %v26362_v62 = vld [vmem:[#allocation66_spill] sm:$0xff] }
 0x901   :  { %17940 = vmatmul.mubr.msk.f32.vlgmr.msra.gmra.mrb[0].mxu1 %vm6530_vm3, %v26358_v23  ;;  %v26364_v23 = vld [vmem:[#allocation68_spill] sm:$0xff] }
 0x902   :  { %18036 = vmatpush3.msra.mxu1 %v23579_v5  ;;  %17942 = vmatprep.mubr.msk.f32.mxu1 %vm6530_vm3, %v26359_v4  ;;  %v26365_v5 = vld [vmem:[#allocation69_spill] sm:$0xff]  ;;  %v26366_v4 = vld [vmem:[#allocation70_spill] sm:$0xff] }
 0x903   :  { %18133 = vmatprep.subr.mxu1 %v23831_v29 }
 0x905   :  { %17943 = vmatmul.mubr.msk.f32.gmra.mrb[2].mxu1 %vm6530_vm3, %v26360_v7  ;;  %v26368_v7 = vld [vmem:[#allocation72_spill] sm:$0xff] }
 0x906   :  { %17945 = vmatprep.mubr.msk.f32.mxu1 %vm6530_vm3, %v26361_v19  ;;  %v26369_v19 = vld [vmem:[#allocation8_spill] sm:$0xff] }
 0x909   :  { %17946 = vmatmul.mubr.msk.f32.gmra.mrb[4].mxu1 %vm6530_vm3, %v26362_v62  ;;  %v26370_v62 = vld [vmem:[#allocation9_spill] sm:$0xff] }
 0x90a   :  { %17948 = vmatprep.mubr.msk.f32.mxu1 %vm6530_vm3, %v26363_v10  ;;  %v26371_v10 = vld [vmem:[#allocation11_spill] sm:$0xff] }
 0x90d   :  { %17949 = vmatmul.mubr.msk.f32.gmra.mrb[6].mxu1 %vm6530_vm3, %v26364_v23  ;;  %v26372_v23 = vld [vmem:[#allocation10_spill] sm:$0xff] }
 0x90e   :  { %17951 = vmatprep.mubr.msk.f32.mxu1 %vm6530_vm3, %v26365_v5  ;;  %v26373_v5 = vld [vmem:[#allocation13_spill] sm:$0xff] }
 0x911   :  { %17952 = vmatmul.mubr.msk.f32.gmra.mrb[8].mxu1 %vm6530_vm3, %v26366_v4  ;;  %v26374_v4 = vld [vmem:[#allocation12_spill] sm:$0xff] }
 0x912   :  { %17954 = vmatprep.mubr.msk.f32.mxu1 %vm6530_vm3, %v26367_v31  ;;  %v26375_v31 = vld [vmem:[#allocation15_spill] sm:$0xff] }
 0x915   :  { %17955 = vmatmul.mubr.msk.f32.gmra.mrb[10].mxu1 %vm6530_vm3, %v26368_v7  ;;  %v26376_v7 = vld [vmem:[#allocation14_spill] sm:$0xff] }
 0x916   :  { %17957 = vmatprep.mubr.msk.f32.mxu1 %vm6530_vm3, %v26369_v19  ;;  %v26377_v19 = vld [vmem:[#allocation17_spill] sm:$0xff] }
 0x919   :  { %17958 = vmatmul.mubr.msk.f32.gmra.mrb[12].mxu1 %vm6530_vm3, %v26370_v62  ;;  %v26378_v62 = vld [vmem:[#allocation16_spill] sm:$0xff] }
 0x91a   :  { %17960 = vmatprep.mubr.msk.f32.mxu1 %vm6530_vm3, %v26371_v10  ;;  %v26379_v10 = vld [vmem:[#allocation19_spill] sm:$0xff] }
 0x91d   :  { %17961 = vmatmul.mubr.msk.f32.gmra.mrb[14].mxu1 %vm6530_vm3, %v26372_v23  ;;  %v26380_v23 = vld [vmem:[#allocation18_spill] sm:$0xff] }
 0x91e   :  { %17963 = vmatprep.mubr.msk.f32.mxu1 %vm6530_vm3, %v26373_v5  ;;  %v26381_v5 = vld [vmem:[#allocation21_spill] sm:$0xff] }
 0x921   :  { %17964 = vmatmul.mubr.msk.f32.gmra.mrb[16].mxu1 %vm6530_vm3, %v26374_v4  ;;  %v26382_v4 = vld [vmem:[#allocation20_spill] sm:$0xff] }
 0x922   :  { %17966 = vmatprep.mubr.msk.f32.mxu1 %vm6530_vm3, %v26375_v31  ;;  %v26383_v31 = vld [vmem:[#allocation23_spill] sm:$0xff] }
 0x925   :  { %17967 = vmatmul.mubr.msk.f32.gmra.mrb[18].mxu1 %vm6530_vm3, %v26376_v7  ;;  %v26384_v7 = vld [vmem:[#allocation22_spill] sm:$0xff] }
 0x926   :  { %17969 = vmatprep.mubr.msk.f32.mxu1 %vm6530_vm3, %v26377_v19  ;;  %v26385_v19 = vld [vmem:[#allocation43_spill] sm:$0xff] }
 0x929   :  { %17970 = vmatmul.mubr.msk.f32.gmra.mrb[20].mxu1 %vm6530_vm3, %v26378_v62  ;;  %v26386_v62 = vld [vmem:[#allocation24_spill] sm:$0xff] }
 0x92a   :  { %17972 = vmatprep.mubr.msk.f32.mxu1 %vm6530_vm3, %v26379_v10  ;;  %v23893_v10 = vld [vmem:[#allocation3 + $0x182] sm:$0xff] }
 0x92d   :  { %17973 = vmatmul.mubr.msk.f32.gmra.mrb[22].mxu1 %vm6530_vm3, %v26380_v23  ;;  %v23897_v23 = vld [vmem:[#allocation3 + $0x18a] sm:$0xff] }
 0x92e   :  { %17975 = vmatprep.mubr.msk.f32.mxu1 %vm6530_vm3, %v26381_v5  ;;  %26387 = vst [vmem:[#allocation7_spill] sm:$0xff] %v23897_v23  ;;  %v26388_v5 = vld [vmem:[#allocation25_spill] sm:$0xff] }
 0x931   :  { %17976 = vmatmul.mubr.msk.f32.gmra.mrb[24].mxu1 %vm6530_vm3, %v26382_v4  ;;  %v26389_v4 = vld [vmem:[#allocation26_spill] sm:$0xff] }
 0x932   :  { %17978 = vmatprep.mubr.msk.f32.mxu1 %vm6530_vm3, %v26383_v31  ;;  %v26390_v31 = vld [vmem:[#allocation27_spill] sm:$0xff] }
 0x935   :  { %17979 = vmatmul.mubr.msk.f32.gmra.mrb[26].mxu1 %vm6530_vm3, %v26384_v7  ;;  %v26391_v7 = vld [vmem:[#allocation28_spill] sm:$0xff] }
 0x936   :  { %17981 = vmatprep.mubr.msk.f32.mxu1 %vm6530_vm3, %v26385_v19  ;;  %v26392_v19 = vld [vmem:[#allocation29_spill] sm:$0xff] }
 0x939   :  { %17982 = vmatmul.mubr.msk.f32.gmra.mrb[28].mxu1 %vm6530_vm3, %v26386_v62  ;;  %v26393_v62 = vld [vmem:[#allocation30_spill] sm:$0xff] }
 0x93a   :  { %17984 = vmatprep.mubr.msk.f32.mxu1 %vm6530_vm3, %v23893_v10 }
 0x93d   :  { %17985 = vmatmul.mubr.msk.f32.gmra.mrb[30].mxu1 %vm6530_vm3, %v23897_v23  ;;  %v26394_v23 = vld [vmem:[#allocation31_spill] sm:$0xff] }
 0x93e   :  { %17987 = vmatprep.mubr.msk.f32.mxu1 %vm6530_vm3, %v23312_v60  ;;  %v26395_v60 = vld [vmem:[#allocation32_spill] sm:$0xff] }
 0x941   :  { %17988 = vmatmul.mubr.msk.f32.gmra.mrb[32].mxu1 %vm6530_vm3, %v26388_v5  ;;  %v26396_v5 = vld [vmem:[#allocation33_spill] sm:$0xff] }
 0x942   :  { %17990 = vmatprep.mubr.msk.f32.mxu1 %vm6530_vm3, %v26389_v4  ;;  %v26397_v4 = vld [vmem:[#allocation34_spill] sm:$0xff] }
 0x945   :  { %17991 = vmatmul.mubr.msk.f32.gmra.mrb[34].mxu1 %vm6530_vm3, %v26390_v31  ;;  %v26398_v31 = vld [vmem:[#allocation35_spill] sm:$0xff] }
 0x946   :  { %17993 = vmatprep.mubr.msk.f32.mxu1 %vm6530_vm3, %v26391_v7  ;;  %v26399_v7 = vld [vmem:[#allocation36_spill] sm:$0xff] }
 0x949   :  { %17994 = vmatmul.mubr.msk.f32.gmra.mrb[36].mxu1 %vm6530_vm3, %v26392_v19  ;;  %v26400_v19 = vld [vmem:[#allocation37_spill] sm:$0xff] }
 0x94a   :  { %17996 = vmatprep.mubr.msk.f32.mxu1 %vm6530_vm3, %v26393_v62  ;;  %v26401_v62 = vld [vmem:[#allocation38_spill] sm:$0xff] }
 0x94d   :  { %17997 = vmatmul.mubr.msk.f32.gmra.mrb[38].mxu1 %vm6530_vm3, %v26394_v23  ;;  %v26402_v23 = vld [vmem:[#allocation39_spill] sm:$0xff] }
 0x94e   :  { %17999 = vmatprep.mubr.msk.f32.mxu1 %vm6530_vm3, %v26395_v60  ;;  %v26403_v60 = vld [vmem:[#allocation40_spill] sm:$0xff] }
 0x951   :  { %18000 = vmatmul.mubr.msk.f32.gmra.mrb[40].mxu1 %vm6530_vm3, %v26396_v5  ;;  %v26404_v5 = vld [vmem:[#allocation41_spill] sm:$0xff] }
 0x952   :  { %18002 = vmatprep.mubr.msk.f32.mxu1 %vm6530_vm3, %v26397_v4  ;;  %v26405_v4 = vld [vmem:[#allocation42_spill] sm:$0xff] }
 0x955   :  { %18003 = vmatmul.mubr.msk.f32.gmra.mrb[42].mxu1 %vm6530_vm3, %v26398_v31  ;;  %v26406_v31 = vld [vmem:[#allocation44_spill] sm:$0xff] }
 0x956   :  { %18005 = vmatprep.mubr.msk.f32.mxu1 %vm6530_vm3, %v26399_v7  ;;  %v26407_v7 = vld [vmem:[#allocation46_spill] sm:$0xff] }
 0x959   :  { %18006 = vmatmul.mubr.msk.f32.gmra.mrb[44].mxu1 %vm6530_vm3, %v26400_v19  ;;  %v26408_v19 = vld [vmem:[#allocation47_spill] sm:$0xff] }
 0x95a   :  { %18008 = vmatprep.mubr.msk.f32.mxu1 %vm6530_vm3, %v26401_v62  ;;  %v26409_v62 = vld [vmem:[#allocation48_spill] sm:$0xff] }
 0x95d   :  { %18009 = vmatmul.mubr.msk.f32.gmra.mrb[46].mxu1 %vm6530_vm3, %v26402_v23  ;;  %v26410_v23 = vld [vmem:[#allocation49_spill] sm:$0xff] }
 0x95e   :  { %18011 = vmatprep.mubr.msk.f32.mxu1 %vm6530_vm3, %v26403_v60  ;;  %v26411_v60 = vld [vmem:[#allocation50_spill] sm:$0xff] }
 0x961   :  { %18012 = vmatmul.mubr.msk.f32.gmra.mrb[48].mxu1 %vm6530_vm3, %v26404_v5  ;;  %v26412_v5 = vld [vmem:[#allocation51_spill] sm:$0xff] }
 0x962   :  { %18014 = vmatprep.mubr.msk.f32.mxu1 %vm6530_vm3, %v26405_v4  ;;  %v23961_v4 = vld [vmem:[#allocation3 + $0x332] sm:$0xff] }
 0x965   :  { %18015 = vmatmul.mubr.msk.f32.gmra.mrb[50].mxu1 %vm6530_vm3, %v26406_v31  ;;  %v23965_v31 = vld [vmem:[#allocation3 + $0x33a] sm:$0xff] }
 0x966   :  { %18017 = vmatprep.mubr.msk.f32.mxu1 %vm6530_vm3, %v26407_v7  ;;  %v11425_v7 = vld [vmem:[#allocation3 + $0x50] sm:$0xff] }
 0x969   :  { %18018 = vmatmul.mubr.msk.f32.gmra.mrb[52].mxu1 %vm6530_vm3, %v26408_v19  ;;  %v11426_v19 = vld [vmem:[#allocation3 + $0x60] sm:$0xff] }
 0x96a   :  { %18020 = vmatprep.mubr.msk.f32.mxu1 %vm6530_vm3, %v26409_v62  ;;  %v11427_v62 = vld [vmem:[#allocation3 + $0x68] sm:$0xff] }
 0x96d   :  { %18021 = vmatmul.mubr.msk.f32.gmra.mrb[54].mxu1 %vm6530_vm3, %v26410_v23  ;;  %v11428_v23 = vld [vmem:[#allocation3 + $0x78] sm:$0xff] }
 0x96e   :  { %18023 = vmatprep.mubr.msk.f32.mxu1 %vm6530_vm3, %v26411_v60  ;;  %v11429_v60 = vld [vmem:[#allocation3 + $0x80] sm:$0xff] }
 0x971   :  { %18024 = vmatmul.mubr.msk.f32.gmra.mrb[56].mxu1 %vm6530_vm3, %v23412_v2  ;;  %v11422_v2 = vld [vmem:[#allocation3 + $0x30] sm:$0xff] }
 0x972   :  { %18026 = vmatprep.mubr.msk.f32.mxu1 %vm6530_vm3, %v26412_v5  ;;  %v11431_v5 = vld [vmem:[#allocation3 + $0x98] sm:$0xff] }
 0x975   :  { %18027 = vmatmul.mubr.msk.f32.gmra.mrb[58].mxu1 %vm6530_vm3, %v23420_v49  ;;  %v11423_v49 = vld [vmem:[#allocation3 + $0x38] sm:$0xff] }
 0x976   :  { %18029 = vmatprep.mubr.msk.f32.mxu1 %vm6530_vm3, %v23424_v61  ;;  %v23973_v61 = vld [vmem:[%s25789_s4 + $0x40] sm:$0xff] }
 0x979   :  { %18030 = vmatmul.mubr.msk.f32.gmra.mrb[60].mxu1 %vm6530_vm3, %v23428_v53  ;;  %v11424_v53 = vld [vmem:[#allocation3 + $0x48] sm:$0xff] }
 0x97a   :  { %18032 = vmatprep.mubr.msk.f32.mxu1 %vm6530_vm3, %v23961_v4 }
 0x97d   :  { %18033 = vmatmul.mubr.msk.f32.gmra.mrb[62].mxu1 %vm6530_vm3, %v23965_v31 }
 0x97e   :  { %18037 = vmatprep.mubr.msk.f32.mxu1 %vm6530_vm3, %v11422_v2  ;;  %v11432_v2 = vld [vmem:[#allocation3 + $0xa8] sm:$0xff] }
 0x981   :  { %18038 = vmatmul.mubr.msk.f32.vlgmr.msra.gmra.mrb[0].mxu1 %vm6530_vm3, %v11423_v49  ;;  %v11433_v49 = vld [vmem:[#allocation3 + $0xb0] sm:$0xff] }
 0x982   :  { %18134 = vmatpush3.msra.mxu1 %v23831_v29  ;;  %18040 = vmatprep.mubr.msk.f32.mxu1 %vm6530_vm3, %v11424_v53  ;;  %v11430_v29 = vld [vmem:[#allocation3 + $0x90] sm:$0xff]  ;;  %v11434_v53 = vld [vmem:[#allocation3 + $0xc0] sm:$0xff] }
 0x983   :  { %18231 = vmatprep.subr.mxu1 %v23973_v61 }
 0x985   :  { %18041 = vmatmul.mubr.msk.f32.gmra.mrb[2].mxu1 %vm6530_vm3, %v11425_v7  ;;  %v11435_v7 = vld [vmem:[#allocation3 + $0xc8] sm:$0xff] }
 0x986   :  { %18043 = vmatprep.mubr.msk.f32.mxu1 %vm6530_vm3, %v11426_v19  ;;  %v11436_v19 = vld [vmem:[#allocation3 + $0xd8] sm:$0xff] }
 0x989   :  { %18044 = vmatmul.mubr.msk.f32.gmra.mrb[4].mxu1 %vm6530_vm3, %v11427_v62  ;;  %v11437_v62 = vld [vmem:[#allocation3 + $0xe0] sm:$0xff] }
 0x98a   :  { %18046 = vmatprep.mubr.msk.f32.mxu1 %vm6530_vm3, %v11428_v23  ;;  %v11438_v23 = vld [vmem:[#allocation3 + $0xf0] sm:$0xff] }
 0x98d   :  { %18047 = vmatmul.mubr.msk.f32.gmra.mrb[6].mxu1 %vm6530_vm3, %v11429_v60  ;;  %v11439_v60 = vld [vmem:[#allocation3 + $0xf8] sm:$0xff] }
 0x98e   :  { %18049 = vmatprep.mubr.msk.f32.mxu1 %vm6530_vm3, %v11430_v29  ;;  %v11440_v29 = vld [vmem:[#allocation3 + $0x108] sm:$0xff] }
 0x991   :  { %18050 = vmatmul.mubr.msk.f32.gmra.mrb[8].mxu1 %vm6530_vm3, %v11431_v5  ;;  %v11441_v5 = vld [vmem:[#allocation3 + $0x110] sm:$0xff] }
 0x992   :  { %18052 = vmatprep.mubr.msk.f32.mxu1 %vm6530_vm3, %v11432_v2  ;;  %v11442_v2 = vld [vmem:[#allocation3 + $0x120] sm:$0xff] }
 0x995   :  { %18053 = vmatmul.mubr.msk.f32.gmra.mrb[10].mxu1 %vm6530_vm3, %v11433_v49  ;;  %v11443_v49 = vld [vmem:[#allocation3 + $0x128] sm:$0xff] }
 0x996   :  { %18055 = vmatprep.mubr.msk.f32.mxu1 %vm6530_vm3, %v11434_v53  ;;  %v11444_v53 = vld [vmem:[#allocation3 + $0x138] sm:$0xff] }
 0x999   :  { %18056 = vmatmul.mubr.msk.f32.gmra.mrb[12].mxu1 %vm6530_vm3, %v11435_v7  ;;  %v11445_v7 = vld [vmem:[#allocation3 + $0x140] sm:$0xff] }
 0x99a   :  { %18058 = vmatprep.mubr.msk.f32.mxu1 %vm6530_vm3, %v11436_v19  ;;  %v11446_v19 = vld [vmem:[#allocation3 + $0x150] sm:$0xff] }
 0x99d   :  { %18059 = vmatmul.mubr.msk.f32.gmra.mrb[14].mxu1 %vm6530_vm3, %v11437_v62  ;;  %v11447_v62 = vld [vmem:[#allocation3 + $0x158] sm:$0xff] }
 0x99e   :  { %18061 = vmatprep.mubr.msk.f32.mxu1 %vm6530_vm3, %v11438_v23  ;;  %v11448_v23 = vld [vmem:[#allocation3 + $0x168] sm:$0xff] }
 0x9a1   :  { %18062 = vmatmul.mubr.msk.f32.gmra.mrb[16].mxu1 %vm6530_vm3, %v11439_v60  ;;  %v11449_v60 = vld [vmem:[#allocation3 + $0x170] sm:$0xff] }
 0x9a2   :  { %18064 = vmatprep.mubr.msk.f32.mxu1 %vm6530_vm3, %v11440_v29  ;;  %v11452_v29 = vld [vmem:[#allocation3 + $0x198] sm:$0xff] }
 0x9a5   :  { %18065 = vmatmul.mubr.msk.f32.gmra.mrb[18].mxu1 %vm6530_vm3, %v11441_v5  ;;  %v11453_v5 = vld [vmem:[#allocation3 + $0x1a0] sm:$0xff] }
 0x9a6   :  { %18067 = vmatprep.mubr.msk.f32.mxu1 %vm6530_vm3, %v11442_v2  ;;  %v11454_v2 = vld [vmem:[#allocation3 + $0x1e0] sm:$0xff] }
 0x9a9   :  { %18068 = vmatmul.mubr.msk.f32.gmra.mrb[20].mxu1 %vm6530_vm3, %v11443_v49  ;;  %v11455_v49 = vld [vmem:[#allocation3 + $0x1e8] sm:$0xff] }
 0x9aa   :  { %18070 = vmatprep.mubr.msk.f32.mxu1 %vm6530_vm3, %v11444_v53  ;;  %v11456_v53 = vld [vmem:[#allocation3 + $0x1f8] sm:$0xff] }
 0x9ad   :  { %18071 = vmatmul.mubr.msk.f32.gmra.mrb[22].mxu1 %vm6530_vm3, %v11445_v7  ;;  %v11457_v7 = vld [vmem:[#allocation3 + $0x200] sm:$0xff] }
 0x9ae   :  { %18073 = vmatprep.mubr.msk.f32.mxu1 %vm6530_vm3, %v11446_v19  ;;  %v11460_v19 = vld [vmem:[#allocation3 + $0x228] sm:$0xff] }
 0x9b1   :  { %18074 = vmatmul.mubr.msk.f32.gmra.mrb[24].mxu1 %vm6530_vm3, %v11447_v62  ;;  %v11461_v62 = vld [vmem:[#allocation3 + $0x230] sm:$0xff] }
 0x9b2   :  { %18076 = vmatprep.mubr.msk.f32.mxu1 %vm6530_vm3, %v11448_v23  ;;  %v11462_v23 = vld [vmem:[#allocation3 + $0x240] sm:$0xff] }
 0x9b5   :  { %18077 = vmatmul.mubr.msk.f32.gmra.mrb[26].mxu1 %vm6530_vm3, %v11449_v60  ;;  %v11463_v60 = vld [vmem:[#allocation3 + $0x248] sm:$0xff] }
 0x9b6   :  { %18079 = vmatprep.mubr.msk.f32.mxu1 %vm6530_vm3, %v23499_v47  ;;  %v11458_v47 = vld [vmem:[#allocation3 + $0x210] sm:$0xff] }
 0x9b9   :  { %18080 = vmatmul.mubr.msk.f32.gmra.mrb[28].mxu1 %vm6530_vm3, %v23503_v59  ;;  %v11459_v59 = vld [vmem:[#allocation3 + $0x218] sm:$0xff] }
 0x9ba   :  { %18082 = vmatprep.mubr.msk.f32.mxu1 %vm6530_vm3, %v11452_v29  ;;  %v11464_v29 = vld [vmem:[#allocation3 + $0x258] sm:$0xff] }
 0x9bd   :  { %18083 = vmatmul.mubr.msk.f32.gmra.mrb[30].mxu1 %vm6530_vm3, %v11453_v5  ;;  %v11465_v5 = vld [vmem:[#allocation3 + $0x260] sm:$0xff] }
 0x9be   :  { %18085 = vmatprep.mubr.msk.f32.mxu1 %vm6530_vm3, %v11454_v2  ;;  %v11466_v2 = vld [vmem:[#allocation3 + $0x270] sm:$0xff] }
 0x9c1   :  { %18086 = vmatmul.mubr.msk.f32.gmra.mrb[32].mxu1 %vm6530_vm3, %v11455_v49  ;;  %v11467_v49 = vld [vmem:[#allocation3 + $0x278] sm:$0xff] }
 0x9c2   :  { %18088 = vmatprep.mubr.msk.f32.mxu1 %vm6530_vm3, %v11456_v53  ;;  %v11468_v53 = vld [vmem:[#allocation3 + $0x288] sm:$0xff] }
 0x9c5   :  { %18089 = vmatmul.mubr.msk.f32.gmra.mrb[34].mxu1 %vm6530_vm3, %v11457_v7  ;;  %v11469_v7 = vld [vmem:[#allocation3 + $0x290] sm:$0xff] }
 0x9c6   :  { %18091 = vmatprep.mubr.msk.f32.mxu1 %vm6530_vm3, %v11458_v47  ;;  %v11470_v47 = vld [vmem:[#allocation3 + $0x2a0] sm:$0xff] }
 0x9c9   :  { %18092 = vmatmul.mubr.msk.f32.gmra.mrb[36].mxu1 %vm6530_vm3, %v11459_v59  ;;  %v11471_v59 = vld [vmem:[#allocation3 + $0x2a8] sm:$0xff] }
 0x9ca   :  { %18094 = vmatprep.mubr.msk.f32.mxu1 %vm6530_vm3, %v11460_v19  ;;  %v11472_v19 = vld [vmem:[#allocation3 + $0x2b8] sm:$0xff] }
 0x9cd   :  { %18095 = vmatmul.mubr.msk.f32.gmra.mrb[38].mxu1 %vm6530_vm3, %v11461_v62  ;;  %v11473_v62 = vld [vmem:[#allocation3 + $0x2c0] sm:$0xff] }
 0x9ce   :  { %18097 = vmatprep.mubr.msk.f32.mxu1 %vm6530_vm3, %v11462_v23  ;;  %v11474_v23 = vld [vmem:[#allocation3 + $0x2d0] sm:$0xff] }
 0x9d1   :  { %18098 = vmatmul.mubr.msk.f32.gmra.mrb[40].mxu1 %vm6530_vm3, %v11463_v60  ;;  %v11475_v60 = vld [vmem:[#allocation3 + $0x2d8] sm:$0xff] }
 0x9d2   :  { %18100 = vmatprep.mubr.msk.f32.mxu1 %vm6530_vm3, %v11464_v29  ;;  %v11476_v29 = vld [vmem:[#allocation3 + $0x2e8] sm:$0xff] }
 0x9d5   :  { %18101 = vmatmul.mubr.msk.f32.gmra.mrb[42].mxu1 %vm6530_vm3, %v11465_v5  ;;  %v11477_v5 = vld [vmem:[#allocation3 + $0x2f0] sm:$0xff] }
 0x9d6   :  { %18103 = vmatprep.mubr.msk.f32.mxu1 %vm6530_vm3, %v11466_v2  ;;  %v11478_v2 = vld [vmem:[#allocation3 + $0x300] sm:$0xff] }
 0x9d9   :  { %18104 = vmatmul.mubr.msk.f32.gmra.mrb[44].mxu1 %vm6530_vm3, %v11467_v49  ;;  %v11479_v49 = vld [vmem:[#allocation3 + $0x308] sm:$0xff] }
 0x9da   :  { %18106 = vmatprep.mubr.msk.f32.mxu1 %vm6530_vm3, %v11468_v53  ;;  %v11480_v53 = vld [vmem:[#allocation3 + $0x318] sm:$0xff] }
 0x9dd   :  { %18107 = vmatmul.mubr.msk.f32.gmra.mrb[46].mxu1 %vm6530_vm3, %v11469_v7  ;;  %v11481_v7 = vld [vmem:[#allocation3 + $0x320] sm:$0xff] }
 0x9de   :  { %18109 = vmatprep.mubr.msk.f32.mxu1 %vm6530_vm3, %v11470_v47  ;;  %v11484_v47 = vld [vmem:[#allocation3 + $0x348] sm:$0xff] }
 0x9e1   :  { %18110 = vmatmul.mubr.msk.f32.gmra.mrb[48].mxu1 %vm6530_vm3, %v11471_v59  ;;  %v11485_v59 = vld [vmem:[#allocation3 + $0x350] sm:$0xff] }
 0x9e2   :  { %18112 = vmatprep.mubr.msk.f32.mxu1 %vm6530_vm3, %v11472_v19  ;;  %v12868_v19 = vld [vmem:[#allocation3 + $0x1e2] sm:$0xff] }
 0x9e5   :  { %18113 = vmatmul.mubr.msk.f32.gmra.mrb[50].mxu1 %vm6530_vm3, %v11473_v62  ;;  %v12869_v62 = vld [vmem:[#allocation3 + $0x1ea] sm:$0xff] }
 0x9e6   :  { %18115 = vmatprep.mubr.msk.f32.mxu1 %vm6530_vm3, %v11474_v23  ;;  %v12870_v23 = vld [vmem:[#allocation3 + $0x1fa] sm:$0xff] }
 0x9e9   :  { %18116 = vmatmul.mubr.msk.f32.gmra.mrb[52].mxu1 %vm6530_vm3, %v11475_v60  ;;  %v12871_v60 = vld [vmem:[#allocation3 + $0x202] sm:$0xff] }
 0x9ea   :  { %18118 = vmatprep.mubr.msk.f32.mxu1 %vm6530_vm3, %v11476_v29  ;;  %v12873_v29 = vld [vmem:[#allocation3 + $0x21a] sm:$0xff] }
 0x9ed   :  { %18119 = vmatmul.mubr.msk.f32.gmra.mrb[54].mxu1 %vm6530_vm3, %v11477_v5  ;;  %v12874_v5 = vld [vmem:[#allocation3 + $0x22a] sm:$0xff] }
 0x9ee   :  { %18121 = vmatprep.mubr.msk.f32.mxu1 %vm6530_vm3, %v11478_v2  ;;  %v12875_v2 = vld [vmem:[#allocation3 + $0x232] sm:$0xff] }
 0x9f1   :  { %18122 = vmatmul.mubr.msk.f32.gmra.mrb[56].mxu1 %vm6530_vm3, %v11479_v49  ;;  %v12876_v49 = vld [vmem:[#allocation3 + $0x242] sm:$0xff] }
 0x9f2   :  { %18124 = vmatprep.mubr.msk.f32.mxu1 %vm6530_vm3, %v11480_v53  ;;  %v12877_v53 = vld [vmem:[#allocation3 + $0x24a] sm:$0xff] }
 0x9f5   :  { %18125 = vmatmul.mubr.msk.f32.gmra.mrb[58].mxu1 %vm6530_vm3, %v11481_v7  ;;  %v12878_v7 = vld [vmem:[#allocation3 + $0x25a] sm:$0xff] }
 0x9f6   :  { %18127 = vmatprep.mubr.msk.f32.mxu1 %vm6530_vm3, %v23567_v11  ;;  %v12159_v11 = vld [vmem:[#allocation3 + $0x199] sm:$0xff] }
 0x9f9   :  { %18128 = vmatmul.mubr.msk.f32.gmra.mrb[60].mxu1 %vm6530_vm3, %v23571_v32  ;;  %v12160_v32 = vld [vmem:[#allocation3 + $0x1a1] sm:$0xff] }
 0x9fa   :  { %18130 = vmatprep.mubr.msk.f32.mxu1 %vm6530_vm3, %v11484_v47  ;;  %v12879_v47 = vld [vmem:[#allocation3 + $0x262] sm:$0xff] }
 0x9fd   :  { %18131 = vmatmul.mubr.msk.f32.gmra.mrb[62].mxu1 %vm6530_vm3, %v11485_v59  ;;  %v12880_v59 = vld [vmem:[#allocation3 + $0x272] sm:$0xff] }
 0x9fe   :  { %18135 = vmatprep.mubr.msk.f32.mxu1 %vm6530_vm3, %v23582_v24  ;;  %v26413_v24 = vld [vmem:[#allocation52_spill] sm:$0xff] }
 0xa01   :  { %18136 = vmatmul.mubr.msk.f32.vlgmr.msra.gmra.mrb[0].mxu1 %vm6530_vm3, %v23588_v14  ;;  %v26414_v14 = vld [vmem:[#allocation53_spill] sm:$0xff] }
 0xa02   :  { %18232 = vmatpush3.msra.mxu1 %v23973_v61  ;;  %18138 = vmatprep.mubr.msk.f32.mxu1 %vm6530_vm3, %v23592_v20  ;;  %v26415_v20 = vld [vmem:[#allocation54_spill] sm:$0xff]  ;;  %v12867_v61 = vld [vmem:[#allocation3 + $0x1a2] sm:$0xff] }
 0xa05   :  { %18139 = vmatmul.mubr.msk.f32.gmra.mrb[2].mxu1 %vm6530_vm3, %v23596_v48  ;;  %v26416_v48 = vld [vmem:[#allocation55_spill] sm:$0xff] }
 0xa06   :  { %18141 = vmatprep.mubr.msk.f32.mxu1 %vm6530_vm3, %v23600_v37  ;;  %v26417_v37 = vld [vmem:[#allocation56_spill] sm:$0xff] }
 0xa09   :  { %18142 = vmatmul.mubr.msk.f32.gmra.mrb[4].mxu1 %vm6530_vm3, %v23604_v33  ;;  %v26418_v33 = vld [vmem:[#allocation57_spill] sm:$0xff] }
 0xa0a   :  { %18144 = vmatprep.mubr.msk.f32.mxu1 %vm6530_vm3, %v23608_v40  ;;  %v26419_v40 = vld [vmem:[#allocation58_spill] sm:$0xff] }
 0xa0d   :  { %18145 = vmatmul.mubr.msk.f32.gmra.mrb[6].mxu1 %vm6530_vm3, %v23612_v39  ;;  %v26420_v39 = vld [vmem:[#allocation59_spill] sm:$0xff] }
 0xa0e   :  { %18147 = vmatprep.mubr.msk.f32.mxu1 %vm6530_vm3, %v23616_v45  ;;  %v26421_v45 = vld [vmem:[#allocation60_spill] sm:$0xff] }
 0xa11   :  { %18148 = vmatmul.mubr.msk.f32.gmra.mrb[8].mxu1 %vm6530_vm3, %v23620_v43  ;;  %v26422_v43 = vld [vmem:[#allocation61_spill] sm:$0xff] }
 0xa12   :  { %18150 = vmatprep.mubr.msk.f32.mxu1 %vm6530_vm3, %v23624_v52  ;;  %v26423_v52 = vld [vmem:[#allocation4_spill] sm:$0xff] }
 0xa15   :  { %18151 = vmatmul.mubr.msk.f32.gmra.mrb[10].mxu1 %vm6530_vm3, %v23628_v51  ;;  %v26424_v51 = vld [vmem:[#allocation5_spill] sm:$0xff] }
 0xa16   :  { %18153 = vmatprep.mubr.msk.f32.mxu1 %vm6530_vm3, %v23632_v58  ;;  %v26425_v58 = vld [vmem:[#allocation6_spill] sm:$0xff] }
 0xa19   :  { %18154 = vmatmul.mubr.msk.f32.gmra.mrb[12].mxu1 %vm6530_vm3, %v23636_v57  ;;  %v12191_v57 = vld [vmem:[#allocation3 + $0x349] sm:$0xff] }
 0xa1a   :  { %18156 = vmatprep.mubr.msk.f32.mxu1 %vm6530_vm3, %v23640_v36  ;;  %v26426_v36 = vld [vmem:[#allocation73_spill] sm:$0xff] }
 0xa1d   :  { %18157 = vmatmul.mubr.msk.f32.gmra.mrb[14].mxu1 %vm6530_vm3, %v23644_v63  ;;  %v12192_v63 = vld [vmem:[#allocation3 + $0x351] sm:$0xff] }
 0xa1e   :  { %18159 = vmatprep.mubr.msk.f32.mxu1 %vm6530_vm3, %v23648_v0  ;;  %v12836_v0 = vld [vmem:[#allocation3 + $0x32] sm:$0xff] }
 0xa21   :  { %18160 = vmatmul.mubr.msk.f32.gmra.mrb[16].mxu1 %vm6530_vm3, %v23652_v35  ;;  %v12837_v35 = vld [vmem:[#allocation3 + $0x3a] sm:$0xff] }
 0xa22   :  { %18162 = vmatprep.mubr.msk.f32.mxu1 %vm6530_vm3, %v23656_v8  ;;  %v12838_v8 = vld [vmem:[#allocation3 + $0x4a] sm:$0xff] }
 0xa25   :  { %18163 = vmatmul.mubr.msk.f32.gmra.mrb[18].mxu1 %vm6530_vm3, %v23660_v15  ;;  %v12839_v15 = vld [vmem:[#allocation3 + $0x52] sm:$0xff] }
 0xa26   :  { %18165 = vmatprep.mubr.msk.f32.mxu1 %vm6530_vm3, %v23664_v22  ;;  %v12840_v22 = vld [vmem:[#allocation3 + $0x62] sm:$0xff] }
 0xa29   :  { %18166 = vmatmul.mubr.msk.f32.gmra.mrb[20].mxu1 %vm6530_vm3, %v23668_v21  ;;  %v12841_v21 = vld [vmem:[#allocation3 + $0x6a] sm:$0xff] }
 0xa2a   :  { %18168 = vmatprep.mubr.msk.f32.mxu1 %vm6530_vm3, %v23672_v28  ;;  %v12842_v28 = vld [vmem:[#allocation3 + $0x7a] sm:$0xff] }
 0xa2d   :  { %18169 = vmatmul.mubr.msk.f32.gmra.mrb[22].mxu1 %vm6530_vm3, %v23676_v27  ;;  %v12843_v27 = vld [vmem:[#allocation3 + $0x82] sm:$0xff] }
 0xa2e   :  { %18171 = vmatprep.mubr.msk.f32.mxu1 %vm6530_vm3, %v23680_v38  ;;  %v12844_v38 = vld [vmem:[#allocation3 + $0x92] sm:$0xff] }
 0xa31   :  { %18172 = vmatmul.mubr.msk.f32.gmra.mrb[24].mxu1 %vm6530_vm3, %v23684_v34  ;;  %v12845_v34 = vld [vmem:[#allocation3 + $0x9a] sm:$0xff] }
 0xa32   :  { %18174 = vmatprep.mubr.msk.f32.mxu1 %vm6530_vm3, %v23688_v46  ;;  %v12846_v46 = vld [vmem:[#allocation3 + $0xaa] sm:$0xff] }
 0xa35   :  { %18175 = vmatmul.mubr.msk.f32.gmra.mrb[26].mxu1 %vm6530_vm3, %v23692_v44  ;;  %v12847_v44 = vld [vmem:[#allocation3 + $0xb2] sm:$0xff] }
 0xa36   :  { %18177 = vmatprep.mubr.msk.f32.mxu1 %vm6530_vm3, %v23696_v56  ;;  %v12848_v56 = vld [vmem:[#allocation3 + $0xc2] sm:$0xff] }
 0xa39   :  { %18178 = vmatmul.mubr.msk.f32.gmra.mrb[28].mxu1 %vm6530_vm3, %v23700_v55  ;;  %v12849_v55 = vld [vmem:[#allocation3 + $0xca] sm:$0xff] }
 0xa3a   :  { %18180 = vmatprep.mubr.msk.f32.mxu1 %vm6530_vm3, %v12159_v11  ;;  %v12881_v11 = vld [vmem:[#allocation3 + $0x27a] sm:$0xff] }
 0xa3d   :  { %18181 = vmatmul.mubr.msk.f32.gmra.mrb[30].mxu1 %vm6530_vm3, %v12160_v32  ;;  %v12882_v32 = vld [vmem:[#allocation3 + $0x28a] sm:$0xff] }
 0xa3e   :  { %18183 = vmatprep.mubr.msk.f32.mxu1 %vm6530_vm3, %v23706_v3  ;;  %v12850_v3 = vld [vmem:[#allocation3 + $0xda] sm:$0xff] }
 0xa41   :  { %18184 = vmatmul.mubr.msk.f32.gmra.mrb[32].mxu1 %vm6530_vm3, %v23710_v18  ;;  %v12851_v18 = vld [vmem:[#allocation3 + $0xe2] sm:$0xff] }
 0xa42   :  { %18186 = vmatprep.mubr.msk.f32.mxu1 %vm6530_vm3, %v23714_v9  ;;  %v12852_v9 = vld [vmem:[#allocation3 + $0xf2] sm:$0xff] }
 0xa45   :  { %18187 = vmatmul.mubr.msk.f32.gmra.mrb[34].mxu1 %vm6530_vm3, %v23718_v17  ;;  %v12853_v17 = vld [vmem:[#allocation3 + $0xfa] sm:$0xff] }
 0xa46   :  { %18189 = vmatprep.mubr.msk.f32.mxu1 %vm6530_vm3, %v23722_v26  ;;  %v12854_v26 = vld [vmem:[#allocation3 + $0x10a] sm:$0xff] }
 0xa49   :  { %18190 = vmatmul.mubr.msk.f32.gmra.mrb[36].mxu1 %vm6530_vm3, %v23726_v25  ;;  %v12855_v25 = vld [vmem:[#allocation3 + $0x112] sm:$0xff] }
 0xa4a   :  { %18192 = vmatprep.mubr.msk.f32.mxu1 %vm6530_vm3, %v23730_v42  ;;  %v12856_v42 = vld [vmem:[#allocation3 + $0x122] sm:$0xff] }
 0xa4d   :  { %18193 = vmatmul.mubr.msk.f32.gmra.mrb[38].mxu1 %vm6530_vm3, %v23734_v50  ;;  %v12857_v50 = vld [vmem:[#allocation3 + $0x12a] sm:$0xff] }
 0xa4e   :  { %18195 = vmatprep.mubr.msk.f32.mxu1 %vm6530_vm3, %v23738_v41  ;;  %v12858_v41 = vld [vmem:[#allocation3 + $0x13a] sm:$0xff] }
 0xa51   :  { %18196 = vmatmul.mubr.msk.f32.gmra.mrb[40].mxu1 %vm6530_vm3, %v23742_v30  ;;  %v12859_v30 = vld [vmem:[#allocation3 + $0x142] sm:$0xff] }
 0xa52   :  { %18198 = vmatprep.mubr.msk.f32.mxu1 %vm6530_vm3, %v23746_v13  ;;  %v12860_v13 = vld [vmem:[#allocation3 + $0x152] sm:$0xff] }
 0xa55   :  { %18199 = vmatmul.mubr.msk.f32.gmra.mrb[42].mxu1 %vm6530_vm3, %v23750_v1  ;;  %v12861_v1 = vld [vmem:[#allocation3 + $0x15a] sm:$0xff] }
 0xa56   :  { %18201 = vmatprep.mubr.msk.f32.mxu1 %vm6530_vm3, %v23754_v6  ;;  %v12862_v6 = vld [vmem:[#allocation3 + $0x16a] sm:$0xff] }
 0xa59   :  { %18202 = vmatmul.mubr.msk.f32.gmra.mrb[44].mxu1 %vm6530_vm3, %v23758_v16  ;;  %v12863_v16 = vld [vmem:[#allocation3 + $0x172] sm:$0xff] }
 0xa5a   :  { %18204 = vmatprep.mubr.msk.f32.mxu1 %vm6530_vm3, %v23762_v54  ;;  %v12866_v54 = vld [vmem:[#allocation3 + $0x19a] sm:$0xff] }
 0xa5d   :  { %18205 = vmatmul.mubr.msk.f32.gmra.mrb[46].mxu1 %vm6530_vm3, %v23766_v12  ;;  %v26427_v12 = vld [vmem:[#allocation7_spill] sm:$0xff] }
 0xa5e   :  { %18207 = vmatprep.mubr.msk.f32.mxu1 %vm6530_vm3, %v26413_v24  ;;  %v12883_v24 = vld [vmem:[#allocation3 + $0x292] sm:$0xff] }
 0xa61   :  { %18208 = vmatmul.mubr.msk.f32.gmra.mrb[48].mxu1 %vm6530_vm3, %v26414_v14  ;;  %v12884_v14 = vld [vmem:[#allocation3 + $0x2a2] sm:$0xff] }
 0xa62   :  { %18210 = vmatprep.mubr.msk.f32.mxu1 %vm6530_vm3, %v26415_v20  ;;  %v12885_v20 = vld [vmem:[#allocation3 + $0x2aa] sm:$0xff] }
 0xa65   :  { %18211 = vmatmul.mubr.msk.f32.gmra.mrb[50].mxu1 %vm6530_vm3, %v26416_v48  ;;  %v12886_v48 = vld [vmem:[#allocation3 + $0x2ba] sm:$0xff] }
 0xa66   :  { %18213 = vmatprep.mubr.msk.f32.mxu1 %vm6530_vm3, %v26417_v37  ;;  %v12887_v37 = vld [vmem:[#allocation3 + $0x2c2] sm:$0xff] }
 0xa69   :  { %18214 = vmatmul.mubr.msk.f32.gmra.mrb[52].mxu1 %vm6530_vm3, %v26418_v33  ;;  %v12888_v33 = vld [vmem:[#allocation3 + $0x2d2] sm:$0xff] }
 0xa6a   :  { %18216 = vmatprep.mubr.msk.f32.mxu1 %vm6530_vm3, %v26419_v40  ;;  %v12889_v40 = vld [vmem:[#allocation3 + $0x2da] sm:$0xff] }
 0xa6d   :  { %18217 = vmatmul.mubr.msk.f32.gmra.mrb[54].mxu1 %vm6530_vm3, %v26420_v39  ;;  %v12890_v39 = vld [vmem:[#allocation3 + $0x2ea] sm:$0xff] }
 0xa6e   :  { %18219 = vmatprep.mubr.msk.f32.mxu1 %vm6530_vm3, %v26421_v45  ;;  %v12891_v45 = vld [vmem:[#allocation3 + $0x2f2] sm:$0xff] }
 0xa71   :  { %18220 = vmatmul.mubr.msk.f32.gmra.mrb[56].mxu1 %vm6530_vm3, %v26422_v43  ;;  %v12892_v43 = vld [vmem:[#allocation3 + $0x302] sm:$0xff] }
 0xa72   :  { %18222 = vmatprep.mubr.msk.f32.mxu1 %vm6530_vm3, %v26423_v52  ;;  %v12893_v52 = vld [vmem:[#allocation3 + $0x30a] sm:$0xff] }
 0xa75   :  { %18223 = vmatmul.mubr.msk.f32.gmra.mrb[58].mxu1 %vm6530_vm3, %v26424_v51  ;;  %v12894_v51 = vld [vmem:[#allocation3 + $0x31a] sm:$0xff] }
 0xa76   :  { %18225 = vmatprep.mubr.msk.f32.mxu1 %vm6530_vm3, %v26425_v58  ;;  %v12895_v58 = vld [vmem:[#allocation3 + $0x322] sm:$0xff] }
 0xa79   :  { %18226 = vmatmul.mubr.msk.f32.gmra.mrb[60].mxu1 %vm6530_vm3, %v26426_v36  ;;  %v12899_v36 = vld [vmem:[#allocation3 + $0x352] sm:$0xff] }
 0xa7a   :  { %18228 = vmatprep.mubr.msk.f32.mxu1 %vm6530_vm3, %v12191_v57  ;;  %v12898_v57 = vld [vmem:[#allocation3 + $0x34a] sm:$0xff] }
 0xa7d   :  { %18229 = vmatmul.mubr.msk.f32.gmra.mrb[62].mxu1 %vm6530_vm3, %v12192_v63 }
 0xa7e   :  { %18233 = vmatprep.mubr.msk.f32.mxu1 %vm6530_vm3, %v12836_v0 }
 0xa81   :  { %18234 = vmatmul.mubr.msk.f32.vlgmr.msra.gmra.mrb[0].mxu1 %vm6530_vm3, %v12837_v35 }
 0xa82   :  { %18236 = vmatprep.mubr.msk.f32.mxu1 %vm6530_vm3, %v12838_v8 }
 0xa85   :  { %18237 = vmatmul.mubr.msk.f32.gmra.mrb[2].mxu1 %vm6530_vm3, %v12839_v15 }
 0xa86   :  { %18239 = vmatprep.mubr.msk.f32.mxu1 %vm6530_vm3, %v12840_v22 }
 0xa89   :  { %18240 = vmatmul.mubr.msk.f32.gmra.mrb[4].mxu1 %vm6530_vm3, %v12841_v21 }
 0xa8a   :  { %18242 = vmatprep.mubr.msk.f32.mxu1 %vm6530_vm3, %v12842_v28 }
 0xa8d   :  { %18243 = vmatmul.mubr.msk.f32.gmra.mrb[6].mxu1 %vm6530_vm3, %v12843_v27 }
 0xa8e   :  { %18245 = vmatprep.mubr.msk.f32.mxu1 %vm6530_vm3, %v12844_v38 }
 0xa91   :  { %18246 = vmatmul.mubr.msk.f32.gmra.mrb[8].mxu1 %vm6530_vm3, %v12845_v34 }
 0xa92   :  { %18248 = vmatprep.mubr.msk.f32.mxu1 %vm6530_vm3, %v12846_v46 }
 0xa95   :  { %18249 = vmatmul.mubr.msk.f32.gmra.mrb[10].mxu1 %vm6530_vm3, %v12847_v44 }
 0xa96   :  { %18251 = vmatprep.mubr.msk.f32.mxu1 %vm6530_vm3, %v12848_v56 }
 0xa99   :  { %18252 = vmatmul.mubr.msk.f32.gmra.mrb[12].mxu1 %vm6530_vm3, %v12849_v55 }
 0xa9a   :  { %18254 = vmatprep.mubr.msk.f32.mxu1 %vm6530_vm3, %v12850_v3 }
 0xa9d   :  { %18255 = vmatmul.mubr.msk.f32.gmra.mrb[14].mxu1 %vm6530_vm3, %v12851_v18 }
 0xa9e   :  { %18257 = vmatprep.mubr.msk.f32.mxu1 %vm6530_vm3, %v12852_v9 }
 0xaa1   :  { %18258 = vmatmul.mubr.msk.f32.gmra.mrb[16].mxu1 %vm6530_vm3, %v12853_v17 }
 0xaa2   :  { %18260 = vmatprep.mubr.msk.f32.mxu1 %vm6530_vm3, %v12854_v26 }
 0xaa5   :  { %18261 = vmatmul.mubr.msk.f32.gmra.mrb[18].mxu1 %vm6530_vm3, %v12855_v25 }
 0xaa6   :  { %18263 = vmatprep.mubr.msk.f32.mxu1 %vm6530_vm3, %v12856_v42 }
 0xaa9   :  { %18264 = vmatmul.mubr.msk.f32.gmra.mrb[20].mxu1 %vm6530_vm3, %v12857_v50 }
 0xaaa   :  { %18266 = vmatprep.mubr.msk.f32.mxu1 %vm6530_vm3, %v12858_v41 }
 0xaad   :  { %18267 = vmatmul.mubr.msk.f32.gmra.mrb[22].mxu1 %vm6530_vm3, %v12859_v30 }
 0xaae   :  { %18269 = vmatprep.mubr.msk.f32.mxu1 %vm6530_vm3, %v12860_v13 }
 0xab1   :  { %18270 = vmatmul.mubr.msk.f32.gmra.mrb[24].mxu1 %vm6530_vm3, %v12861_v1 }
 0xab2   :  { %18272 = vmatprep.mubr.msk.f32.mxu1 %vm6530_vm3, %v12862_v6 }
 0xab5   :  { %18273 = vmatmul.mubr.msk.f32.gmra.mrb[26].mxu1 %vm6530_vm3, %v12863_v16 }
 0xab6   :  { %18275 = vmatprep.mubr.msk.f32.mxu1 %vm6530_vm3, %v23893_v10  ;;  %v12872_v10 = vld [vmem:[#allocation3 + $0x212] sm:$0xff] }
 0xab9   :  { %18276 = vmatmul.mubr.msk.f32.gmra.mrb[28].mxu1 %vm6530_vm3, %v26427_v12 }
 0xaba   :  { %18278 = vmatprep.mubr.msk.f32.mxu1 %vm6530_vm3, %v12866_v54 }
 0xabd   :  { %18279 = vmatmul.mubr.msk.f32.gmra.mrb[30].mxu1 %vm6530_vm3, %v12867_v61 }
 0xabe   :  { %18281 = vmatprep.mubr.msk.f32.mxu1 %vm6530_vm3, %v12868_v19 }
 0xac1   :  { %18282 = vmatmul.mubr.msk.f32.gmra.mrb[32].mxu1 %vm6530_vm3, %v12869_v62 }
 0xac2   :  { %18284 = vmatprep.mubr.msk.f32.mxu1 %vm6530_vm3, %v12870_v23 }
 0xac5   :  { %18285 = vmatmul.mubr.msk.f32.gmra.mrb[34].mxu1 %vm6530_vm3, %v12871_v60 }
 0xac6   :  { %18287 = vmatprep.mubr.msk.f32.mxu1 %vm6530_vm3, %v12872_v10 }
 0xac9   :  { %18288 = vmatmul.mubr.msk.f32.gmra.mrb[36].mxu1 %vm6530_vm3, %v12873_v29 }
 0xaca   :  { %18290 = vmatprep.mubr.msk.f32.mxu1 %vm6530_vm3, %v12874_v5 }
 0xacd   :  { %18291 = vmatmul.mubr.msk.f32.gmra.mrb[38].mxu1 %vm6530_vm3, %v12875_v2 }
 0xace   :  { %18293 = vmatprep.mubr.msk.f32.mxu1 %vm6530_vm3, %v12876_v49 }
 0xad1   :  { %18294 = vmatmul.mubr.msk.f32.gmra.mrb[40].mxu1 %vm6530_vm3, %v12877_v53 }
 0xad2   :  { %18296 = vmatprep.mubr.msk.f32.mxu1 %vm6530_vm3, %v12878_v7 }
 0xad5   :  { %18297 = vmatmul.mubr.msk.f32.gmra.mrb[42].mxu1 %vm6530_vm3, %v12879_v47 }
 0xad6   :  { %18299 = vmatprep.mubr.msk.f32.mxu1 %vm6530_vm3, %v12880_v59 }
 0xad9   :  { %18300 = vmatmul.mubr.msk.f32.gmra.mrb[44].mxu1 %vm6530_vm3, %v12881_v11 }
 0xada   :  { %18302 = vmatprep.mubr.msk.f32.mxu1 %vm6530_vm3, %v12882_v32 }
 0xadd   :  { %18303 = vmatmul.mubr.msk.f32.gmra.mrb[46].mxu1 %vm6530_vm3, %v12883_v24 }
 0xade   :  { %18305 = vmatprep.mubr.msk.f32.mxu1 %vm6530_vm3, %v12884_v14 }
 0xae1   :  { %18306 = vmatmul.mubr.msk.f32.gmra.mrb[48].mxu1 %vm6530_vm3, %v12885_v20 }
 0xae2   :  { %18308 = vmatprep.mubr.msk.f32.mxu1 %vm6530_vm3, %v12886_v48 }
 0xae5   :  { %18309 = vmatmul.mubr.msk.f32.gmra.mrb[50].mxu1 %vm6530_vm3, %v12887_v37 }
 0xae6   :  { %18311 = vmatprep.mubr.msk.f32.mxu1 %vm6530_vm3, %v12888_v33 }
 0xae9   :  { %18312 = vmatmul.mubr.msk.f32.gmra.mrb[52].mxu1 %vm6530_vm3, %v12889_v40 }
 0xaea   :  { %18314 = vmatprep.mubr.msk.f32.mxu1 %vm6530_vm3, %v12890_v39 }
 0xaed   :  { %18315 = vmatmul.mubr.msk.f32.gmra.mrb[54].mxu1 %vm6530_vm3, %v12891_v45 }
 0xaee   :  { %18317 = vmatprep.mubr.msk.f32.mxu1 %vm6530_vm3, %v12892_v43 }
 0xaf1   :  { %18318 = vmatmul.mubr.msk.f32.gmra.mrb[56].mxu1 %vm6530_vm3, %v12893_v52 }
 0xaf2   :  { %18320 = vmatprep.mubr.msk.f32.mxu1 %vm6530_vm3, %v12894_v51 }
 0xaf5   :  { %18321 = vmatmul.mubr.msk.f32.gmra.mrb[58].mxu1 %vm6530_vm3, %v12895_v58 }
 0xaf6   :  { %18323 = vmatprep.mubr.msk.f32.mxu1 %vm6530_vm3, %v23961_v4 }
 0xaf9   :  { %18324 = vmatmul.mubr.msk.f32.gmra.mrb[60].mxu1 %vm6530_vm3, %v23965_v31 }
 0xafa   :  { %18326 = vmatprep.mubr.msk.f32.mxu1 %vm6530_vm3, %v12898_v57 }
 0xafd   :  { %18327 = vmatmul.mubr.msk.f32.gmra.mrb[62].mxu1 %vm6530_vm3, %v12899_v36 }
 0xb54   :  { %v24237_v63 = vpop.f32.mrb[0].mxu1 }
 0xb55   :  { %v13546_v0 = vsel %vm6530_vm3, %v24237_v63, 0.0  ;;  %v24241_v35 = vpop.f32.mrb[1].mxu1 }
 0xb56   :  { %v13545_v8 = vsel %vm6530_vm3, %v24241_v35, 0.0 }
 0xb57   :  { %v13547_v4 = vadd.f32 %v13546_v0, %v13545_v8 }
 0xb58   :  { %v24245_v15 = vpop.f32.mrb[2].mxu1 }
 0xb59   :  { %v24247_v22 = vpop.f32.mrb[3].mxu1  ;;  %v13550_v28 = vsel %vm6530_vm3, %v24245_v15, 0.0 }
 0xb5a   :  { %v13548_v31 = vsel %vm6530_vm3, %v24247_v22, 0.0 }
 0xb5b   :  { %v13549_v21 = vadd.f32 %v13548_v31, %v13547_v4 }
 0xb5c   :  { %v24253_v27 = vpop.f32.mrb[4].mxu1 }
 0xb5d   :  { %v13551_v38 = vadd.f32 %v13550_v28, %v13549_v21  ;;  %v24255_v34 = vpop.f32.mrb[5].mxu1  ;;  %v13554_v56 = vsel %vm6530_vm3, %v24253_v27, 0.0 }
 0xb5e   :  { %v13552_v46 = vsel %vm6530_vm3, %v24255_v34, 0.0 }
 0xb5f   :  { %v13553_v44 = vadd.f32 %v13552_v46, %v13551_v38 }
 0xb60   :  { %v24261_v55 = vpop.f32.mrb[6].mxu1 }
 0xb61   :  { %v24263_v3 = vpop.f32.mrb[7].mxu1  ;;  %v13555_v18 = vadd.f32 %v13554_v56, %v13553_v44  ;;  %v13558_v26 = vsel %vm6530_vm3, %v24261_v55, 0.0 }
 0xb62   :  { %v13556_v9 = vsel %vm6530_vm3, %v24263_v3, 0.0 }
 0xb63   :  { %v13557_v17 = vadd.f32 %v13556_v9, %v13555_v18 }
 0xb64   :  { %v24269_v25 = vpop.f32.mrb[8].mxu1 }
 0xb65   :  { %v24271_v42 = vpop.f32.mrb[9].mxu1  ;;  %v13559_v50 = vadd.f32 %v13558_v26, %v13557_v17  ;;  %v13562_v13 = vsel %vm6530_vm3, %v24269_v25, 0.0 }
 0xb66   :  { %v13560_v41 = vsel %vm6530_vm3, %v24271_v42, 0.0 }
 0xb67   :  { %v13561_v30 = vadd.f32 %v13560_v41, %v13559_v50 }
 0xb68   :  { %v24277_v1 = vpop.f32.mrb[10].mxu1 }
 0xb69   :  { %v24279_v6 = vpop.f32.mrb[11].mxu1  ;;  %v13563_v16 = vadd.f32 %v13562_v13, %v13561_v30  ;;  %v13566_v61 = vsel %vm6530_vm3, %v24277_v1, 0.0 }
 0xb6a   :  { %v13564_v54 = vsel %vm6530_vm3, %v24279_v6, 0.0 }
 0xb6b   :  { %v13565_v12 = vadd.f32 %v13564_v54, %v13563_v16 }
 0xb6c   :  { %v24285_v19 = vpop.f32.mrb[12].mxu1 }
 0xb6d   :  { %v24287_v62 = vpop.f32.mrb[13].mxu1  ;;  %v13567_v23 = vadd.f32 %v13566_v61, %v13565_v12  ;;  %v13570_v29 = vsel %vm6530_vm3, %v24285_v19, 0.0 }
 0xb6e   :  { %v13568_v60 = vsel %vm6530_vm3, %v24287_v62, 0.0 }
 0xb6f   :  { %v13569_v10 = vadd.f32 %v13568_v60, %v13567_v23 }
 0xb70   :  { %v24293_v5 = vpop.f32.mrb[14].mxu1 }
 0xb71   :  { %v24295_v2 = vpop.f32.mrb[15].mxu1  ;;  %v13571_v49 = vadd.f32 %v13570_v29, %v13569_v10  ;;  %v13574_v47 = vsel %vm6530_vm3, %v24293_v5, 0.0 }
 0xb72   :  { %v13572_v53 = vsel %vm6530_vm3, %v24295_v2, 0.0 }
 0xb73   :  { %v13573_v7 = vadd.f32 %v13572_v53, %v13571_v49 }
 0xb74   :  { %v24301_v59 = vpop.f32.mrb[16].mxu1 }
 0xb75   :  { %v24303_v11 = vpop.f32.mrb[17].mxu1  ;;  %v13575_v32 = vadd.f32 %v13574_v47, %v13573_v7  ;;  %v13578_v20 = vsel %vm6530_vm3, %v24301_v59, 0.0 }
 0xb76   :  { %v13576_v24 = vsel %vm6530_vm3, %v24303_v11, 0.0 }
 0xb77   :  { %v13577_v14 = vadd.f32 %v13576_v24, %v13575_v32 }
 0xb78   :  { %v24309_v48 = vpop.f32.mrb[18].mxu1 }
 0xb79   :  { %v24311_v37 = vpop.f32.mrb[19].mxu1  ;;  %v13579_v33 = vadd.f32 %v13578_v20, %v13577_v14  ;;  %v13582_v45 = vsel %vm6530_vm3, %v24309_v48, 0.0 }
 0xb7a   :  { %v13580_v40 = vsel %vm6530_vm3, %v24311_v37, 0.0 }
 0xb7b   :  { %v13581_v39 = vadd.f32 %v13580_v40, %v13579_v33 }
 0xb7c   :  { %v24317_v43 = vpop.f32.mrb[20].mxu1 }
 0xb7d   :  { %v24319_v52 = vpop.f32.mrb[21].mxu1  ;;  %v13583_v51 = vadd.f32 %v13582_v45, %v13581_v39  ;;  %v13586_v36 = vsel %vm6530_vm3, %v24317_v43, 0.0 }
 0xb7e   :  { %v13584_v58 = vsel %vm6530_vm3, %v24319_v52, 0.0 }
 0xb7f   :  { %v13585_v57 = vadd.f32 %v13584_v58, %v13583_v51 }
 0xb80   :  { %v24325_v0 = vpop.f32.mrb[22].mxu1 }
 0xb81   :  { %v24327_v8 = vpop.f32.mrb[23].mxu1  ;;  %v13587_v4 = vadd.f32 %v13586_v36, %v13585_v57  ;;  %v13590_v28 = vsel %vm6530_vm3, %v24325_v0, 0.0 }
 0xb82   :  { %v13588_v31 = vsel %vm6530_vm3, %v24327_v8, 0.0 }
 0xb83   :  { %v13589_v21 = vadd.f32 %v13588_v31, %v13587_v4 }
 0xb84   :  { %v24333_v38 = vpop.f32.mrb[24].mxu1 }
 0xb85   :  { %v24335_v46 = vpop.f32.mrb[25].mxu1  ;;  %v13591_v44 = vadd.f32 %v13590_v28, %v13589_v21  ;;  %v13594_v9 = vsel %vm6530_vm3, %v24333_v38, 0.0 }
 0xb86   :  { %v13592_v56 = vsel %vm6530_vm3, %v24335_v46, 0.0 }
 0xb87   :  { %v13593_v18 = vadd.f32 %v13592_v56, %v13591_v44 }
 0xb88   :  { %v24341_v17 = vpop.f32.mrb[26].mxu1 }
 0xb89   :  { %v24343_v26 = vpop.f32.mrb[27].mxu1  ;;  %v13595_v50 = vadd.f32 %v13594_v9, %v13593_v18  ;;  %v13598_v13 = vsel %vm6530_vm3, %v24341_v17, 0.0 }
 0xb8a   :  { %v13596_v41 = vsel %vm6530_vm3, %v24343_v26, 0.0 }
 0xb8b   :  { %v13597_v30 = vadd.f32 %v13596_v41, %v13595_v50 }
 0xb8c   :  { %v24349_v16 = vpop.f32.mrb[28].mxu1 }
 0xb8d   :  { %v24351_v54 = vpop.f32.mrb[29].mxu1  ;;  %v13599_v12 = vadd.f32 %v13598_v13, %v13597_v30  ;;  %v13602_v60 = vsel %vm6530_vm3, %v24349_v16, 0.0 }
 0xb8e   :  { %v13600_v61 = vsel %vm6530_vm3, %v24351_v54, 0.0 }
 0xb8f   :  { %v13601_v23 = vadd.f32 %v13600_v61, %v13599_v12 }
 0xb90   :  { %v24357_v10 = vpop.f32.mrb[30].mxu1 }
 0xb91   :  { %v24359_v29 = vpop.f32.mrb[31].mxu1  ;;  %v13603_v49 = vadd.f32 %v13602_v60, %v13601_v23  ;;  %v13606_v47 = vsel %vm6530_vm3, %v24357_v10, 0.0 }
 0xb92   :  { %v13604_v53 = vsel %vm6530_vm3, %v24359_v29, 0.0 }
 0xb93   :  { %v13605_v7 = vadd.f32 %v13604_v53, %v13603_v49 }
 0xb94   :  { %v24365_v32 = vpop.f32.mrb[32].mxu1 }
 0xb95   :  { %v24367_v24 = vpop.f32.mrb[33].mxu1  ;;  %v13607_v14 = vadd.f32 %v13606_v47, %v13605_v7  ;;  %v13610_v40 = vsel %vm6530_vm3, %v24365_v32, 0.0 }
 0xb96   :  { %v13608_v20 = vsel %vm6530_vm3, %v24367_v24, 0.0 }
 0xb97   :  { %v13609_v33 = vadd.f32 %v13608_v20, %v13607_v14 }
 0xb98   :  { %v24373_v39 = vpop.f32.mrb[34].mxu1 }
 0xb99   :  { %v24375_v45 = vpop.f32.mrb[35].mxu1  ;;  %v13611_v51 = vadd.f32 %v13610_v40, %v13609_v33  ;;  %v13614_v36 = vsel %vm6530_vm3, %v24373_v39, 0.0 }
 0xb9a   :  { %v13612_v58 = vsel %vm6530_vm3, %v24375_v45, 0.0 }
 0xb9b   :  { %v13613_v57 = vadd.f32 %v13612_v58, %v13611_v51 }
 0xb9c   :  { %v24381_v4 = vpop.f32.mrb[36].mxu1 }
 0xb9d   :  { %v24383_v31 = vpop.f32.mrb[37].mxu1  ;;  %v13615_v21 = vadd.f32 %v13614_v36, %v13613_v57  ;;  %v13618_v56 = vsel %vm6530_vm3, %v24381_v4, 0.0 }
 0xb9e   :  { %v13616_v28 = vsel %vm6530_vm3, %v24383_v31, 0.0 }
 0xb9f   :  { %v13617_v44 = vadd.f32 %v13616_v28, %v13615_v21 }
 0xba0   :  { %v24389_v18 = vpop.f32.mrb[38].mxu1 }
 0xba1   :  { %v24391_v9 = vpop.f32.mrb[39].mxu1  ;;  %v13619_v50 = vadd.f32 %v13618_v56, %v13617_v44  ;;  %v13622_v13 = vsel %vm6530_vm3, %v24389_v18, 0.0 }
 0xba2   :  { %v13620_v41 = vsel %vm6530_vm3, %v24391_v9, 0.0 }
 0xba3   :  { %v13621_v30 = vadd.f32 %v13620_v41, %v13619_v50 }
 0xba4   :  { %v24397_v12 = vpop.f32.mrb[40].mxu1 }
 0xba5   :  { %v24399_v61 = vpop.f32.mrb[41].mxu1  ;;  %v13623_v23 = vadd.f32 %v13622_v13, %v13621_v30  ;;  %v13626_v53 = vsel %vm6530_vm3, %v24397_v12, 0.0 }
 0xba6   :  { %v13624_v60 = vsel %vm6530_vm3, %v24399_v61, 0.0 }
 0xba7   :  { %v13625_v49 = vadd.f32 %v13624_v60, %v13623_v23 }
 0xba8   :  { %v24405_v7 = vpop.f32.mrb[42].mxu1 }
 0xba9   :  { %v24407_v47 = vpop.f32.mrb[43].mxu1  ;;  %v13627_v14 = vadd.f32 %v13626_v53, %v13625_v49  ;;  %v13630_v40 = vsel %vm6530_vm3, %v24405_v7, 0.0 }
 0xbaa   :  { %v13628_v20 = vsel %vm6530_vm3, %v24407_v47, 0.0 }
 0xbab   :  { %v13629_v33 = vadd.f32 %v13628_v20, %v13627_v14 }
 0xbac   :  { %v24413_v51 = vpop.f32.mrb[44].mxu1 }
 0xbad   :  { %v24415_v58 = vpop.f32.mrb[45].mxu1  ;;  %v13631_v57 = vadd.f32 %v13630_v40, %v13629_v33  ;;  %v13634_v28 = vsel %vm6530_vm3, %v24413_v51, 0.0 }
 0xbae   :  { %v13632_v36 = vsel %vm6530_vm3, %v24415_v58, 0.0 }
 0xbaf   :  { %v13633_v21 = vadd.f32 %v13632_v36, %v13631_v57 }
 0xbb0   :  { %v24421_v44 = vpop.f32.mrb[46].mxu1 }
 0xbb1   :  { %26428 = vst [vmem:[#allocation62_spill] sm:$0xff] %v24421_v44  ;;  %v24423_v56 = vpop.f32.mrb[47].mxu1  ;;  %v13635_v50 = vadd.f32 %v13634_v28, %v13633_v21  ;;  %v13638_v13 = vsel %vm6530_vm3, %v24421_v44, 0.0 }
 0xbb2   :  { %v13636_v41 = vsel %vm6530_vm3, %v24423_v56, 0.0 }
 0xbb3   :  { %v13637_v30 = vadd.f32 %v13636_v41, %v13635_v50 }
 0xbb4   :  { %v24429_v23 = vpop.f32.mrb[48].mxu1 }
 0xbb5   :  { %26429 = vst [vmem:[#allocation63_spill] sm:$0xff] %v24429_v23  ;;  %v24431_v60 = vpop.f32.mrb[49].mxu1  ;;  %v13639_v49 = vadd.f32 %v13638_v13, %v13637_v30  ;;  %v13642_v20 = vsel %vm6530_vm3, %v24429_v23, 0.0 }
 0xbb6   :  { %26430 = vst [vmem:[#allocation64_spill] sm:$0xff] %v24431_v60  ;;  %v13640_v53 = vsel %vm6530_vm3, %v24431_v60, 0.0 }
 0xbb7   :  { %v13641_v14 = vadd.f32 %v13640_v53, %v13639_v49 }
 0xbb8   :  { %v24437_v33 = vpop.f32.mrb[50].mxu1 }
 0xbb9   :  { %26431 = vst [vmem:[#allocation65_spill] sm:$0xff] %v24437_v33  ;;  %v24439_v40 = vpop.f32.mrb[51].mxu1  ;;  %v13643_v57 = vadd.f32 %v13642_v20, %v13641_v14  ;;  %v13646_v28 = vsel %vm6530_vm3, %v24437_v33, 0.0 }
 0xbba   :  { %26432 = vst [vmem:[#allocation66_spill] sm:$0xff] %v24439_v40  ;;  %v13644_v36 = vsel %vm6530_vm3, %v24439_v40, 0.0 }
 0xbbb   :  { %v13645_v21 = vadd.f32 %v13644_v36, %v13643_v57 }
 0xbbc   :  { %v24445_v50 = vpop.f32.mrb[52].mxu1 }
 0xbbd   :  { %26433 = vst [vmem:[#allocation67_spill] sm:$0xff] %v24445_v50  ;;  %v24447_v41 = vpop.f32.mrb[53].mxu1  ;;  %v13647_v30 = vadd.f32 %v13646_v28, %v13645_v21  ;;  %v13650_v53 = vsel %vm6530_vm3, %v24445_v50, 0.0 }
 0xbbe   :  { %26434 = vst [vmem:[#allocation68_spill] sm:$0xff] %v24447_v41  ;;  %v13648_v13 = vsel %vm6530_vm3, %v24447_v41, 0.0 }
 0xbbf   :  { %v13649_v49 = vadd.f32 %v13648_v13, %v13647_v30 }
 0xbc0   :  { %v24453_v14 = vpop.f32.mrb[54].mxu1 }
 0xbc1   :  { %26435 = vst [vmem:[#allocation69_spill] sm:$0xff] %v24453_v14  ;;  %v24455_v20 = vpop.f32.mrb[55].mxu1  ;;  %v13651_v57 = vadd.f32 %v13650_v53, %v13649_v49  ;;  %v13654_v40 = vsel %vm6530_vm3, %v24453_v14, 0.0 }
 0xbc2   :  { %26436 = vst [vmem:[#allocation70_spill] sm:$0xff] %v24455_v20  ;;  %v13652_v36 = vsel %vm6530_vm3, %v24455_v20, 0.0 }
 0xbc3   :  { %v13653_v33 = vadd.f32 %v13652_v36, %v13651_v57 }
 0xbc4   :  { %v24461_v21 = vpop.f32.mrb[56].mxu1 }
 0xbc5   :  { %26437 = vst [vmem:[#allocation71_spill] sm:$0xff] %v24461_v21  ;;  %v24463_v28 = vpop.f32.mrb[57].mxu1  ;;  %v13655_v30 = vadd.f32 %v13654_v40, %v13653_v33  ;;  %v13658_v41 = vsel %vm6530_vm3, %v24461_v21, 0.0 }
 0xbc6   :  { %26438 = vst [vmem:[#allocation72_spill] sm:$0xff] %v24463_v28  ;;  %v13656_v13 = vsel %vm6530_vm3, %v24463_v28, 0.0 }
 0xbc7   :  { %v13657_v50 = vadd.f32 %v13656_v13, %v13655_v30 }
 0xbc8   :  { %v24469_v49 = vpop.f32.mrb[58].mxu1 }
 0xbc9   :  { %26439 = vst [vmem:[#allocation8_spill] sm:$0xff] %v24469_v49  ;;  %v24471_v53 = vpop.f32.mrb[59].mxu1  ;;  %v13659_v57 = vadd.f32 %v13658_v41, %v13657_v50  ;;  %v13662_v20 = vsel %vm6530_vm3, %v24469_v49, 0.0 }
 0xbca   :  { %26440 = vst [vmem:[#allocation9_spill] sm:$0xff] %v24471_v53  ;;  %v13660_v36 = vsel %vm6530_vm3, %v24471_v53, 0.0 }
 0xbcb   :  { %v13661_v14 = vadd.f32 %v13660_v36, %v13659_v57 }
 0xbcc   :  { %v24477_v33 = vpop.f32.mrb[60].mxu1 }
 0xbcd   :  { %26441 = vst [vmem:[#allocation11_spill] sm:$0xff] %v24477_v33  ;;  %v24479_v40 = vpop.f32.mrb[61].mxu1  ;;  %v13663_v30 = vadd.f32 %v13662_v20, %v13661_v14  ;;  %v13666_v28 = vsel %vm6530_vm3, %v24477_v33, 0.0 }
 0xbce   :  { %26442 = vst [vmem:[#allocation10_spill] sm:$0xff] %v24479_v40  ;;  %v13664_v13 = vsel %vm6530_vm3, %v24479_v40, 0.0 }
 0xbcf   :  { %v13665_v21 = vadd.f32 %v13664_v13, %v13663_v30 }
 0xbd0   :  { %v24485_v50 = vpop.f32.mrb[62].mxu1 }
 0xbd1   :  { %v24487_v41 = vpop.f32.mrb[63].mxu1  ;;  %v13667_v57 = vadd.f32 %v13666_v28, %v13665_v21  ;;  %v13670_v53 = vsel %vm6530_vm3, %v24485_v50, 0.0 }
 0xbd2   :  { %v13668_v36 = vsel %vm6530_vm3, %v24487_v41, 0.0 }
 0xbd3   :  { %v13669_v49 = vadd.f32 %v13668_v36, %v13667_v57  ;;  %v26453_v57 = vld [vmem:[#allocation66_spill] sm:$0xff]  ;;  %v26455_v36 = vld [vmem:[#allocation65_spill] sm:$0xff] }
 0xbd5   :  { %v13671_v14 = vadd.f32 %v13670_v53, %v13669_v49  ;;  %v26449_v53 = vld [vmem:[#allocation64_spill] sm:$0xff] }
 0xbd7   :  { %v13672_v20 = vrot.slane %v13671_v14, 4 }
 0xbd9   :  { %v13673_v23 = vadd.f32 %v13672_v20, %v13671_v14  ;;  %v26457_v14 = vld [vmem:[#allocation68_spill] sm:$0xff] }
 0xbdb   :  { %v13674_v40 = vrot.slane %v13673_v23, 2 }
 0xbdd   :  { %v13675_v30 = vadd.f32 %v13674_v40, %v13673_v23  ;;  %v26451_v40 = vld [vmem:[#allocation63_spill] sm:$0xff] }
 0xbdf   :  { %v13676_v13 = vrot.slane %v13675_v30, 1 }
 0xbe1   :  { %v13677_v60 = vadd.f32 %v13676_v13, %v13675_v30  ;;  %v26459_v30 = vld [vmem:[#allocation67_spill] sm:$0xff] }
 0xbe3   :  { %v24493_v33 = vmul.f32 0.001953125, %v13677_v60  ;;  %v26447_v60 = vld [vmem:[#allocation62_spill] sm:$0xff] }
 0xbe5   :  { %v24497_v44 = vsub.f32 %v24241_v35, %v24493_v33  ;;  %v24501_v21 = vsub.f32 %v24237_v63, %v24493_v33  ;;  %v24505_v28 = vsub.f32 %v24247_v22, %v24493_v33  ;;  %v24509_v49 = vsub.f32 %v24245_v15, %v24493_v33 }
 0xbe6   :  { %v24513_v23 = vsub.f32 %v24255_v34, %v24493_v33  ;;  %v24517_v35 = vsub.f32 %v24253_v27, %v24493_v33  ;;  %v24521_v63 = vsub.f32 %v24263_v3, %v24493_v33  ;;  %v24525_v22 = vsub.f32 %v24261_v55, %v24493_v33 }
 0xbe7   :  { %26443 = vst [vmem:[#allocation13_spill] sm:$0xff] %v24497_v44  ;;  %26444 = vst [vmem:[#allocation12_spill] sm:$0xff] %v24501_v21  ;;  %v24529_v15 = vsub.f32 %v24271_v42, %v24493_v33  ;;  %v24533_v34 = vsub.f32 %v24269_v25, %v24493_v33  ;;  %v24537_v27 = vsub.f32 %v24279_v6, %v24493_v33 }
 0xbe8   :  { %26445 = vst [vmem:[#allocation15_spill] sm:$0xff] %v24505_v28  ;;  %26446 = vst [vmem:[#allocation14_spill] sm:$0xff] %v24509_v49  ;;  %v24541_v3 = vsub.f32 %v24277_v1, %v24493_v33  ;;  %v24545_v55 = vsub.f32 %v24287_v62, %v24493_v33  ;;  %v24549_v42 = vsub.f32 %v24285_v19, %v24493_v33 }
 0xbe9   :  { %v24553_v25 = vsub.f32 %v24295_v2, %v24493_v33  ;;  %v24557_v6 = vsub.f32 %v24293_v5, %v24493_v33  ;;  %v24561_v1 = vsub.f32 %v24303_v11, %v24493_v33  ;;  %v24565_v62 = vsub.f32 %v24301_v59, %v24493_v33 }
 0xbea   :  { %v24569_v19 = vsub.f32 %v24311_v37, %v24493_v33  ;;  %v24573_v2 = vsub.f32 %v24309_v48, %v24493_v33  ;;  %v24577_v5 = vsub.f32 %v24319_v52, %v24493_v33  ;;  %v24581_v11 = vsub.f32 %v24317_v43, %v24493_v33 }
 0xbeb   :  { %v24585_v59 = vsub.f32 %v24327_v8, %v24493_v33  ;;  %v24589_v37 = vsub.f32 %v24325_v0, %v24493_v33  ;;  %v24593_v48 = vsub.f32 %v24335_v46, %v24493_v33  ;;  %v24597_v52 = vsub.f32 %v24333_v38, %v24493_v33 }
 0xbec   :  { %v24601_v43 = vsub.f32 %v24343_v26, %v24493_v33  ;;  %v24605_v8 = vsub.f32 %v24341_v17, %v24493_v33  ;;  %v24609_v0 = vsub.f32 %v24351_v54, %v24493_v33  ;;  %v24613_v46 = vsub.f32 %v24349_v16, %v24493_v33 }
 0xbed   :  { %v24617_v38 = vsub.f32 %v24359_v29, %v24493_v33  ;;  %v24621_v26 = vsub.f32 %v24357_v10, %v24493_v33  ;;  %v24625_v17 = vsub.f32 %v24367_v24, %v24493_v33  ;;  %v24629_v54 = vsub.f32 %v24365_v32, %v24493_v33 }
 0xbee   :  { %v24633_v16 = vsub.f32 %v24375_v45, %v24493_v33  ;;  %v24637_v29 = vsub.f32 %v24373_v39, %v24493_v33  ;;  %v24641_v10 = vsub.f32 %v24383_v31, %v24493_v33  ;;  %v24645_v24 = vsub.f32 %v24381_v4, %v24493_v33 }
 0xbef   :  { %v24649_v32 = vsub.f32 %v24391_v9, %v24493_v33  ;;  %v24653_v45 = vsub.f32 %v24389_v18, %v24493_v33  ;;  %v24657_v39 = vsub.f32 %v24399_v61, %v24493_v33  ;;  %v24661_v31 = vsub.f32 %v24397_v12, %v24493_v33 }
 0xbf0   :  { %v24665_v4 = vsub.f32 %v24407_v47, %v24493_v33  ;;  %v24669_v9 = vsub.f32 %v24405_v7, %v24493_v33  ;;  %v24673_v18 = vsub.f32 %v24415_v58, %v24493_v33  ;;  %v24677_v61 = vsub.f32 %v24413_v51, %v24493_v33 }
 0xbf1   :  { %v24681_v12 = vsub.f32 %v24423_v56, %v24493_v33  ;;  %v24685_v47 = vsub.f32 %v26447_v60, %v24493_v33  ;;  %v24689_v7 = vsub.f32 %v26449_v53, %v24493_v33  ;;  %v24693_v58 = vsub.f32 %v26451_v40, %v24493_v33  ;;  %v26461_v60 = vld [vmem:[#allocation70_spill] sm:$0xff]  ;;  %v26463_v40 = vld [vmem:[#allocation69_spill] sm:$0xff] }
 0xbf2   :  { %v24697_v51 = vsub.f32 %v26453_v57, %v24493_v33  ;;  %v24701_v56 = vsub.f32 %v26455_v36, %v24493_v33  ;;  %v24705_v20 = vsub.f32 %v26457_v14, %v24493_v33  ;;  %v24709_v13 = vsub.f32 %v26459_v30, %v24493_v33 }
 0xbf3   :  { %26448 = vst [vmem:[#allocation17_spill] sm:$0xff] %v24685_v47  ;;  %26450 = vst [vmem:[#allocation16_spill] sm:$0xff] %v24689_v7  ;;  %v24713_v53 = vsub.f32 %v26461_v60, %v24493_v33  ;;  %v24717_v57 = vsub.f32 %v26463_v40, %v24493_v33 }
 0xbf4   :  { %26452 = vst [vmem:[#allocation19_spill] sm:$0xff] %v24693_v58  ;;  %26454 = vst [vmem:[#allocation18_spill] sm:$0xff] %v24697_v51  ;;  %v26465_v51 = vld [vmem:[#allocation72_spill] sm:$0xff] }
 0xbf5   :  { %26456 = vst [vmem:[#allocation21_spill] sm:$0xff] %v24701_v56  ;;  %26458 = vst [vmem:[#allocation20_spill] sm:$0xff] %v24705_v20  ;;  %v24721_v36 = vsub.f32 %v26465_v51, %v24493_v33  ;;  %v26467_v56 = vld [vmem:[#allocation71_spill] sm:$0xff]  ;;  %v26469_v20 = vld [vmem:[#allocation9_spill] sm:$0xff] }
 0xbf6   :  { %26460 = vst [vmem:[#allocation23_spill] sm:$0xff] %v24709_v13  ;;  %26462 = vst [vmem:[#allocation22_spill] sm:$0xff] %v24713_v53  ;;  %v24725_v14 = vsub.f32 %v26467_v56, %v24493_v33  ;;  %v24729_v30 = vsub.f32 %v26469_v20, %v24493_v33  ;;  %v26471_v13 = vld [vmem:[#allocation8_spill] sm:$0xff]  ;;  %v26473_v53 = vld [vmem:[#allocation10_spill] sm:$0xff]  ;;  %v24745_v56 = vsub.f32 %v24487_v41, %v24493_v33 }
 0xbf7   :  { %26464 = vst [vmem:[#allocation43_spill] sm:$0xff] %v24717_v57  ;;  %26466 = vst [vmem:[#allocation24_spill] sm:$0xff] %v24721_v36  ;;  %v24733_v60 = vsub.f32 %v26471_v13, %v24493_v33  ;;  %v24737_v40 = vsub.f32 %v26473_v53, %v24493_v33  ;;  %v26475_v57 = vld [vmem:[#allocation11_spill] sm:$0xff]  ;;  %v24749_v20 = vsub.f32 %v24485_v50, %v24493_v33 }
 0xbf8   :  { %26468 = vst [vmem:[#allocation25_spill] sm:$0xff] %v24725_v14  ;;  %26470 = vst [vmem:[#allocation26_spill] sm:$0xff] %v24729_v30  ;;  %v24741_v51 = vsub.f32 %v26475_v57, %v24493_v33  ;;  %v13743_v13 = vmul.f32 %v24497_v44, %v24497_v44  ;;  %v13745_v53 = vmul.f32 %v24505_v28, %v24505_v28 }
 0xbf9   :  { %26472 = vst [vmem:[#allocation27_spill] sm:$0xff] %v24733_v60  ;;  %26474 = vst [vmem:[#allocation28_spill] sm:$0xff] %v24737_v40  ;;  %v13744_v60 = vmul.f32 %v24501_v21, %v24501_v21  ;;  %v13746_v57 = vmul.f32 %v24509_v49, %v24509_v49  ;;  %v13747_v33 = vmul.f32 %v24513_v23, %v24513_v23 }
 0xbfa   :  { %26476 = vst [vmem:[#allocation29_spill] sm:$0xff] %v24741_v51  ;;  %26477 = vst [vmem:[#allocation30_spill] sm:$0xff] %v24745_v56  ;;  %v13807_v51 = vsel %vm6530_vm3, %v13743_v13, 0.0  ;;  %v13810_v50 = vsel %vm6530_vm3, %v13745_v53, 0.0  ;;  %v13748_v21 = vmul.f32 %v24517_v35, %v24517_v35  ;;  %v13749_v49 = vmul.f32 %v24521_v63, %v24521_v63 }
 0xbfb   :  { %26478 = vst [vmem:[#allocation31_spill] sm:$0xff] %v24749_v20  ;;  %v13808_v41 = vsel %vm6530_vm3, %v13744_v60, 0.0  ;;  %v13812_v20 = vsel %vm6530_vm3, %v13746_v57, 0.0  ;;  %v13814_v13 = vsel %vm6530_vm3, %v13747_v33, 0.0  ;;  %v13750_v60 = vmul.f32 %v24525_v22, %v24525_v22 }
 0xbfc   :  { %v13809_v56 = vadd.f32 %v13808_v41, %v13807_v51  ;;  %v13816_v51 = vsel %vm6530_vm3, %v13748_v21, 0.0  ;;  %v13818_v53 = vsel %vm6530_vm3, %v13749_v49, 0.0  ;;  %v13754_v21 = vmul.f32 %v24541_v3, %v24541_v3 }
 0xbfd   :  { %v13755_v49 = vmul.f32 %v24545_v55, %v24545_v55 }
 0xbfe   :  { %v13811_v44 = vadd.f32 %v13810_v50, %v13809_v56  ;;  %v13751_v56 = vmul.f32 %v24529_v15, %v24529_v15 }
 0xc00   :  { %v13813_v28 = vadd.f32 %v13812_v20, %v13811_v44  ;;  %v13752_v44 = vmul.f32 %v24533_v34, %v24533_v34  ;;  %v13820_v20 = vsel %vm6530_vm3, %v13750_v60, 0.0  ;;  %v13822_v33 = vsel %vm6530_vm3, %v13751_v56, 0.0 }
 0xc01   :  { %v13756_v60 = vmul.f32 %v24549_v42, %v24549_v42  ;;  %v13757_v56 = vmul.f32 %v24553_v25, %v24553_v25 }
 0xc02   :  { %v13815_v40 = vadd.f32 %v13814_v13, %v13813_v28  ;;  %v13753_v28 = vmul.f32 %v24537_v27, %v24537_v27 }
 0xc04   :  { %v13817_v41 = vadd.f32 %v13816_v51, %v13815_v40  ;;  %v13824_v40 = vsel %vm6530_vm3, %v13752_v44, 0.0  ;;  %v13758_v44 = vmul.f32 %v24557_v6, %v24557_v6 }
 0xc06   :  { %v13819_v50 = vadd.f32 %v13818_v53, %v13817_v41  ;;  %v13826_v41 = vsel %vm6530_vm3, %v13753_v28, 0.0  ;;  %v13759_v28 = vmul.f32 %v24561_v1, %v24561_v1 }
 0xc08   :  { %v13821_v57 = vadd.f32 %v13820_v20, %v13819_v50  ;;  %v13828_v50 = vsel %vm6530_vm3, %v13754_v21, 0.0  ;;  %v13760_v21 = vmul.f32 %v24565_v62, %v24565_v62 }
 0xc0a   :  { %v13823_v13 = vadd.f32 %v13822_v33, %v13821_v57  ;;  %v13830_v57 = vsel %vm6530_vm3, %v13755_v49, 0.0  ;;  %v13761_v49 = vmul.f32 %v24569_v19, %v24569_v19 }
 0xc0c   :  { %v13825_v51 = vadd.f32 %v13824_v40, %v13823_v13  ;;  %v13832_v13 = vsel %vm6530_vm3, %v13756_v60, 0.0  ;;  %v13762_v60 = vmul.f32 %v24573_v2, %v24573_v2 }
 0xc0e   :  { %v13827_v53 = vadd.f32 %v13826_v41, %v13825_v51  ;;  %v13834_v51 = vsel %vm6530_vm3, %v13757_v56, 0.0  ;;  %v13763_v56 = vmul.f32 %v24577_v5, %v24577_v5 }
 0xc10   :  { %v13829_v20 = vadd.f32 %v13828_v50, %v13827_v53  ;;  %v13836_v53 = vsel %vm6530_vm3, %v13758_v44, 0.0  ;;  %v13764_v44 = vmul.f32 %v24581_v11, %v24581_v11 }
 0xc12   :  { %v13831_v33 = vadd.f32 %v13830_v57, %v13829_v20  ;;  %v13838_v20 = vsel %vm6530_vm3, %v13759_v28, 0.0  ;;  %v13765_v28 = vmul.f32 %v24585_v59, %v24585_v59 }
 0xc14   :  { %v13833_v40 = vadd.f32 %v13832_v13, %v13831_v33  ;;  %v13840_v33 = vsel %vm6530_vm3, %v13760_v21, 0.0  ;;  %v13766_v21 = vmul.f32 %v24589_v37, %v24589_v37 }
 0xc16   :  { %v13835_v41 = vadd.f32 %v13834_v51, %v13833_v40  ;;  %v13842_v40 = vsel %vm6530_vm3, %v13761_v49, 0.0  ;;  %v13767_v49 = vmul.f32 %v24593_v48, %v24593_v48 }
 0xc18   :  { %v13837_v50 = vadd.f32 %v13836_v53, %v13835_v41  ;;  %v13844_v41 = vsel %vm6530_vm3, %v13762_v60, 0.0  ;;  %v13768_v60 = vmul.f32 %v24597_v52, %v24597_v52 }
 0xc1a   :  { %v13839_v57 = vadd.f32 %v13838_v20, %v13837_v50  ;;  %v13846_v50 = vsel %vm6530_vm3, %v13763_v56, 0.0  ;;  %v13769_v56 = vmul.f32 %v24601_v43, %v24601_v43 }
 0xc1c   :  { %v13841_v13 = vadd.f32 %v13840_v33, %v13839_v57  ;;  %v13848_v57 = vsel %vm6530_vm3, %v13764_v44, 0.0  ;;  %v13770_v44 = vmul.f32 %v24605_v8, %v24605_v8 }
 0xc1e   :  { %v13843_v51 = vadd.f32 %v13842_v40, %v13841_v13  ;;  %v13850_v13 = vsel %vm6530_vm3, %v13765_v28, 0.0  ;;  %v13771_v28 = vmul.f32 %v24609_v0, %v24609_v0 }
 0xc20   :  { %v13845_v53 = vadd.f32 %v13844_v41, %v13843_v51  ;;  %v13852_v51 = vsel %vm6530_vm3, %v13766_v21, 0.0  ;;  %v13772_v21 = vmul.f32 %v24613_v46, %v24613_v46 }
 0xc22   :  { %v13847_v20 = vadd.f32 %v13846_v50, %v13845_v53  ;;  %v13854_v53 = vsel %vm6530_vm3, %v13767_v49, 0.0  ;;  %v13773_v49 = vmul.f32 %v24617_v38, %v24617_v38 }
 0xc24   :  { %v13849_v33 = vadd.f32 %v13848_v57, %v13847_v20  ;;  %v13856_v20 = vsel %vm6530_vm3, %v13768_v60, 0.0  ;;  %v13774_v60 = vmul.f32 %v24621_v26, %v24621_v26 }
 0xc26   :  { %v13851_v40 = vadd.f32 %v13850_v13, %v13849_v33  ;;  %v13858_v33 = vsel %vm6530_vm3, %v13769_v56, 0.0  ;;  %v13775_v56 = vmul.f32 %v24625_v17, %v24625_v17 }
 0xc28   :  { %v13853_v41 = vadd.f32 %v13852_v51, %v13851_v40  ;;  %v13860_v40 = vsel %vm6530_vm3, %v13770_v44, 0.0  ;;  %v13776_v44 = vmul.f32 %v24629_v54, %v24629_v54 }
 0xc2a   :  { %v13855_v50 = vadd.f32 %v13854_v53, %v13853_v41  ;;  %v13862_v41 = vsel %vm6530_vm3, %v13771_v28, 0.0  ;;  %v13777_v28 = vmul.f32 %v24633_v16, %v24633_v16 }
 0xc2c   :  { %v13857_v57 = vadd.f32 %v13856_v20, %v13855_v50  ;;  %v13864_v50 = vsel %vm6530_vm3, %v13772_v21, 0.0  ;;  %v13778_v21 = vmul.f32 %v24637_v29, %v24637_v29 }
 0xc2e   :  { %v13859_v13 = vadd.f32 %v13858_v33, %v13857_v57  ;;  %v13866_v57 = vsel %vm6530_vm3, %v13773_v49, 0.0  ;;  %v13779_v49 = vmul.f32 %v24641_v10, %v24641_v10 }
 0xc30   :  { %v13861_v51 = vadd.f32 %v13860_v40, %v13859_v13  ;;  %v13868_v13 = vsel %vm6530_vm3, %v13774_v60, 0.0  ;;  %v13780_v60 = vmul.f32 %v24645_v24, %v24645_v24 }
 0xc32   :  { %v13863_v53 = vadd.f32 %v13862_v41, %v13861_v51  ;;  %v13870_v51 = vsel %vm6530_vm3, %v13775_v56, 0.0  ;;  %v13781_v56 = vmul.f32 %v24649_v32, %v24649_v32 }
 0xc34   :  { %v13865_v20 = vadd.f32 %v13864_v50, %v13863_v53  ;;  %v13872_v53 = vsel %vm6530_vm3, %v13776_v44, 0.0  ;;  %v13782_v44 = vmul.f32 %v24653_v45, %v24653_v45 }
 0xc36   :  { %v13867_v33 = vadd.f32 %v13866_v57, %v13865_v20  ;;  %v13874_v20 = vsel %vm6530_vm3, %v13777_v28, 0.0  ;;  %v13783_v28 = vmul.f32 %v24657_v39, %v24657_v39 }
 0xc38   :  { %v13869_v40 = vadd.f32 %v13868_v13, %v13867_v33  ;;  %v13876_v33 = vsel %vm6530_vm3, %v13778_v21, 0.0  ;;  %v13784_v21 = vmul.f32 %v24661_v31, %v24661_v31 }
 0xc3a   :  { %v13871_v41 = vadd.f32 %v13870_v51, %v13869_v40  ;;  %v13878_v40 = vsel %vm6530_vm3, %v13779_v49, 0.0  ;;  %v13785_v49 = vmul.f32 %v24665_v4, %v24665_v4 }
 0xc3c   :  { %v13873_v50 = vadd.f32 %v13872_v53, %v13871_v41  ;;  %v13880_v41 = vsel %vm6530_vm3, %v13780_v60, 0.0  ;;  %v13786_v60 = vmul.f32 %v24669_v9, %v24669_v9 }
 0xc3e   :  { %v13875_v57 = vadd.f32 %v13874_v20, %v13873_v50  ;;  %v13882_v50 = vsel %vm6530_vm3, %v13781_v56, 0.0  ;;  %v13787_v56 = vmul.f32 %v24673_v18, %v24673_v18 }
 0xc40   :  { %v13877_v13 = vadd.f32 %v13876_v33, %v13875_v57  ;;  %v13884_v57 = vsel %vm6530_vm3, %v13782_v44, 0.0  ;;  %v13788_v44 = vmul.f32 %v24677_v61, %v24677_v61 }
 0xc42   :  { %v13879_v51 = vadd.f32 %v13878_v40, %v13877_v13  ;;  %v13886_v13 = vsel %vm6530_vm3, %v13783_v28, 0.0  ;;  %v13789_v28 = vmul.f32 %v24681_v12, %v24681_v12 }
 0xc44   :  { %v13881_v53 = vadd.f32 %v13880_v41, %v13879_v51  ;;  %v13888_v51 = vsel %vm6530_vm3, %v13784_v21, 0.0  ;;  %v13790_v21 = vmul.f32 %v24685_v47, %v24685_v47 }
 0xc46   :  { %v13883_v20 = vadd.f32 %v13882_v50, %v13881_v53  ;;  %v13890_v53 = vsel %vm6530_vm3, %v13785_v49, 0.0  ;;  %v13791_v49 = vmul.f32 %v24689_v7, %v24689_v7 }
 0xc48   :  { %v13885_v33 = vadd.f32 %v13884_v57, %v13883_v20  ;;  %v13892_v20 = vsel %vm6530_vm3, %v13786_v60, 0.0  ;;  %v13792_v60 = vmul.f32 %v24693_v58, %v24693_v58 }
 0xc4a   :  { %v13887_v40 = vadd.f32 %v13886_v13, %v13885_v33  ;;  %v13894_v33 = vsel %vm6530_vm3, %v13787_v56, 0.0  ;;  %v26479_v56 = vld [vmem:[#allocation18_spill] sm:$0xff] }
 0xc4c   :  { %v13889_v41 = vadd.f32 %v13888_v51, %v13887_v40  ;;  %v13896_v40 = vsel %vm6530_vm3, %v13788_v44, 0.0  ;;  %v26480_v44 = vld [vmem:[#allocation21_spill] sm:$0xff] }
 0xc4e   :  { %v13891_v50 = vadd.f32 %v13890_v53, %v13889_v41  ;;  %v13898_v41 = vsel %vm6530_vm3, %v13789_v28, 0.0  ;;  %v26481_v28 = vld [vmem:[#allocation20_spill] sm:$0xff] }
 0xc50   :  { %v13893_v57 = vadd.f32 %v13892_v20, %v13891_v50  ;;  %v13900_v50 = vsel %vm6530_vm3, %v13790_v21, 0.0  ;;  %v26482_v21 = vld [vmem:[#allocation23_spill] sm:$0xff] }
 0xc52   :  { %v13895_v13 = vadd.f32 %v13894_v33, %v13893_v57  ;;  %v13793_v57 = vmul.f32 %v26479_v56, %v26479_v56  ;;  %v13902_v33 = vsel %vm6530_vm3, %v13791_v49, 0.0  ;;  %v26483_v49 = vld [vmem:[#allocation22_spill] sm:$0xff] }
 0xc54   :  { %v13897_v51 = vadd.f32 %v13896_v40, %v13895_v13  ;;  %v13794_v13 = vmul.f32 %v26480_v44, %v26480_v44  ;;  %v13904_v40 = vsel %vm6530_vm3, %v13792_v60, 0.0  ;;  %v26484_v60 = vld [vmem:[#allocation43_spill] sm:$0xff] }
 0xc56   :  { %v13899_v53 = vadd.f32 %v13898_v41, %v13897_v51  ;;  %v13795_v51 = vmul.f32 %v26481_v28, %v26481_v28  ;;  %v13906_v41 = vsel %vm6530_vm3, %v13793_v57, 0.0 }
 0xc58   :  { %v13901_v20 = vadd.f32 %v13900_v50, %v13899_v53  ;;  %v13796_v53 = vmul.f32 %v26482_v21, %v26482_v21  ;;  %v13908_v50 = vsel %vm6530_vm3, %v13794_v13, 0.0 }
 0xc5a   :  { %v13903_v47 = vadd.f32 %v13902_v33, %v13901_v20  ;;  %v13797_v20 = vmul.f32 %v26483_v49, %v26483_v49  ;;  %v13910_v33 = vsel %vm6530_vm3, %v13795_v51, 0.0 }
 0xc5c   :  { %v13905_v7 = vadd.f32 %v13904_v40, %v13903_v47  ;;  %v13798_v47 = vmul.f32 %v26484_v60, %v26484_v60  ;;  %v13912_v40 = vsel %vm6530_vm3, %v13796_v53, 0.0  ;;  %v13914_v57 = vsel %vm6530_vm3, %v13797_v20, 0.0  ;;  %v26485_v53 = vld [vmem:[#allocation27_spill] sm:$0xff]  ;;  %v26486_v20 = vld [vmem:[#allocation28_spill] sm:$0xff] }
 0xc5e   :  { %v13907_v58 = vadd.f32 %v13906_v41, %v13905_v7  ;;  %v13799_v7 = vmul.f32 %v24721_v36, %v24721_v36  ;;  %v13916_v13 = vsel %vm6530_vm3, %v13798_v47, 0.0  ;;  %v26487_v47 = vld [vmem:[#allocation29_spill] sm:$0xff] }
 0xc60   :  { %v13909_v56 = vadd.f32 %v13908_v50, %v13907_v58  ;;  %v13800_v58 = vmul.f32 %v24725_v14, %v24725_v14  ;;  %v13918_v51 = vsel %vm6530_vm3, %v13799_v7, 0.0  ;;  %v26488_v7 = vld [vmem:[#allocation30_spill] sm:$0xff] }
 0xc62   :  { %v13911_v44 = vadd.f32 %v13910_v33, %v13909_v56  ;;  %v13801_v56 = vmul.f32 %v24729_v30, %v24729_v30 }
 0xc64   :  { %v13913_v28 = vadd.f32 %v13912_v40, %v13911_v44  ;;  %v13802_v44 = vmul.f32 %v26485_v53, %v26485_v53  ;;  %v13920_v40 = vsel %vm6530_vm3, %v13800_v58, 0.0  ;;  %v26489_v58 = vld [vmem:[#allocation31_spill] sm:$0xff] }
 0xc66   :  { %v13915_v41 = vadd.f32 %v13914_v57, %v13913_v28  ;;  %v13803_v28 = vmul.f32 %v26486_v20, %v26486_v20  ;;  %v13922_v57 = vsel %vm6530_vm3, %v13801_v56, 0.0 }
 0xc68   :  { %v13917_v50 = vadd.f32 %v13916_v13, %v13915_v41  ;;  %v13804_v41 = vmul.f32 %v26487_v47, %v26487_v47  ;;  %v13924_v13 = vsel %vm6530_vm3, %v13802_v44, 0.0 }
 0xc6a   :  { %v13919_v33 = vadd.f32 %v13918_v51, %v13917_v50  ;;  %v13805_v50 = vmul.f32 %v26488_v7, %v26488_v7  ;;  %v13926_v51 = vsel %vm6530_vm3, %v13803_v28, 0.0 }
 0xc6c   :  { %v13921_v36 = vadd.f32 %v13920_v40, %v13919_v33  ;;  %v13806_v33 = vmul.f32 %v26489_v58, %v26489_v58  ;;  %v13928_v40 = vsel %vm6530_vm3, %v13804_v41, 0.0  ;;  %v13543_v41 = vld [vmem:[%s25792_s5] sm:$0x1] }
 0xc6e   :  { %v13923_v14 = vadd.f32 %v13922_v57, %v13921_v36  ;;  %v13930_v36 = vsel %vm6530_vm3, %v13805_v50, 0.0  ;;  %v13932_v57 = vsel %vm6530_vm3, %v13806_v33, 0.0  ;;  %v26490_v50 = vld [vmem:[#allocation45_spill] sm:$0xff] }
 0xc6f   :  { %v26492_v33 = vld [vmem:[#allocation13_spill] sm:$0xff] }
 0xc70   :  { %v13925_v30 = vadd.f32 %v13924_v13, %v13923_v14 }
 0xc72   :  { %v13927_v53 = vadd.f32 %v13926_v51, %v13925_v30 }
 0xc74   :  { %v13929_v20 = vadd.f32 %v13928_v40, %v13927_v53 }
 0xc76   :  { %v13931_v56 = vadd.f32 %v13930_v36, %v13929_v20  ;;  %v26491_v20 = vsub.s32 0, %v26490_v50  ;;  %v26493_v36 = vld [vmem:[#allocation12_spill] sm:$0xff]  ;;  %v26499_v50 = vld [vmem:[#allocation18_spill] sm:$0xff] }
 0xc78   :  { %v13933_v47 = vadd.f32 %v13932_v57, %v13931_v56  ;;  %v26495_v56 = vld [vmem:[#allocation14_spill] sm:$0xff] }
 0xc7a   :  { %v13934_v44 = vrot.slane %v13933_v47, 4 }
 0xc7c   :  { %v13935_v14 = vadd.f32 %v13934_v44, %v13933_v47 }
 0xc7e   :  { %v13936_v13 = vrot.slane %v13935_v14, 2 }
 0xc80   :  { %v13937_v60 = vadd.f32 %v13936_v13, %v13935_v14 }
 0xc82   :  { %v13938_v7 = vrot.slane %v13937_v60, 1 }
 0xc84   :  { %v13939_v49 = vadd.f32 %v13938_v7, %v13937_v60 }
 0xc86   :  { %v13940_v28 = vmul.f32 0.001953125, %v13939_v49  ;;  %v26494_v49 = vld [vmem:[#allocation15_spill] sm:$0xff] }
 0xc88   :  { %v13941_v30 = vadd.f32 1e-05, %v13940_v28 }
 0xc8a   :  { %19356 = vrsqrt.f32 %v13941_v30 }
 0xc94   :  { %v19357_v53 = vpop.eup %19356 }
 0xc95   :  { %v13943_v51 = vmul.f32 %v19357_v53, %v13543_v41  ;;  %v26496_v41 = vld [vmem:[#allocation17_spill] sm:$0xff]  ;;  %v26497_v53 = vld [vmem:[#allocation16_spill] sm:$0xff] }
 0xc97   :  { %v24948_v40 = vrot.slane %v13943_v51, %v26491_v20  ;;  %v26498_v51 = vld [vmem:[#allocation19_spill] sm:$0xff]  ;;  %v26501_v20 = vld [vmem:[#allocation21_spill] sm:$0xff] }
 0xc99   :  { %v24952_v47 = vmul.f32 %v24948_v40, %v26492_v33  ;;  %v24956_v60 = vmul.f32 %v24948_v40, %v26493_v36  ;;  %v24960_v7 = vmul.f32 %v24948_v40, %v26494_v49  ;;  %v24964_v57 = vmul.f32 %v24948_v40, %v26495_v56  ;;  %v25161_v33 = vld [vmem:[%s25793_s6] ss:$0 sm:$0xff] }
 0xc9a   :  { %v24968_v44 = vmul.f32 %v24948_v40, %v24513_v23  ;;  %v24972_v14 = vmul.f32 %v24948_v40, %v24517_v35  ;;  %v24976_v13 = vmul.f32 %v24948_v40, %v24521_v63  ;;  %v24980_v28 = vmul.f32 %v24948_v40, %v24525_v22  ;;  %v26503_v36 = vld [vmem:[#allocation20_spill] sm:$0xff] }
 0xc9b   :  { %v24984_v30 = vmul.f32 %v24948_v40, %v24529_v15  ;;  %v24988_v23 = vmul.f32 %v24948_v40, %v24533_v34  ;;  %v24992_v35 = vmul.f32 %v24948_v40, %v24537_v27  ;;  %v24996_v63 = vmul.f32 %v24948_v40, %v24541_v3 }
 0xc9c   :  { %v25000_v22 = vmul.f32 %v24948_v40, %v24545_v55  ;;  %v25004_v15 = vmul.f32 %v24948_v40, %v24549_v42  ;;  %v25008_v34 = vmul.f32 %v24948_v40, %v24553_v25  ;;  %v25012_v27 = vmul.f32 %v24948_v40, %v24557_v6 }
 0xc9d   :  { %v25016_v3 = vmul.f32 %v24948_v40, %v24561_v1  ;;  %v25020_v55 = vmul.f32 %v24948_v40, %v24565_v62  ;;  %v25024_v42 = vmul.f32 %v24948_v40, %v24569_v19  ;;  %v25028_v25 = vmul.f32 %v24948_v40, %v24573_v2 }
 0xc9e   :  { %v25032_v6 = vmul.f32 %v24948_v40, %v24577_v5  ;;  %v25036_v1 = vmul.f32 %v24948_v40, %v24581_v11  ;;  %v25040_v62 = vmul.f32 %v24948_v40, %v24585_v59  ;;  %v25044_v19 = vmul.f32 %v24948_v40, %v24589_v37 }
 0xc9f   :  { %v25048_v2 = vmul.f32 %v24948_v40, %v24593_v48  ;;  %v25052_v5 = vmul.f32 %v24948_v40, %v24597_v52  ;;  %v25056_v11 = vmul.f32 %v24948_v40, %v24601_v43  ;;  %v25060_v59 = vmul.f32 %v24948_v40, %v24605_v8 }
 0xca0   :  { %v25064_v37 = vmul.f32 %v24948_v40, %v24609_v0  ;;  %v25068_v48 = vmul.f32 %v24948_v40, %v24613_v46  ;;  %v25072_v52 = vmul.f32 %v24948_v40, %v24617_v38  ;;  %v25076_v43 = vmul.f32 %v24948_v40, %v24621_v26 }
 0xca1   :  { %v25080_v8 = vmul.f32 %v24948_v40, %v24625_v17  ;;  %v25084_v0 = vmul.f32 %v24948_v40, %v24629_v54  ;;  %v25088_v46 = vmul.f32 %v24948_v40, %v24633_v16  ;;  %v25092_v38 = vmul.f32 %v24948_v40, %v24637_v29 }
 0xca2   :  { %v25096_v26 = vmul.f32 %v24948_v40, %v24641_v10  ;;  %v25100_v17 = vmul.f32 %v24948_v40, %v24645_v24  ;;  %v25104_v54 = vmul.f32 %v24948_v40, %v24649_v32  ;;  %v25108_v16 = vmul.f32 %v24948_v40, %v24653_v45 }
 0xca3   :  { %v25112_v29 = vmul.f32 %v24948_v40, %v24657_v39  ;;  %v25116_v10 = vmul.f32 %v24948_v40, %v24661_v31  ;;  %v25120_v24 = vmul.f32 %v24948_v40, %v24665_v4  ;;  %v25124_v32 = vmul.f32 %v24948_v40, %v24669_v9 }
 0xca4   :  { %v25128_v45 = vmul.f32 %v24948_v40, %v24673_v18  ;;  %v25132_v39 = vmul.f32 %v24948_v40, %v24677_v61  ;;  %v25136_v31 = vmul.f32 %v24948_v40, %v24681_v12  ;;  %v25140_v4 = vmul.f32 %v24948_v40, %v26496_v41  ;;  %v26506_v41 = vld [vmem:[#allocation22_spill] sm:$0xff] }
 0xca5   :  { %v25144_v9 = vmul.f32 %v24948_v40, %v26497_v53  ;;  %v25148_v18 = vmul.f32 %v24948_v40, %v26498_v51  ;;  %v25152_v61 = vmul.f32 %v24948_v40, %v26499_v50  ;;  %v25156_v12 = vmul.f32 %v24948_v40, %v26501_v20  ;;  %v26508_v51 = vld [vmem:[#allocation43_spill] sm:$0xff]  ;;  %v26510_v20 = vld [vmem:[#allocation24_spill] sm:$0xff] }
 0xca6   :  { %v25165_v49 = vmul.f32 %v24948_v40, %v26503_v36  ;;  %v25169_v56 = vmul.f32 %v24948_v40, %v26482_v21  ;;  %v25173_v53 = vmul.f32 %v24948_v40, %v26506_v41  ;;  %v25177_v50 = vmul.f32 %v24948_v40, %v26508_v51 }
 0xca7   :  { %26500 = vst [vmem:[#allocation32_spill] sm:$0xff] %v25152_v61  ;;  %26502 = vst [vmem:[#allocation33_spill] sm:$0xff] %v25156_v12  ;;  %v25181_v12 = vmul.f32 %v24948_v40, %v26510_v20  ;;  %v26512_v61 = vld [vmem:[#allocation25_spill] sm:$0xff] }
 0xca8   :  { %26504 = vst [vmem:[#allocation34_spill] sm:$0xff] %v25165_v49  ;;  %26505 = vst [vmem:[#allocation35_spill] sm:$0xff] %v25169_v56  ;;  %v25185_v36 = vmul.f32 %v24948_v40, %v26512_v61  ;;  %v26513_v49 = vld [vmem:[#allocation26_spill] sm:$0xff]  ;;  %v26514_v56 = vld [vmem:[#allocation27_spill] sm:$0xff] }
 0xca9   :  { %26507 = vst [vmem:[#allocation36_spill] sm:$0xff] %v25173_v53  ;;  %26509 = vst [vmem:[#allocation37_spill] sm:$0xff] %v25177_v50  ;;  %v25189_v21 = vmul.f32 %v24948_v40, %v26513_v49  ;;  %v25193_v41 = vmul.f32 %v24948_v40, %v26514_v56  ;;  %v26515_v53 = vld [vmem:[#allocation28_spill] sm:$0xff]  ;;  %v26516_v50 = vld [vmem:[#allocation29_spill] sm:$0xff]  ;;  %v25209_v49 = vmul.f32 %v24948_v40, %v26489_v58 }
 0xcaa   :  { %26511 = vst [vmem:[#allocation38_spill] sm:$0xff] %v25181_v12  ;;  %v25197_v51 = vmul.f32 %v24948_v40, %v26515_v53  ;;  %v25201_v20 = vmul.f32 %v24948_v40, %v26516_v50  ;;  %v26517_v12 = vld [vmem:[#allocation30_spill] sm:$0xff]  ;;  %v25213_v56 = vadd.f32 %v25161_v33, %v24952_v47  ;;  %v25217_v53 = vadd.f32 %v25161_v33, %v24956_v60 }
 0xcab   :  { %v25205_v61 = vmul.f32 %v24948_v40, %v26517_v12  ;;  %v25221_v50 = vadd.f32 %v25161_v33, %v24960_v7  ;;  %v25225_v12 = vadd.f32 %v25161_v33, %v24964_v57  ;;  %v25229_v58 = vadd.f32 %v25161_v33, %v24968_v44 }
 0xcac   :  { %v25233_v40 = vadd.f32 %v25161_v33, %v24972_v14  ;;  %v25237_v47 = vadd.f32 %v25161_v33, %v24976_v13  ;;  %v25241_v60 = vadd.f32 %v25161_v33, %v24980_v28  ;;  %v25245_v7 = vadd.f32 %v25161_v33, %v24984_v30 }
 0xcad   :  { %v25249_v57 = vadd.f32 %v25161_v33, %v24988_v23  ;;  %v25253_v44 = vadd.f32 %v25161_v33, %v24992_v35  ;;  %v25257_v14 = vadd.f32 %v25161_v33, %v24996_v63  ;;  %v25261_v13 = vadd.f32 %v25161_v33, %v25000_v22 }
 0xcae   :  { %v25265_v28 = vadd.f32 %v25161_v33, %v25004_v15  ;;  %v25269_v30 = vadd.f32 %v25161_v33, %v25008_v34  ;;  %v25273_v23 = vadd.f32 %v25161_v33, %v25012_v27  ;;  %v25277_v35 = vadd.f32 %v25161_v33, %v25016_v3 }
 0xcaf   :  { %v25281_v63 = vadd.f32 %v25161_v33, %v25020_v55  ;;  %v25285_v22 = vadd.f32 %v25161_v33, %v25024_v42  ;;  %v25289_v15 = vadd.f32 %v25161_v33, %v25028_v25  ;;  %v25293_v34 = vadd.f32 %v25161_v33, %v25032_v6 }
 0xcb0   :  { %v25297_v27 = vadd.f32 %v25161_v33, %v25036_v1  ;;  %v25301_v3 = vadd.f32 %v25161_v33, %v25040_v62  ;;  %v25305_v55 = vadd.f32 %v25161_v33, %v25044_v19  ;;  %v25309_v42 = vadd.f32 %v25161_v33, %v25048_v2 }
 0xcb1   :  { %v25313_v25 = vadd.f32 %v25161_v33, %v25052_v5  ;;  %v25317_v6 = vadd.f32 %v25161_v33, %v25056_v11  ;;  %v25321_v1 = vadd.f32 %v25161_v33, %v25060_v59  ;;  %v25325_v62 = vadd.f32 %v25161_v33, %v25064_v37 }
 0xcb2   :  { %v25329_v19 = vadd.f32 %v25161_v33, %v25068_v48  ;;  %v25333_v2 = vadd.f32 %v25161_v33, %v25072_v52  ;;  %v25337_v5 = vadd.f32 %v25161_v33, %v25076_v43  ;;  %v25341_v11 = vadd.f32 %v25161_v33, %v25080_v8 }
 0xcb3   :  { %v25345_v59 = vadd.f32 %v25161_v33, %v25084_v0  ;;  %v25349_v37 = vadd.f32 %v25161_v33, %v25088_v46  ;;  %v25353_v48 = vadd.f32 %v25161_v33, %v25092_v38  ;;  %v25357_v52 = vadd.f32 %v25161_v33, %v25096_v26 }
 0xcb4   :  { %v25361_v43 = vadd.f32 %v25161_v33, %v25100_v17  ;;  %v25365_v8 = vadd.f32 %v25161_v33, %v25104_v54  ;;  %v25369_v0 = vadd.f32 %v25161_v33, %v25108_v16  ;;  %v25373_v46 = vadd.f32 %v25161_v33, %v25112_v29 }
 0xcb5   :  { %v25377_v38 = vadd.f32 %v25161_v33, %v25116_v10  ;;  %v25381_v26 = vadd.f32 %v25161_v33, %v25120_v24  ;;  %v25385_v17 = vadd.f32 %v25161_v33, %v25124_v32  ;;  %v25389_v54 = vadd.f32 %v25161_v33, %v25128_v45  ;;  %v26523_v45 = vld [vmem:[#allocation32_spill] sm:$0xff] }
 0xcb6   :  { %v25393_v16 = vadd.f32 %v25161_v33, %v25132_v39  ;;  %v25397_v29 = vadd.f32 %v25161_v33, %v25136_v31  ;;  %v25401_v10 = vadd.f32 %v25161_v33, %v25140_v4  ;;  %v25405_v24 = vadd.f32 %v25161_v33, %v25144_v9 }
 0xcb7   :  { %v25409_v32 = vadd.f32 %v25161_v33, %v25148_v18  ;;  %v25413_v39 = vadd.f32 %v25161_v33, %v26523_v45 }
 0xcb8   :  { %26518 = vst [vmem:[#allocation39_spill] sm:$0xff] %v25393_v16  ;;  %26519 = vst [vmem:[#allocation40_spill] sm:$0xff] %v25397_v29  ;;  %v26525_v16 = vld [vmem:[#allocation33_spill] sm:$0xff]  ;;  %v26526_v29 = vld [vmem:[#allocation34_spill] sm:$0xff] }
 0xcb9   :  { %26520 = vst [vmem:[#allocation41_spill] sm:$0xff] %v25401_v10  ;;  %26521 = vst [vmem:[#allocation42_spill] sm:$0xff] %v25405_v24  ;;  %v25417_v31 = vadd.f32 %v25161_v33, %v26525_v16  ;;  %v25421_v4 = vadd.f32 %v25161_v33, %v26526_v29  ;;  %v26527_v10 = vld [vmem:[#allocation35_spill] sm:$0xff]  ;;  %v26528_v24 = vld [vmem:[#allocation36_spill] sm:$0xff]  ;;  %v25441_v29 = vadd.f32 %v25161_v33, %v25185_v36 }
 0xcba   :  { %26522 = vst [vmem:[#allocation44_spill] sm:$0xff] %v25409_v32  ;;  %26524 = vst [vmem:[#allocation46_spill] sm:$0xff] %v25413_v39  ;;  %v25425_v9 = vadd.f32 %v25161_v33, %v26527_v10  ;;  %v25429_v18 = vadd.f32 %v25161_v33, %v26528_v24  ;;  %v26529_v32 = vld [vmem:[#allocation37_spill] sm:$0xff]  ;;  %v26530_v39 = vld [vmem:[#allocation38_spill] sm:$0xff]  ;;  %v25445_v10 = vadd.f32 %v25161_v33, %v25189_v21 }
 0xcbb   :  { %v25433_v45 = vadd.f32 %v25161_v33, %v26529_v32  ;;  %v25437_v16 = vadd.f32 %v25161_v33, %v26530_v39  ;;  %v25449_v24 = vadd.f32 %v25161_v33, %v25193_v41  ;;  %v25453_v32 = vadd.f32 %v25161_v33, %v25197_v51 }
 0xcbc   :  { %26531 = vst [vmem:[#allocation47_spill] sm:$0xff] %v25445_v10  ;;  %v25457_v39 = vadd.f32 %v25161_v33, %v25201_v20  ;;  %v25461_v36 = vadd.f32 %v25161_v33, %v25205_v61  ;;  %v25465_v21 = vadd.f32 %v25161_v33, %v25209_v49  ;;  %v14084_v10 = vmax.f32 %v25213_v56, 0.0 }
 0xcbd   :  { %26532 = vst [vmem:[#allocation48_spill] sm:$0xff] %v25449_v24  ;;  %26533 = vst [vmem:[#allocation49_spill] sm:$0xff] %v25453_v32  ;;  %v14085_v41 = vmax.f32 %v25217_v53, 0.0  ;;  %v14086_v24 = vmax.f32 %v25221_v50, 0.0  ;;  %v14087_v51 = vmax.f32 %v25225_v12, 0.0  ;;  %v14088_v32 = vmax.f32 %v25229_v58, 0.0 }
 0xcbe   :  { %26534 = vst [vmem:[#allocation50_spill] sm:$0xff] %v25457_v39  ;;  %26535 = vst [vmem:[#allocation51_spill] sm:$0xff] %v25461_v36  ;;  %v14089_v20 = vmax.f32 %v25233_v40, 0.0  ;;  %v14090_v39 = vmax.f32 %v25237_v47, 0.0  ;;  %v14091_v61 = vmax.f32 %v25241_v60, 0.0  ;;  %v14092_v36 = vmax.f32 %v25245_v7, 0.0 }
 0xcbf   :  { %v14093_v33 = vmax.f32 %v25249_v57, 0.0  ;;  %v14094_v49 = vmax.f32 %v25253_v44, 0.0  ;;  %v14095_v56 = vmax.f32 %v25257_v14, 0.0  ;;  %14148 = vst.msk [vmem:[%s25794_s7] sm:$0xff] %vm6530_vm3, %v14084_v10  ;;  %14149 = vst.msk [vmem:[%s25794_s7 + $0x8] sm:$0xff] %vm6530_vm3, %v14085_v41  ;;  %v14096_v53 = vmax.f32 %v25261_v13, 0.0 }
 0xcc0   :  { %14150 = vst.msk [vmem:[%s25794_s7 + $0x10] sm:$0xff] %vm6530_vm3, %v14086_v24  ;;  %14151 = vst.msk [vmem:[%s25794_s7 + $0x18] sm:$0xff] %vm6530_vm3, %v14087_v51  ;;  %v14097_v50 = vmax.f32 %v25265_v28, 0.0  ;;  %v14098_v12 = vmax.f32 %v25269_v30, 0.0  ;;  %v14099_v58 = vmax.f32 %v25273_v23, 0.0  ;;  %v14100_v40 = vmax.f32 %v25277_v35, 0.0 }
 0xcc1   :  { %14152 = vst.msk [vmem:[%s25794_s7 + $0x20] sm:$0xff] %vm6530_vm3, %v14088_v32  ;;  %14153 = vst.msk [vmem:[%s25794_s7 + $0x28] sm:$0xff] %vm6530_vm3, %v14089_v20  ;;  %v14101_v47 = vmax.f32 %v25281_v63, 0.0  ;;  %v14102_v60 = vmax.f32 %v25285_v22, 0.0  ;;  %v14103_v7 = vmax.f32 %v25289_v15, 0.0  ;;  %v14104_v57 = vmax.f32 %v25293_v34, 0.0 }
 0xcc2   :  { %14154 = vst.msk [vmem:[%s25794_s7 + $0x30] sm:$0xff] %vm6530_vm3, %v14090_v39  ;;  %14155 = vst.msk [vmem:[%s25794_s7 + $0x38] sm:$0xff] %vm6530_vm3, %v14091_v61  ;;  %v14105_v44 = vmax.f32 %v25297_v27, 0.0  ;;  %v14106_v14 = vmax.f32 %v25301_v3, 0.0  ;;  %v14107_v13 = vmax.f32 %v25305_v55, 0.0  ;;  %v14108_v28 = vmax.f32 %v25309_v42, 0.0 }
 0xcc3   :  { %14156 = vst.msk [vmem:[%s25794_s7 + $0x40] sm:$0xff] %vm6530_vm3, %v14092_v36  ;;  %14157 = vst.msk [vmem:[%s25794_s7 + $0x48] sm:$0xff] %vm6530_vm3, %v14093_v33  ;;  %v14109_v30 = vmax.f32 %v25313_v25, 0.0  ;;  %v14110_v23 = vmax.f32 %v25317_v6, 0.0  ;;  %v14111_v35 = vmax.f32 %v25321_v1, 0.0  ;;  %v14112_v63 = vmax.f32 %v25325_v62, 0.0 }
 0xcc4   :  { %14158 = vst.msk [vmem:[%s25794_s7 + $0x50] sm:$0xff] %vm6530_vm3, %v14094_v49  ;;  %14159 = vst.msk [vmem:[%s25794_s7 + $0x58] sm:$0xff] %vm6530_vm3, %v14095_v56  ;;  %v14113_v22 = vmax.f32 %v25329_v19, 0.0  ;;  %v14114_v15 = vmax.f32 %v25333_v2, 0.0  ;;  %v14115_v34 = vmax.f32 %v25337_v5, 0.0  ;;  %v14116_v27 = vmax.f32 %v25341_v11, 0.0 }
 0xcc5   :  { %14160 = vst.msk [vmem:[%s25794_s7 + $0x60] sm:$0xff] %vm6530_vm3, %v14096_v53  ;;  %14161 = vst.msk [vmem:[%s25794_s7 + $0x68] sm:$0xff] %vm6530_vm3, %v14097_v50  ;;  %v14117_v3 = vmax.f32 %v25345_v59, 0.0  ;;  %v14118_v55 = vmax.f32 %v25349_v37, 0.0  ;;  %v14119_v42 = vmax.f32 %v25353_v48, 0.0  ;;  %v14120_v25 = vmax.f32 %v25357_v52, 0.0 }
 0xcc6   :  { %14162 = vst.msk [vmem:[%s25794_s7 + $0x70] sm:$0xff] %vm6530_vm3, %v14098_v12  ;;  %14163 = vst.msk [vmem:[%s25794_s7 + $0x78] sm:$0xff] %vm6530_vm3, %v14099_v58  ;;  %v14121_v6 = vmax.f32 %v25361_v43, 0.0  ;;  %v14122_v1 = vmax.f32 %v25365_v8, 0.0  ;;  %v14123_v62 = vmax.f32 %v25369_v0, 0.0  ;;  %v14124_v19 = vmax.f32 %v25373_v46, 0.0 }
 0xcc7   :  { %14164 = vst.msk [vmem:[%s25794_s7 + $0x80] sm:$0xff] %vm6530_vm3, %v14100_v40  ;;  %14165 = vst.msk [vmem:[%s25794_s7 + $0x88] sm:$0xff] %vm6530_vm3, %v14101_v47  ;;  %v14125_v2 = vmax.f32 %v25377_v38, 0.0  ;;  %v14126_v5 = vmax.f32 %v25381_v26, 0.0  ;;  %v14127_v11 = vmax.f32 %v25385_v17, 0.0  ;;  %v14128_v59 = vmax.f32 %v25389_v54, 0.0 }
 0xcc8   :  { %14166 = vst.msk [vmem:[%s25794_s7 + $0x90] sm:$0xff] %vm6530_vm3, %v14102_v60  ;;  %14167 = vst.msk [vmem:[%s25794_s7 + $0x98] sm:$0xff] %vm6530_vm3, %v14103_v7  ;;  %v26536_v37 = vld [vmem:[#allocation39_spill] sm:$0xff]  ;;  %v26537_v52 = vld [vmem:[#allocation40_spill] sm:$0xff]  ;;  %v14135_v24 = vmax.f32 %v25417_v31, 0.0  ;;  %v14136_v31 = vmax.f32 %v25421_v4, 0.0 }
 0xcc9   :  { %14168 = vst.msk [vmem:[%s25794_s7 + $0xa0] sm:$0xff] %vm6530_vm3, %v14104_v57  ;;  %14169 = vst.msk [vmem:[%s25794_s7 + $0xa8] sm:$0xff] %vm6530_vm3, %v14105_v44  ;;  %v14129_v48 = vmax.f32 %v26536_v37, 0.0  ;;  %v14130_v43 = vmax.f32 %v26537_v52, 0.0  ;;  %v26538_v8 = vld [vmem:[#allocation41_spill] sm:$0xff]  ;;  %v26539_v46 = vld [vmem:[#allocation42_spill] sm:$0xff] }
 0xcca   :  { %14170 = vst.msk [vmem:[%s25794_s7 + $0xb0] sm:$0xff] %vm6530_vm3, %v14106_v14  ;;  %14171 = vst.msk [vmem:[%s25794_s7 + $0xb8] sm:$0xff] %vm6530_vm3, %v14107_v13  ;;  %v14131_v0 = vmax.f32 %v26538_v8, 0.0  ;;  %v14132_v38 = vmax.f32 %v26539_v46, 0.0  ;;  %v26540_v26 = vld [vmem:[#allocation44_spill] sm:$0xff]  ;;  %v26541_v54 = vld [vmem:[#allocation46_spill] sm:$0xff] }
 0xccb   :  { %14172 = vst.msk [vmem:[%s25794_s7 + $0xc0] sm:$0xff] %vm6530_vm3, %v14108_v28  ;;  %14173 = vst.msk [vmem:[%s25794_s7 + $0xc8] sm:$0xff] %vm6530_vm3, %v14109_v30  ;;  %v14133_v17 = vmax.f32 %v26540_v26, 0.0  ;;  %v14134_v10 = vmax.f32 %v26541_v54, 0.0  ;;  %v14137_v32 = vmax.f32 %v25425_v9, 0.0  ;;  %v14138_v39 = vmax.f32 %v25429_v18, 0.0 }
 0xccc   :  { %14174 = vst.msk [vmem:[%s25794_s7 + $0xd0] sm:$0xff] %vm6530_vm3, %v14110_v23  ;;  %14175 = vst.msk [vmem:[%s25794_s7 + $0xd8] sm:$0xff] %vm6530_vm3, %v14111_v35  ;;  %v14139_v36 = vmax.f32 %v25433_v45, 0.0  ;;  %v14140_v4 = vmax.f32 %v25437_v16, 0.0  ;;  %v14141_v9 = vmax.f32 %v25441_v29, 0.0  ;;  %v26542_v18 = vld [vmem:[#allocation47_spill] sm:$0xff] }
 0xccd   :  { %14176 = vst.msk [vmem:[%s25794_s7 + $0xe0] sm:$0xff] %vm6530_vm3, %v14112_v63  ;;  %14177 = vst.msk [vmem:[%s25794_s7 + $0xe8] sm:$0xff] %vm6530_vm3, %v14113_v22  ;;  %v14142_v45 = vmax.f32 %v26542_v18, 0.0  ;;  %v26543_v41 = vld [vmem:[#allocation48_spill] sm:$0xff]  ;;  %v26544_v16 = vld [vmem:[#allocation49_spill] sm:$0xff]  ;;  %v14147_v56 = vmax.f32 %v25465_v21, 0.0 }
 0xcce   :  { %14178 = vst.msk [vmem:[%s25794_s7 + $0xf0] sm:$0xff] %vm6530_vm3, %v14114_v15  ;;  %14179 = vst.msk [vmem:[%s25794_s7 + $0xf8] sm:$0xff] %vm6530_vm3, %v14115_v34  ;;  %v14143_v51 = vmax.f32 %v26543_v41, 0.0  ;;  %v14144_v29 = vmax.f32 %v26544_v16, 0.0  ;;  %v26545_v20 = vld [vmem:[#allocation50_spill] sm:$0xff]  ;;  %v26546_v33 = vld [vmem:[#allocation51_spill] sm:$0xff] }
 0xccf   :  { %14180 = vst.msk [vmem:[%s25794_s7 + $0x100] sm:$0xff] %vm6530_vm3, %v14116_v27  ;;  %14181 = vst.msk [vmem:[%s25794_s7 + $0x108] sm:$0xff] %vm6530_vm3, %v14117_v3  ;;  %v14145_v61 = vmax.f32 %v26545_v20, 0.0  ;;  %v14146_v49 = vmax.f32 %v26546_v33, 0.0 }
 0xcd0   :  { %14182 = vst.msk [vmem:[%s25794_s7 + $0x110] sm:$0xff] %vm6530_vm3, %v14118_v55  ;;  %14183 = vst.msk [vmem:[%s25794_s7 + $0x118] sm:$0xff] %vm6530_vm3, %v14119_v42 }
 0xcd1   :  { %14184 = vst.msk [vmem:[%s25794_s7 + $0x120] sm:$0xff] %vm6530_vm3, %v14120_v25  ;;  %14185 = vst.msk [vmem:[%s25794_s7 + $0x128] sm:$0xff] %vm6530_vm3, %v14121_v6 }
 0xcd2   :  { %14186 = vst.msk [vmem:[%s25794_s7 + $0x130] sm:$0xff] %vm6530_vm3, %v14122_v1  ;;  %14187 = vst.msk [vmem:[%s25794_s7 + $0x138] sm:$0xff] %vm6530_vm3, %v14123_v62 }
 0xcd3   :  { %14188 = vst.msk [vmem:[%s25794_s7 + $0x140] sm:$0xff] %vm6530_vm3, %v14124_v19  ;;  %14189 = vst.msk [vmem:[%s25794_s7 + $0x148] sm:$0xff] %vm6530_vm3, %v14125_v2 }
 0xcd4   :  { %14190 = vst.msk [vmem:[%s25794_s7 + $0x150] sm:$0xff] %vm6530_vm3, %v14126_v5  ;;  %14191 = vst.msk [vmem:[%s25794_s7 + $0x158] sm:$0xff] %vm6530_vm3, %v14127_v11 }
 0xcd5   :  { %14192 = vst.msk [vmem:[%s25794_s7 + $0x160] sm:$0xff] %vm6530_vm3, %v14128_v59  ;;  %14193 = vst.msk [vmem:[%s25794_s7 + $0x168] sm:$0xff] %vm6530_vm3, %v14129_v48 }
 0xcd6   :  { %14194 = vst.msk [vmem:[%s25794_s7 + $0x170] sm:$0xff] %vm6530_vm3, %v14130_v43  ;;  %14195 = vst.msk [vmem:[%s25794_s7 + $0x178] sm:$0xff] %vm6530_vm3, %v14131_v0 }
 0xcd7   :  { %14196 = vst.msk [vmem:[%s25794_s7 + $0x180] sm:$0xff] %vm6530_vm3, %v14132_v38  ;;  %14197 = vst.msk [vmem:[%s25794_s7 + $0x188] sm:$0xff] %vm6530_vm3, %v14133_v17 }
 0xcd8   :  { %14198 = vst.msk [vmem:[%s25794_s7 + $0x190] sm:$0xff] %vm6530_vm3, %v14134_v10  ;;  %14199 = vst.msk [vmem:[%s25794_s7 + $0x198] sm:$0xff] %vm6530_vm3, %v14135_v24 }
 0xcd9   :  { %14200 = vst.msk [vmem:[%s25794_s7 + $0x1a0] sm:$0xff] %vm6530_vm3, %v14136_v31  ;;  %14201 = vst.msk [vmem:[%s25794_s7 + $0x1a8] sm:$0xff] %vm6530_vm3, %v14137_v32 }
 0xcda   :  { %14202 = vst.msk [vmem:[%s25794_s7 + $0x1b0] sm:$0xff] %vm6530_vm3, %v14138_v39  ;;  %14203 = vst.msk [vmem:[%s25794_s7 + $0x1b8] sm:$0xff] %vm6530_vm3, %v14139_v36 }
 0xcdb   :  { %14204 = vst.msk [vmem:[%s25794_s7 + $0x1c0] sm:$0xff] %vm6530_vm3, %v14140_v4  ;;  %14205 = vst.msk [vmem:[%s25794_s7 + $0x1c8] sm:$0xff] %vm6530_vm3, %v14141_v9 }
 0xcdc   :  { %14206 = vst.msk [vmem:[%s25794_s7 + $0x1d0] sm:$0xff] %vm6530_vm3, %v14142_v45  ;;  %14207 = vst.msk [vmem:[%s25794_s7 + $0x1d8] sm:$0xff] %vm6530_vm3, %v14143_v51 }
 0xcdd   :  { %14208 = vst.msk [vmem:[%s25794_s7 + $0x1e0] sm:$0xff] %vm6530_vm3, %v14144_v29  ;;  %14209 = vst.msk [vmem:[%s25794_s7 + $0x1e8] sm:$0xff] %vm6530_vm3, %v14145_v61 }
 0xcde   :  { %14210 = vst.msk [vmem:[%s25794_s7 + $0x1f0] sm:$0xff] %vm6530_vm3, %v14146_v49  ;;  %14211 = vst.msk [vmem:[%s25794_s7 + $0x1f8] sm:$0xff] %vm6530_vm3, %v14147_v56 }

</bundles_post_ra>
